<compile_context>
chip_gen: v6e
topology: v6e:2x2x1
jax: 0.10.0
libtpu: 0.0.40
codegen_flags: <defaults>
</compile_context>

<pallas_src>
import functools
import math

import jax
import jax.numpy as jnp
from jax import lax
from jax.experimental import pallas as pl
from jax.experimental.pallas import tpu as pltpu

EPS = 1e-5

# MXU operand dtype: bf16 gives ~2x MXU throughput on v5e/v6e/v7x and halves the
# weight / input / intermediate HBM bytes.  Accumulation is f32
# (preferred_element_type) and BN statistics / scale / shift stay f32.
MATMUL_DTYPE = jnp.bfloat16

# Per-chunk budget for the in-VMEM (chunk_rows, 9*C) tap buffer (f32 + bf16 copy).
_TAP_CHUNK_BYTES = 8 * 1024 * 1024


# ---------------------------------------------------------------------------
# In-kernel helpers
# ---------------------------------------------------------------------------
def _floor_div_const(idx, d):
    # Exact floor(idx / d) for |idx| < ~4M using only f32 mul/floor + casts
    # (vector integer div/rem is not guaranteed to lower in Mosaic).
    q = jnp.floor((idx.astype(jnp.float32) + 0.5) * (1.0 / float(d)))
    return q.astype(jnp.int32)


def _row_col(n_rows, wp, offset=0):
    # (row, col) within the Wp-wide padded image for each flat row index.
    idx = lax.broadcasted_iota(jnp.int32, (n_rows, 1), 0) - offset
    row = _floor_div_const(idx, wp)
    col = idx - row * wp
    return row, col


def _wide_mask(m, wp, w_real):
    # 1.0 on the W valid output columns of each wide row, 0.0 on the 2 junk columns.
    # Generated in-kernel (iota + compare = free VPU filler, no HBM mask DMA).
    _, col = _row_col(m, wp)
    return (col < w_real).astype(jnp.float32)


def _interior_mask(n_rows, wp, h_real, w_real, offset):
    # True on interior (non-padding) pixels of the zero-padded flat layout.
    row, col = _row_col(n_rows, wp, offset)
    return (row >= 1) & (row <= h_real) & (col >= 1) & (col <= w_real)


def _conv3x3(x, w_ref, *, wp, m, base, n_chunks):
    """3x3 same-conv as one (or a few, chunked) MXU matmuls.

    `x` is the f32 zero-padded image flattened over (H+2, W+2) (+ slack rows); the
    nine 3x3 taps of a row chunk are plain contiguous row windows of `x`, gathered
    in VMEM only, concatenated along K and contracted against the (9*C, Cout)
    weight slab with f32 accumulation.  Chunking bounds the 9x tap buffer so it
    stays inside v7x's 64 MiB VMEM at realistic image sizes.
    """
    w_mat = w_ref[...]                                       # (9*C, Cout), MATMUL_DTYPE
    chunk = -(-m // n_chunks)                                # ceil
    outs = []
    start = 0
    while start < m:
        cm = min(chunk, m - start)
        # NOTE: slices are concatenated in f32 (proven minor-dim concat path) and
        # cast to the MXU dtype afterwards; the cast is VPU filler and the tap
        # chunking already bounds VMEM.
        taps = jnp.concatenate(
            [x[base + dy * wp + dx + start: base + dy * wp + dx + start + cm, :]
             for dy in range(3) for dx in range(3)],
            axis=1)                                          # (cm, 9*C), f32
        outs.append(jnp.dot(taps.astype(MATMUL_DTYPE), w_mat,
                            preferred_element_type=jnp.float32))
        start += cm
    return outs[0] if len(outs) == 1 else jnp.concatenate(outs, axis=0)


def _store_stats(stats_ref, acc, mask):
    # Per-image masked sum / sum-of-squares (partial BatchNorm statistics), f32.
    am = acc * mask
    stats_ref[0, 0:1, :] = jnp.sum(am, axis=0, keepdims=True)
    stats_ref[0, 1:2, :] = jnp.sum(am * acc, axis=0, keepdims=True)


# ---------------------------------------------------------------------------
# Kernels
# ---------------------------------------------------------------------------
def _conv1_kernel(x_ref, w_ref, h1_ref, stats_ref, *, wp, w_real, m, off, n_chunks):
    x = x_ref[0].astype(jnp.float32)                              # (R0, Cin)
    acc = _conv3x3(x, w_ref, wp=wp, m=m, base=0, n_chunks=n_chunks)   # (M, Cout), f32
    # Single, sublane-aligned store directly in the zero-padded flat layout conv2
    # consumes.  The padding-ring rows of h1 are left unwritten: conv2 re-zeroes
    # them with a select, so stale VMEM (even NaN) can never propagate.
    h1_ref[0, pl.ds(off, m), :] = acc.astype(h1_ref.dtype)
    _store_stats(stats_ref, acc, _wide_mask(m, wp, w_real))


def _conv2_kernel(h_ref, scale_ref, shift_ref, w_ref, y_ref, stats_ref, *,
                  wp, h_real, w_real, m, front, n_chunks):
    raw = h_ref[0].astype(jnp.float32)                            # (R1, Cout)
    interior = _interior_mask(raw.shape[0], wp, h_real, w_real, front)
    # bn2(conv1) -> relu as one FMA pass; the select (not a multiply) forces the
    # conv padding ring / unwritten rows to exact zero.
    h = jnp.where(interior,
                  jnp.maximum(raw * scale_ref[...] + shift_ref[...], 0.0),
                  0.0)
    acc = _conv3x3(h, w_ref, wp=wp, m=m, base=front, n_chunks=n_chunks)
    y_ref[0] = acc.astype(y_ref.dtype)
    _store_stats(stats_ref, acc, _wide_mask(m, wp, w_real))


def _finalize_kernel(y_ref, res_ref, scale_ref, shift_ref, out_ref):
    # bn2(conv2) + identity residual + relu, single fused elementwise pass (f32).
    y = y_ref[0].astype(jnp.float32)
    out_ref[0] = jnp.maximum(y * scale_ref[...] + shift_ref[...] + res_ref[0], 0.0)


# ---------------------------------------------------------------------------
# pallas_call wrappers
# ---------------------------------------------------------------------------
def _nbytes(shape, dtype):
    return math.prod(shape) * jnp.dtype(dtype).itemsize


def _compiler_params(block_bytes, temp_bytes):
    # Double-buffered pipelined blocks + in-kernel temporaries + slack, clamped so
    # it stays well inside v7x's 64 MiB physical VMEM (v5e/v6e have 128 MiB).
    est = 2 * block_bytes + temp_bytes + (2 << 20)
    return pltpu.CompilerParams(
        dimension_semantics=("parallel",),
        vmem_limit_bytes=int(max(8 << 20, min(est, 48 << 20))),
    )


def _conv1_call(xflat, w_slab, *, r1, cout, wp, w_real, m, off, n_chunks):
    n, r0, cin = xflat.shape
    chunk = -(-m // n_chunks)
    block_bytes = (_nbytes((r0, cin), xflat.dtype)
                   + _nbytes(w_slab.shape, w_slab.dtype)
                   + _nbytes((r1, cout), MATMUL_DTYPE)
                   + _nbytes((2, cout), jnp.float32))
    temp_bytes = r0 * cin * 4 + chunk * 9 * cin * 6 + 2 * m * cout * 4
    return pl.pallas_call(
        functools.partial(_conv1_kernel, wp=wp, w_real=w_real, m=m, off=off,
                          n_chunks=n_chunks),
        grid=(n,),
        in_specs=[
            pl.BlockSpec((1, r0, cin), lambda i: (i, 0, 0)),
            pl.BlockSpec(w_slab.shape, lambda i: (0, 0)),
        ],
        out_specs=(
            pl.BlockSpec((1, r1, cout), lambda i: (i, 0, 0)),
            pl.BlockSpec((1, 2, cout), lambda i: (i, 0, 0)),
        ),
        out_shape=(
            jax.ShapeDtypeStruct((n, r1, cout), MATMUL_DTYPE),
            jax.ShapeDtypeStruct((n, 2, cout), jnp.float32),
        ),
        compiler_params=_compiler_params(block_bytes, temp_bytes),
    )(xflat, w_slab)


def _conv2_call(h1, scale, shift, w_slab, *, wp, h_real, w_real, m, front, n_chunks):
    n, r1, cout = h1.shape
    chunk = -(-m // n_chunks)
    block_bytes = (_nbytes((r1, cout), h1.dtype)
                   + 2 * _nbytes((1, cout), jnp.float32)
                   + _nbytes(w_slab.shape, w_slab.dtype)
                   + _nbytes((m, cout), MATMUL_DTYPE)
                   + _nbytes((2, cout), jnp.float32))
    temp_bytes = 2 * r1 * cout * 4 + chunk * 9 * cout * 6 + 2 * m * cout * 4
    return pl.pallas_call(
        functools.partial(_conv2_kernel, wp=wp, h_real=h_real, w_real=w_real, m=m,
                          front=front, n_chunks=n_chunks),
        grid=(n,),
        in_specs=[
            pl.BlockSpec((1, r1, cout), lambda i: (i, 0, 0)),
            pl.BlockSpec((1, cout), lambda i: (0, 0)),
            pl.BlockSpec((1, cout), lambda i: (0, 0)),
            pl.BlockSpec(w_slab.shape, lambda i: (0, 0)),
        ],
        out_specs=(
            pl.BlockSpec((1, m, cout), lambda i: (i, 0, 0)),
            pl.BlockSpec((1, 2, cout), lambda i: (i, 0, 0)),
        ),
        out_shape=(
            jax.ShapeDtypeStruct((n, m, cout), MATMUL_DTYPE),
            jax.ShapeDtypeStruct((n, 2, cout), jnp.float32),
        ),
        compiler_params=_compiler_params(block_bytes, temp_bytes),
    )(h1, scale, shift, w_slab)


def _finalize_call(y2, res_wide, scale, shift):
    n, m, cout = y2.shape
    block_bytes = (_nbytes((m, cout), y2.dtype)
                   + _nbytes((m, cout), jnp.float32)
                   + 2 * _nbytes((1, cout), jnp.float32)
                   + _nbytes((m, cout), jnp.float32))
    temp_bytes = 2 * m * cout * 4
    return pl.pallas_call(
        _finalize_kernel,
        grid=(n,),
        in_specs=[
            pl.BlockSpec((1, m, cout), lambda i: (i, 0, 0)),
            pl.BlockSpec((1, m, cout), lambda i: (i, 0, 0)),
            pl.BlockSpec((1, cout), lambda i: (0, 0)),
            pl.BlockSpec((1, cout), lambda i: (0, 0)),
        ],
        out_specs=pl.BlockSpec((1, m, cout), lambda i: (i, 0, 0)),
        out_shape=jax.ShapeDtypeStruct((n, m, cout), jnp.float32),
        compiler_params=_compiler_params(block_bytes, temp_bytes),
    )(y2, res_wide, scale, shift)


# ---------------------------------------------------------------------------
# Host-side glue (layout plumbing + tiny per-channel math)
# ---------------------------------------------------------------------------
def _weight_slab(w_oihw):
    # PyTorch conv weight (Cout, Cin, 3, 3) -> (9*Cin, Cout) slab whose row order
    # (dy, dx, cin) matches the in-kernel tap concatenation.  Pre-cast to the MXU
    # operand dtype on the host so there is no per-step VPU cast of the weights.
    cout, cin = w_oihw.shape[0], w_oihw.shape[1]
    slab = jnp.transpose(w_oihw.astype(jnp.float32), (2, 3, 1, 0)).reshape(9 * cin, cout)
    return slab.astype(MATMUL_DTYPE)


def _bn_scale_shift(stats, gamma, beta, count):
    # Fold training-mode BatchNorm (batch mean, biased variance, eps=1e-5) into one
    # per-channel scale/shift (f32) applied as a single FMA pass by the next kernel.
    s = jnp.sum(stats[:, 0, :], axis=0)
    ss = jnp.sum(stats[:, 1, :], axis=0)
    mean = s / count
    var = jnp.maximum(ss / count - mean * mean, 0.0)
    scale = gamma * lax.rsqrt(var + EPS)
    shift = beta - mean * scale
    return scale, shift


def init_basic_block_params(key, in_channels, out_channels):
    k1, k2, k3, k4 = jax.random.split(key, 4)
    return {
        "w1": jax.random.normal(k1, (out_channels, in_channels, 3, 3), jnp.float32) * 0.1,
        "w2": jax.random.normal(k2, (out_channels, out_channels, 3, 3), jnp.float32) * 0.1,
        # bn1 params exist in the module but are never used in forward (module quirk).
        "gamma1": jnp.ones((1, out_channels), jnp.float32),
        "beta1": jnp.zeros((1, out_channels), jnp.float32),
        "gamma2": 1.0 + 0.1 * jax.random.normal(k3, (1, out_channels), jnp.float32),
        "beta2": 0.1 * jax.random.normal(k4, (1, out_channels), jnp.float32),
    }


def basic_block_forward(x_nchw, params):
    """Forward of `basic_block` with stride=1, downsample=None (identity residual),
    reproducing the module quirk: bn2 is applied after BOTH convs, bn1 is unused."""
    x = jnp.transpose(x_nchw, (0, 2, 3, 1)).astype(jnp.float32)      # NCHW -> NHWC
    n, h, w, cin = x.shape
    cout = params["w1"].shape[0]
    assert cin == cout, "identity residual path requires in_channels == out_channels"
    # TODO(synk): stride > 1 / downsample branch not implemented (this instance uses
    # stride=1, downsample=None).
    # TODO(synk): for large H*W add a row-tile grid axis (the flat layout gives the
    # halo as a contiguous window) so v7x's two TensorCores get many pipelined steps;
    # at these test sizes per-step work is already overhead-bound and the in-kernel
    # tap chunking below bounds VMEM instead.

    hp, wp = h + 2, w + 2
    m = h * wp                          # "wide" rows per image (W valid + 2 junk per row)
    front = (-(wp + 1)) % 8             # slack so conv1's store offset is sublane-aligned
    off = front + wp + 1                # conv1 output occupies h1 rows [off, off + m)
    r0 = hp * wp + 2                    # conv1-input rows (padded-flat + tap slack)
    r1 = front + hp * wp + 2            # conv2-input rows (h1 layout)

    # Bound the in-VMEM tap buffer (matters on v7x: 64 MiB physical VMEM).
    n_chunks = max(1, -(-(m * 9 * cout * 6) // _TAP_CHUNK_BYTES))

    w1_slab = _weight_slab(params["w1"])                    # (9*Cin,  Cout), bf16
    w2_slab = _weight_slab(params["w2"])                    # (9*Cout, Cout), bf16
    gamma = jnp.asarray(params["gamma2"], jnp.float32).reshape(1, cout)
    beta = jnp.asarray(params["beta2"], jnp.float32).reshape(1, cout)

    # Zero-padded input, flattened over (Hp, Wp) with 2 slack rows, stored at the
    # real channel width in the MXU dtype (half the HBM bytes; every 3x3 tap is a
    # plain contiguous row window -> no im2col in HBM).
    xflat = jnp.pad(x, ((0, 0), (1, 1), (1, 1), (0, 0))).reshape(n, hp * wp, cin)
    xflat = jnp.pad(xflat, ((0, 0), (0, 2), (0, 0))).astype(MATMUL_DTYPE)

    # Pass 1: conv1 (+ per-image BN partial sums, f32); the output lands directly in
    # the zero-padded flat layout conv2 consumes (one bf16 HBM round trip, stored
    # once, at the real channel width).
    h1, stats1 = _conv1_call(xflat, w1_slab, r1=r1, cout=cout, wp=wp, w_real=w,
                             m=m, off=off, n_chunks=n_chunks)
    scale1, shift1 = _bn_scale_shift(stats1, gamma, beta, n * h * w)

    # Pass 2: bn2(conv1) -> relu -> conv2 (+ per-image BN partial sums).
    y2, stats2 = _conv2_call(h1, scale1, shift1, w2_slab, wp=wp, h_real=h, w_real=w,
                             m=m, front=front, n_chunks=n_chunks)
    scale2, shift2 = _bn_scale_shift(stats2, gamma, beta, n * h * w)

    # Pass 3: bn2(conv2) + identity residual + relu.
    res_wide = jnp.pad(x, ((0, 0), (0, 0), (0, 2), (0, 0))).reshape(n, m, cout)
    out_wide = _finalize_call(y2, res_wide, scale2, shift2)

    out = out_wide.reshape(n, h, wp, cout)[:, :, :w, :]
    return jnp.transpose(out, (0, 3, 1, 2))                          # NHWC -> NCHW


# ---------------------------------------------------------------------------
# Pure-JAX reference of the same (quirky) forward, for the self-check.
# ---------------------------------------------------------------------------
def _reference_forward(x_nchw, params):
    x = x_nchw.astype(jnp.float32)

    def conv(hh, ww):
        return lax.conv_general_dilated(
            hh, ww.astype(jnp.float32), window_strides=(1, 1),
            padding=((1, 1), (1, 1)),
            dimension_numbers=("NCHW", "OIHW", "NCHW"),
            precision=lax.Precision.HIGHEST)

    def bn(hh, gamma, beta):
        mean = jnp.mean(hh, axis=(0, 2, 3), keepdims=True)
        var = jnp.mean((hh - mean) ** 2, axis=(0, 2, 3), keepdims=True)
        g = jnp.asarray(gamma, jnp.float32).reshape(1, -1, 1, 1)
        b = jnp.asarray(beta, jnp.float32).reshape(1, -1, 1, 1)
        return (hh - mean) * lax.rsqrt(var + EPS) * g + b

    out = conv(x, params["w1"])
    out = jnp.maximum(bn(out, params["gamma2"], params["beta2"]), 0.0)
    out = conv(out, params["w2"])
    out = bn(out, params["gamma2"], params["beta2"]) + x
    return jnp.maximum(out, 0.0)


if __name__ == "__main__":
    key = jax.random.PRNGKey(0)
    kx, kp = jax.random.split(key)

    N, C, H, W = 2, 8, 16, 16
    x = jax.random.normal(kx, (N, C, H, W), jnp.float32)
    params = init_basic_block_params(kp, in_channels=C, out_channels=C)

    fwd = jax.jit(basic_block_forward)
    y = fwd(x, params)
    jax.block_until_ready(y)
    assert y.shape == (N, C, H, W)

    # Sanity check against the pure-JAX reference (bf16 MXU operands -> combined
    # abs/rel tolerance; stats and accumulation are f32).
    y_ref = _reference_forward(x, params)
    err = jnp.abs(y - y_ref)
    tol = 5e-2 + 5e-2 * jnp.abs(y_ref)
    max_err = float(jnp.max(err))
    assert bool(jnp.all(err <= tol)), f"kernel/reference mismatch: max abs err = {max_err}"

    print("KERNEL_OK")
</pallas_src>

<mosaic_0001>
module attributes {stable_mosaic.version = 11 : i64} {
  func.func @_conv1_kernel(%arg0: i32, %arg1: memref<1x326x8xbf16, #tpu.memory_space<vmem>>, %arg2: memref<72x8xbf16, #tpu.memory_space<vmem>>, %arg3: memref<1x331x8xbf16, #tpu.memory_space<vmem>>, %arg4: memref<1x2x8xf32, #tpu.memory_space<vmem>>) attributes {dimension_semantics = [#tpu.dimension_semantics<parallel>], iteration_bounds = array<i64: 2>, scalar_prefetch = 0 : i64, scratch_operands = 0 : i64, tpu.core_type = #tpu.core_type<tc>, window_params = [{transform_indices = @transform_0, window_bounds = array<i64: 1, 326, 8>}, {pipeline_mode = #tpu.pipeline_mode<synchronous>, transform_indices = @transform_1, window_bounds = array<i64: 72, 8>}, {transform_indices = @transform_2, window_bounds = array<i64: 1, 331, 8>}, {transform_indices = @transform_3, window_bounds = array<i64: 1, 2, 8>}]} {
    %c0 = arith.constant 0 : index
    %c0_0 = arith.constant 0 : index
    %c0_1 = arith.constant 0 : index
    %0 = vector.load %arg1[%c0, %c0_0, %c0_1] : memref<1x326x8xbf16, #tpu.memory_space<vmem>>, vector<1x326x8xbf16>
    %1 = vector.shape_cast %0 : vector<1x326x8xbf16> to vector<326x8xbf16>
    %2 = arith.extf %1 : vector<326x8xbf16> to vector<326x8xf32>
    %c0_2 = arith.constant 0 : index
    %c0_3 = arith.constant 0 : index
    %3 = vector.load %arg2[%c0_2, %c0_3] : memref<72x8xbf16, #tpu.memory_space<vmem>>, vector<72x8xbf16>
    %4 = vector.extract_strided_slice %2 {offsets = [0, 0], sizes = [288, 8], strides = [1, 1]} : vector<326x8xf32> to vector<288x8xf32>
    %5 = vector.extract_strided_slice %2 {offsets = [1, 0], sizes = [288, 8], strides = [1, 1]} : vector<326x8xf32> to vector<288x8xf32>
    %6 = vector.extract_strided_slice %2 {offsets = [2, 0], sizes = [288, 8], strides = [1, 1]} : vector<326x8xf32> to vector<288x8xf32>
    %7 = vector.extract_strided_slice %2 {offsets = [18, 0], sizes = [288, 8], strides = [1, 1]} : vector<326x8xf32> to vector<288x8xf32>
    %8 = vector.extract_strided_slice %2 {offsets = [19, 0], sizes = [288, 8], strides = [1, 1]} : vector<326x8xf32> to vector<288x8xf32>
    %9 = vector.extract_strided_slice %2 {offsets = [20, 0], sizes = [288, 8], strides = [1, 1]} : vector<326x8xf32> to vector<288x8xf32>
    %10 = vector.extract_strided_slice %2 {offsets = [36, 0], sizes = [288, 8], strides = [1, 1]} : vector<326x8xf32> to vector<288x8xf32>
    %11 = vector.extract_strided_slice %2 {offsets = [37, 0], sizes = [288, 8], strides = [1, 1]} : vector<326x8xf32> to vector<288x8xf32>
    %12 = vector.extract_strided_slice %2 {offsets = [38, 0], sizes = [288, 8], strides = [1, 1]} : vector<326x8xf32> to vector<288x8xf32>
    %13 = tpu.concatenate %4, %5, %6, %7, %8, %9, %10, %11, %12 in 1 : vector<288x8xf32>, vector<288x8xf32>, vector<288x8xf32>, vector<288x8xf32>, vector<288x8xf32>, vector<288x8xf32>, vector<288x8xf32>, vector<288x8xf32>, vector<288x8xf32> -> vector<288x72xf32>
    %14 = arith.truncf %13 : vector<288x72xf32> to vector<288x72xbf16>
    %cst = arith.constant dense<0.000000e+00> : vector<288x8xf32>
    %15 = tpu.matmul %14, %3, %cst {dimension_numbers = #tpu.dot_dimension_numbers<[1], [0], [0], [1], [0, 0, 1, 1], [], []>} : vector<288x72xbf16>, vector<72x8xbf16>, vector<288x8xf32> -> vector<288x8xf32>
    %16 = arith.truncf %15 : vector<288x8xf32> to vector<288x8xbf16>
    %c0_4 = arith.constant 0 : index
    %c24 = arith.constant 24 : index
    %c0_5 = arith.constant 0 : index
    %17 = vector.load %arg3[%c0_4, %c24, %c0_5] : memref<1x331x8xbf16, #tpu.memory_space<vmem>>, vector<1x288x8xbf16>
    %18 = vector.shape_cast %17 : vector<1x288x8xbf16> to vector<288x8xbf16>
    %19 = vector.shape_cast %16 : vector<288x8xbf16> to vector<1x288x8xbf16>
    tpu.vector_store %arg3[%c0_4, %c24, %c0_5], %19 {strides = array<i32>} : memref<1x331x8xbf16, #tpu.memory_space<vmem>>, vector<1x288x8xbf16>,
    %20 = tpu.iota {dimensions = array<i32: 0>} : vector<288x1xi32>
    %c0_i32 = arith.constant 0 : i32
    %21 = vector.broadcast %c0_i32 : i32 to vector<288x1xi32>
    %22 = arith.subi %20, %21 : vector<288x1xi32>
    %23 = arith.sitofp %22 : vector<288x1xi32> to vector<288x1xf32>
    %cst_6 = arith.constant 5.000000e-01 : f32
    %24 = vector.broadcast %cst_6 : f32 to vector<288x1xf32>
    %25 = arith.addf %23, %24 : vector<288x1xf32>
    %cst_7 = arith.constant 0.055555556 : f32
    %26 = vector.broadcast %cst_7 : f32 to vector<288x1xf32>
    %27 = arith.mulf %25, %26 : vector<288x1xf32>
    %28 = math.floor %27 : vector<288x1xf32>
    %29 = arith.fptosi %28 : vector<288x1xf32> to vector<288x1xi32>
    %c18_i32 = arith.constant 18 : i32
    %30 = vector.broadcast %c18_i32 : i32 to vector<288x1xi32>
    %31 = arith.muli %29, %30 : vector<288x1xi32>
    %32 = arith.subi %22, %31 : vector<288x1xi32>
    %c16_i32 = arith.constant 16 : i32
    %33 = vector.broadcast %c16_i32 : i32 to vector<288x1xi32>
    %34 = arith.cmpi slt, %32, %33 : vector<288x1xi32>
    %35 = arith.extui %34 : vector<288x1xi1> to vector<288x1xi32>
    %36 = arith.sitofp %35 : vector<288x1xi32> to vector<288x1xf32>
    %37 = vector.broadcast %36 : vector<288x1xf32> to vector<288x8xf32>
    %38 = arith.mulf %15, %37 : vector<288x8xf32>
    %cst_8 = arith.constant dense<0.000000e+00> : vector<8xf32>
    %39 = vector.multi_reduction <add>, %38, %cst_8 [0] : vector<288x8xf32> to vector<8xf32>
    %40 = vector.shape_cast %39 : vector<8xf32> to vector<1x8xf32>
    %c0_9 = arith.constant 0 : index
    %c0_10 = arith.constant 0 : index
    %c0_11 = arith.constant 0 : index
    %41 = vector.load %arg4[%c0_9, %c0_10, %c0_11] : memref<1x2x8xf32, #tpu.memory_space<vmem>>, vector<1x1x8xf32>
    %42 = vector.shape_cast %41 : vector<1x1x8xf32> to vector<1x8xf32>
    %43 = vector.shape_cast %40 : vector<1x8xf32> to vector<1x1x8xf32>
    tpu.vector_store %arg4[%c0_9, %c0_10, %c0_11], %43 {strides = array<i32>} : memref<1x2x8xf32, #tpu.memory_space<vmem>>, vector<1x1x8xf32>,
    %44 = arith.mulf %38, %15 : vector<288x8xf32>
    %cst_12 = arith.constant dense<0.000000e+00> : vector<8xf32>
    %45 = vector.multi_reduction <add>, %44, %cst_12 [0] : vector<288x8xf32> to vector<8xf32>
    %46 = vector.shape_cast %45 : vector<8xf32> to vector<1x8xf32>
    %c0_13 = arith.constant 0 : index
    %c1 = arith.constant 1 : index
    %c0_14 = arith.constant 0 : index
    %47 = vector.load %arg4[%c0_13, %c1, %c0_14] : memref<1x2x8xf32, #tpu.memory_space<vmem>>, vector<1x1x8xf32>
    %48 = vector.shape_cast %47 : vector<1x1x8xf32> to vector<1x8xf32>
    %49 = vector.shape_cast %46 : vector<1x8xf32> to vector<1x1x8xf32>
    tpu.vector_store %arg4[%c0_13, %c1, %c0_14], %49 {strides = array<i32>} : memref<1x2x8xf32, #tpu.memory_space<vmem>>, vector<1x1x8xf32>,
    return
  }
  func.func @transform_0(%arg0: i32) -> (i32, i32, i32) {
    %c0_i32 = arith.constant 0 : i32
    %c0_i32_0 = arith.constant 0 : i32
    %c0_i32_1 = arith.constant 0 : i32
    return %arg0, %c0_i32, %c0_i32_0 : i32, i32, i32
  }
  func.func @transform_1(%arg0: i32) -> (i32, i32) {
    %c0_i32 = arith.constant 0 : i32
    %c0_i32_0 = arith.constant 0 : i32
    %c0_i32_1 = arith.constant 0 : i32
    return %c0_i32, %c0_i32_0 : i32, i32
  }
  func.func @transform_2(%arg0: i32) -> (i32, i32, i32) {
    %c0_i32 = arith.constant 0 : i32
    %c0_i32_0 = arith.constant 0 : i32
    %c0_i32_1 = arith.constant 0 : i32
    return %arg0, %c0_i32, %c0_i32_0 : i32, i32, i32
  }
  func.func @transform_3(%arg0: i32) -> (i32, i32, i32) {
    %c0_i32 = arith.constant 0 : i32
    %c0_i32_0 = arith.constant 0 : i32
    %c0_i32_1 = arith.constant 0 : i32
    return %arg0, %c0_i32, %c0_i32_0 : i32, i32, i32
  }
}

module attributes {stable_mosaic.version = 11 : i64} {
  func.func @_finalize_kernel(%arg0: i32, %arg1: memref<1x288x8xbf16, #tpu.memory_space<vmem>>, %arg2: memref<1x288x8xf32, #tpu.memory_space<vmem>>, %arg3: memref<1x8xf32, #tpu.memory_space<vmem>>, %arg4: memref<1x8xf32, #tpu.memory_space<vmem>>, %arg5: memref<1x288x8xf32, #tpu.memory_space<vmem>>) attributes {dimension_semantics = [#tpu.dimension_semantics<parallel>], iteration_bounds = array<i64: 2>, scalar_prefetch = 0 : i64, scratch_operands = 0 : i64, tpu.core_type = #tpu.core_type<tc>, window_params = [{transform_indices = @transform_0, window_bounds = array<i64: 1, 288, 8>}, {transform_indices = @transform_1, window_bounds = array<i64: 1, 288, 8>}, {pipeline_mode = #tpu.pipeline_mode<synchronous>, transform_indices = @transform_2, window_bounds = array<i64: 1, 8>}, {pipeline_mode = #tpu.pipeline_mode<synchronous>, transform_indices = @transform_3, window_bounds = array<i64: 1, 8>}, {transform_indices = @transform_4, window_bounds = array<i64: 1, 288, 8>}]} {
    %c0 = arith.constant 0 : index
    %c0_0 = arith.constant 0 : index
    %c0_1 = arith.constant 0 : index
    %0 = vector.load %arg1[%c0, %c0_0, %c0_1] : memref<1x288x8xbf16, #tpu.memory_space<vmem>>, vector<1x288x8xbf16>
    %1 = vector.shape_cast %0 : vector<1x288x8xbf16> to vector<288x8xbf16>
    %2 = arith.extf %1 : vector<288x8xbf16> to vector<288x8xf32>
    %c0_2 = arith.constant 0 : index
    %c0_3 = arith.constant 0 : index
    %3 = vector.load %arg3[%c0_2, %c0_3] : memref<1x8xf32, #tpu.memory_space<vmem>>, vector<1x8xf32>
    %4 = vector.broadcast %3 : vector<1x8xf32> to vector<288x8xf32>
    %5 = arith.mulf %2, %4 : vector<288x8xf32>
    %c0_4 = arith.constant 0 : index
    %c0_5 = arith.constant 0 : index
    %6 = vector.load %arg4[%c0_4, %c0_5] : memref<1x8xf32, #tpu.memory_space<vmem>>, vector<1x8xf32>
    %7 = vector.broadcast %6 : vector<1x8xf32> to vector<288x8xf32>
    %8 = arith.addf %5, %7 : vector<288x8xf32>
    %c0_6 = arith.constant 0 : index
    %c0_7 = arith.constant 0 : index
    %c0_8 = arith.constant 0 : index
    %9 = vector.load %arg2[%c0_6, %c0_7, %c0_8] : memref<1x288x8xf32, #tpu.memory_space<vmem>>, vector<1x288x8xf32>
    %10 = vector.shape_cast %9 : vector<1x288x8xf32> to vector<288x8xf32>
    %11 = arith.addf %8, %10 : vector<288x8xf32>
    %cst = arith.constant 0.000000e+00 : f32
    %12 = vector.broadcast %cst : f32 to vector<288x8xf32>
    %13 = arith.maximumf %11, %12 : vector<288x8xf32>
    %c0_9 = arith.constant 0 : index
    %c0_10 = arith.constant 0 : index
    %c0_11 = arith.constant 0 : index
    %14 = vector.load %arg5[%c0_9, %c0_10, %c0_11] : memref<1x288x8xf32, #tpu.memory_space<vmem>>, vector<1x288x8xf32>
    %15 = vector.shape_cast %14 : vector<1x288x8xf32> to vector<288x8xf32>
    %16 = vector.shape_cast %13 : vector<288x8xf32> to vector<1x288x8xf32>
    tpu.vector_store %arg5[%c0_9, %c0_10, %c0_11], %16 {strides = array<i32>} : memref<1x288x8xf32, #tpu.memory_space<vmem>>, vector<1x288x8xf32>,
    return
  }
  func.func @transform_0(%arg0: i32) -> (i32, i32, i32) {
    %c0_i32 = arith.constant 0 : i32
    %c0_i32_0 = arith.constant 0 : i32
    %c0_i32_1 = arith.constant 0 : i32
    return %arg0, %c0_i32, %c0_i32_0 : i32, i32, i32
  }
  func.func @transform_1(%arg0: i32) -> (i32, i32, i32) {
    %c0_i32 = arith.constant 0 : i32
    %c0_i32_0 = arith.constant 0 : i32
    %c0_i32_1 = arith.constant 0 : i32
    return %arg0, %c0_i32, %c0_i32_0 : i32, i32, i32
  }
  func.func @transform_2(%arg0: i32) -> (i32, i32) {
    %c0_i32 = arith.constant 0 : i32
    %c0_i32_0 = arith.constant 0 : i32
    %c0_i32_1 = arith.constant 0 : i32
    return %c0_i32, %c0_i32_0 : i32, i32
  }
  func.func @transform_3(%arg0: i32) -> (i32, i32) {
    %c0_i32 = arith.constant 0 : i32
    %c0_i32_0 = arith.constant 0 : i32
    %c0_i32_1 = arith.constant 0 : i32
    return %c0_i32, %c0_i32_0 : i32, i32
  }
  func.func @transform_4(%arg0: i32) -> (i32, i32, i32) {
    %c0_i32 = arith.constant 0 : i32
    %c0_i32_0 = arith.constant 0 : i32
    %c0_i32_1 = arith.constant 0 : i32
    return %arg0, %c0_i32, %c0_i32_0 : i32, i32, i32
  }
}

module attributes {stable_mosaic.version = 11 : i64} {
  func.func @_conv2_kernel(%arg0: i32, %arg1: memref<1x331x8xbf16, #tpu.memory_space<vmem>>, %arg2: memref<1x8xf32, #tpu.memory_space<vmem>>, %arg3: memref<1x8xf32, #tpu.memory_space<vmem>>, %arg4: memref<72x8xbf16, #tpu.memory_space<vmem>>, %arg5: memref<1x288x8xbf16, #tpu.memory_space<vmem>>, %arg6: memref<1x2x8xf32, #tpu.memory_space<vmem>>) attributes {dimension_semantics = [#tpu.dimension_semantics<parallel>], iteration_bounds = array<i64: 2>, scalar_prefetch = 0 : i64, scratch_operands = 0 : i64, tpu.core_type = #tpu.core_type<tc>, window_params = [{transform_indices = @transform_0, window_bounds = array<i64: 1, 331, 8>}, {pipeline_mode = #tpu.pipeline_mode<synchronous>, transform_indices = @transform_1, window_bounds = array<i64: 1, 8>}, {pipeline_mode = #tpu.pipeline_mode<synchronous>, transform_indices = @transform_2, window_bounds = array<i64: 1, 8>}, {pipeline_mode = #tpu.pipeline_mode<synchronous>, transform_indices = @transform_3, window_bounds = array<i64: 72, 8>}, {transform_indices = @transform_4, window_bounds = array<i64: 1, 288, 8>}, {transform_indices = @transform_5, window_bounds = array<i64: 1, 2, 8>}]} {
    %c0 = arith.constant 0 : index
    %c0_0 = arith.constant 0 : index
    %c0_1 = arith.constant 0 : index
    %0 = vector.load %arg1[%c0, %c0_0, %c0_1] : memref<1x331x8xbf16, #tpu.memory_space<vmem>>, vector<1x331x8xbf16>
    %1 = vector.shape_cast %0 : vector<1x331x8xbf16> to vector<331x8xbf16>
    %2 = arith.extf %1 : vector<331x8xbf16> to vector<331x8xf32>
    %3 = tpu.iota {dimensions = array<i32: 0>} : vector<331x1xi32>
    %c5_i32 = arith.constant 5 : i32
    %4 = vector.broadcast %c5_i32 : i32 to vector<331x1xi32>
    %5 = arith.subi %3, %4 : vector<331x1xi32>
    %6 = arith.sitofp %5 : vector<331x1xi32> to vector<331x1xf32>
    %cst = arith.constant 5.000000e-01 : f32
    %7 = vector.broadcast %cst : f32 to vector<331x1xf32>
    %8 = arith.addf %6, %7 : vector<331x1xf32>
    %cst_2 = arith.constant 0.055555556 : f32
    %9 = vector.broadcast %cst_2 : f32 to vector<331x1xf32>
    %10 = arith.mulf %8, %9 : vector<331x1xf32>
    %11 = math.floor %10 : vector<331x1xf32>
    %12 = arith.fptosi %11 : vector<331x1xf32> to vector<331x1xi32>
    %c18_i32 = arith.constant 18 : i32
    %13 = vector.broadcast %c18_i32 : i32 to vector<331x1xi32>
    %14 = arith.muli %12, %13 : vector<331x1xi32>
    %15 = arith.subi %5, %14 : vector<331x1xi32>
    %c1_i32 = arith.constant 1 : i32
    %16 = vector.broadcast %c1_i32 : i32 to vector<331x1xi32>
    %17 = arith.cmpi sge, %12, %16 : vector<331x1xi32>
    %c16_i32 = arith.constant 16 : i32
    %18 = vector.broadcast %c16_i32 : i32 to vector<331x1xi32>
    %19 = arith.cmpi sle, %12, %18 : vector<331x1xi32>
    %20 = arith.andi %17, %19 : vector<331x1xi1>
    %c1_i32_3 = arith.constant 1 : i32
    %21 = vector.broadcast %c1_i32_3 : i32 to vector<331x1xi32>
    %22 = arith.cmpi sge, %15, %21 : vector<331x1xi32>
    %23 = arith.andi %20, %22 : vector<331x1xi1>
    %c16_i32_4 = arith.constant 16 : i32
    %24 = vector.broadcast %c16_i32_4 : i32 to vector<331x1xi32>
    %25 = arith.cmpi sle, %15, %24 : vector<331x1xi32>
    %26 = arith.andi %23, %25 : vector<331x1xi1>
    %c0_5 = arith.constant 0 : index
    %c0_6 = arith.constant 0 : index
    %27 = vector.load %arg2[%c0_5, %c0_6] : memref<1x8xf32, #tpu.memory_space<vmem>>, vector<1x8xf32>
    %28 = vector.broadcast %27 : vector<1x8xf32> to vector<331x8xf32>
    %29 = arith.mulf %2, %28 : vector<331x8xf32>
    %c0_7 = arith.constant 0 : index
    %c0_8 = arith.constant 0 : index
    %30 = vector.load %arg3[%c0_7, %c0_8] : memref<1x8xf32, #tpu.memory_space<vmem>>, vector<1x8xf32>
    %31 = vector.broadcast %30 : vector<1x8xf32> to vector<331x8xf32>
    %32 = arith.addf %29, %31 : vector<331x8xf32>
    %cst_9 = arith.constant 0.000000e+00 : f32
    %33 = vector.broadcast %cst_9 : f32 to vector<331x8xf32>
    %34 = arith.maximumf %32, %33 : vector<331x8xf32>
    %cst_10 = arith.constant 0.000000e+00 : f32
    %35 = vector.shape_cast %26 : vector<331x1xi1> to vector<331x1xi1>
    %36 = vector.broadcast %35 : vector<331x1xi1> to vector<331x8xi1>
    %37 = vector.broadcast %cst_10 : f32 to vector<331x8xf32>
    %38 = arith.select %36, %34, %37 : vector<331x8xi1>, vector<331x8xf32>
    %c0_11 = arith.constant 0 : index
    %c0_12 = arith.constant 0 : index
    %39 = vector.load %arg4[%c0_11, %c0_12] : memref<72x8xbf16, #tpu.memory_space<vmem>>, vector<72x8xbf16>
    %40 = vector.extract_strided_slice %38 {offsets = [5, 0], sizes = [288, 8], strides = [1, 1]} : vector<331x8xf32> to vector<288x8xf32>
    %41 = vector.extract_strided_slice %38 {offsets = [6, 0], sizes = [288, 8], strides = [1, 1]} : vector<331x8xf32> to vector<288x8xf32>
    %42 = vector.extract_strided_slice %38 {offsets = [7, 0], sizes = [288, 8], strides = [1, 1]} : vector<331x8xf32> to vector<288x8xf32>
    %43 = vector.extract_strided_slice %38 {offsets = [23, 0], sizes = [288, 8], strides = [1, 1]} : vector<331x8xf32> to vector<288x8xf32>
    %44 = vector.extract_strided_slice %38 {offsets = [24, 0], sizes = [288, 8], strides = [1, 1]} : vector<331x8xf32> to vector<288x8xf32>
    %45 = vector.extract_strided_slice %38 {offsets = [25, 0], sizes = [288, 8], strides = [1, 1]} : vector<331x8xf32> to vector<288x8xf32>
    %46 = vector.extract_strided_slice %38 {offsets = [41, 0], sizes = [288, 8], strides = [1, 1]} : vector<331x8xf32> to vector<288x8xf32>
    %47 = vector.extract_strided_slice %38 {offsets = [42, 0], sizes = [288, 8], strides = [1, 1]} : vector<331x8xf32> to vector<288x8xf32>
    %48 = vector.extract_strided_slice %38 {offsets = [43, 0], sizes = [288, 8], strides = [1, 1]} : vector<331x8xf32> to vector<288x8xf32>
    %49 = tpu.concatenate %40, %41, %42, %43, %44, %45, %46, %47, %48 in 1 : vector<288x8xf32>, vector<288x8xf32>, vector<288x8xf32>, vector<288x8xf32>, vector<288x8xf32>, vector<288x8xf32>, vector<288x8xf32>, vector<288x8xf32>, vector<288x8xf32> -> vector<288x72xf32>
    %50 = arith.truncf %49 : vector<288x72xf32> to vector<288x72xbf16>
    %cst_13 = arith.constant dense<0.000000e+00> : vector<288x8xf32>
    %51 = tpu.matmul %50, %39, %cst_13 {dimension_numbers = #tpu.dot_dimension_numbers<[1], [0], [0], [1], [0, 0, 1, 1], [], []>} : vector<288x72xbf16>, vector<72x8xbf16>, vector<288x8xf32> -> vector<288x8xf32>
    %52 = arith.truncf %51 : vector<288x8xf32> to vector<288x8xbf16>
    %c0_14 = arith.constant 0 : index
    %c0_15 = arith.constant 0 : index
    %c0_16 = arith.constant 0 : index
    %53 = vector.load %arg5[%c0_14, %c0_15, %c0_16] : memref<1x288x8xbf16, #tpu.memory_space<vmem>>, vector<1x288x8xbf16>
    %54 = vector.shape_cast %53 : vector<1x288x8xbf16> to vector<288x8xbf16>
    %55 = vector.shape_cast %52 : vector<288x8xbf16> to vector<1x288x8xbf16>
    tpu.vector_store %arg5[%c0_14, %c0_15, %c0_16], %55 {strides = array<i32>} : memref<1x288x8xbf16, #tpu.memory_space<vmem>>, vector<1x288x8xbf16>,
    %56 = tpu.iota {dimensions = array<i32: 0>} : vector<288x1xi32>
    %c0_i32 = arith.constant 0 : i32
    %57 = vector.broadcast %c0_i32 : i32 to vector<288x1xi32>
    %58 = arith.subi %56, %57 : vector<288x1xi32>
    %59 = arith.sitofp %58 : vector<288x1xi32> to vector<288x1xf32>
    %cst_17 = arith.constant 5.000000e-01 : f32
    %60 = vector.broadcast %cst_17 : f32 to vector<288x1xf32>
    %61 = arith.addf %59, %60 : vector<288x1xf32>
    %cst_18 = arith.constant 0.055555556 : f32
    %62 = vector.broadcast %cst_18 : f32 to vector<288x1xf32>
    %63 = arith.mulf %61, %62 : vector<288x1xf32>
    %64 = math.floor %63 : vector<288x1xf32>
    %65 = arith.fptosi %64 : vector<288x1xf32> to vector<288x1xi32>
    %c18_i32_19 = arith.constant 18 : i32
    %66 = vector.broadcast %c18_i32_19 : i32 to vector<288x1xi32>
    %67 = arith.muli %65, %66 : vector<288x1xi32>
    %68 = arith.subi %58, %67 : vector<288x1xi32>
    %c16_i32_20 = arith.constant 16 : i32
    %69 = vector.broadcast %c16_i32_20 : i32 to vector<288x1xi32>
    %70 = arith.cmpi slt, %68, %69 : vector<288x1xi32>
    %71 = arith.extui %70 : vector<288x1xi1> to vector<288x1xi32>
    %72 = arith.sitofp %71 : vector<288x1xi32> to vector<288x1xf32>
    %73 = vector.broadcast %72 : vector<288x1xf32> to vector<288x8xf32>
    %74 = arith.mulf %51, %73 : vector<288x8xf32>
    %cst_21 = arith.constant dense<0.000000e+00> : vector<8xf32>
    %75 = vector.multi_reduction <add>, %74, %cst_21 [0] : vector<288x8xf32> to vector<8xf32>
    %76 = vector.shape_cast %75 : vector<8xf32> to vector<1x8xf32>
    %c0_22 = arith.constant 0 : index
    %c0_23 = arith.constant 0 : index
    %c0_24 = arith.constant 0 : index
    %77 = vector.load %arg6[%c0_22, %c0_23, %c0_24] : memref<1x2x8xf32, #tpu.memory_space<vmem>>, vector<1x1x8xf32>
    %78 = vector.shape_cast %77 : vector<1x1x8xf32> to vector<1x8xf32>
    %79 = vector.shape_cast %76 : vector<1x8xf32> to vector<1x1x8xf32>
    tpu.vector_store %arg6[%c0_22, %c0_23, %c0_24], %79 {strides = array<i32>} : memref<1x2x8xf32, #tpu.memory_space<vmem>>, vector<1x1x8xf32>,
    %80 = arith.mulf %74, %51 : vector<288x8xf32>
    %cst_25 = arith.constant dense<0.000000e+00> : vector<8xf32>
    %81 = vector.multi_reduction <add>, %80, %cst_25 [0] : vector<288x8xf32> to vector<8xf32>
    %82 = vector.shape_cast %81 : vector<8xf32> to vector<1x8xf32>
    %c0_26 = arith.constant 0 : index
    %c1 = arith.constant 1 : index
    %c0_27 = arith.constant 0 : index
    %83 = vector.load %arg6[%c0_26, %c1, %c0_27] : memref<1x2x8xf32, #tpu.memory_space<vmem>>, vector<1x1x8xf32>
    %84 = vector.shape_cast %83 : vector<1x1x8xf32> to vector<1x8xf32>
    %85 = vector.shape_cast %82 : vector<1x8xf32> to vector<1x1x8xf32>
    tpu.vector_store %arg6[%c0_26, %c1, %c0_27], %85 {strides = array<i32>} : memref<1x2x8xf32, #tpu.memory_space<vmem>>, vector<1x1x8xf32>,
    return
  }
  func.func @transform_0(%arg0: i32) -> (i32, i32, i32) {
    %c0_i32 = arith.constant 0 : i32
    %c0_i32_0 = arith.constant 0 : i32
    %c0_i32_1 = arith.constant 0 : i32
    return %arg0, %c0_i32, %c0_i32_0 : i32, i32, i32
  }
  func.func @transform_1(%arg0: i32) -> (i32, i32) {
    %c0_i32 = arith.constant 0 : i32
    %c0_i32_0 = arith.constant 0 : i32
    %c0_i32_1 = arith.constant 0 : i32
    return %c0_i32, %c0_i32_0 : i32, i32
  }
  func.func @transform_2(%arg0: i32) -> (i32, i32) {
    %c0_i32 = arith.constant 0 : i32
    %c0_i32_0 = arith.constant 0 : i32
    %c0_i32_1 = arith.constant 0 : i32
    return %c0_i32, %c0_i32_0 : i32, i32
  }
  func.func @transform_3(%arg0: i32) -> (i32, i32) {
    %c0_i32 = arith.constant 0 : i32
    %c0_i32_0 = arith.constant 0 : i32
    %c0_i32_1 = arith.constant 0 : i32
    return %c0_i32, %c0_i32_0 : i32, i32
  }
  func.func @transform_4(%arg0: i32) -> (i32, i32, i32) {
    %c0_i32 = arith.constant 0 : i32
    %c0_i32_0 = arith.constant 0 : i32
    %c0_i32_1 = arith.constant 0 : i32
    return %arg0, %c0_i32, %c0_i32_0 : i32, i32, i32
  }
  func.func @transform_5(%arg0: i32) -> (i32, i32, i32) {
    %c0_i32 = arith.constant 0 : i32
    %c0_i32_0 = arith.constant 0 : i32
    %c0_i32_1 = arith.constant 0 : i32
    return %arg0, %c0_i32, %c0_i32_0 : i32, i32, i32
  }
}

</mosaic_0001>

<bundles_post_ra>
// kernel: basic_block_forward.5
= control target key start
LH: loop header
LB: loop body
LE: loop exit
PB: predicated region body
PF: predicated region fallthrough
CT: control target
= control target key end

     0   :  { %s732_s15 = smov 0   ;;  %s974_s0 = inlined_call_operand.vmem [shape: bf16[2,288,8], index: 0, kind: input, shape index: {}]   ;;  %s975_s1 = inlined_call_operand.vmem [shape: f32[2,288,8], index: 1, kind: input, shape index: {}]   ;;  %s976_s2 = inlined_call_operand.vmem [shape: f32[1,8], index: 2, kind: input, shape index: {}]   ;;  %s977_s3 = inlined_call_operand.vmem [shape: f32[1,8], index: 3, kind: input, shape index: {}]   ;;  %s978_s4 = inlined_call_operand.vmem [shape: f32[2,288,8], index: 4, kind: output, shape index: {}]  }
   0x1 LB: > { %s588_s16 = sadd.s32 4294967295, %s705_s15   ;;  %p592_p0 = scmp.ge.s32.totalorder %s705_s15, 1  ;;  %s705_s15 = sphi %s732_s15, %s14_s15  }
   0x2   : > { %p172_p1 = scmp.lt.s32.totalorder %s705_s15, 3 }
   0x4   : > { %p173_p2 = pnand %p592_p0, %p172_p1 }
   0x5   : > { %p203_p3 = scmp.lt.s32.totalorder (!%p173_p2), %s588_s16, 1 }
   0x6   : > { %176 = sbr.rel (%p173_p2) target bundleno = 67 (0x43), region = 36 }
   0xb   : > { %s980_s16 = smov (!%p203_p3, %s588_s16), 1  ;;  %v752_v0 = vld [vmem:[%s976_s2] ss:$0 sm:$0xff]  ;;  %vm484_vm0 = vcmask 64512  }
   0xc   : > { %s689_s17 = smul.u32 144, %s980_s16  ;;  %v767_v8 = vld [vmem:[%s977_s3] ss:$0 sm:$0xff] }
   0xd   : > { %s690_s18 = smul.u32 288, %s980_s16 }
   0xe   : > { %s747_s21 = scalar_lea.vmem %s974_s0, %s689_s17 }
   0xf   : > { %s759_s26 = scalar_lea.vmem %s975_s1, %s690_s18  ;;  %v601_v1 = vld [vmem:[%s747_s21] sm:$0xff]   ;;  %v672_v2 = vld [vmem:[%s747_s21 + $0x8] sm:$0xff]   ;;  %v673_v3 = vld [vmem:[%s747_s21 + $0x10] sm:$0xff]   ;;  %s797_s5 = scalar_lea.vmem %s978_s4, %s690_s18 }
  0x10   : > { %v602_v4 = vunpack.c.l.bf16 %v601_v1  ;;  %v603_v5 = vunpack.c.h.bf16 %v601_v1  ;;  %v606_v6 = vunpack.c.l.bf16 %v672_v2  ;;  %v607_v7 = vunpack.c.h.bf16 %v672_v2  ;;  %v376_v12 = vld [vmem:[%s759_s26] sm:$0xff]  ;;  %v674_v16 = vld [vmem:[%s747_s21 + $0x18] sm:$0xff]   ;;  %v377_v17 = vld [vmem:[%s759_s26 + $0x8] sm:$0xff] }
  0x11   : > { %v610_v9 = vunpack.c.l.bf16 %v673_v3  ;;  %v611_v10 = vunpack.c.h.bf16 %v673_v3  ;;  %v378_v18 = vld [vmem:[%s759_s26 + $0x10] sm:$0xff]  ;;  %v379_v19 = vld [vmem:[%s759_s26 + $0x18] sm:$0xff]  ;;  %v614_v22 = vunpack.c.l.bf16 %v674_v16  ;;  %v615_v23 = vunpack.c.h.bf16 %v674_v16  ;;  %v380_v28 = vld [vmem:[%s759_s26 + $0x20] sm:$0xff] }
  0x12   : > { %v297_v11 = vmul.f32 %v602_v4, %v752_v0  ;;  %v298_v13 = vmul.f32 %v603_v5, %v752_v0  ;;  %v299_v14 = vmul.f32 %v606_v6, %v752_v0  ;;  %v300_v15 = vmul.f32 %v607_v7, %v752_v0  ;;  %v381_v29 = vld [vmem:[%s759_s26 + $0x28] sm:$0xff]  ;;  %v382_v38 = vld [vmem:[%s759_s26 + $0x30] sm:$0xff]  ;;  %v383_v39 = vld [vmem:[%s759_s26 + $0x38] sm:$0xff] }
  0x13   : > { %v301_v20 = vmul.f32 %v610_v9, %v752_v0  ;;  %v302_v21 = vmul.f32 %v611_v10, %v752_v0  ;;  %v303_v32 = vmul.f32 %v614_v22, %v752_v0  ;;  %v304_v33 = vmul.f32 %v615_v23, %v752_v0  ;;  %v675_v44 = vld [vmem:[%s747_s21 + $0x20] sm:$0xff]   ;;  %v676_v45 = vld [vmem:[%s747_s21 + $0x28] sm:$0xff]   ;;  %v677_v50 = vld [vmem:[%s747_s21 + $0x30] sm:$0xff]  }
  0x14   : > { %v340_v24 = vadd.f32 %v767_v8, %v297_v11  ;;  %v341_v25 = vadd.f32 %v767_v8, %v298_v13  ;;  %v342_v26 = vadd.f32 %v767_v8, %v299_v14  ;;  %v343_v27 = vadd.f32 %v767_v8, %v300_v15  ;;  %v678_v59 = vld [vmem:[%s747_s21 + $0x38] sm:$0xff]   ;;  %v384_v2 = vld [vmem:[%s759_s26 + $0x40] sm:$0xff]  ;;  %v385_v6 = vld [vmem:[%s759_s26 + $0x48] sm:$0xff] }
  0x15   : > { %v344_v30 = vadd.f32 %v767_v8, %v301_v20  ;;  %v345_v31 = vadd.f32 %v767_v8, %v302_v21  ;;  %v346_v42 = vadd.f32 %v767_v8, %v303_v32  ;;  %v347_v43 = vadd.f32 %v767_v8, %v304_v33  ;;  %v386_v7 = vld [vmem:[%s759_s26 + $0x50] sm:$0xff]  ;;  %v387_v9 = vld [vmem:[%s759_s26 + $0x58] sm:$0xff] }
  0x16   : > { %v412_v34 = vadd.f32 %v376_v12, %v340_v24  ;;  %v413_v35 = vadd.f32 %v377_v17, %v341_v25  ;;  %v414_v36 = vadd.f32 %v378_v18, %v342_v26  ;;  %v415_v37 = vadd.f32 %v379_v19, %v343_v27  ;;  %v388_v18 = vld [vmem:[%s759_s26 + $0x60] sm:$0xff]  ;;  %v389_v19 = vld [vmem:[%s759_s26 + $0x68] sm:$0xff] }
  0x17   : > { %v416_v40 = vadd.f32 %v380_v28, %v344_v30  ;;  %v417_v41 = vadd.f32 %v381_v29, %v345_v31  ;;  %v418_v53 = vadd.f32 %v382_v38, %v346_v42  ;;  %v419_v54 = vadd.f32 %v383_v39, %v347_v43  ;;  %v390_v28 = vld [vmem:[%s759_s26 + $0x70] sm:$0xff]  ;;  %v391_v29 = vld [vmem:[%s759_s26 + $0x78] sm:$0xff] }
  0x18   : > { %v448_v46 = vmax.f32 %v412_v34, 0.0  ;;  %v449_v47 = vmax.f32 %v413_v35, 0.0  ;;  %v450_v48 = vmax.f32 %v414_v36, 0.0  ;;  %v451_v49 = vmax.f32 %v415_v37, 0.0  ;;  %v679_v34 = vld [vmem:[%s747_s21 + $0x40] sm:$0xff]   ;;  %v680_v35 = vld [vmem:[%s747_s21 + $0x48] sm:$0xff]  }
  0x19   : > { %v452_v51 = vmax.f32 %v416_v40, 0.0  ;;  %v453_v52 = vmax.f32 %v417_v41, 0.0  ;;  %v618_v55 = vunpack.c.l.bf16 %v675_v44  ;;  %v619_v56 = vunpack.c.h.bf16 %v675_v44  ;;  %v681_v40 = vld [vmem:[%s747_s21 + $0x50] sm:$0xff]  }
  0x1a   : > { %485 = vst.msk [vmem:[%s797_s5] sm:$0xff] %vm484_vm0, %v448_v46  ;;  %486 = vst.msk [vmem:[%s797_s5 + $0x8] sm:$0xff] %vm484_vm0, %v449_v47  ;;  %v622_v57 = vunpack.c.l.bf16 %v676_v45  ;;  %v623_v58 = vunpack.c.h.bf16 %v676_v45  ;;  %v454_v60 = vmax.f32 %v418_v53, 0.0  ;;  %v455_v61 = vmax.f32 %v419_v54, 0.0 }
  0x1b   : > { %487 = vst.msk [vmem:[%s797_s5 + $0x10] sm:$0xff] %vm484_vm0, %v450_v48  ;;  %488 = vst.msk [vmem:[%s797_s5 + $0x18] sm:$0xff] %vm484_vm0, %v451_v49  ;;  %v626_v62 = vunpack.c.l.bf16 %v677_v50  ;;  %v627_v63 = vunpack.c.h.bf16 %v677_v50  ;;  %v305_v1 = vmul.f32 %v618_v55, %v752_v0  ;;  %v306_v3 = vmul.f32 %v619_v56, %v752_v0  ;;  %v682_v49 = vld [vmem:[%s747_s21 + $0x58] sm:$0xff]   ;;  %v392_v55 = vld [vmem:[%s759_s26 + $0x80] sm:$0xff] }
  0x1c   : > { %489 = vst.msk [vmem:[%s797_s5 + $0x20] sm:$0xff] %vm484_vm0, %v452_v51  ;;  %490 = vst.msk [vmem:[%s797_s5 + $0x28] sm:$0xff] %vm484_vm0, %v453_v52  ;;  %v307_v4 = vmul.f32 %v622_v57, %v752_v0  ;;  %v308_v5 = vmul.f32 %v623_v58, %v752_v0  ;;  %v630_v12 = vunpack.c.l.bf16 %v678_v59  ;;  %v631_v13 = vunpack.c.h.bf16 %v678_v59  ;;  %v393_v59 = vld [vmem:[%s759_s26 + $0x88] sm:$0xff] }
  0x1d   : > { %491 = vst.msk [vmem:[%s797_s5 + $0x30] sm:$0xff] %vm484_vm0, %v454_v60  ;;  %492 = vst.msk [vmem:[%s797_s5 + $0x38] sm:$0xff] %vm484_vm0, %v455_v61  ;;  %v309_v10 = vmul.f32 %v626_v62, %v752_v0  ;;  %v310_v11 = vmul.f32 %v627_v63, %v752_v0  ;;  %v348_v14 = vadd.f32 %v767_v8, %v305_v1  ;;  %v634_v45 = vunpack.c.l.bf16 %v679_v34  ;;  %v394_v60 = vld [vmem:[%s759_s26 + $0x90] sm:$0xff]  ;;  %v395_v61 = vld [vmem:[%s759_s26 + $0x98] sm:$0xff] }
  0x1e   : > { %v349_v15 = vadd.f32 %v767_v8, %v306_v3  ;;  %v350_v16 = vadd.f32 %v767_v8, %v307_v4  ;;  %v351_v17 = vadd.f32 %v767_v8, %v308_v5  ;;  %v311_v22 = vmul.f32 %v630_v12, %v752_v0 }
  0x1f   : > { %v352_v20 = vadd.f32 %v767_v8, %v309_v10  ;;  %v353_v21 = vadd.f32 %v767_v8, %v310_v11  ;;  %v312_v23 = vmul.f32 %v631_v13, %v752_v0  ;;  %v420_v24 = vadd.f32 %v384_v2, %v348_v14 }
  0x20   : > { %v421_v25 = vadd.f32 %v385_v6, %v349_v15  ;;  %v422_v26 = vadd.f32 %v386_v7, %v350_v16  ;;  %v423_v27 = vadd.f32 %v387_v9, %v351_v17  ;;  %v354_v32 = vadd.f32 %v767_v8, %v311_v22  ;;  %v396_v7 = vld [vmem:[%s759_s26 + $0xa0] sm:$0xff]  ;;  %v397_v9 = vld [vmem:[%s759_s26 + $0xa8] sm:$0xff] }
  0x21   : > { %v424_v30 = vadd.f32 %v388_v18, %v352_v20  ;;  %v425_v31 = vadd.f32 %v389_v19, %v353_v21  ;;  %v355_v33 = vadd.f32 %v767_v8, %v312_v23  ;;  %v456_v36 = vmax.f32 %v420_v24, 0.0  ;;  %v398_v18 = vld [vmem:[%s759_s26 + $0xb0] sm:$0xff]  ;;  %v399_v19 = vld [vmem:[%s759_s26 + $0xb8] sm:$0xff]  ;;  %v683_v24 = vld [vmem:[%s747_s21 + $0x60] sm:$0xff]  }
  0x22   : > { %v457_v37 = vmax.f32 %v421_v25, 0.0  ;;  %v458_v38 = vmax.f32 %v422_v26, 0.0  ;;  %v459_v39 = vmax.f32 %v423_v27, 0.0  ;;  %v426_v43 = vadd.f32 %v390_v28, %v354_v32  ;;  %v684_v25 = vld [vmem:[%s747_s21 + $0x68] sm:$0xff]  }
  0x23   : > { %v460_v41 = vmax.f32 %v424_v30, 0.0  ;;  %v461_v42 = vmax.f32 %v425_v31, 0.0  ;;  %v427_v44 = vadd.f32 %v391_v29, %v355_v33  ;;  %493 = vst.msk [vmem:[%s797_s5 + $0x40] sm:$0xff] %vm484_vm0, %v456_v36  ;;  %v635_v46 = vunpack.c.h.bf16 %v679_v34  ;;  %v685_v30 = vld [vmem:[%s747_s21 + $0x70] sm:$0xff]  }
  0x24   : > { %494 = vst.msk [vmem:[%s797_s5 + $0x48] sm:$0xff] %vm484_vm0, %v457_v37  ;;  %495 = vst.msk [vmem:[%s797_s5 + $0x50] sm:$0xff] %vm484_vm0, %v458_v38  ;;  %v638_v47 = vunpack.c.l.bf16 %v680_v35  ;;  %v639_v48 = vunpack.c.h.bf16 %v680_v35  ;;  %v462_v50 = vmax.f32 %v426_v43, 0.0  ;;  %v642_v52 = vunpack.c.l.bf16 %v681_v40 }
  0x25   : > { %496 = vst.msk [vmem:[%s797_s5 + $0x58] sm:$0xff] %vm484_vm0, %v459_v39  ;;  %497 = vst.msk [vmem:[%s797_s5 + $0x60] sm:$0xff] %vm484_vm0, %v460_v41  ;;  %v463_v51 = vmax.f32 %v427_v44, 0.0  ;;  %v643_v53 = vunpack.c.h.bf16 %v681_v40  ;;  %v313_v54 = vmul.f32 %v634_v45, %v752_v0  ;;  %v314_v56 = vmul.f32 %v635_v46, %v752_v0  ;;  %v686_v39 = vld [vmem:[%s747_s21 + $0x78] sm:$0xff]   ;;  %v400_v45 = vld [vmem:[%s759_s26 + $0xc0] sm:$0xff] }
  0x26   : > { %498 = vst.msk [vmem:[%s797_s5 + $0x68] sm:$0xff] %vm484_vm0, %v461_v42  ;;  %v315_v57 = vmul.f32 %v638_v47, %v752_v0  ;;  %v316_v58 = vmul.f32 %v639_v48, %v752_v0  ;;  %499 = vst.msk [vmem:[%s797_s5 + $0x70] sm:$0xff] %vm484_vm0, %v462_v50  ;;  %v317_v62 = vmul.f32 %v642_v52, %v752_v0  ;;  %v646_v1 = vunpack.c.l.bf16 %v682_v49  ;;  %v402_v50 = vld [vmem:[%s759_s26 + $0xd0] sm:$0xff] }
  0x27   : > { %500 = vst.msk [vmem:[%s797_s5 + $0x78] sm:$0xff] %vm484_vm0, %v463_v51  ;;  %v318_v63 = vmul.f32 %v643_v53, %v752_v0  ;;  %v647_v2 = vunpack.c.h.bf16 %v682_v49  ;;  %v356_v3 = vadd.f32 %v767_v8, %v313_v54  ;;  %v357_v4 = vadd.f32 %v767_v8, %v314_v56  ;;  %v401_v49 = vld [vmem:[%s759_s26 + $0xc8] sm:$0xff]  ;;  %v403_v51 = vld [vmem:[%s759_s26 + $0xd8] sm:$0xff] }
  0x28   : > { %v358_v5 = vadd.f32 %v767_v8, %v315_v57  ;;  %v359_v6 = vadd.f32 %v767_v8, %v316_v58  ;;  %v360_v10 = vadd.f32 %v767_v8, %v317_v62  ;;  %v319_v12 = vmul.f32 %v646_v1, %v752_v0 }
  0x29   : > { %v361_v11 = vadd.f32 %v767_v8, %v318_v63  ;;  %v320_v13 = vmul.f32 %v647_v2, %v752_v0  ;;  %v428_v14 = vadd.f32 %v392_v55, %v356_v3  ;;  %v429_v15 = vadd.f32 %v393_v59, %v357_v4 }
  0x2a   : > { %v430_v16 = vadd.f32 %v394_v60, %v358_v5  ;;  %v431_v17 = vadd.f32 %v395_v61, %v359_v6  ;;  %v432_v20 = vadd.f32 %v396_v7, %v360_v10  ;;  %v362_v22 = vadd.f32 %v767_v8, %v319_v12  ;;  %v404_v60 = vld [vmem:[%s759_s26 + $0xe0] sm:$0xff]  ;;  %v405_v61 = vld [vmem:[%s759_s26 + $0xe8] sm:$0xff]  ;;  %v406_v7 = vld [vmem:[%s759_s26 + $0xf0] sm:$0xff] }
  0x2b   : > { %v433_v21 = vadd.f32 %v397_v9, %v361_v11  ;;  %v363_v23 = vadd.f32 %v767_v8, %v320_v13  ;;  %v464_v26 = vmax.f32 %v428_v14, 0.0  ;;  %v465_v27 = vmax.f32 %v429_v15, 0.0  ;;  %v407_v9 = vld [vmem:[%s759_s26 + $0xf8] sm:$0xff]  ;;  %v687_v14 = vld [vmem:[%s747_s21 + $0x80] sm:$0xff]   ;;  %v688_v15 = vld [vmem:[%s747_s21 + $0x88] sm:$0xff]  }
  0x2c   : > { %v466_v28 = vmax.f32 %v430_v16, 0.0  ;;  %v467_v29 = vmax.f32 %v431_v17, 0.0  ;;  %v468_v31 = vmax.f32 %v432_v20, 0.0  ;;  %v434_v33 = vadd.f32 %v398_v18, %v362_v22 }
  0x2d   : > { %v469_v32 = vmax.f32 %v433_v21, 0.0  ;;  %v435_v34 = vadd.f32 %v399_v19, %v363_v23  ;;  %501 = vst.msk [vmem:[%s797_s5 + $0x80] sm:$0xff] %vm484_vm0, %v464_v26  ;;  %502 = vst.msk [vmem:[%s797_s5 + $0x88] sm:$0xff] %vm484_vm0, %v465_v27  ;;  %v650_v35 = vunpack.c.l.bf16 %v683_v24  ;;  %v651_v36 = vunpack.c.h.bf16 %v683_v24 }
  0x2e   : > { %503 = vst.msk [vmem:[%s797_s5 + $0x90] sm:$0xff] %vm484_vm0, %v466_v28  ;;  %504 = vst.msk [vmem:[%s797_s5 + $0x98] sm:$0xff] %vm484_vm0, %v467_v29  ;;  %v654_v37 = vunpack.c.l.bf16 %v684_v25  ;;  %v655_v38 = vunpack.c.h.bf16 %v684_v25  ;;  %v470_v40 = vmax.f32 %v434_v33, 0.0  ;;  %v658_v42 = vunpack.c.l.bf16 %v685_v30 }
  0x2f   : > { %505 = vst.msk [vmem:[%s797_s5 + $0xa0] sm:$0xff] %vm484_vm0, %v468_v31  ;;  %506 = vst.msk [vmem:[%s797_s5 + $0xa8] sm:$0xff] %vm484_vm0, %v469_v32  ;;  %v471_v41 = vmax.f32 %v435_v34, 0.0  ;;  %v659_v43 = vunpack.c.h.bf16 %v685_v30  ;;  %v321_v44 = vmul.f32 %v650_v35, %v752_v0  ;;  %v322_v46 = vmul.f32 %v651_v36, %v752_v0  ;;  %v408_v31 = vld [vmem:[%s759_s26 + $0x100] sm:$0xff]  ;;  %v409_v35 = vld [vmem:[%s759_s26 + $0x108] sm:$0xff] }
  0x30   : > { %v323_v47 = vmul.f32 %v654_v37, %v752_v0  ;;  %v324_v48 = vmul.f32 %v655_v38, %v752_v0  ;;  %507 = vst.msk [vmem:[%s797_s5 + $0xb0] sm:$0xff] %vm484_vm0, %v470_v40  ;;  %v325_v52 = vmul.f32 %v658_v42, %v752_v0  ;;  %v662_v54 = vunpack.c.l.bf16 %v686_v39  ;;  %v410_v36 = vld [vmem:[%s759_s26 + $0x110] sm:$0xff]  ;;  %v411_v37 = vld [vmem:[%s759_s26 + $0x118] sm:$0xff] }
  0x31   : > { %508 = vst.msk [vmem:[%s797_s5 + $0xb8] sm:$0xff] %vm484_vm0, %v471_v41  ;;  %v326_v53 = vmul.f32 %v659_v43, %v752_v0  ;;  %v663_v55 = vunpack.c.h.bf16 %v686_v39  ;;  %v364_v56 = vadd.f32 %v767_v8, %v321_v44  ;;  %v365_v57 = vadd.f32 %v767_v8, %v322_v46 }
  0x32   : > { %v366_v58 = vadd.f32 %v767_v8, %v323_v47  ;;  %v367_v59 = vadd.f32 %v767_v8, %v324_v48  ;;  %v368_v62 = vadd.f32 %v767_v8, %v325_v52  ;;  %v327_v1 = vmul.f32 %v662_v54, %v752_v0 }
  0x33   : > { %v369_v63 = vadd.f32 %v767_v8, %v326_v53  ;;  %v328_v2 = vmul.f32 %v663_v55, %v752_v0  ;;  %v436_v3 = vadd.f32 %v400_v45, %v364_v56  ;;  %v437_v4 = vadd.f32 %v401_v49, %v365_v57 }
  0x34   : > { %v438_v5 = vadd.f32 %v402_v50, %v366_v58  ;;  %v439_v6 = vadd.f32 %v403_v51, %v367_v59  ;;  %v440_v10 = vadd.f32 %v404_v60, %v368_v62  ;;  %v370_v12 = vadd.f32 %v767_v8, %v327_v1 }
  0x35   : > { %v441_v11 = vadd.f32 %v405_v61, %v369_v63  ;;  %v371_v13 = vadd.f32 %v767_v8, %v328_v2  ;;  %v472_v16 = vmax.f32 %v436_v3, 0.0  ;;  %v473_v17 = vmax.f32 %v437_v4, 0.0 }
  0x36   : > { %v474_v18 = vmax.f32 %v438_v5, 0.0  ;;  %v475_v19 = vmax.f32 %v439_v6, 0.0  ;;  %v476_v20 = vmax.f32 %v440_v10, 0.0  ;;  %v442_v22 = vadd.f32 %v406_v7, %v370_v12 }
  0x37   : > { %v477_v21 = vmax.f32 %v441_v11, 0.0  ;;  %v443_v23 = vadd.f32 %v407_v9, %v371_v13  ;;  %509 = vst.msk [vmem:[%s797_s5 + $0xc0] sm:$0xff] %vm484_vm0, %v472_v16  ;;  %510 = vst.msk [vmem:[%s797_s5 + $0xc8] sm:$0xff] %vm484_vm0, %v473_v17  ;;  %v666_v24 = vunpack.c.l.bf16 %v687_v14  ;;  %v667_v25 = vunpack.c.h.bf16 %v687_v14 }
  0x38   : > { %511 = vst.msk [vmem:[%s797_s5 + $0xd0] sm:$0xff] %vm484_vm0, %v474_v18  ;;  %512 = vst.msk [vmem:[%s797_s5 + $0xd8] sm:$0xff] %vm484_vm0, %v475_v19  ;;  %v670_v26 = vunpack.c.l.bf16 %v688_v15  ;;  %v671_v27 = vunpack.c.h.bf16 %v688_v15  ;;  %v478_v28 = vmax.f32 %v442_v22, 0.0 }
  0x39   : > { %513 = vst.msk [vmem:[%s797_s5 + $0xe0] sm:$0xff] %vm484_vm0, %v476_v20  ;;  %514 = vst.msk [vmem:[%s797_s5 + $0xe8] sm:$0xff] %vm484_vm0, %v477_v21  ;;  %v479_v29 = vmax.f32 %v443_v23, 0.0  ;;  %v329_v30 = vmul.f32 %v666_v24, %v752_v0  ;;  %v330_v32 = vmul.f32 %v667_v25, %v752_v0 }
  0x3a   : > { %v331_v33 = vmul.f32 %v670_v26, %v752_v0  ;;  %v332_v34 = vmul.f32 %v671_v27, %v752_v0  ;;  %515 = vst.msk [vmem:[%s797_s5 + $0xf0] sm:$0xff] %vm484_vm0, %v478_v28 }
  0x3b   : > { %516 = vst.msk [vmem:[%s797_s5 + $0xf8] sm:$0xff] %vm484_vm0, %v479_v29  ;;  %v372_v38 = vadd.f32 %v767_v8, %v329_v30  ;;  %v373_v39 = vadd.f32 %v767_v8, %v330_v32 }
  0x3c   : > { %v374_v40 = vadd.f32 %v767_v8, %v331_v33  ;;  %v375_v41 = vadd.f32 %v767_v8, %v332_v34 }
  0x3d   : > { %v444_v0 = vadd.f32 %v408_v31, %v372_v38  ;;  %v445_v42 = vadd.f32 %v409_v35, %v373_v39 }
  0x3e   : > { %v446_v43 = vadd.f32 %v410_v36, %v374_v40  ;;  %v447_v44 = vadd.f32 %v411_v37, %v375_v41 }
  0x3f   : > { %v480_v45 = vmax.f32 %v444_v0, 0.0  ;;  %v481_v46 = vmax.f32 %v445_v42, 0.0 }
  0x40   : > { %v482_v47 = vmax.f32 %v446_v43, 0.0  ;;  %v483_v48 = vmax.f32 %v447_v44, 0.0 }
  0x41   : > { %517 = vst.msk [vmem:[%s797_s5 + $0x100] sm:$0xff] %vm484_vm0, %v480_v45  ;;  %518 = vst.msk [vmem:[%s797_s5 + $0x108] sm:$0xff] %vm484_vm0, %v481_v46 }
  0x42   : > { %519 = vst.msk [vmem:[%s797_s5 + $0x110] sm:$0xff] %vm484_vm0, %v482_v47  ;;  %520 = vst.msk [vmem:[%s797_s5 + $0x118] sm:$0xff] %vm484_vm0, %v483_v48 }
  0x43 PF: > { %s14_s15 = sadd.s32 1, %s705_s15  }
  0x44   : > { %p11_p4 = scmp.ge.s32.totalorder %s14_s15, 4  }
  0x46   :  { %13 = sbr.rel (!%p11_p4) target bundleno = 1 (0x1), region = 69 }

// kernel: basic_block_forward.3
= control target key start
LH: loop header
LB: loop body
LE: loop exit
PB: predicated region body
PF: predicated region fallthrough
CT: control target
= control target key end

     0   :  { %s4275_s12 = smov 0   ;;  %s6938_s0 = inlined_call_operand.vmem [shape: bf16[2,326,8], index: 0, kind: input, shape index: {}]   ;;  %s6939_s1 = inlined_call_operand.vmem [shape: bf16[72,8], index: 1, kind: input, shape index: {}]   ;;  %s6940_s2 = inlined_call_operand.vmem [shape: bf16[2,331,8], index: 2, kind: output, shape index: {0}]   ;;  %s6941_s3 = inlined_call_operand.vmem [shape: f32[2,2,8], index: 3, kind: output, shape index: {1}]  }
   0x1 LB: > { %s3100_s13 = sadd.s32 4294967295, %s4244_s12   ;;  %p3104_p0 = scmp.ge.s32.totalorder %s4244_s12, 1  ;;  %s4244_s12 = sphi %s4275_s12, %s14_s12  }
   0x2   : > { %p140_p1 = scmp.lt.s32.totalorder %s4244_s12, 3 }
   0x4   : > { %p141_p2 = pnand %p3104_p0, %p140_p1 }
   0x6   : > { %144 = sbr.rel (%p141_p2) target bundleno = 659 (0x293), region = 28 }
   0xb   : > { %p168_p3 = scmp.lt.s32.totalorder %s3100_s13, 1  ;;  %vm311_vm0 = vcmask 1046528   ;;  %s4246_s18 = smov 8   ;;  %vm493_vm1 = vcmask 1045504   ;;  %vm789_vm2 = vcmask 1044480   ;;  %vm971_vm3 = vcmask 1043456  }
   0xc   : > { %s4247_s19 = smov 16   ;;  %s4248_s20 = smov 24   ;;  %vm1267_vm4 = vcmask 1042432   ;;  %vm1449_vm5 = vcmask 1041408   ;;  %vm1631_vm6 = vcmask 64512   ;;  %vm1668_vm7 = vcmask 130048  }
   0xd   : > { %s7395_s13 = smov (!%p168_p3, %s3100_s13), 1  ;;  %s4249_s23 = smov 32   ;;  %vm1705_vm8 = vcmask 195584   ;;  %vm1742_vm9 = vcmask 261120   ;;  %vm1779_vm10 = vcmask 326656   ;;  %vm1816_vm11 = vcmask 392192  }
   0xe   : > { %s3421_s14 = smul.u32 164, %s7395_s13  ;;  %s4250_s24 = smov 40   ;;  %vm1853_vm12 = vcmask 457728   ;;  %vm1890_vm13 = vcmask 523264   ;;  %vm1972_vm14 = vcmask 588800  }
   0xf   : > { %s4251_s25 = smov 48   ;;  %s4252_s26 = smov 56  }
  0x10   : > { %s4289_s17 = scalar_lea.vmem %s6938_s0, %s3421_s14  ;;  %s4253_s27 = smov 64  }
  0x11   : > { %v3322_v0 = vld [vmem:[%s4289_s17 + $0x10] sm:$0xff]   ;;  %v3323_v1 = vld [vmem:[%s4289_s17 + $0x18] sm:$0xff]   ;;  %v3242_v2 = vld [vmem:[%s4289_s17] sm:$0xff]   ;;  %s3422_s9 = smul.u32 168, %s7395_s13  ;;  %s3107_s15 = sshll.u32 %s7395_s13, 1 }
  0x12   : > { %v4294_v3 = vunpack.c.l.bf16 %v3322_v0  ;;  %v4296_v4 = vunpack.c.h.bf16 %v3322_v0  ;;  %v4298_v5 = vunpack.c.l.bf16 %v3323_v1  ;;  %v4300_v6 = vunpack.c.h.bf16 %v3323_v1  ;;  %v3321_v7 = vld [vmem:[%s4289_s17 + $0x8] sm:$0xff]   ;;  %v3324_v8 = vld [vmem:[%s4289_s17 + $0x20] sm:$0xff]   ;;  %v3326_v30 = vld [vmem:[%s4289_s17 + $0x30] sm:$0xff]  }
  0x13   : > { %v4304_v9 = vunpack.c.l.bf16 %v3242_v2  ;;  %v4306_v10 = vunpack.c.h.bf16 %v3242_v2  ;;  %v4308_v11 = vunpack.c.l.bf16 %v3321_v7  ;;  %v4310_v12 = vunpack.c.h.bf16 %v3321_v7  ;;  %v3325_v25 = vld [vmem:[%s4289_s17 + $0x28] sm:$0xff]   ;;  %v3327_v31 = vld [vmem:[%s4289_s17 + $0x38] sm:$0xff]   ;;  %v3328_v36 = vld [vmem:[%s4289_s17 + $0x40] sm:$0xff]   ;;  %s6430_s14 = scalar_lea.vmem %s6940_s2, %s3422_s9 }
  0x14   : > { %7043 = vst [vmem:[#allocation2_spill] sm:$0xff] %v4298_v5  ;;  %v319_v13 = vrot.slane %v4294_v3, 1  ;;  %v321_v14 = vrot.slane %v4296_v4, 1  ;;  %v323_v15 = vrot.slane %v4298_v5, 1  ;;  %v4315_v16 = vunpack.c.l.bf16 %v3324_v8  ;;  %v3329_v45 = vld [vmem:[%s4289_s17 + $0x48] sm:$0xff]   ;;  %v3330_v58 = vld [vmem:[%s4289_s17 + $0x50] sm:$0xff]  }
  0x15   : > { %7044 = vst [vmem:[#allocation3_spill] sm:$0xff] %v4304_v9  ;;  %7045 = vst [vmem:[#allocation4_spill] sm:$0xff] %v4308_v11  ;;  %v312_v17 = vrot.slane %v4304_v9, 1  ;;  %v313_v18 = vrot.slane %v4306_v10, 1  ;;  %v315_v19 = vrot.slane %v4308_v11, 1  ;;  %v325_v20 = vrot.slane %v4300_v6, 1 }
  0x16   : > { %7046 = vst [vmem:[#allocation5_spill] sm:$0xff] %v4310_v12  ;;  %7047 = vst [vmem:[#allocation6_spill] sm:$0xff] %v4315_v16  ;;  %v322_v21 = vsel %vm311_vm0, %v319_v13, %v321_v14  ;;  %v324_v22 = vsel %vm311_vm0, %v321_v14, %v323_v15  ;;  %v327_v23 = vrot.slane %v4315_v16, 1  ;;  %v317_v24 = vrot.slane %v4310_v12, 1  ;;  %v3331_v63 = vld [vmem:[%s4289_s17 + $0x58] sm:$0xff]  }
  0x17   : > { %v3522_v26 = vpack.i.bf16 %v324_v22, %v322_v21  ;;  %v314_v27 = vsel %vm311_vm0, %v312_v17, %v313_v18  ;;  %v316_v28 = vsel %vm311_vm0, %v313_v18, %v315_v19  ;;  %v326_v29 = vsel %vm311_vm0, %v323_v15, %v325_v20  ;;  %v3333_v18 = vld [vmem:[%s4289_s17 + $0x68] sm:$0xff]  }
  0x18   : > { %v3512_v32 = vpack.i.bf16 %v316_v28, %v314_v27  ;;  %v328_v33 = vsel %vm311_vm0, %v325_v20, %v327_v23  ;;  %v318_v34 = vsel %vm311_vm0, %v315_v19, %v317_v24  ;;  %v320_v35 = vsel %vm311_vm0, %v317_v24, %v319_v13 }
  0x19   : > { %3523 = vrot.lane.b32.xlu1 %v3522_v26, %s4246_s18  ;;  %v3527_v37 = vpack.i.bf16 %v328_v33, %v326_v29  ;;  %v3517_v38 = vpack.i.bf16 %v320_v35, %v318_v34  ;;  %v4336_v39 = vunpack.c.l.bf16 %v3325_v25  ;;  %v4338_v40 = vunpack.c.h.bf16 %v3325_v25  ;;  %v3334_v35 = vld [vmem:[%s4289_s17 + $0x70] sm:$0xff]  }
  0x1a   : > { %3513 = vrot.lane.b32.xlu0 %v3512_v32, %s4246_s18  ;;  %v4341_v41 = vunpack.c.l.bf16 %v3326_v30  ;;  %v4343_v42 = vunpack.c.h.bf16 %v3324_v8  ;;  %v4345_v43 = vunpack.c.l.bf16 %v3327_v31  ;;  %v4347_v44 = vunpack.c.h.bf16 %v3327_v31  ;;  %v3332_v8 = vld [vmem:[%s4289_s17 + $0x60] sm:$0xff]  }
  0x1b   : > { %7048 = vst [vmem:[#allocation7_spill] sm:$0xff] %v4336_v39  ;;  %7049 = vst [vmem:[#allocation8_spill] sm:$0xff] %v4338_v40  ;;  %v331_v46 = vrot.slane %v4336_v39, 1  ;;  %v333_v47 = vrot.slane %v4338_v40, 1  ;;  %v4352_v48 = vunpack.c.l.bf16 %v3328_v36  ;;  %v4354_v49 = vunpack.c.h.bf16 %v3326_v30 }
  0x1c   : > { %7050 = vst [vmem:[#allocation9_spill] sm:$0xff] %v4341_v41  ;;  %7051 = vst [vmem:[#allocation10_spill] sm:$0xff] %v4343_v42  ;;  %v335_v50 = vrot.slane %v4341_v41, 1  ;;  %v329_v51 = vrot.slane %v4343_v42, 1  ;;  %v339_v52 = vrot.slane %v4345_v43, 1  ;;  %v341_v53 = vrot.slane %v4347_v44, 1 }
  0x1d   : > { %7052 = vst [vmem:[#allocation11_spill] sm:$0xff] %v4345_v43  ;;  %7053 = vst [vmem:[#allocation12_spill] sm:$0xff] %v4347_v44  ;;  %3528 = vrot.lane.b32.xlu1 %v3527_v37, %s4246_s18  ;;  %v334_v54 = vsel %vm311_vm0, %v331_v46, %v333_v47  ;;  %v343_v55 = vrot.slane %v4352_v48, 1  ;;  %v337_v56 = vrot.slane %v4354_v49, 1  ;;  %v4364_v57 = vunpack.c.l.bf16 %v3329_v45 }
  0x1e   : > { %7054 = vst [vmem:[#allocation13_spill] sm:$0xff] %v4352_v48  ;;  %7055 = vst [vmem:[#allocation14_spill] sm:$0xff] %v4354_v49  ;;  %3518 = vrot.lane.b32.xlu0 %v3517_v38, %s4246_s18  ;;  %v336_v59 = vsel %vm311_vm0, %v333_v47, %v335_v50  ;;  %v330_v60 = vsel %vm311_vm0, %v327_v23, %v329_v51  ;;  %v332_v61 = vsel %vm311_vm0, %v329_v51, %v331_v46 }
  0x1f   : > { %v342_v62 = vsel %vm311_vm0, %v339_v52, %v341_v53  ;;  %v3537_v0 = vpack.i.bf16 %v336_v59, %v334_v54  ;;  %v3532_v1 = vpack.i.bf16 %v332_v61, %v330_v60  ;;  %v344_v2 = vsel %vm311_vm0, %v341_v53, %v343_v55  ;;  %v3336_v53 = vld [vmem:[%s4289_s17 + $0x80] sm:$0xff]   ;;  %v3337_v59 = vld [vmem:[%s4289_s17 + $0x88] sm:$0xff]  }
  0x20   : > { %v338_v7 = vsel %vm311_vm0, %v335_v50, %v337_v56  ;;  %v3547_v13 = vpack.i.bf16 %v344_v2, %v342_v62  ;;  %v340_v14 = vsel %vm311_vm0, %v337_v56, %v339_v52  ;;  %v4377_v15 = vunpack.c.h.bf16 %v3329_v45  ;;  %v3335_v52 = vld [vmem:[%s4289_s17 + $0x78] sm:$0xff]  }
  0x21   : > { %v4379_v17 = vunpack.c.l.bf16 %v3330_v58  ;;  %3538 = vrot.lane.b32.xlu1 %v3537_v0, %s4246_s18  ;;  %v3542_v19 = vpack.i.bf16 %v340_v14, %v338_v7  ;;  %v347_v20 = vrot.slane %v4364_v57, 1  ;;  %v4384_v21 = vunpack.c.h.bf16 %v3328_v36 }
  0x22   : > { %v4386_v22 = vunpack.c.l.bf16 %v3331_v63  ;;  %3533 = vrot.lane.b32.xlu0 %v3532_v1, %s4246_s18  ;;  %v349_v23 = vrot.slane %v4377_v15, 1  ;;  %v4391_v25 = vunpack.c.h.bf16 %v3331_v63  ;;  %v4393_v26 = vunpack.c.l.bf16 %v3332_v8 }
  0x23   : > { %7056 = vst [vmem:[#allocation15_spill] sm:$0xff] %v4384_v21  ;;  %v351_v24 = vrot.slane %v4379_v17, 1  ;;  %v345_v27 = vrot.slane %v4384_v21, 1  ;;  %v4397_v29 = vunpack.c.h.bf16 %v3330_v58  ;;  %v4399_v30 = vunpack.c.l.bf16 %v3333_v18 }
  0x24   : > { %v355_v28 = vrot.slane %v4386_v22, 1  ;;  %v350_v31 = vsel %vm311_vm0, %v347_v20, %v349_v23  ;;  %v357_v33 = vrot.slane %v4391_v25, 1  ;;  %v359_v34 = vrot.slane %v4393_v26, 1 }
  0x25   : > { %v352_v32 = vsel %vm311_vm0, %v349_v23, %v351_v24  ;;  %3548 = vrot.lane.b32.xlu1 %v3547_v13, %s4246_s18  ;;  %v346_v37 = vsel %vm311_vm0, %v343_v55, %v345_v27  ;;  %v348_v38 = vsel %vm311_vm0, %v345_v27, %v347_v20  ;;  %v353_v45 = vrot.slane %v4397_v29, 1  ;;  %v4446_v27 = vld [vmem:[%s4289_s17 + $0x90] sm:$0xff]  }
  0x26   : > { %v3557_v36 = vpack.i.bf16 %v352_v32, %v350_v31  ;;  %3543 = vrot.lane.b32.xlu0 %v3542_v19, %s4246_s18  ;;  %v3552_v46 = vpack.i.bf16 %v348_v38, %v346_v37  ;;  %v358_v47 = vsel %vm311_vm0, %v355_v28, %v357_v33  ;;  %v360_v50 = vsel %vm311_vm0, %v357_v33, %v359_v34 }
  0x27   : > { %v4413_v51 = vunpack.c.h.bf16 %v3333_v18  ;;  %v3567_v54 = vpack.i.bf16 %v360_v50, %v358_v47  ;;  %v354_v56 = vsel %vm311_vm0, %v351_v24, %v353_v45  ;;  %v356_v55 = vsel %vm311_vm0, %v353_v45, %v355_v28 }
  0x28   : > { %v4419_v58 = vunpack.c.l.bf16 %v3334_v35  ;;  %v3562_v60 = vpack.i.bf16 %v356_v55, %v354_v56  ;;  %v363_v61 = vrot.slane %v4399_v30, 1  ;;  %v4424_v63 = vunpack.c.h.bf16 %v3332_v8 }
  0x29   : > { %v365_v62 = vrot.slane %v4413_v51, 1  ;;  %3558 = vrot.lane.b32.xlu1 %v3557_v36, %s4246_s18  ;;  %v4428_v1 = vunpack.c.l.bf16 %v3335_v52  ;;  %v4430_v2 = vunpack.c.h.bf16 %v3335_v52  ;;  %v4432_v7 = vunpack.c.l.bf16 %v3336_v53 }
  0x2a   : > { %v367_v0 = vrot.slane %v4419_v58, 1  ;;  %3553 = vrot.lane.b32.xlu0 %v3552_v46, %s4246_s18  ;;  %v361_v14 = vrot.slane %v4424_v63, 1  ;;  %v4437_v18 = vunpack.c.h.bf16 %v3334_v35  ;;  %v4439_v8 = vunpack.c.l.bf16 %v3337_v59 }
  0x2b   : > { %7057 = vst [vmem:[#allocation16_spill] sm:$0xff] %v4428_v1  ;;  %7058 = vst [vmem:[#allocation17_spill] sm:$0xff] %v4430_v2  ;;  %v366_v13 = vsel %vm311_vm0, %v363_v61, %v365_v62  ;;  %v371_v20 = vrot.slane %v4428_v1, 1  ;;  %v373_v23 = vrot.slane %v4430_v2, 1  ;;  %v375_v24 = vrot.slane %v4432_v7, 1 }
  0x2c   : > { %7059 = vst [vmem:[#allocation18_spill] sm:$0xff] %v4432_v7  ;;  %7060 = vst [vmem:[#allocation19_spill] sm:$0xff] %v4439_v8  ;;  %v368_v19 = vsel %vm311_vm0, %v365_v62, %v367_v0  ;;  %v362_v28 = vsel %vm311_vm0, %v359_v34, %v361_v14  ;;  %v364_v31 = vsel %vm311_vm0, %v361_v14, %v363_v61  ;;  %v369_v32 = vrot.slane %v4437_v18, 1 }
  0x2d   : > { %3568 = vrot.lane.b32.xlu1 %v3567_v54, %s4246_s18  ;;  %v3577_v33 = vpack.i.bf16 %v368_v19, %v366_v13  ;;  %v3572_v35 = vpack.i.bf16 %v364_v31, %v362_v28  ;;  %v4452_v36 = vunpack.c.h.bf16 %v3337_v59  ;;  %v374_v37 = vsel %vm311_vm0, %v371_v20, %v373_v23 }
  0x2e   : > { %3563 = vrot.lane.b32.xlu0 %v3562_v60, %s4246_s18  ;;  %v376_v38 = vsel %vm311_vm0, %v373_v23, %v375_v24  ;;  %v370_v45 = vsel %vm311_vm0, %v367_v0, %v369_v32  ;;  %v4459_v34 = vunpack.c.l.bf16 %v4446_v27  ;;  %v372_v46 = vsel %vm311_vm0, %v369_v32, %v371_v20 }
  0x2f   : > { %7061 = vst [vmem:[#allocation20_spill] sm:$0xff] %v4452_v36  ;;  %v379_v47 = vrot.slane %v4439_v8, 1  ;;  %v381_v50 = vrot.slane %v4452_v36, 1  ;;  %v4464_v52 = vunpack.c.h.bf16 %v3336_v53  ;;  %v497_v56 = vrot.slane %v4308_v11, 2 }
  0x30   : > { %7062 = vst [vmem:[#allocation21_spill] sm:$0xff] %v4459_v34  ;;  %v383_v54 = vrot.slane %v4459_v34, 1  ;;  %v499_v55 = vrot.slane %v4310_v12, 2  ;;  %v501_v59 = vrot.slane %v4294_v3, 2  ;;  %v3587_v60 = vpack.i.bf16 %v376_v38, %v374_v37 }
  0x31   : > { %7063 = vst [vmem:[#allocation22_spill] sm:$0xff] %v4464_v52  ;;  %3578 = vrot.lane.b32.xlu1 %v3577_v33, %s4246_s18  ;;  %v377_v61 = vrot.slane %v4464_v52, 1  ;;  %v3582_v62 = vpack.i.bf16 %v372_v46, %v370_v45  ;;  %v382_v53 = vsel %vm311_vm0, %v379_v47, %v381_v50  ;;  %v494_v19 = vrot.slane %v4304_v9, 2 }
  0x32   : > { %3573 = vrot.lane.b32.xlu0 %v3572_v35, %s4246_s18  ;;  %v384_v0 = vsel %vm311_vm0, %v381_v50, %v383_v54  ;;  %v495_v20 = vrot.slane %v4306_v10, 2  ;;  %v500_v23 = vsel %vm493_vm1, %v497_v56, %v499_v55  ;;  %v502_v28 = vsel %vm493_vm1, %v499_v55, %v501_v59 }
  0x33   : > { %v378_v13 = vsel %vm311_vm0, %v375_v24, %v377_v61  ;;  %v380_v14 = vsel %vm311_vm0, %v377_v61, %v379_v47  ;;  %v3597_v31 = vpack.i.bf16 %v384_v0, %v382_v53  ;;  %v505_v32 = vrot.slane %v4298_v5, 2 }
  0x34   : > { %v507_v33 = vrot.slane %v4300_v6, 2  ;;  %v509_v35 = vrot.slane %v4315_v16, 2  ;;  %v3592_v24 = vpack.i.bf16 %v380_v14, %v378_v13  ;;  %v496_v37 = vsel %vm493_vm1, %v494_v19, %v495_v20 }
  0x35   : > { %3588 = vrot.lane.b32.xlu1 %v3587_v60, %s4246_s18  ;;  %v498_v38 = vsel %vm493_vm1, %v495_v20, %v497_v56  ;;  %v503_v45 = vrot.slane %v4296_v4, 2  ;;  %v4489_v46 = vpack.i.bf16 %v502_v28, %v500_v23  ;;  %v513_v47 = vrot.slane %v4336_v39, 2 }
  0x36   : > { %3583 = vrot.lane.b32.xlu0 %v3582_v62, %s4246_s18  ;;  %v508_v50 = vsel %vm493_vm1, %v505_v32, %v507_v33  ;;  %v510_v54 = vsel %vm493_vm1, %v507_v33, %v509_v35  ;;  %v515_v55 = vrot.slane %v4338_v40, 2  ;;  %v517_v60 = vrot.slane %v4341_v41, 2 }
  0x37   : > { %v3602_v61 = vpack.i.bf16 %v498_v38, %v496_v37  ;;  %v504_v56 = vsel %vm493_vm1, %v501_v59, %v503_v45  ;;  %v506_v62 = vsel %vm493_vm1, %v503_v45, %v505_v32  ;;  %v511_v53 = vrot.slane %v4343_v42, 2 }
  0x38   : > { %v4501_v0 = vpack.i.bf16 %v510_v54, %v508_v50  ;;  %v521_v13 = vrot.slane %v4345_v43, 2  ;;  %v516_v14 = vsel %vm493_vm1, %v513_v47, %v515_v55  ;;  %v518_v19 = vsel %vm493_vm1, %v515_v55, %v517_v60 }
  0x39   : > { %3598 = vrot.lane.b32.xlu1 %v3597_v31, %s4246_s18  ;;  %v523_v20 = vrot.slane %v4347_v44, 2  ;;  %v525_v59 = vrot.slane %v4352_v48, 2  ;;  %v4511_v23 = vpack.i.bf16 %v506_v62, %v504_v56  ;;  %v512_v28 = vsel %vm493_vm1, %v509_v35, %v511_v53 }
  0x3a   : > { %3593 = vrot.lane.b32.xlu0 %v3592_v24, %s4246_s18  ;;  %v514_v31 = vsel %vm493_vm1, %v511_v53, %v513_v47  ;;  %v519_v32 = vrot.slane %v4354_v49, 2  ;;  %v4516_v33 = vpack.i.bf16 %v518_v19, %v516_v14  ;;  %v529_v24 = vrot.slane %v4364_v57, 2  ;;  %s181_s18 = scalar_lea.vmem %s6941_s3, %s3107_s15 }
  0x3b   : > { %v531_v37 = vrot.slane %v4377_v15, 2  ;;  %v524_v38 = vsel %vm493_vm1, %v521_v13, %v523_v20  ;;  %v526_v45 = vsel %vm493_vm1, %v523_v20, %v525_v59  ;;  %v533_v50 = vrot.slane %v4379_v17, 2 }
  0x3c   : > { %v527_v35 = vrot.slane %v4384_v21, 2  ;;  %v4528_v47 = vpack.i.bf16 %v514_v31, %v512_v28  ;;  %v520_v54 = vsel %vm493_vm1, %v517_v60, %v519_v32  ;;  %v522_v55 = vsel %vm493_vm1, %v519_v32, %v521_v13 }
  0x3d   : > { %3608 = vrot.lane.b32.xlu1 %v4489_v46, %s4247_s19  ;;  %v532_v56 = vsel %vm493_vm1, %v529_v24, %v531_v37  ;;  %v537_v62 = vrot.slane %v4386_v22, 2  ;;  %v534_v53 = vsel %vm493_vm1, %v531_v37, %v533_v50  ;;  %v539_v20 = vrot.slane %v4391_v25, 2 }
  0x3e   : > { %3603 = vrot.lane.b32.xlu0 %v3602_v61, %s4247_s19  ;;  %v4532_v61 = vpack.i.bf16 %v526_v45, %v524_v38  ;;  %v528_v14 = vsel %vm493_vm1, %v525_v59, %v527_v35  ;;  %v530_v19 = vsel %vm493_vm1, %v527_v35, %v529_v24  ;;  %v3632_v60 = vpack.i.bf16 %v522_v55, %v520_v54 }
  0x3f   : > { %v541_v13 = vrot.slane %v4393_v26, 2  ;;  %v535_v28 = vrot.slane %v4397_v29, 2  ;;  %v3647_v31 = vpack.i.bf16 %v534_v53, %v532_v56  ;;  %v3642_v32 = vpack.i.bf16 %v530_v19, %v528_v14 }
  0x40   : > { %v540_v37 = vsel %vm493_vm1, %v537_v62, %v539_v20  ;;  %v545_v59 = vrot.slane %v4399_v30, 2  ;;  %v547_v24 = vrot.slane %v4413_v51, 2  ;;  %v549_v38 = vrot.slane %v4419_v58, 2 }
  0x41   : > { %3618 = vrot.lane.b32.xlu1 %v4501_v0, %s4247_s19  ;;  %v542_v45 = vsel %vm493_vm1, %v539_v20, %v541_v13  ;;  %v536_v35 = vsel %vm493_vm1, %v533_v50, %v535_v28  ;;  %v538_v54 = vsel %vm493_vm1, %v535_v28, %v537_v62  ;;  %v543_v55 = vrot.slane %v4424_v63, 2 }
  0x42   : > { %3613 = vrot.lane.b32.xlu0 %v4511_v23, %s4247_s19  ;;  %v553_v56 = vrot.slane %v4428_v1, 2  ;;  %v3657_v53 = vpack.i.bf16 %v542_v45, %v540_v37  ;;  %v3652_v14 = vpack.i.bf16 %v538_v54, %v536_v35  ;;  %v548_v19 = vsel %vm493_vm1, %v545_v59, %v547_v24 }
  0x43   : > { %v550_v9 = vsel %vm493_vm1, %v547_v24, %v549_v38  ;;  %v544_v20 = vsel %vm493_vm1, %v541_v13, %v543_v55  ;;  %v546_v50 = vsel %vm493_vm1, %v543_v55, %v545_v59  ;;  %v555_v62 = vrot.slane %v4430_v2, 2 }
  0x44   : > { %v557_v28 = vrot.slane %v4432_v7, 2  ;;  %v551_v1 = vrot.slane %v4437_v18, 2  ;;  %v3667_v37 = vpack.i.bf16 %v550_v9, %v548_v19  ;;  %v3662_v45 = vpack.i.bf16 %v546_v50, %v544_v20 }
  0x45   : > { %3628 = vrot.lane.b32.xlu1 %v4516_v33, %s4247_s19  ;;  %v561_v35 = vrot.slane %v4439_v8, 2  ;;  %v556_v24 = vsel %vm493_vm1, %v553_v56, %v555_v62  ;;  %v563_v59 = vrot.slane %v4452_v36, 2  ;;  %v565_v54 = vrot.slane %v4459_v34, 2 }
  0x46   : > { %3623 = vrot.lane.b32.xlu0 %v4528_v47, %s4247_s19  ;;  %v558_v13 = vsel %vm493_vm1, %v555_v62, %v557_v28  ;;  %v552_v55 = vsel %vm493_vm1, %v549_v38, %v551_v1  ;;  %v554_v7 = vsel %vm493_vm1, %v551_v1, %v553_v56  ;;  %v559_v2 = vrot.slane %v4464_v52, 2 }
  0x47   : > { %v3677_v9 = vpack.i.bf16 %v558_v13, %v556_v24  ;;  %v3672_v19 = vpack.i.bf16 %v554_v7, %v552_v55  ;;  %v564_v20 = vsel %vm493_vm1, %v561_v35, %v563_v59  ;;  %v566_v50 = vsel %vm493_vm1, %v563_v59, %v565_v54 }
  0x48   : > { %v560_v62 = vsel %vm493_vm1, %v557_v28, %v559_v2  ;;  %v562_v34 = vsel %vm493_vm1, %v559_v2, %v561_v35  ;;  %v3687_v1 = vpack.i.bf16 %v566_v50, %v564_v20  ;;  %v3339_v2 = vld [vmem:[%s4289_s17 + $0x98] sm:$0xff]   ;;  %v4605_v7 = vunpack.c.h.bf16 %v4446_v27 }
  0x49   : > { %3638 = vrot.lane.b32.xlu1 %v4532_v61, %s4247_s19  ;;  %v3682_v38 = vpack.i.bf16 %v562_v34, %v560_v62  ;;  %v4607_v34 = vunpack.c.l.bf16 %v3339_v2  ;;  %v797_v27 = vrot.slane %v4298_v5, 3  ;;  %v972_v56 = vrot.slane %v4308_v11, 4 }
  0x4a   : > { %3633 = vrot.lane.b32.xlu0 %v3632_v60, %s4247_s19  ;;  %7064 = vst [vmem:[#allocation23_spill] sm:$0xff] %v4605_v7  ;;  %v975_v24 = vrot.slane %v4294_v3, 4  ;;  %v799_v13 = vrot.slane %v4300_v6, 3  ;;  %v801_v59 = vrot.slane %v4315_v16, 3  ;;  %v979_v20 = vrot.slane %v4298_v5, 4 }
  0x4b   : > { %7065 = vst [vmem:[#allocation24_spill] sm:$0xff] %v4607_v34  ;;  %v1268_v50 = vrot.slane %v4294_v3, 5  ;;  %v1269_v62 = vrot.slane %v4296_v4, 5  ;;  %v7077_v36 = vrot.slane %v4336_v39, 3  ;;  %v1289_v52 = vrot.slane %v4347_v44, 5 }
  0x4c   : > { %v800_v2 = vsel %vm789_vm2, %v797_v27, %v799_v13  ;;  %v1471_v8 = vrot.slane %v4347_v44, 6 }
  0x4d   : > { %3648 = vrot.lane.b32.xlu1 %v3647_v31, %s4247_s19 }
  0x4e   : > { %3643 = vrot.lane.b32.xlu0 %v3642_v32, %s4247_s19 }
  0x51   : > { %3658 = vrot.lane.b32.xlu1 %v3657_v53, %s4247_s19 }
  0x52   : > { %3653 = vrot.lane.b32.xlu0 %v3652_v14, %s4247_s19 }
  0x55   : > { %3668 = vrot.lane.b32.xlu1 %v3667_v37, %s4247_s19 }
  0x56   : > { %3663 = vrot.lane.b32.xlu0 %v3662_v45, %s4247_s19 }
  0x59   : > { %3678 = vrot.lane.b32.xlu1 %v3677_v9, %s4247_s19 }
  0x5a   : > { %3673 = vrot.lane.b32.xlu0 %v3672_v19, %s4247_s19 }
  0x5d   : > { %3688 = vrot.lane.b32.xlu1 %v3687_v1, %s4247_s19 }
  0x5e   : > { %3683 = vrot.lane.b32.xlu0 %v3682_v38, %s4247_s19 }
  0x61   : > { %3698 = vrot.lane.b32.xlu1 %v4511_v23, %s4248_s20  ;;  %v793_v23 = vrot.slane %v4294_v3, 3 }
  0x62   : > { %3693 = vrot.lane.b32.xlu0 %v4489_v46, %s4248_s20  ;;  %v677_v46 = vrot.slane %v4605_v7, 2  ;;  %v7071_v7 = vrot.slane %v4315_v16, 5 }
  0x65   : > { %3708 = vrot.lane.b32.xlu1 %v4528_v47, %s4248_s20  ;;  %v790_v47 = vrot.slane %v4308_v11, 3  ;;  %v815_v11 = vrot.slane %v4347_v44, 3 }
  0x66   : > { %3703 = vrot.lane.b32.xlu0 %v4501_v0, %s4248_s20  ;;  %v679_v0 = vrot.slane %v4607_v34, 2  ;;  %v811_v34 = vrot.slane %v4354_v49, 3 }
  0x69   : > { %3718 = vrot.lane.b32.xlu1 %v3632_v60, %s4248_s20  ;;  %v678_v60 = vsel %vm493_vm1, %v565_v54, %v677_v46 }
  0x6a   : > { %3713 = vrot.lane.b32.xlu0 %v4516_v33, %s4248_s20  ;;  %v795_v33 = vrot.slane %v4296_v4, 3 }
  0x6d   : > { %3728 = vrot.lane.b32.xlu1 %v3642_v32, %s4248_s20  ;;  %v796_v32 = vsel %vm789_vm2, %v793_v23, %v795_v33 }
  0x6e   : > { %3723 = vrot.lane.b32.xlu0 %v4532_v61, %s4248_s20  ;;  %v791_v61 = vrot.slane %v4310_v12, 3 }
  0x70   : > { %v794_v35 = vsel %vm789_vm2, %v791_v61, %v793_v23 }
  0x71   : > { %3738 = vrot.lane.b32.xlu1 %v3652_v14, %s4248_s20  ;;  %v4628_v14 = vld [vmem:[%s6939_s1 + $0x20] ss:$0 sps:$4 sm:$0xff]  }
  0x72   : > { %3733 = vrot.lane.b32.xlu0 %v3647_v31, %s4248_s20  ;;  %v680_v31 = vsel %vm493_vm1, %v677_v46, %v679_v0  ;;  %3419 = vmatprep.subr.msk.bf16.mxu0 %vm971_vm3, %v4628_v14  ;;  %v802_v46 = vsel %vm789_vm2, %v799_v13, %v801_v59  ;;  %v1271_v0 = vrot.slane %v4298_v5, 5  ;;  %vm2351_vm1 = vcmask 60416  }
  0x73   : > { %v3777_v28 = vpack.i.bf16 %v680_v31, %v678_v60  ;;  %3420 = vmatprep.subr.msk.bf16.mxu1 %vm971_vm3, %v4628_v14  ;;  %v981_v60 = vrot.slane %v4300_v6, 4  ;;  %v983_v31 = vrot.slane %v4315_v16, 4 }
  0x75   : > { %3748 = vrot.lane.b32.xlu1 %v3662_v45, %s4248_s20  ;;  %v792_v45 = vsel %vm789_vm2, %v790_v47, %v791_v61  ;;  %v1270_v61 = vsel %vm1267_vm4, %v1268_v50, %v1269_v62  ;;  %v982_v13 = vsel %vm971_vm3, %v979_v20, %v981_v60 }
  0x76   : > { %3743 = vrot.lane.b32.xlu0 %v3657_v53, %s4248_s20  ;;  %v973_v53 = vrot.slane %v4310_v12, 4  ;;  %v3782_v55 = vpack.i.bf16 %v794_v35, %v792_v45 }
  0x79   : > { %3758 = vrot.lane.b32.xlu1 %v3672_v19, %s4248_s20  ;;  %v974_v19 = vsel %vm971_vm3, %v972_v56, %v973_v53  ;;  %v1451_v56 = vrot.slane %v4296_v4, 6 }
  0x7a   : > { %3753 = vrot.lane.b32.xlu0 %v3667_v37, %s4248_s20  ;;  %v798_v37 = vsel %vm789_vm2, %v795_v33, %v797_v27  ;;  %v3792_v33 = vpack.i.bf16 %v802_v46, %v800_v2  ;;  %v1272_v27 = vsel %vm1267_vm4, %v1269_v62, %v1271_v0  ;;  %v6951_v2 = vrot.slane %v4336_v39, 3 }
  0x7b   : > { %v3787_v54 = vpack.i.bf16 %v798_v37, %v796_v32  ;;  %v1450_v32 = vrot.slane %v4294_v3, 6  ;;  %v6952_v37 = vrot.slane %v4315_v16, 5  ;;  %v3817_v35 = vpack.i.bf16 %v1272_v27, %v1270_v61 }
  0x7c   : > { %v1457_v46 = vrot.slane %v4315_v16, 6  ;;  %v4235_v16 = vld [vmem:[%s6939_s1 + $0x8] sm:$0xff]  }
  0x7d   : > { %3768 = vrot.lane.b32.xlu1 %v3682_v38, %s4248_s20  ;;  %v976_v38 = vsel %vm971_vm3, %v973_v53, %v975_v24  ;;  %v1453_v53 = vrot.slane %v4298_v5, 6 }
  0x7e   : > { %3763 = vrot.lane.b32.xlu0 %v3677_v9, %s4248_s20  ;;  %v977_v9 = vrot.slane %v4296_v4, 4  ;;  %v3797_v23 = vpack.i.bf16 %v976_v38, %v974_v19  ;;  %v803_v19 = vrot.slane %v4343_v42, 3 }
  0x7f   : > { %v1454_v50 = vsel %vm1449_vm5, %v1451_v56, %v1453_v53 }
  0x80   : > { %v978_v47 = vsel %vm971_vm3, %v975_v24, %v977_v9 }
  0x81   : > { %3778 = vrot.lane.b32.xlu1 %v3777_v28, %s4248_s20  ;;  %v1273_v28 = vrot.slane %v4300_v6, 5 }
  0x82   : > { %3773 = vrot.lane.b32.xlu0 %v3687_v1, %s4248_s20  ;;  %v980_v1 = vsel %vm971_vm3, %v977_v9, %v979_v20  ;;  %v1455_v20 = vrot.slane %v4300_v6, 6 }
  0x83   : > { %v3807_v45 = vpack.i.bf16 %v980_v1, %v978_v47  ;;  %v1274_v62 = vsel %vm1267_vm4, %v1271_v0, %v1273_v28  ;;  %v1276_v38 = vsel %vm1267_vm4, %v1273_v28, %v6952_v37  ;;  %v1459_v37 = vrot.slane %v4343_v42, 6 }
  0x84   : > { %v3822_v27 = vpack.i.bf16 %v1276_v38, %v1274_v62  ;;  %v1456_v28 = vsel %vm1449_vm5, %v1453_v53, %v1455_v20  ;;  %v1277_v53 = vrot.slane %v4343_v42, 5  ;;  %v1461_v62 = vrot.slane %v4336_v39, 6 }
  0x85   : > { %3788 = vrot.lane.b32.xlu1 %v3787_v54, %s4249_s23  ;;  %v984_v54 = vsel %vm971_vm3, %v981_v60, %v983_v31  ;;  %v804_v60 = vsel %vm789_vm2, %v801_v59, %v803_v19  ;;  %v809_v59 = vrot.slane %v4341_v41, 3 }
  0x86   : > { %3783 = vrot.lane.b32.xlu0 %v3782_v55, %s4249_s23  ;;  %v1452_v55 = vsel %vm1449_vm5, %v1450_v32, %v1451_v56  ;;  %v4688_v0 = vpack.i.bf16 %v984_v54, %v982_v13  ;;  %v806_v32 = vsel %vm789_vm2, %v803_v19, %v6951_v2  ;;  %v989_v56 = vrot.slane %v4338_v40, 4 }
  0x87   : > { %v3827_v1 = vpack.i.bf16 %v1454_v50, %v1452_v55  ;;  %v1279_v55 = vrot.slane %v4336_v39, 5  ;;  %v1281_v19 = vrot.slane %v4338_v40, 5 }
  0x89   : > { %3798 = vrot.lane.b32.xlu1 %v3797_v23, %s4250_s24  ;;  %v985_v23 = vrot.slane %v4343_v42, 4 }
  0x8a   : > { %3793 = vrot.lane.b32.xlu0 %v3792_v33, %s4249_s23  ;;  %v987_v33 = vrot.slane %v4336_v39, 4 }
  0x8b   : > { %v4668_v24 = vpop.permute.xlu1 %3523  ;;  %v986_v13 = vsel %vm971_vm3, %v983_v31, %v985_v23  ;;  %v1463_v31 = vrot.slane %v4338_v40, 6 }
  0x8c   : > { %v4674_v9 = vpop.permute.xlu0 %3513  ;;  %v988_v54 = vsel %vm971_vm3, %v985_v23, %v987_v33  ;;  %v3837_v23 = vpack.i.bf16 %v806_v32, %v804_v60  ;;  %v990_v50 = vsel %vm971_vm3, %v987_v33, %v989_v56  ;;  %v7068_v60 = vrot.slane %v4341_v41, 4 }
  0x8d   : > { %3808 = vrot.lane.b32.xlu1 %v3807_v45, %s4251_s25  ;;  %v4725_v38 = vpack.i.bf16 %v988_v54, %v986_v13  ;;  %v4746_v13 = vsel %vm1267_vm4, %v1277_v53, %v1279_v55  ;;  %v7072_v54 = vrot.slane %v4341_v41, 6 }
  0x8e   : > { %3803 = vrot.lane.b32.xlu0 %v3807_v45, %s4250_s24  ;;  %v1458_v45 = vsel %vm1449_vm5, %v1455_v20, %v1457_v46  ;;  %v992_v32 = vsel %vm971_vm3, %v989_v56, %v7068_v60  ;;  %v4749_v56 = vsel %vm1449_vm5, %v1461_v62, %v1463_v31 }
  0x8f   : > { %v4690_v47 = vpop.permute.xlu1 %3528  ;;  %v3832_v2 = vpack.i.bf16 %v1458_v45, %v1456_v28  ;;  %v4731_v28 = vsel %vm1267_vm4, %v1279_v55, %v1281_v19  ;;  %v4754_v60 = vsel %vm1449_vm5, %v1463_v31, %v7072_v54  ;;  %v4765_v55 = vsel %vm1449_vm5, %v1459_v37, %v1461_v62 }
  0x90   : > { %v4692_v61 = vpop.permute.xlu0 %3518  ;;  %v4772_v31 = vsel %vm789_vm2, %v809_v59, %v811_v34  ;;  %v7074_v54 = vrot.slane %v4345_v43, 3  ;;  %v993_v62 = vrot.slane %v4354_v49, 4 }
  0x91   : > { %3818 = vrot.lane.b32.xlu1 %v3817_v35, %s4252_s26 }
  0x92   : > { %3813 = vrot.lane.b32.xlu0 %v4688_v0, %s4251_s25 }
  0x93   : > { %v4710_v35 = vpop.permute.xlu1 %3538 }
  0x94   : > { %7066 = vst [vmem:[#allocation25_spill] sm:$0xff] %v4710_v35  ;;  %v4716_v20 = vpop.permute.xlu0 %3533 }
  0x95   : > { %7067 = vst [vmem:[#allocation26_spill] sm:$0xff] %v4716_v20  ;;  %3828 = vrot.lane.b32.xlu1 %v3827_v1, %s4253_s27  ;;  %v7069_v1 = vrot.slane %v4341_v41, 5  ;;  %v819_v20 = vrot.slane %v4384_v21, 3 }
  0x96   : > { %3823 = vrot.lane.b32.xlu0 %v3822_v27, %s4252_s26  ;;  %v4743_v27 = vsel %vm1267_vm4, %v7071_v7, %v1277_v53  ;;  %v4762_v7 = vsel %vm1449_vm5, %v1457_v46, %v1459_v37  ;;  %v807_v53 = vrot.slane %v4338_v40, 3  ;;  %v4780_v37 = vpack.i.bf16 %v992_v32, %v990_v50  ;;  %v4234_v32 = vld [vmem:[%s6939_s1 + $0x10] sm:$0xff]  }
  0x97   : > { %v4736_v33 = vsel %vm1267_vm4, %v1281_v19, %v7069_v1  ;;  %v4738_v45 = vpop.permute.xlu1 %3548  ;;  %v4233_v19 = vld [vmem:[%s6939_s1 + $0x18] sm:$0xff]   ;;  %v997_v50 = vrot.slane %v4347_v44, 4 }
  0x98   : > { %7070 = vst [vmem:[#allocation27_spill] sm:$0xff] %v4738_v45  ;;  %v4759_v1 = vpop.permute.xlu0 %3543  ;;  %v2028_v45 = vsel %vm971_vm3, %v4628_v14, 0  ;;  %v4805_v46 = vsel %vm789_vm2, %v7077_v36, %v807_v53  ;;  %v7078_v36 = vrot.slane %v4341_v41, 4 }
  0x99   : > { %7073 = vst [vmem:[#allocation28_spill] sm:$0xff] %v4759_v1  ;;  %3838 = vrot.lane.b32.xlu1 %v3837_v23, %s4249_s23  ;;  %v4777_v1 = vsel %vm789_vm2, %v811_v34, %v7074_v54  ;;  %3364 = vmatpush3.bf16.msra.mxu0 %v2028_v45  ;;  %v4808_v34 = vsel %vm789_vm2, %v807_v53, %v809_v59  ;;  %v1285_v53 = vrot.slane %v4354_v49, 5 }
  0x9a   : > { %3833 = vrot.lane.b32.xlu0 %v3832_v2, %s4253_s27  ;;  %v995_v2 = vrot.slane %v4345_v43, 4  ;;  %3365 = vmatprep.subr.bf16.mxu0 %v4233_v19  ;;  %v994_v59 = vsel %vm971_vm3, %v7078_v36, %v993_v62  ;;  %v1467_v36 = vrot.slane %v4354_v49, 6  ;;  %v7082_v49 = vrot.slane %v4352_v48, 5 }
  0x9b   : > { %v4787_v23 = vpop.permute.xlu1 %3558  ;;  %3414 = vmatpush3.bf16.msra.mxu1 %v2028_v45  ;;  %v1287_v45 = vrot.slane %v4345_v43, 5  ;;  %v3882_v12 = vpack.i.bf16 %v4808_v34, %v4805_v46 }
  0x9c   : > { %7075 = vst [vmem:[#allocation29_spill] sm:$0xff] %v4787_v23  ;;  %v4798_v54 = vpop.permute.xlu0 %3553  ;;  %3410 = vmatprep.subr.bf16.mxu1 %v4233_v19  ;;  %v996_v14 = vsel %vm971_vm3, %v993_v62, %v995_v2  ;;  %v817_v23 = vrot.slane %v4352_v48, 3  ;;  %v7081_v62 = vrot.slane %v4352_v48, 4 }
  0x9d   : > { %7076 = vst [vmem:[#allocation30_spill] sm:$0xff] %v4798_v54  ;;  %3848 = vrot.lane.b32.xlu1 %v4725_v38, %s4250_s24  ;;  %3366 = vmatpush3.bf16.msra.mxu0 %v4233_v19  ;;  %v1469_v54 = vrot.slane %v4345_v43, 6  ;;  %v4845_v39 = vsel %vm1267_vm4, %v1287_v45, %v1289_v52  ;;  %v4860_v44 = vsel %vm1267_vm4, %v1285_v53, %v1287_v45  ;;  %v1001_v45 = vrot.slane %v4384_v21, 4 }
  0x9e   : > { %3843 = vrot.lane.b32.xlu0 %v4688_v0, %s4250_s24  ;;  %v998_v0 = vsel %vm971_vm3, %v995_v2, %v997_v50  ;;  %3367 = vmatprep.subr.bf16.mxu0 %v4234_v32  ;;  %v1000_v2 = vsel %vm971_vm3, %v997_v50, %v7081_v62  ;;  %v4908_v5 = vpack.i.bf16 %v996_v14, %v994_v59 }
  0x9f   : > { %v4827_v42 = vpop.permute.xlu1 %3568  ;;  %3415 = vmatpush3.bf16.msra.mxu1 %v4233_v19  ;;  %v7083_v19 = vrot.slane %v4341_v41, 5  ;;  %v4863_v50 = vsel %vm1449_vm5, %v1469_v54, %v1471_v8  ;;  %v7096_v14 = vpack.i.bf16 %v4765_v55, %v4762_v7  ;;  %v823_v7 = vrot.slane %v4377_v15, 3 }
  0xa0   : > { %7079 = vst [vmem:[#allocation31_spill] sm:$0xff] %v4827_v42  ;;  %v4833_v40 = vpop.permute.xlu0 %3563  ;;  %3411 = vmatprep.subr.bf16.mxu1 %v4234_v32 }
  0xa1   : > { %7080 = vst [vmem:[#allocation32_spill] sm:$0xff] %v4833_v40  ;;  %3858 = vrot.lane.b32.xlu1 %v4780_v37, %s4251_s25  ;;  %v4850_v40 = vsel %vm1267_vm4, %v1289_v52, %v7082_v49  ;;  %3368 = vmatpush3.bf16.msra.mxu0 %v4234_v32  ;;  %v4857_v35 = vsel %vm1267_vm4, %v7083_v19, %v1285_v53  ;;  %v7085_v49 = vrot.slane %v4352_v48, 6  ;;  %v4236_v53 = vld [vmem:[%s6939_s1] sm:$0xff]  }
  0xa2   : > { %3853 = vrot.lane.b32.xlu0 %v4725_v38, %s4251_s25  ;;  %3369 = vmatprep.subr.bf16.mxu0 %v4235_v16  ;;  %v7086_v38 = vrot.slane %v4341_v41, 6  ;;  %v4878_v19 = vsel %vm1449_vm5, %v1467_v36, %v1469_v54  ;;  %v7089_v54 = vrot.slane %v4345_v43, 3  ;;  %v4900_v41 = vsel %vm789_vm2, %v815_v11, %v817_v23 }
  0xa3   : > { %v4865_v62 = vpop.permute.xlu1 %3578  ;;  %v4870_v52 = vsel %vm1449_vm5, %v1471_v8, %v7085_v49  ;;  %v4887_v8 = vsel %vm789_vm2, %v817_v23, %v819_v20  ;;  %v7088_v49 = vrot.slane %v4364_v57, 3  ;;  %3416 = vmatpush3.bf16.msra.mxu1 %v4234_v32  ;;  %v7094_v32 = vrot.slane %v4352_v48, 4 }
  0xa4   : > { %7084 = vst [vmem:[#allocation33_spill] sm:$0xff] %v4865_v62  ;;  %v4875_v42 = vsel %vm1449_vm5, %v7086_v38, %v1467_v36  ;;  %v4884_v62 = vpop.permute.xlu0 %3573  ;;  %v4897_v36 = vsel %vm789_vm2, %v7089_v54, %v815_v11  ;;  %v4915_v11 = vpack.i.bf16 %v1000_v2, %v998_v0  ;;  %3412 = vmatprep.subr.bf16.mxu1 %v4235_v16  ;;  %v1005_v0 = vrot.slane %v4377_v15, 4 }
  0xa5   : > { %7087 = vst [vmem:[#allocation34_spill] sm:$0xff] %v4884_v62  ;;  %v4892_v38 = vsel %vm789_vm2, %v819_v20, %v7088_v49  ;;  %v7090_v62 = vpack.i.bf16 %v4736_v33, %v4731_v28  ;;  %v1003_v20 = vrot.slane %v4364_v57, 4  ;;  %3370 = vmatpush3.bf16.msra.mxu0 %v4235_v16  ;;  %v7091_v49 = vpack.i.bf16 %v4746_v13, %v4743_v27 }
  0xa6   : > { %3371 = vmatprep.subr.bf16.mxu0 %v4236_v53  ;;  %v1002_v59 = vsel %vm971_vm3, %v7094_v32, %v1001_v45  ;;  %v1007_v2 = vrot.slane %v4379_v17, 4  ;;  %v7095_v54 = vpack.i.bf16 %v4754_v60, %v4749_v56  ;;  %v1297_v13 = vrot.slane %v4377_v15, 5 }
  0xa7   : > { %3868 = vrot.lane.b32.xlu1 %v7090_v62, %s4252_s26  ;;  %3863 = vrot.lane.b32.xlu0 %v7091_v49, %s4252_s26  ;;  %v4923_v46 = vpop.permute.xlu1 %3588  ;;  %v1295_v62 = vrot.slane %v4364_v57, 5  ;;  %v1004_v49 = vsel %vm971_vm3, %v1001_v45, %v1003_v20  ;;  %v1293_v32 = vrot.slane %v4384_v21, 5  ;;  %v1479_v33 = vrot.slane %v4377_v15, 6 }
  0xa8   : > { %7092 = vst [vmem:[#allocation35_spill] sm:$0xff] %v4923_v46  ;;  %v4931_v34 = vpop.permute.xlu0 %3583  ;;  %3417 = vmatpush3.bf16.msra.mxu1 %v4235_v16  ;;  %v1477_v16 = vrot.slane %v4364_v57, 6  ;;  %v1475_v60 = vrot.slane %v4384_v21, 6  ;;  %v827_v28 = vrot.slane %v4397_v29, 3  ;;  %v1006_v27 = vsel %vm971_vm3, %v1003_v20, %v1005_v0 }
  0xa9   : > { %7093 = vst [vmem:[#allocation36_spill] sm:$0xff] %v4931_v34  ;;  %3372 = vmatpush3.bf16.msra.mxu0 %v4236_v53  ;;  %3413 = vmatprep.subr.bf16.mxu1 %v4236_v53  ;;  %v1008_v56 = vsel %vm971_vm3, %v1005_v0, %v1007_v2  ;;  %v7099_v43 = vpack.i.bf16 %v4777_v1, %v4772_v31  ;;  %v7100_v23 = vrot.slane %v4379_v17, 5  ;;  %v7102_v1 = vrot.slane %v4379_v17, 6 }
  0xaa   : > { %v1301_v46 = vrot.slane %v4397_v29, 5 }
  0xab   : > { %3878 = vrot.lane.b32.xlu1 %v7095_v54, %s4253_s27  ;;  %3873 = vrot.lane.b32.xlu0 %v7096_v14, %s4253_s27  ;;  %v4955_v45 = vpop.permute.xlu1 %3598  ;;  %v825_v54 = vrot.slane %v4379_v17, 3  ;;  %v4963_v14 = vpack.i.bf16 %v1004_v49, %v1002_v59  ;;  %v4977_v34 = vsel %vm1267_vm4, %v1297_v13, %v7100_v23  ;;  %v7101_v59 = vrot.slane %v4352_v48, 5 }
  0xac   : > { %7097 = vst [vmem:[#allocation37_spill] sm:$0xff] %v4955_v45  ;;  %v4961_v55 = vpop.permute.xlu0 %3593  ;;  %3418 = vmatpush3.bf16.msra.mxu1 %v4236_v53  ;;  %v4972_v45 = vsel %vm1267_vm4, %v1295_v62, %v1297_v13  ;;  %v4986_v53 = vsel %vm1267_vm4, %v1293_v32, %v1295_v62  ;;  %v4994_v31 = vsel %vm1449_vm5, %v1479_v33, %v7102_v1  ;;  %v7103_v23 = vrot.slane %v4352_v48, 6 }
  0xad   : > { %7098 = vst [vmem:[#allocation38_spill] sm:$0xff] %v4961_v55  ;;  %v4982_v20 = vsel %vm1267_vm4, %v7101_v59, %v1293_v32  ;;  %v5007_v62 = vsel %vm789_vm2, %v825_v54, %v827_v28  ;;  %v7106_v49 = vrot.slane %v4386_v22, 3 }
  0xae   : > { %v4999_v13 = vsel %vm1449_vm5, %v7103_v23, %v1475_v60  ;;  %7105 = vst [vmem:[#allocation40_spill] sm:$0xff] %v5007_v62  ;;  %v5022_v23 = vsel %vm789_vm2, %v823_v7, %v825_v54  ;;  %v5035_v54 = vpack.i.bf16 %v1008_v56, %v1006_v27  ;;  %v7121_v62 = vrot.slane %v4379_v17, 5 }
  0xaf   : > { %3888 = vrot.lane.b32.xlu1 %v7099_v43, %s4249_s23  ;;  %3883 = vrot.lane.b32.xlu0 %v3882_v12, %s4249_s23  ;;  %v4989_v43 = vsel %vm1449_vm5, %v1477_v16, %v1479_v33  ;;  %v5001_v0 = vpop.permute.xlu1 %3608  ;;  %v5004_v12 = vsel %vm1449_vm5, %v1475_v60, %v1477_v16  ;;  %v5012_v32 = vsel %vm789_vm2, %v827_v28, %v7106_v49  ;;  %v7108_v33 = vrot.slane %v4364_v57, 3 }
  0xb0   : > { %7104 = vst [vmem:[#allocation39_spill] sm:$0xff] %v5001_v0  ;;  %7107 = vst [vmem:[#allocation41_spill] sm:$0xff] %v5012_v32  ;;  %v5019_v1 = vpop.permute.xlu0 %3603  ;;  %v1009_v16 = vrot.slane %v4397_v29, 4  ;;  %v1011_v60 = vrot.slane %v4386_v22, 4  ;;  %v1013_v0 = vrot.slane %v4391_v25, 4  ;;  %v1015_v28 = vrot.slane %v4393_v26, 4 }
  0xb1   : > { %v5017_v59 = vsel %vm789_vm2, %v7108_v33, %v823_v7  ;;  %7110 = vst [vmem:[#allocation43_spill] sm:$0xff] %v5019_v1  ;;  %7111 = vst [vmem:[#allocation44_spill] sm:$0xff] %v5022_v23  ;;  %v1303_v49 = vrot.slane %v4386_v22, 5  ;;  %v1305_v33 = vrot.slane %v4391_v25, 5  ;;  %v1017_v23 = vrot.slane %v4424_v63, 4 }
  0xb2   : > { %7109 = vst [vmem:[#allocation42_spill] sm:$0xff] %v5017_v59  ;;  %v1010_v56 = vsel %vm971_vm3, %v1007_v2, %v1009_v16  ;;  %v1012_v55 = vsel %vm971_vm3, %v1009_v16, %v1011_v60  ;;  %v1014_v7 = vsel %vm971_vm3, %v1011_v60, %v1013_v0  ;;  %v1016_v1 = vsel %vm971_vm3, %v1013_v0, %v1015_v28 }
  0xb3   : > { %3898 = vrot.lane.b32.xlu1 %v4908_v5, %s4250_s24  ;;  %3893 = vrot.lane.b32.xlu0 %v4780_v37, %s4250_s24  ;;  %v5043_v48 = vpop.permute.xlu1 %3618  ;;  %v5059_v21 = vpack.i.bf16 %v1012_v55, %v1010_v56  ;;  %v7116_v37 = vrot.slane %v4393_v26, 5  ;;  %v1485_v16 = vrot.slane %v4386_v22, 6  ;;  %v1487_v60 = vrot.slane %v4391_v25, 6 }
  0xb4   : > { %7112 = vst [vmem:[#allocation45_spill] sm:$0xff] %v5043_v48  ;;  %v5051_v27 = vpop.permute.xlu0 %3613  ;;  %v5063_v48 = vsel %vm1267_vm4, %v1303_v49, %v1305_v33  ;;  %v1483_v56 = vrot.slane %v4397_v29, 6  ;;  %v5084_v59 = vpack.i.bf16 %v1016_v1, %v1014_v7  ;;  %v1019_v55 = vrot.slane %v4399_v30, 4 }
  0xb5   : > { %7113 = vst [vmem:[#allocation46_spill] sm:$0xff] %v5051_v27  ;;  %7114 = vst [vmem:[#allocation47_spill] sm:$0xff] %v5059_v21  ;;  %v5068_v2 = vsel %vm1267_vm4, %v1305_v33, %v7116_v37  ;;  %v833_v27 = vrot.slane %v4393_v26, 3  ;;  %v835_v21 = vrot.slane %v4424_v63, 3  ;;  %v831_v37 = vrot.slane %v4391_v25, 3 }
  0xb6   : > { %7115 = vst [vmem:[#allocation48_spill] sm:$0xff] %v5063_v48  ;;  %7117 = vst [vmem:[#allocation49_spill] sm:$0xff] %v5068_v2  ;;  %v5095_v32 = vsel %vm1267_vm4, %v7121_v62, %v1301_v46  ;;  %v5098_v33 = vsel %vm1267_vm4, %v1301_v46, %v1303_v49  ;;  %v1021_v1 = vrot.slane %v4413_v51, 4  ;;  %v7123_v62 = vrot.slane %v4393_v26, 6 }
  0xb7   : > { %3908 = vrot.lane.b32.xlu1 %v4915_v11, %s4251_s25  ;;  %3903 = vrot.lane.b32.xlu0 %v4908_v5, %s4251_s25  ;;  %v5076_v0 = vpop.permute.xlu1 %3628  ;;  %v7124_v49 = vrot.slane %v4379_v17, 6  ;;  %v1311_v48 = vrot.slane %v4399_v30, 5  ;;  %v7132_v2 = vpack.i.bf16 %v4878_v19, %v4875_v42  ;;  %v7137_v42 = vrot.slane %v4419_v58, 5 }
  0xb8   : > { %7118 = vst [vmem:[#allocation50_spill] sm:$0xff] %v5076_v0  ;;  %v5082_v5 = vpop.permute.xlu0 %3623  ;;  %v7120_v0 = vpack.i.bf16 %v4850_v40, %v4845_v39  ;;  %v5109_v40 = vsel %vm1449_vm5, %v1485_v16, %v1487_v60  ;;  %v5114_v46 = vsel %vm1449_vm5, %v1487_v60, %v7123_v62  ;;  %v7127_v60 = vrot.slane %v4386_v22, 3 }
  0xb9   : > { %7119 = vst [vmem:[#allocation51_spill] sm:$0xff] %v5082_v5  ;;  %v7122_v5 = vpack.i.bf16 %v4860_v44, %v4857_v35  ;;  %v5124_v44 = vsel %vm1449_vm5, %v1483_v56, %v1485_v16  ;;  %v5127_v35 = vsel %vm789_vm2, %v833_v27, %v835_v21  ;;  %v1018_v16 = vsel %vm971_vm3, %v1015_v28, %v1017_v23 }
  0xba   : > { %v5137_v62 = vsel %vm789_vm2, %v7127_v60, %v831_v37  ;;  %v7131_v60 = vrot.slane %v4419_v58, 4  ;;  %v3526_v28 = vunpack.i.h.bf16 %v4668_v24 }
  0xbb   : > { %3918 = vrot.lane.b32.xlu1 %v7120_v0, %s4252_s26  ;;  %3913 = vrot.lane.b32.xlu0 %v7122_v5, %s4252_s26  ;;  %v5119_v0 = vsel %vm1449_vm5, %v7124_v49, %v1483_v56  ;;  %v5121_v7 = vpop.permute.xlu1 %3638  ;;  %v7126_v5 = vrot.slane %v4399_v30, 3  ;;  %7128 = vst [vmem:[#allocation53_spill] sm:$0xff] %v5137_v62  ;;  %v1020_v56 = vsel %vm971_vm3, %v1017_v23, %v1019_v55  ;;  %v3525_v23 = vunpack.i.l.bf16 %v4668_v24 }
  0xbc   : > { %7125 = vst [vmem:[#allocation52_spill] sm:$0xff] %v5121_v7  ;;  %v5139_v49 = vpop.permute.xlu0 %3633  ;;  %v5142_v7 = vsel %vm789_vm2, %v831_v37, %v833_v27  ;;  %v1313_v27 = vrot.slane %v4413_v51, 5  ;;  %v3515_v37 = vunpack.i.l.bf16 %v4674_v9 }
  0xbd   : > { %v5132_v39 = vsel %vm789_vm2, %v835_v21, %v7126_v5  ;;  %7129 = vst [vmem:[#allocation54_spill] sm:$0xff] %v5139_v49  ;;  %v7130_v21 = vpack.i.bf16 %v4870_v52, %v4863_v50  ;;  %v1022_v5 = vsel %vm971_vm3, %v1019_v55, %v1021_v1  ;;  %v1024_v49 = vsel %vm971_vm3, %v1021_v1, %v7131_v60 }
  0xbe   : > { %v1309_v52 = vrot.slane %v4424_v63, 5  ;;  %v5180_v60 = vpack.i.bf16 %v1024_v49, %v1022_v5  ;;  %v3516_v50 = vunpack.i.h.bf16 %v4674_v9  ;;  %v5189_v24 = vsel %vm1267_vm4, %v1311_v48, %v1313_v27 }
  0xbf   : > { %3928 = vrot.lane.b32.xlu1 %v7130_v21, %s4253_s27  ;;  %3923 = vrot.lane.b32.xlu0 %v7132_v2, %s4253_s27  ;;  %v5166_v55 = vpop.permute.xlu1 %3648  ;;  %v5178_v2 = vpack.i.bf16 %v1020_v56, %v1018_v16  ;;  %v7135_v21 = vpack.i.bf16 %v4892_v38, %v4887_v8  ;;  %7136 = vst [vmem:[#allocation57_spill] sm:$0xff] %v5189_v24  ;;  %v7142_v38 = vrot.slane %v4393_v26, 5  ;;  %v3530_v5 = vunpack.i.l.bf16 %v4690_v47 }
  0xc0   : > { %v5176_v19 = vpop.permute.xlu0 %3643  ;;  %7134 = vst [vmem:[#allocation56_spill] sm:$0xff] %v5180_v60  ;;  %v5194_v1 = vsel %vm1267_vm4, %v1313_v27, %v7137_v42  ;;  %v5198_v49 = vsel %vm1631_vm6, %v4296_v4, %v3526_v28  ;;  %v5202_v9 = vsel %vm1631_vm6, %v4294_v3, %v3525_v23  ;;  %v7141_v8 = vpack.i.bf16 %v4900_v41, %v4897_v36  ;;  %v7155_v36 = vld [vmem:[#allocation25_spill] sm:$0xff] }
  0xc1   : > { %7133 = vst [vmem:[#allocation55_spill] sm:$0xff] %v5178_v2  ;;  %7138 = vst [vmem:[#allocation58_spill] sm:$0xff] %v5194_v1  ;;  %v5211_v16 = vsel %vm1267_vm4, %v7142_v38, %v1309_v52  ;;  %v5214_v56 = vsel %vm1267_vm4, %v1309_v52, %v1311_v48  ;;  %v3531_v4 = vunpack.i.h.bf16 %v4690_v47  ;;  %v3521_v3 = vunpack.i.h.bf16 %v4692_v61  ;;  %v7150_v52 = vld [vmem:[#allocation2_spill] sm:$0xff] }
  0xc2   : > { %7139 = vst [vmem:[#allocation59_spill] sm:$0xff] %v5198_v49  ;;  %7140 = vst [vmem:[#allocation60_spill] sm:$0xff] %v5202_v9  ;;  %v3520_v27 = vunpack.i.l.bf16 %v4692_v61  ;;  %v1493_v23 = vrot.slane %v4399_v30, 6  ;;  %v1495_v48 = vrot.slane %v4413_v51, 6  ;;  %v5231_v47 = vsel %vm1631_vm6, %v4306_v10, %v3516_v50  ;;  %v7148_v50 = vld [vmem:[#allocation16_spill] sm:$0xff]  ;;  %v7152_v9 = vld [vmem:[#allocation5_spill] sm:$0xff] }
  0xc3   : > { %3938 = vrot.lane.b32.xlu1 %v7135_v21, %s4249_s23  ;;  %3933 = vrot.lane.b32.xlu0 %v7141_v8, %s4249_s23  ;;  %7143 = vst [vmem:[#allocation61_spill] sm:$0xff] %v5211_v16  ;;  %7144 = vst [vmem:[#allocation62_spill] sm:$0xff] %v5214_v56  ;;  %v5220_v28 = vpop.permute.xlu1 %3658  ;;  %v7146_v21 = vld [vmem:[#allocation3_spill] sm:$0xff]  ;;  %v1491_v8 = vrot.slane %v4424_v63, 6  ;;  %v841_v38 = vrot.slane %v4419_v58, 3  ;;  %v843_v10 = vrot.slane %v4437_v18, 3  ;;  %v5254_v42 = vsel %vm1631_vm6, %v7150_v52, %v3530_v5 }
  0xc4   : > { %v5222_v41 = vpop.permute.xlu0 %3653  ;;  %7145 = vst [vmem:[#allocation63_spill] sm:$0xff] %v5231_v47  ;;  %v5235_v61 = vsel %vm1631_vm6, %v7146_v21, %v3515_v37  ;;  %v839_v37 = vrot.slane %v4413_v51, 3  ;;  %v5250_v21 = vsel %vm1631_vm6, %v4300_v6, %v3531_v4  ;;  %7151 = vst [vmem:[#allocation2_spill] sm:$0xff] %v5254_v42  ;;  %v5258_v49 = vsel %vm1631_vm6, %v7152_v9, %v3521_v3  ;;  %v7159_v3 = vld [vmem:[#allocation26_spill] sm:$0xff] }
  0xc5   : > { %7147 = vst [vmem:[#allocation3_spill] sm:$0xff] %v5235_v61  ;;  %7149 = vst [vmem:[#allocation16_spill] sm:$0xff] %v5250_v21  ;;  %v3541_v16 = vunpack.i.h.bf16 %v7155_v36  ;;  %v3540_v56 = vunpack.i.l.bf16 %v7155_v36  ;;  %v5271_v4 = vsel %vm1449_vm5, %v1493_v23, %v1495_v48  ;;  %v7157_v5 = vrot.slane %v4419_v58, 6 }
  0xc6   : > { %7153 = vst [vmem:[#allocation5_spill] sm:$0xff] %v5258_v49  ;;  %v3536_v52 = vunpack.i.h.bf16 %v7159_v3  ;;  %v5288_v42 = vsel %vm1449_vm5, %v1491_v8, %v1493_v23  ;;  %v7166_v21 = vrot.slane %v4399_v30, 3  ;;  %v7169_v23 = vld [vmem:[#allocation29_spill] sm:$0xff]  ;;  %v1025_v1 = vrot.slane %v4437_v18, 4 }
  0xc7   : > { %3948 = vrot.lane.b32.xlu1 %v4963_v14, %s4250_s24  ;;  %3943 = vrot.lane.b32.xlu0 %v4915_v11, %s4250_s24  ;;  %v7154_v11 = vld [vmem:[#allocation4_spill] sm:$0xff]  ;;  %v5264_v61 = vpop.permute.xlu1 %3668  ;;  %v5276_v9 = vsel %vm1449_vm5, %v1495_v48, %v7157_v5  ;;  %7162 = vst [vmem:[#allocation64_spill] sm:$0xff] %v5288_v42  ;;  %v5293_v48 = vsel %vm789_vm2, %v841_v38, %v843_v10  ;;  %v7164_v5 = vrot.slane %v7148_v50, 3 }
  0xc8   : > { %v5262_v47 = vsel %vm1631_vm6, %v7154_v11, %v3520_v27  ;;  %v5268_v6 = vpop.permute.xlu0 %3663  ;;  %7156 = vst [vmem:[#allocation4_spill] sm:$0xff] %v5271_v4  ;;  %7158 = vst [vmem:[#allocation25_spill] sm:$0xff] %v5276_v9  ;;  %v3535_v27 = vunpack.i.l.bf16 %v7159_v3  ;;  %v7160_v11 = vrot.slane %v4393_v26, 6  ;;  %v5303_v49 = vsel %vm789_vm2, %v7166_v21, %v839_v37  ;;  %v7173_v21 = vld [vmem:[#allocation7_spill] sm:$0xff]  ;;  %v7177_v9 = vld [vmem:[#allocation6_spill] sm:$0xff] }
  0xc9   : > { %7163 = vst [vmem:[#allocation65_spill] sm:$0xff] %v5293_v48  ;;  %v5298_v3 = vsel %vm789_vm2, %v843_v10, %v7164_v5  ;;  %7167 = vst [vmem:[#allocation67_spill] sm:$0xff] %v5303_v49  ;;  %v1027_v10 = vrot.slane %v7148_v50, 4  ;;  %v7171_v5 = vld [vmem:[#allocation8_spill] sm:$0xff]  ;;  %v5321_v2 = vsel %vm1631_vm6, %v7173_v21, %v3540_v56  ;;  %v7189_v49 = vld [vmem:[#allocation13_spill] sm:$0xff] }
  0xca   : > { %v5285_v36 = vsel %vm1449_vm5, %v7160_v11, %v1491_v8  ;;  %7165 = vst [vmem:[#allocation66_spill] sm:$0xff] %v5298_v3  ;;  %v5306_v11 = vsel %vm789_vm2, %v839_v37, %v841_v38  ;;  %v3561_v8 = vunpack.i.h.bf16 %v7169_v23  ;;  %v5317_v60 = vsel %vm1631_vm6, %v7171_v5, %v3541_v16  ;;  %7174 = vst [vmem:[#allocation7_spill] sm:$0xff] %v5321_v2  ;;  %v7180_v5 = vld [vmem:[#allocation30_spill] sm:$0xff]  ;;  %v7222_v48 = vld [vmem:[#allocation19_spill] sm:$0xff] }
  0xcb   : > { %3958 = vrot.lane.b32.xlu1 %v5035_v54, %s4251_s25  ;;  %7161 = vst [vmem:[#allocation26_spill] sm:$0xff] %v5285_v36  ;;  %3953 = vrot.lane.b32.xlu0 %v4963_v14, %s4251_s25  ;;  %7168 = vst [vmem:[#allocation68_spill] sm:$0xff] %v5306_v11  ;;  %v5309_v24 = vpop.permute.xlu1 %3678  ;;  %v3560_v38 = vunpack.i.l.bf16 %v7169_v23  ;;  %v7175_v14 = vld [vmem:[#allocation10_spill] sm:$0xff]  ;;  %v5334_v62 = vsel %vm1631_vm6, %v7177_v9, %v3535_v27  ;;  %v7179_v16 = vpack.i.bf16 %v4977_v34, %v4972_v45  ;;  %v7182_v27 = vld [vmem:[#allocation17_spill] sm:$0xff] }
  0xcc   : > { %7170 = vst [vmem:[#allocation29_spill] sm:$0xff] %v5309_v24  ;;  %7172 = vst [vmem:[#allocation8_spill] sm:$0xff] %v5317_v60  ;;  %v5324_v37 = vpop.permute.xlu0 %3673  ;;  %v5330_v4 = vsel %vm1631_vm6, %v7175_v14, %v3536_v52  ;;  %v3556_v21 = vunpack.i.h.bf16 %v7180_v5  ;;  %v3555_v52 = vunpack.i.l.bf16 %v7180_v5  ;;  %v7181_v9 = vpack.i.bf16 %v4986_v53, %v4982_v20  ;;  %v7183_v45 = vld [vmem:[#allocation31_spill] sm:$0xff]  ;;  %v7223_v36 = vld [vmem:[#allocation38_spill] sm:$0xff] }
  0xcd   : > { %7176 = vst [vmem:[#allocation10_spill] sm:$0xff] %v5330_v4  ;;  %7178 = vst [vmem:[#allocation6_spill] sm:$0xff] %v5334_v62  ;;  %v1029_v14 = vrot.slane %v7182_v27, 4  ;;  %v5353_v34 = vsel %vm1631_vm6, %v4377_v15, %v3561_v8  ;;  %v7184_v23 = vrot.slane %v4419_v58, 4  ;;  %v1028_v5 = vsel %vm971_vm3, %v1025_v1, %v1027_v10  ;;  %v7186_v8 = vld [vmem:[#allocation18_spill] sm:$0xff] }
  0xce   : > { %v5364_v20 = vsel %vm1631_vm6, %v4364_v57, %v3560_v38  ;;  %v3570_v53 = vunpack.i.l.bf16 %v7183_v45  ;;  %v1321_v57 = vrot.slane %v7182_v27, 5  ;;  %v5385_v62 = vsel %vm1631_vm6, %v7189_v49, %v3555_v52  ;;  %v7192_v38 = vld [vmem:[#allocation33_spill] sm:$0xff] }
  0xcf   : > { %3968 = vrot.lane.b32.xlu1 %v7179_v16, %s4252_s26  ;;  %3963 = vrot.lane.b32.xlu0 %v7181_v9, %s4252_s26  ;;  %v3571_v16 = vunpack.i.h.bf16 %v7183_v45  ;;  %v5356_v56 = vpop.permute.xlu1 %3688  ;;  %v1026_v24 = vsel %vm971_vm3, %v7184_v23, %v1025_v1  ;;  %v7185_v9 = vld [vmem:[#allocation32_spill] sm:$0xff]  ;;  %v7187_v23 = vpack.i.bf16 %v4994_v31, %v4989_v43  ;;  %v1319_v1 = vrot.slane %v7148_v50, 5  ;;  %v7188_v45 = vld [vmem:[#allocation15_spill] sm:$0xff] }
  0xd0   : > { %v3566_v4 = vunpack.i.h.bf16 %v7185_v9  ;;  %v5368_v15 = vpop.permute.xlu0 %3683  ;;  %v3565_v2 = vunpack.i.l.bf16 %v7185_v9  ;;  %v5381_v60 = vsel %vm1631_vm6, %v7188_v45, %v3556_v21  ;;  %v7190_v9 = vpack.i.bf16 %v5004_v12, %v4999_v13  ;;  %v7194_v13 = vld [vmem:[#allocation34_spill] sm:$0xff] }
  0xd1   : > { %v5391_v43 = vpack.i.bf16 %v1028_v5, %v1026_v24  ;;  %v1030_v31 = vsel %vm971_vm3, %v1027_v10, %v1029_v14  ;;  %v3581_v21 = vunpack.i.h.bf16 %v7192_v38  ;;  %v3580_v45 = vunpack.i.l.bf16 %v7192_v38 }
  0xd2   : > { %v5404_v49 = vsel %vm1631_vm6, %v4386_v22, %v3570_v53  ;;  %v3576_v12 = vunpack.i.h.bf16 %v7194_v13  ;;  %v7196_v10 = vrot.slane %v7186_v8, 4  ;;  %v5419_v5 = vsel %vm1631_vm6, %v4379_v17, %v3565_v2  ;;  %v7197_v22 = vld [vmem:[#allocation41_spill] sm:$0xff]  ;;  %v7198_v53 = vld [vmem:[#allocation40_spill] sm:$0xff] }
  0xd3   : > { %3978 = vrot.lane.b32.xlu1 %v7187_v23, %s4253_s27  ;;  %3973 = vrot.lane.b32.xlu0 %v7190_v9, %s4253_s27  ;;  %7191 = vst [vmem:[#allocation30_spill] sm:$0xff] %v5391_v43  ;;  %v5396_v23 = vsel %vm1631_vm6, %v4391_v25, %v3571_v16  ;;  %v5400_v11 = vpop.permute.xlu1 %3698  ;;  %v1317_v25 = vrot.slane %v4437_v18, 5  ;;  %v5415_v16 = vsel %vm1631_vm6, %v4397_v29, %v3566_v4  ;;  %v7203_v29 = vld [vmem:[#allocation44_spill] sm:$0xff]  ;;  %v7204_v4 = vld [vmem:[#allocation42_spill] sm:$0xff]  ;;  %v1501_v17 = vrot.slane %v7148_v50, 6 }
  0xd4   : > { %7193 = vst [vmem:[#allocation17_spill] sm:$0xff] %v5400_v11  ;;  %v5407_v24 = vpop.permute.xlu0 %3693  ;;  %v1032_v52 = vsel %vm971_vm3, %v1029_v14, %v7196_v10  ;;  %v7199_v38 = vpack.i.bf16 %v7197_v22, %v7198_v53  ;;  %v5426_v9 = vsel %vm1267_vm4, %v1319_v1, %v1321_v57  ;;  %v7201_v14 = vrot.slane %v7186_v8, 5 }
  0xd5   : > { %7195 = vst [vmem:[#allocation31_spill] sm:$0xff] %v5407_v24  ;;  %7200 = vst [vmem:[#allocation32_spill] sm:$0xff] %v5426_v9  ;;  %v7205_v43 = vpack.i.bf16 %v7203_v29, %v7204_v4  ;;  %v1503_v2 = vrot.slane %v7182_v27, 6  ;;  %v1499_v53 = vrot.slane %v4437_v18, 6  ;;  %v5456_v4 = vsel %vm1631_vm6, %v4424_v63, %v3576_v12  ;;  %v7211_v63 = vld [vmem:[#allocation36_spill] sm:$0xff]  ;;  %v7221_v24 = vld [vmem:[#allocation22_spill] sm:$0xff] }
  0xd6   : > { %v5431_v10 = vsel %vm1267_vm4, %v1321_v57, %v7201_v14  ;;  %v5447_v57 = vsel %vm1631_vm6, %v4399_v30, %v3580_v45  ;;  %v3575_v14 = vunpack.i.l.bf16 %v7194_v13  ;;  %v5468_v45 = vsel %vm1267_vm4, %v1317_v25, %v1319_v1 }
  0xd7   : > { %3988 = vrot.lane.b32.xlu1 %v7199_v38, %s4249_s23  ;;  %7202 = vst [vmem:[#allocation18_spill] sm:$0xff] %v5431_v10  ;;  %3983 = vrot.lane.b32.xlu0 %v7205_v43, %s4249_s23  ;;  %v5443_v38 = vsel %vm1631_vm6, %v4413_v51, %v3581_v21  ;;  %v5450_v29 = vpop.permute.xlu1 %3708  ;;  %v5452_v43 = vpack.i.bf16 %v1032_v52, %v1030_v31  ;;  %v7209_v21 = vrot.slane %v4419_v58, 5  ;;  %v7210_v31 = vld [vmem:[#allocation35_spill] sm:$0xff]  ;;  %v3586_v12 = vunpack.i.h.bf16 %v7211_v63  ;;  %v7213_v51 = vld [vmem:[#allocation37_spill] sm:$0xff] }
  0xd8   : > { %7206 = vst [vmem:[#allocation15_spill] sm:$0xff] %v5450_v29  ;;  %v5458_v22 = vpop.permute.xlu0 %3703  ;;  %v3591_v13 = vunpack.i.h.bf16 %v7210_v31  ;;  %v3590_v52 = vunpack.i.l.bf16 %v7210_v31  ;;  %v3585_v29 = vunpack.i.l.bf16 %v7211_v63  ;;  %v3601_v9 = vunpack.i.h.bf16 %v7213_v51 }
  0xd9   : > { %7207 = vst [vmem:[#allocation13_spill] sm:$0xff] %v5452_v43  ;;  %7208 = vst [vmem:[#allocation33_spill] sm:$0xff] %v5458_v22  ;;  %v5465_v30 = vsel %vm1267_vm4, %v7209_v21, %v1317_v25  ;;  %v7212_v22 = vld [vmem:[#allocation47_spill] sm:$0xff]  ;;  %v5480_v21 = vsel %vm1449_vm5, %v1501_v17, %v1503_v2  ;;  %v7215_v1 = vrot.slane %v7186_v8, 6  ;;  %v7217_v31 = vrot.slane %v4419_v58, 6 }
  0xda   : > { %7214 = vst [vmem:[#allocation34_spill] sm:$0xff] %v5480_v21  ;;  %v5495_v43 = vsel %vm1449_vm5, %v1499_v53, %v1501_v17  ;;  %v851_v11 = vrot.slane %v7221_v24, 3  ;;  %v3595_v42 = vunpack.i.l.bf16 %v7223_v36  ;;  %v5511_v17 = vsel %vm1631_vm6, %v7182_v27, %v3591_v13 }
  0xdb   : > { %3998 = vrot.lane.b32.xlu1 %v7212_v22, %s4250_s24  ;;  %3993 = vrot.lane.b32.xlu0 %v5035_v54, %s4250_s24  ;;  %v5485_v25 = vsel %vm1449_vm5, %v1503_v2, %v7215_v1  ;;  %v5490_v63 = vsel %vm1449_vm5, %v7217_v31, %v1499_v53  ;;  %v5492_v10 = vpop.permute.xlu1 %3718  ;;  %7220 = vst [vmem:[#allocation42_spill] sm:$0xff] %v5495_v43  ;;  %v7031_v54 = vrot.slane %v7186_v8, 3  ;;  %v3600_v1 = vunpack.i.l.bf16 %v7213_v51  ;;  %v7225_v51 = vld [vmem:[#allocation20_spill] sm:$0xff]  ;;  %v7233_v43 = vld [vmem:[#allocation49_spill] sm:$0xff] }
  0xdc   : > { %7216 = vst [vmem:[#allocation41_spill] sm:$0xff] %v5485_v25  ;;  %7218 = vst [vmem:[#allocation40_spill] sm:$0xff] %v5490_v63  ;;  %v5502_v2 = vsel %vm1631_vm6, %v4393_v26, %v3575_v14  ;;  %v3596_v31 = vunpack.i.h.bf16 %v7223_v36  ;;  %v5515_v53 = vsel %vm1631_vm6, %v7148_v50, %v3590_v52  ;;  %v5519_v26 = vsel %vm1631_vm6, %v4437_v18, %v3586_v12  ;;  %v7226_v12 = vld [vmem:[#allocation39_spill] sm:$0xff] }
  0xdd   : > { %7219 = vst [vmem:[#allocation44_spill] sm:$0xff] %v5492_v10  ;;  %v5507_v10 = vpop.permute.xlu0 %3713  ;;  %v5527_v14 = vsel %vm1631_vm6, %v4419_v58, %v3585_v29  ;;  %v5531_v13 = vsel %vm1631_vm6, %v7225_v51, %v3601_v9  ;;  %v3610_v3 = vunpack.i.l.bf16 %v7226_v12  ;;  %v5545_v58 = vsel %vm789_vm2, %v7031_v54, %v851_v11 }
  0xde   : > { %7224 = vst [vmem:[#allocation35_spill] sm:$0xff] %v5507_v10  ;;  %7228 = vst [vmem:[#allocation47_spill] sm:$0xff] %v5545_v58  ;;  %v7229_v9 = vrot.slane %v7222_v48, 3  ;;  %v5555_v18 = vsel %vm1631_vm6, %v7222_v48, %v3600_v1  ;;  %v5559_v52 = vsel %vm1631_vm6, %v7221_v24, %v3596_v31  ;;  %v3651_v63 = vunpack.i.h.bf16 %v5166_v55  ;;  %v7234_v31 = vld [vmem:[#allocation48_spill] sm:$0xff] }
  0xdf   : > { %4008 = vrot.lane.b32.xlu1 %v5084_v59, %s4251_s25  ;;  %4003 = vrot.lane.b32.xlu0 %v7212_v22, %s4251_s25  ;;  %v5540_v36 = vpop.permute.xlu1 %3728  ;;  %v3650_v1 = vunpack.i.l.bf16 %v5166_v55  ;;  %v7235_v21 = vpack.i.bf16 %v7233_v43, %v7234_v31  ;;  %v3646_v25 = vunpack.i.h.bf16 %v5176_v19  ;;  %v5587_v55 = vsel %vm1668_vm7, %v5262_v47, %v3610_v3 }
  0xe0   : > { %7227 = vst [vmem:[#allocation36_spill] sm:$0xff] %v5540_v36  ;;  %v5550_v29 = vsel %vm789_vm2, %v851_v11, %v7229_v9  ;;  %v5563_v36 = vsel %vm1631_vm6, %v7186_v8, %v3595_v42  ;;  %v7232_v9 = vld [vmem:[#allocation43_spill] sm:$0xff]  ;;  %v7236_v11 = vpack.i.bf16 %v5098_v33, %v5095_v32  ;;  %v3661_v43 = vunpack.i.h.bf16 %v5220_v28 }
  0xe1   : > { %7230 = vst [vmem:[#allocation37_spill] sm:$0xff] %v5550_v29  ;;  %v5565_v54 = vpop.permute.xlu0 %3723  ;;  %v7237_v42 = vrot.slane %v7182_v27, 3  ;;  %v3656_v32 = vunpack.i.h.bf16 %v5222_v41  ;;  %v3655_v33 = vunpack.i.l.bf16 %v5222_v41  ;;  %v1688_v3 = vsel %vm1668_vm7, %v5353_v34, %v3651_v63 }
  0xe2   : > { %7231 = vst [vmem:[#allocation22_spill] sm:$0xff] %v5565_v54  ;;  %v3645_v54 = vunpack.i.l.bf16 %v5176_v19  ;;  %v7238_v19 = vrot.slane %v7148_v50, 3  ;;  %v7239_v50 = vpack.i.bf16 %v5114_v46, %v5109_v40  ;;  %v1686_v41 = vsel %vm1668_vm7, %v5381_v60, %v3646_v25 }
  0xe3   : > { %4018 = vrot.lane.b32.xlu1 %v7235_v21, %s4252_s26  ;;  %4013 = vrot.lane.b32.xlu0 %v7236_v11, %s4252_s26  ;;  %v3660_v21 = vunpack.i.l.bf16 %v5220_v28  ;;  %v3739_v31 = vpop.permute.xlu1 %3738  ;;  %v1687_v28 = vsel %vm1668_vm7, %v5364_v20, %v3650_v1  ;;  %v7240_v20 = vpack.i.bf16 %v5124_v44, %v5119_v0  ;;  %v1692_v40 = vsel %vm1668_vm7, %v5396_v23, %v3661_v43 }
  0xe4   : > { %v5596_v10 = vsel %vm789_vm2, %v7238_v19, %v7237_v42  ;;  %v3741_v11 = vunpack.i.h.bf16 %v3739_v31  ;;  %v3740_v22 = vunpack.i.l.bf16 %v3739_v31  ;;  %v1685_v42 = vsel %vm1668_vm7, %v5385_v62, %v3645_v54 }
  0xe5   : > { %v3734_v47 = vpop.permute.xlu0 %3733  ;;  %v1691_v46 = vsel %vm1668_vm7, %v5404_v49, %v3660_v21  ;;  %v1689_v63 = vsel %vm1668_vm7, %v5419_v5, %v3655_v33  ;;  %v1690_v0 = vsel %vm1668_vm7, %v5415_v16, %v3656_v32  ;;  %v3671_v23 = vunpack.i.h.bf16 %v5264_v61  ;;  %v7244_v32 = vld [vmem:[#allocation29_spill] sm:$0xff] }
  0xe6   : > { %v3736_v58 = vunpack.i.h.bf16 %v3734_v47  ;;  %v3735_v29 = vunpack.i.l.bf16 %v3734_v47  ;;  %v5613_v31 = vsel %vm1705_vm8, %v1687_v28, %v3740_v22  ;;  %v5616_v34 = vsel %vm1705_vm8, %v1688_v3, %v3741_v11 }
  0xe7   : > { %4028 = vrot.lane.b32.xlu1 %v7239_v50, %s4253_s27  ;;  %4023 = vrot.lane.b32.xlu0 %v7240_v20, %s4253_s27  ;;  %v3749_v25 = vpop.permute.xlu1 %3748  ;;  %v3670_v49 = vunpack.i.l.bf16 %v5264_v61  ;;  %v3666_v43 = vunpack.i.h.bf16 %v5268_v6  ;;  %v3665_v5 = vunpack.i.l.bf16 %v5268_v6  ;;  %v7242_v61 = vld [vmem:[#allocation53_spill] sm:$0xff]  ;;  %v3681_v33 = vunpack.i.h.bf16 %v7244_v32 }
  0xe8   : > { %v5627_v62 = vsel %vm1705_vm8, %v1685_v42, %v3735_v29  ;;  %v5630_v60 = vsel %vm1705_vm8, %v1686_v41, %v3736_v58  ;;  %v3751_v44 = vunpack.i.h.bf16 %v3749_v25  ;;  %v3750_v54 = vunpack.i.l.bf16 %v3749_v25 }
  0xe9   : > { %v3744_v22 = vpop.permute.xlu0 %3743  ;;  %v7241_v58 = vpack.i.bf16 %v5132_v39, %v5127_v35  ;;  %v7243_v19 = vpack.i.bf16 %v5142_v7, %v7242_v61  ;;  %v3680_v39 = vunpack.i.l.bf16 %v7244_v32  ;;  %v3676_v47 = vunpack.i.h.bf16 %v5324_v37 }
  0xea   : > { %v3746_v1 = vunpack.i.h.bf16 %v3744_v22  ;;  %v3745_v29 = vunpack.i.l.bf16 %v3744_v22  ;;  %v5645_v16 = vsel %vm1705_vm8, %v1691_v46, %v3750_v54  ;;  %v5648_v21 = vsel %vm1705_vm8, %v1692_v40, %v3751_v44  ;;  %v7245_v46 = vld [vmem:[#allocation55_spill] sm:$0xff] }
  0xeb   : > { %4038 = vrot.lane.b32.xlu1 %v7241_v58, %s4249_s23  ;;  %4033 = vrot.lane.b32.xlu0 %v7243_v19, %s4249_s23  ;;  %v3759_v11 = vpop.permute.xlu1 %3758  ;;  %v3675_v3 = vunpack.i.l.bf16 %v5324_v37  ;;  %v1696_v7 = vsel %vm1668_vm7, %v5443_v38, %v3671_v23  ;;  %v1695_v41 = vsel %vm1668_vm7, %v5447_v57, %v3670_v49  ;;  %v1693_v25 = vsel %vm1668_vm7, %v5502_v2, %v3665_v5  ;;  %v7248_v58 = vld [vmem:[#allocation56_spill] sm:$0xff] }
  0xec   : > { %v5657_v35 = vsel %vm1705_vm8, %v1689_v63, %v3745_v29  ;;  %v5660_v6 = vsel %vm1705_vm8, %v1690_v0, %v3746_v1  ;;  %v3761_v28 = vunpack.i.h.bf16 %v3759_v11  ;;  %v3760_v50 = vunpack.i.l.bf16 %v3759_v11 }
  0xed   : > { %v3754_v42 = vpop.permute.xlu0 %3753  ;;  %v1694_v37 = vsel %vm1668_vm7, %v5456_v4, %v3666_v43  ;;  %v1700_v38 = vsel %vm1668_vm7, %v5511_v17, %v3681_v33  ;;  %v1699_v57 = vsel %vm1668_vm7, %v5515_v53, %v3680_v39  ;;  %v1697_v54 = vsel %vm1668_vm7, %v5527_v14, %v3675_v3  ;;  %v7257_v3 = vld [vmem:[#allocation45_spill] sm:$0xff] }
  0xee   : > { %v3756_v20 = vunpack.i.h.bf16 %v3754_v42  ;;  %v3755_v40 = vunpack.i.l.bf16 %v3754_v42  ;;  %v5675_v63 = vsel %vm1705_vm8, %v1695_v41, %v3760_v50  ;;  %v5678_v0 = vsel %vm1705_vm8, %v1696_v7, %v3761_v28 }
  0xef   : > { %4048 = vrot.lane.b32.xlu1 %v7245_v46, %s4250_s24  ;;  %4043 = vrot.lane.b32.xlu0 %v5084_v59, %s4250_s24  ;;  %v3769_v44 = vpop.permute.xlu1 %3768  ;;  %v1698_v22 = vsel %vm1668_vm7, %v5519_v26, %v3676_v47  ;;  %v3691_v17 = vunpack.i.h.bf16 %v5356_v56  ;;  %v3690_v53 = vunpack.i.l.bf16 %v5356_v56  ;;  %v3686_v43 = vunpack.i.h.bf16 %v5368_v15 }
  0xf0   : > { %v5687_v2 = vsel %vm1705_vm8, %v1693_v25, %v3755_v40  ;;  %v5690_v4 = vsel %vm1705_vm8, %v1694_v37, %v3756_v20  ;;  %v3771_v59 = vunpack.i.h.bf16 %v3769_v44  ;;  %v3770_v23 = vunpack.i.l.bf16 %v3769_v44  ;;  %v7258_v25 = vld [vmem:[#allocation58_spill] sm:$0xff]  ;;  %v7259_v37 = vld [vmem:[#allocation57_spill] sm:$0xff] }
  0xf1   : > { %7246 = vst [vmem:[#allocation19_spill] sm:$0xff] %v5687_v2  ;;  %7247 = vst [vmem:[#allocation38_spill] sm:$0xff] %v5690_v4  ;;  %v3764_v49 = vpop.permute.xlu0 %3763  ;;  %v3685_v5 = vunpack.i.l.bf16 %v5368_v15  ;;  %v7253_v32 = vrot.slane %v7186_v8, 3  ;;  %v7254_v15 = vrot.slane %v7182_v27, 3  ;;  %v7255_v39 = vrot.slane %v7221_v24, 4 }
  0xf2   : > { %v3766_v1 = vunpack.i.h.bf16 %v3764_v49  ;;  %v3765_v29 = vunpack.i.l.bf16 %v3764_v49  ;;  %v5703_v14 = vsel %vm1705_vm8, %v1699_v57, %v3770_v23  ;;  %v5706_v26 = vsel %vm1705_vm8, %v1700_v38, %v3771_v59 }
  0xf3   : > { %4058 = vrot.lane.b32.xlu1 %v7248_v58, %s4251_s25  ;;  %7249 = vst [vmem:[#allocation20_spill] sm:$0xff] %v5703_v14  ;;  %7250 = vst [vmem:[#allocation39_spill] sm:$0xff] %v5706_v26  ;;  %4053 = vrot.lane.b32.xlu0 %v7245_v46, %s4251_s25  ;;  %v3779_v19 = vpop.permute.xlu1 %3778  ;;  %v5721_v33 = vsel %vm789_vm2, %v7254_v15, %v7253_v32  ;;  %v7256_v11 = vrot.slane %v7186_v8, 4  ;;  %v3621_v28 = vunpack.i.h.bf16 %v7257_v3  ;;  %v1035_v41 = vrot.slane %v7222_v48, 4  ;;  %v7270_v32 = vld [vmem:[#allocation21_spill] sm:$0xff] }
  0xf4   : > { %v5711_v56 = vsel %vm1705_vm8, %v1697_v54, %v3765_v29  ;;  %v5714_v61 = vsel %vm1705_vm8, %v1698_v22, %v3766_v1  ;;  %v3781_v50 = vunpack.i.h.bf16 %v3779_v19  ;;  %v3780_v42 = vunpack.i.l.bf16 %v3779_v19  ;;  %v7264_v22 = vld [vmem:[#allocation61_spill] sm:$0xff] }
  0xf5   : > { %7251 = vst [vmem:[#allocation43_spill] sm:$0xff] %v5711_v56  ;;  %7252 = vst [vmem:[#allocation49_spill] sm:$0xff] %v5714_v61  ;;  %v1034_v47 = vsel %vm971_vm3, %v7256_v11, %v7255_v39  ;;  %v3774_v7 = vpop.permute.xlu0 %3773  ;;  %v1704_v20 = vsel %vm1668_vm7, %v5531_v13, %v3691_v17  ;;  %v1703_v27 = vsel %vm1668_vm7, %v5555_v18, %v3690_v53  ;;  %v7263_v18 = vld [vmem:[#allocation62_spill] sm:$0xff]  ;;  %v3620_v23 = vunpack.i.l.bf16 %v7257_v3  ;;  %v7272_v11 = vld [vmem:[#allocation5_spill] sm:$0xff] }
  0xf6   : > { %v3776_v40 = vunpack.i.h.bf16 %v3774_v7  ;;  %v3775_v46 = vunpack.i.l.bf16 %v3774_v7  ;;  %v7260_v38 = vpack.i.bf16 %v7258_v25, %v7259_v37  ;;  %v1701_v57 = vsel %vm1668_vm7, %v5563_v36, %v3685_v5  ;;  %v7268_v53 = vld [vmem:[#allocation46_spill] sm:$0xff]  ;;  %v7277_v25 = vld [vmem:[#allocation3_spill] sm:$0xff] }
  0xf7   : > { %v1702_v44 = vsel %vm1668_vm7, %v5559_v52, %v3686_v43  ;;  %v5743_v54 = vsel %vm1705_vm8, %v1703_v27, %v3780_v42  ;;  %v5746_v13 = vsel %vm1705_vm8, %v1704_v20, %v3781_v50  ;;  %v7265_v59 = vpack.i.bf16 %v7263_v18, %v7264_v22  ;;  %v5759_v52 = vpop.permute.xlu1 %3788  ;;  %v7273_v50 = vld [vmem:[#allocation25_spill] sm:$0xff]  ;;  %v7274_v42 = vld [vmem:[#allocation4_spill] sm:$0xff]  ;;  %v7281_v18 = vld [vmem:[#allocation26_spill] sm:$0xff] }
  0xf8   : > { %4068 = vrot.lane.b32.xlu1 %v7260_v38, %s4252_s26  ;;  %7261 = vst [vmem:[#allocation48_spill] sm:$0xff] %v5743_v54  ;;  %7262 = vst [vmem:[#allocation53_spill] sm:$0xff] %v5746_v13  ;;  %v5754_v49 = vsel %vm1705_vm8, %v1701_v57, %v3775_v46  ;;  %v5757_v36 = vsel %vm1705_vm8, %v1702_v44, %v3776_v40  ;;  %v1037_v17 = vrot.slane %v7225_v51, 4  ;;  %v3616_v1 = vunpack.i.h.bf16 %v7268_v53  ;;  %v7279_v38 = vld [vmem:[#allocation63_spill] sm:$0xff]  ;;  %v7280_v44 = vld [vmem:[#allocation64_spill] sm:$0xff] }
  0xf9   : > { %4063 = vrot.lane.b32.xlu0 %v7265_v59, %s4252_s26  ;;  %7266 = vst [vmem:[#allocation29_spill] sm:$0xff] %v5754_v49  ;;  %7267 = vst [vmem:[#allocation55_spill] sm:$0xff] %v5757_v36  ;;  %v3615_v29 = vunpack.i.l.bf16 %v7268_v53  ;;  %v5764_v43 = vpop.permute.xlu0 %3783  ;;  %v7269_v5 = vmov %v7255_v39  ;;  %v7041_v15 = vrot.slane %v7270_v32, 4  ;;  %v7271_v39 = vunpack.i.h.bf16 %v7226_v12  ;;  %v7296_v59 = vld [vmem:[#allocation17_spill] sm:$0xff]  ;;  %v7298_v49 = vld [vmem:[#allocation30_spill] sm:$0xff] }
  0xfa   : > { %v1036_v19 = vsel %vm971_vm3, %v7269_v5, %v1035_v41  ;;  %v7275_v7 = vpack.i.bf16 %v7273_v50, %v7274_v42  ;;  %v1327_v20 = vrot.slane %v7222_v48, 5  ;;  %v1329_v27 = vrot.slane %v7225_v51, 5  ;;  %v7283_v5 = vld [vmem:[#allocation16_spill] sm:$0xff] }
  0xfb   : > { %v1672_v3 = vsel %vm1668_vm7, %v7272_v11, %v7271_v39  ;;  %v7040_v40 = vrot.slane %v7270_v32, 5  ;;  %v7276_v46 = vunpack.i.l.bf16 %v7232_v9  ;;  %v7278_v12 = vunpack.i.h.bf16 %v7232_v9  ;;  %v7284_v11 = vld [vmem:[#allocation2_spill] sm:$0xff]  ;;  %v5804_v50 = vpop.permute.xlu1 %3798 }
  0xfc   : > { %4078 = vrot.lane.b32.xlu1 %v7275_v7, %s4253_s27  ;;  %v7282_v22 = vpack.i.bf16 %v7280_v44, %v7281_v18  ;;  %v1325_v53 = vrot.slane %v7221_v24, 5  ;;  %v5798_v39 = vsel %vm1668_vm7, %v7283_v5, %v3621_v28  ;;  %v5802_v9 = vsel %vm1668_vm7, %v7284_v11, %v3620_v23  ;;  %v7285_v7 = vld [vmem:[#allocation59_spill] sm:$0xff] }
  0xfd   : > { %v1669_v37 = vsel %vm1668_vm7, %v7277_v25, %v7276_v46  ;;  %v1670_v57 = vsel %vm1668_vm7, %v7279_v38, %v7278_v12  ;;  %v5806_v42 = vpack.i.bf16 %v1036_v19, %v1034_v47  ;;  %v5810_v46 = vsel %vm1668_vm7, %v7285_v7, %v3616_v1  ;;  %v7286_v25 = vld [vmem:[#allocation60_spill] sm:$0xff]  ;;  %v5816_v28 = vpop.permute.xlu0 %3793  ;;  %v7287_v47 = vld [vmem:[#allocation66_spill] sm:$0xff]  ;;  %v7288_v19 = vld [vmem:[#allocation65_spill] sm:$0xff] }
  0xfe   : > { %4073 = vrot.lane.b32.xlu0 %v7282_v22, %s4253_s27  ;;  %v5814_v12 = vsel %vm1668_vm7, %v7286_v25, %v3615_v29  ;;  %v1038_v38 = vsel %vm971_vm3, %v1035_v41, %v1037_v17  ;;  %v1040_v23 = vsel %vm971_vm3, %v1037_v17, %v7041_v15  ;;  %v7289_v44 = vpack.i.bf16 %v7287_v47, %v7288_v19  ;;  %v7290_v17 = vld [vmem:[#allocation68_spill] sm:$0xff]  ;;  %v7291_v22 = vld [vmem:[#allocation67_spill] sm:$0xff]  ;;  %v7294_v47 = vld [vmem:[#allocation50_spill] sm:$0xff] }
  0xff   : > { %v5827_v1 = vsel %vm1267_vm4, %v1327_v20, %v1329_v27  ;;  %v5832_v29 = vsel %vm1267_vm4, %v1329_v27, %v7040_v40  ;;  %v1509_v41 = vrot.slane %v7222_v48, 6  ;;  %v1511_v18 = vrot.slane %v7225_v51, 6  ;;  %v3809_v40 = vpop.permute.xlu1 %3808  ;;  %v7297_v27 = vld [vmem:[#allocation31_spill] sm:$0xff] }
 0x100   : > { %4088 = vrot.lane.b32.xlu1 %v7289_v44, %s4249_s23  ;;  %v7292_v5 = vpack.i.bf16 %v7290_v17, %v7291_v22  ;;  %v7293_v11 = vrot.slane %v7186_v8, 5  ;;  %v5846_v25 = vsel %vm1267_vm4, %v1325_v53, %v1327_v20  ;;  %v5851_v15 = vpack.i.bf16 %v1040_v23, %v1038_v38  ;;  %v7295_v22 = vld [vmem:[#allocation51_spill] sm:$0xff] }
 0x101   : > { %v1507_v17 = vrot.slane %v7221_v24, 6  ;;  %v3700_v36 = vunpack.i.l.bf16 %v7296_v59  ;;  %v3804_v20 = vpop.permute.xlu0 %3803  ;;  %v3696_v19 = vunpack.i.h.bf16 %v7297_v27  ;;  %v3695_v44 = vunpack.i.l.bf16 %v7297_v27 }
 0x102   : > { %4083 = vrot.lane.b32.xlu0 %v7292_v5, %s4249_s23  ;;  %v5843_v7 = vsel %vm1267_vm4, %v7293_v11, %v1325_v53  ;;  %v3701_v11 = vunpack.i.h.bf16 %v7296_v59  ;;  %v5866_v38 = vsel %vm1449_vm5, %v1509_v41, %v1511_v18  ;;  %v3786_v23 = vunpack.i.h.bf16 %v5764_v43 }
 0x103   : > { %v3785_v59 = vunpack.i.l.bf16 %v5764_v43  ;;  %v7299_v5 = vrot.slane %v7270_v32, 6  ;;  %v3801_v24 = vunpack.i.h.bf16 %v5804_v50  ;;  %v3800_v13 = vunpack.i.l.bf16 %v5804_v50  ;;  %v3819_v54 = vpop.permute.xlu1 %3818 }
 0x104   : > { %4098 = vrot.lane.b32.xlu1 %v7298_v49, %s4250_s24  ;;  %v7300_v61 = vrot.slane %v7186_v8, 6  ;;  %v1708_v56 = vsel %vm1705_vm8, %v5587_v55, %v3700_v36  ;;  %v3810_v53 = vunpack.i.l.bf16 %v3809_v40  ;;  %v1706_v14 = vsel %vm1705_vm8, %v1669_v37, %v3695_v44 }
 0x105   : > { %v5875_v27 = vsel %vm1449_vm5, %v1511_v18, %v7299_v5  ;;  %v1709_v18 = vsel %vm1705_vm8, %v1672_v3, %v3701_v11  ;;  %v3811_v5 = vunpack.i.h.bf16 %v3809_v40  ;;  %v3814_v26 = vpop.permute.xlu0 %3813  ;;  %v1707_v50 = vsel %vm1705_vm8, %v1670_v57, %v3696_v19 }
 0x106   : > { %4093 = vrot.lane.b32.xlu0 %v7248_v58, %s4250_s24  ;;  %v5883_v43 = vsel %vm1449_vm5, %v7300_v61, %v1507_v17  ;;  %v5886_v58 = vsel %vm1449_vm5, %v1507_v17, %v1509_v41  ;;  %v3821_v4 = vunpack.i.h.bf16 %v3819_v54  ;;  %v3820_v8 = vunpack.i.l.bf16 %v3819_v54  ;;  %v7301_v61 = vld [vmem:[#allocation13_spill] sm:$0xff] }
 0x107   : > { %v3791_v41 = vunpack.i.h.bf16 %v5759_v52  ;;  %v3790_v17 = vunpack.i.l.bf16 %v5759_v52  ;;  %v1743_v55 = vsel %vm1742_vm9, %v1706_v14, %v3785_v59  ;;  %v1744_v36 = vsel %vm1742_vm9, %v1707_v50, %v3786_v23  ;;  %v3829_v57 = vpop.permute.xlu1 %3828  ;;  %v7302_v23 = vld [vmem:[#allocation18_spill] sm:$0xff]  ;;  %v7303_v50 = vld [vmem:[#allocation32_spill] sm:$0xff] }
 0x108   : > { %4108 = vrot.lane.b32.xlu1 %v7301_v61, %s4251_s25  ;;  %v1780_v3 = vsel %vm1779_vm10, %v1743_v55, %v3800_v13  ;;  %v1781_v40 = vsel %vm1779_vm10, %v1744_v36, %v3801_v24  ;;  %v3806_v37 = vunpack.i.h.bf16 %v3804_v20  ;;  %v3805_v54 = vunpack.i.l.bf16 %v3804_v20 }
 0x109   : > { %v1817_v19 = vsel %vm1816_vm11, %v1780_v3, %v3810_v53  ;;  %v1818_v44 = vsel %vm1816_vm11, %v1781_v40, %v3811_v5  ;;  %v3831_v11 = vunpack.i.h.bf16 %v3829_v57  ;;  %v3830_v52 = vunpack.i.l.bf16 %v3829_v57  ;;  %v3824_v2 = vpop.permute.xlu0 %3823 }
 0x10a   : > { %4103 = vrot.lane.b32.xlu0 %v7298_v49, %s4251_s25  ;;  %v3816_v14 = vunpack.i.h.bf16 %v3814_v26  ;;  %v3815_v59 = vunpack.i.l.bf16 %v3814_v26  ;;  %v7304_v49 = vpack.i.bf16 %v7302_v23, %v7303_v50  ;;  %v1854_v13 = vsel %vm1853_vm12, %v1817_v19, %v3820_v8  ;;  %v7308_v23 = vld [vmem:[#allocation41_spill] sm:$0xff]  ;;  %v7309_v50 = vld [vmem:[#allocation34_spill] sm:$0xff] }
 0x10b   : > { %v1855_v24 = vsel %vm1853_vm12, %v1818_v44, %v3821_v4  ;;  %v3826_v20 = vunpack.i.h.bf16 %v3824_v2  ;;  %v3825_v55 = vunpack.i.l.bf16 %v3824_v2  ;;  %v7305_v53 = vpack.i.bf16 %v5468_v45, %v5465_v30  ;;  %v5919_v40 = vpop.permute.xlu1 %3838  ;;  %v7306_v4 = vld [vmem:[#allocation23_spill] sm:$0xff]  ;;  %v7307_v30 = vld [vmem:[#allocation24_spill] sm:$0xff] }
 0x10c   : > { %4118 = vrot.lane.b32.xlu1 %v7304_v49, %s4252_s26  ;;  %v1891_v5 = vsel %vm1890_vm13, %v1854_v13, %v3830_v52  ;;  %v1892_v26 = vsel %vm1890_vm13, %v1855_v24, %v3831_v11  ;;  %v1745_v36 = vsel %vm1742_vm9, %v1708_v56, %v3790_v17  ;;  %v1746_v3 = vsel %vm1742_vm9, %v1709_v18, %v3791_v41  ;;  %v223_v11 = vld [vmem:[%s4289_s17 + $0xa0] sm:$0x7]  ;;  %v7312_v13 = vld [vmem:[#allocation40_spill] sm:$0xff] }
 0x10d   : > { %v1927_v8 = vpack.c.bf16 %v1892_v26, %v1891_v5  ;;  %v859_v57 = vrot.slane %v7306_v4, 3  ;;  %v1782_v2 = vsel %vm1779_vm10, %v1745_v36, %v3805_v54  ;;  %v1783_v19 = vsel %vm1779_vm10, %v1746_v3, %v3806_v37  ;;  %v3834_v44 = vpop.permute.xlu0 %3833  ;;  %v4237_v36 = vld [vmem:[%s4289_s17 + $0x98] sm:$0xff]  }
 0x10e   : > { %4113 = vrot.lane.b32.xlu0 %v7305_v53, %s4252_s26  ;;  %v861_v45 = vrot.slane %v7307_v30, 3  ;;  %v855_v52 = vrot.slane %v7225_v51, 3  ;;  %v1819_v56 = vsel %vm1816_vm11, %v1782_v2, %v3815_v59  ;;  %v1820_v18 = vsel %vm1816_vm11, %v1783_v19, %v3816_v14  ;;  %v7311_v51 = vld [vmem:[#allocation42_spill] sm:$0xff] }
 0x10f   : > { %v3836_v41 = vunpack.i.h.bf16 %v3834_v44  ;;  %v3835_v17 = vunpack.i.l.bf16 %v3834_v44  ;;  %v7310_v49 = vpack.i.bf16 %v7308_v23, %v7309_v50  ;;  %3373 = vmatprep.mubr.msk.bf16.mxu0 %vm1972_vm14, %v1927_v8  ;;  %v1856_v37 = vsel %vm1853_vm12, %v1819_v56, %v3825_v55  ;;  %v3849_v26 = vpop.permute.xlu1 %3848  ;;  %v7317_v23 = vld [vmem:[#allocation47_spill] sm:$0xff] }
 0x110   : > { %v1857_v54 = vsel %vm1853_vm12, %v1820_v18, %v3826_v20  ;;  %v7313_v24 = vpack.i.bf16 %v7311_v51, %v7312_v13  ;;  %v1041_v14 = vrot.slane %v7306_v4, 4  ;;  %v7042_v59 = vrot.slane %v7307_v30, 4  ;;  %v7315_v18 = vld [vmem:[#allocation15_spill] sm:$0xff]  ;;  %v7320_v51 = vld [vmem:[#allocation33_spill] sm:$0xff] }
 0x111   : > { %4128 = vrot.lane.b32.xlu1 %v7310_v49, %s4253_s27  ;;  %v1893_v53 = vsel %vm1890_vm13, %v1856_v37, %v3835_v17  ;;  %v1894_v5 = vsel %vm1890_vm13, %v1857_v54, %v3836_v41  ;;  %v5945_v3 = vunpack.c.h.bf16 %v4237_v36  ;;  %v5947_v55 = vunpack.c.l.bf16 %v223_v11  ;;  %v3844_v8 = vpop.permute.xlu0 %3843  ;;  %v7316_v11 = vld [vmem:[#allocation37_spill] sm:$0xff] }
 0x112   : > { %4123 = vrot.lane.b32.xlu0 %v7313_v24, %s4253_s27  ;;  %v1928_v20 = vpack.c.bf16 %v1894_v5, %v1893_v53  ;;  %v4177_v2 = vpack.i.bf16 %v5875_v27, %v5866_v38  ;;  %v4172_v19 = vpack.i.bf16 %v5886_v58, %v5883_v43  ;;  %v7314_v44 = vrot.slane %v7270_v32, 3 }
 0x113   : > { %v3711_v41 = vunpack.i.h.bf16 %v7315_v18  ;;  %v3710_v17 = vunpack.i.l.bf16 %v7315_v18  ;;  %v7318_v50 = vpack.i.bf16 %v7316_v11, %v7317_v23  ;;  %v5965_v49 = vsel %vm789_vm2, %v859_v57, %v861_v45  ;;  %v3859_v36 = vpop.permute.xlu1 %3858 }
 0x114   : > { %v5956_v56 = vsel %vm789_vm2, %v7314_v44, %v859_v57  ;;  %v7319_v37 = vrot.slane %v7222_v48, 3  ;;  %v3706_v13 = vunpack.i.h.bf16 %v7320_v51  ;;  %v3705_v24 = vunpack.i.l.bf16 %v7320_v51  ;;  %3374 = vmatmul.mubr.msk.bf16.vlgmr.msra.gmra.mxu0 %vm1972_vm14, %v1928_v20 }
 0x115   : > { %4138 = vrot.lane.b32.xlu1 %v7318_v50, %s4249_s23  ;;  %v7321_v53 = vpack.i.bf16 %v5721_v33, %v5596_v10  ;;  %v7322_v5 = vmov %v7314_v44  ;;  %v7323_v48 = vrot.slane %v7270_v32, 4  ;;  %v5992_v44 = vsel %vm971_vm3, %v1041_v14, %v7042_v59  ;;  %v3854_v11 = vpop.permute.xlu0 %3853 }
 0x116   : > { %v5970_v54 = vsel %vm789_vm2, %v7319_v37, %v855_v52  ;;  %v5982_v57 = vsel %vm789_vm2, %v855_v52, %v7322_v5  ;;  %v1155_v10 = vrot.slane %v5945_v3, 4  ;;  %v3796_v52 = vunpack.i.h.bf16 %v5816_v28 }
 0x117   : > { %4133 = vrot.lane.b32.xlu0 %v7321_v53, %s4249_s23  ;;  %v5987_v45 = vsel %vm971_vm3, %v7323_v48, %v1041_v14  ;;  %v3795_v18 = vunpack.i.l.bf16 %v5816_v28  ;;  %v1712_v37 = vsel %vm1705_vm8, %v5802_v9, %v3710_v17  ;;  %v1713_v14 = vsel %vm1705_vm8, %v5798_v39, %v3711_v41 }
 0x118   : > { %v3841_v51 = vunpack.i.h.bf16 %v5919_v40  ;;  %v3840_v53 = vunpack.i.l.bf16 %v5919_v40  ;;  %v1710_v28 = vsel %vm1705_vm8, %v5814_v12, %v3705_v24  ;;  %v1711_v5 = vsel %vm1705_vm8, %v5810_v46, %v3706_v13 }
 0x119   : > { %4148 = vrot.lane.b32.xlu1 %v5806_v42, %s4250_s24  ;;  %v3851_v48 = vunpack.i.h.bf16 %v3849_v26  ;;  %v3850_v50 = vunpack.i.l.bf16 %v3849_v26  ;;  %v3846_v9 = vunpack.i.h.bf16 %v3844_v8  ;;  %v3845_v39 = vunpack.i.l.bf16 %v3844_v8  ;;  %v3869_v20 = vpop.permute.xlu1 %3868  ;;  %v3864_v12 = vpop.permute.xlu0 %3863 }
 0x11a   : > { %v3861_v41 = vunpack.i.h.bf16 %v3859_v36  ;;  %v3860_v17 = vunpack.i.l.bf16 %v3859_v36  ;;  %v1747_v40 = vsel %vm1742_vm9, %v1710_v28, %v3795_v18  ;;  %v1748_v23 = vsel %vm1742_vm9, %v1711_v5, %v3796_v52 }
 0x11b   : > { %4143 = vrot.lane.b32.xlu0 %v7301_v61, %s4250_s24  ;;  %v3856_v33 = vunpack.i.h.bf16 %v3854_v11  ;;  %v3855_v59 = vunpack.i.l.bf16 %v3854_v11  ;;  %v1749_v24 = vsel %vm1742_vm9, %v1712_v37, %v3840_v53  ;;  %v1750_v46 = vsel %vm1742_vm9, %v1713_v14, %v3841_v51 }
 0x11c   : > { %v3871_v26 = vunpack.i.h.bf16 %v3869_v20  ;;  %v3870_v13 = vunpack.i.l.bf16 %v3869_v20  ;;  %v1786_v61 = vsel %vm1779_vm10, %v1749_v24, %v3850_v50  ;;  %v1787_v8 = vsel %vm1779_vm10, %v1750_v46, %v3851_v48 }
 0x11d   : > { %4158 = vrot.lane.b32.xlu1 %v5851_v15, %s4251_s25  ;;  %v3866_v36 = vunpack.i.h.bf16 %v3864_v12  ;;  %v3865_v18 = vunpack.i.l.bf16 %v3864_v12  ;;  %v1784_v52 = vsel %vm1779_vm10, %v1747_v40, %v3845_v39  ;;  %v1785_v11 = vsel %vm1779_vm10, %v1748_v23, %v3846_v9  ;;  %v3879_v14 = vpop.permute.xlu1 %3878  ;;  %v3874_v5 = vpop.permute.xlu0 %3873 }
 0x11e   : > { %v1823_v37 = vsel %vm1816_vm11, %v1786_v61, %v3860_v17  ;;  %v1824_v20 = vsel %vm1816_vm11, %v1787_v8, %v3861_v41  ;;  %v1821_v51 = vsel %vm1816_vm11, %v1784_v52, %v3855_v59  ;;  %v1822_v50 = vsel %vm1816_vm11, %v1785_v11, %v3856_v33  ;;  %v7329_v11 = vld [vmem:[#allocation7_spill] sm:$0xff] }
 0x11f   : > { %4153 = vrot.lane.b32.xlu0 %v5806_v42, %s4251_s25  ;;  %v3881_v53 = vunpack.i.h.bf16 %v3879_v14  ;;  %v3880_v28 = vunpack.i.l.bf16 %v3879_v14  ;;  %v1860_v48 = vsel %vm1853_vm12, %v1823_v37, %v3870_v13  ;;  %v1861_v42 = vsel %vm1853_vm12, %v1824_v20, %v3871_v26 }
 0x120   : > { %v3876_v12 = vunpack.i.h.bf16 %v3874_v5  ;;  %v3875_v39 = vunpack.i.l.bf16 %v3874_v5  ;;  %v7324_v23 = vpack.i.bf16 %v5832_v29, %v5827_v1  ;;  %v1858_v9 = vsel %vm1853_vm12, %v1821_v51, %v3865_v18 }
 0x121   : > { %v1859_v59 = vsel %vm1853_vm12, %v1822_v50, %v3866_v36  ;;  %v1897_v33 = vsel %vm1890_vm13, %v1860_v48, %v3880_v28  ;;  %v1898_v41 = vsel %vm1890_vm13, %v1861_v42, %v3881_v53  ;;  %v7325_v17 = vpack.i.bf16 %v5846_v25, %v5843_v7  ;;  %v6047_v1 = vpop.permute.xlu1 %3888  ;;  %v6050_v13 = vpop.permute.xlu0 %3883  ;;  %v7327_v25 = vld [vmem:[#allocation8_spill] sm:$0xff]  ;;  %v7331_v53 = vld [vmem:[#allocation6_spill] sm:$0xff] }
 0x122   : > { %4168 = vrot.lane.b32.xlu1 %v7324_v23, %s4252_s26  ;;  %v1930_v40 = vpack.c.bf16 %v1898_v41, %v1897_v33  ;;  %v1895_v24 = vsel %vm1890_vm13, %v1858_v9, %v3875_v39  ;;  %v1896_v46 = vsel %vm1890_vm13, %v1859_v59, %v3876_v12  ;;  %v1333_v29 = vrot.slane %v7306_v4, 5  ;;  %v7342_v59 = vld [vmem:[#allocation10_spill] sm:$0xff]  ;;  %v7343_v41 = vld [vmem:[#allocation35_spill] sm:$0xff] }
 0x123   : > { %4163 = vrot.lane.b32.xlu0 %v7325_v17, %s4252_s26  ;;  %v1929_v26 = vpack.c.bf16 %v1896_v46, %v1895_v24  ;;  %v1517_v61 = vrot.slane %v7307_v30, 6  ;;  %v1519_v8 = vrot.slane %v5945_v3, 6  ;;  %v1521_v36 = vrot.slane %v5947_v55, 6 }
 0x124   : > { %v7326_v7 = vunpack.i.h.bf16 %v7294_v47  ;;  %v7328_v52 = vunpack.i.l.bf16 %v7294_v47  ;;  %v4187_v20 = vpack.i.bf16 %v5965_v49, %v5956_v56  ;;  %v1515_v14 = vrot.slane %v7306_v4, 6 }
 0x125   : > { %v3626_v51 = vunpack.i.h.bf16 %v7295_v22  ;;  %v7330_v50 = vunpack.i.l.bf16 %v7295_v22  ;;  %3377 = vmatprep.mubr.msk.bf16.mxu0 %vm1972_vm14, %v1929_v26  ;;  %v4182_v38 = vpack.i.bf16 %v5982_v57, %v5970_v54  ;;  %v4197_v27 = vpack.i.bf16 %v5992_v44, %v5987_v45  ;;  %v3899_v4 = vpop.permute.xlu1 %3898  ;;  %v3894_v44 = vpop.permute.xlu0 %3893 }
 0x126   : > { %v1680_v18 = vsel %vm1668_vm7, %v7327_v25, %v7326_v7  ;;  %v1679_v37 = vsel %vm1668_vm7, %v7329_v11, %v7328_v52  ;;  %4178 = vrot.lane.b32.xlu1 %v4177_v2, %s4253_s27  ;;  %3378 = vmatmul.mubr.msk.bf16.gmra.mxu0 %vm1972_vm14, %v1930_v40  ;;  %v7332_v22 = vrot.slane %v7307_v30, 4  ;;  %v7333_v43 = vrot.slane %v5947_v55, 4 }
 0x127   : > { %v1677_v47 = vsel %vm1668_vm7, %v7331_v53, %v7330_v50  ;;  %4173 = vrot.lane.b32.xlu0 %v4172_v19, %s4253_s27  ;;  %v7334_v19 = vrot.slane %v5945_v3, 5  ;;  %v7335_v56 = vrot.slane %v7307_v30, 5  ;;  %v7336_v54 = vrot.slane %v5947_v55, 5  ;;  %v7340_v3 = vld [vmem:[#allocation44_spill] sm:$0xff] }
 0x128   : > { %v1156_v2 = vsel %vm971_vm3, %v7332_v22, %v1155_v10  ;;  %v1158_v58 = vsel %vm971_vm3, %v1155_v10, %v7333_v43  ;;  %v7338_v28 = vrot.slane %v7270_v32, 5  ;;  %v6120_v42 = vsel %vm1449_vm5, %v1517_v61, %v1519_v8 }
 0x129   : > { %v6100_v49 = vsel %vm1267_vm4, %v7335_v56, %v7334_v19  ;;  %v7337_v57 = vmov %v7334_v19  ;;  %v7339_v10 = vmov %v7335_v56  ;;  %v6123_v55 = vsel %vm1449_vm5, %v1519_v8, %v1521_v36  ;;  %v3909_v24 = vpop.permute.xlu1 %3908  ;;  %v3904_v8 = vpop.permute.xlu0 %3903 }
 0x12a   : > { %v6107_v45 = vsel %vm1267_vm4, %v7337_v57, %v7336_v54  ;;  %v6112_v5 = vsel %vm1267_vm4, %v7338_v28, %v1333_v29  ;;  %v6117_v48 = vsel %vm1267_vm4, %v1333_v29, %v7339_v10  ;;  %v3721_v12 = vunpack.i.h.bf16 %v7340_v3  ;;  %4188 = vrot.lane.b32.xlu1 %v4187_v20, %s4249_s23 }
 0x12b   : > { %v3720_v39 = vunpack.i.l.bf16 %v7340_v3  ;;  %v7341_v23 = vrot.slane %v7270_v32, 6  ;;  %v6134_v30 = vsel %vm1449_vm5, %v1515_v14, %v1517_v61  ;;  %v1678_v33 = vsel %vm1668_vm7, %v7342_v59, %v3626_v51  ;;  %4183 = vrot.lane.b32.xlu0 %v4182_v38, %s4249_s23 }
 0x12c   : > { %v3716_v17 = vunpack.i.h.bf16 %v7343_v41  ;;  %v3715_v40 = vunpack.i.l.bf16 %v7343_v41  ;;  %v4207_v46 = vpack.i.bf16 %v1158_v58, %v1156_v2  ;;  %v4217_v32 = vpack.i.bf16 %v6107_v45, %v6100_v49 }
 0x12d   : > { %v6131_v9 = vsel %vm1449_vm5, %v7341_v23, %v1515_v14  ;;  %v4212_v29 = vpack.i.bf16 %v6117_v48, %v6112_v5  ;;  %v3891_v26 = vunpack.i.h.bf16 %v6047_v1  ;;  %v3890_v61 = vunpack.i.l.bf16 %v6047_v1  ;;  %v3914_v19 = vpop.permute.xlu0 %3913 }
 0x12e   : > { %v4227_v36 = vpack.i.bf16 %v6123_v55, %v6120_v42  ;;  %v4222_v7 = vpack.i.bf16 %v6134_v30, %v6131_v9  ;;  %v1716_v25 = vsel %vm1705_vm8, %v1679_v37, %v3720_v39  ;;  %v1717_v52 = vsel %vm1705_vm8, %v1680_v18, %v3721_v12  ;;  %4198 = vrot.lane.b32.xlu1 %v4197_v27, %s4250_s24  ;;  %v3919_v18 = vpop.permute.xlu1 %3918 }
 0x12f   : > { %v3886_v11 = vunpack.i.h.bf16 %v6050_v13  ;;  %v3885_v20 = vunpack.i.l.bf16 %v6050_v13  ;;  %v1714_v14 = vsel %vm1705_vm8, %v1677_v47, %v3715_v40  ;;  %v1715_v1 = vsel %vm1705_vm8, %v1678_v33, %v3716_v17  ;;  %4193 = vrot.lane.b32.xlu0 %v5851_v15, %s4250_s24 }
 0x130   : > { %v3901_v51 = vunpack.i.h.bf16 %v3899_v4  ;;  %v3900_v50 = vunpack.i.l.bf16 %v3899_v4  ;;  %v3896_v53 = vunpack.i.h.bf16 %v3894_v44  ;;  %v3895_v38 = vunpack.i.l.bf16 %v3894_v44 }
 0x131   : > { %v3911_v37 = vunpack.i.h.bf16 %v3909_v24  ;;  %v3910_v22 = vunpack.i.l.bf16 %v3909_v24  ;;  %v1753_v2 = vsel %vm1742_vm9, %v1716_v25, %v3890_v61  ;;  %v1754_v13 = vsel %vm1742_vm9, %v1717_v52, %v3891_v26  ;;  %v3924_v39 = vpop.permute.xlu0 %3923 }
 0x132   : > { %v3906_v43 = vunpack.i.h.bf16 %v3904_v8  ;;  %v3905_v58 = vunpack.i.l.bf16 %v3904_v8  ;;  %v1751_v47 = vsel %vm1742_vm9, %v1714_v14, %v3885_v20  ;;  %v1752_v56 = vsel %vm1742_vm9, %v1715_v1, %v3886_v11  ;;  %4208 = vrot.lane.b32.xlu1 %v4207_v46, %s4251_s25  ;;  %v3929_v48 = vpop.permute.xlu1 %3928  ;;  %v7345_v11 = vld [vmem:[#allocation28_spill] sm:$0xff] }
 0x133   : > { %v3921_v4 = vunpack.i.h.bf16 %v3919_v18  ;;  %v3920_v49 = vunpack.i.l.bf16 %v3919_v18  ;;  %v1790_v15 = vsel %vm1779_vm10, %v1753_v2, %v3900_v50  ;;  %v1791_v54 = vsel %vm1779_vm10, %v1754_v13, %v3901_v51  ;;  %4203 = vrot.lane.b32.xlu0 %v4197_v27, %s4251_s25  ;;  %v7346_v14 = vld [vmem:[#allocation52_spill] sm:$0xff] }
 0x134   : > { %v3916_v57 = vunpack.i.h.bf16 %v3914_v19  ;;  %v3915_v45 = vunpack.i.l.bf16 %v3914_v19  ;;  %v1788_v44 = vsel %vm1779_vm10, %v1751_v47, %v3895_v38  ;;  %v1789_v28 = vsel %vm1779_vm10, %v1752_v56, %v3896_v53  ;;  %v7349_v2 = vld [vmem:[#allocation12_spill] sm:$0xff]  ;;  %v7351_v19 = vld [vmem:[#allocation22_spill] sm:$0xff] }
 0x135   : > { %v1827_v5 = vsel %vm1816_vm11, %v1790_v15, %v3910_v22  ;;  %v1828_v10 = vsel %vm1816_vm11, %v1791_v54, %v3911_v37  ;;  %v1825_v42 = vsel %vm1816_vm11, %v1788_v44, %v3905_v58  ;;  %v1826_v55 = vsel %vm1816_vm11, %v1789_v28, %v3906_v43  ;;  %v3934_v8 = vpop.permute.xlu0 %3933  ;;  %v7348_v22 = vld [vmem:[#allocation36_spill] sm:$0xff]  ;;  %v7350_v43 = vld [vmem:[#allocation11_spill] sm:$0xff]  ;;  %v7353_v15 = vld [vmem:[#allocation9_spill] sm:$0xff] }
 0x136   : > { %v3931_v3 = vunpack.i.h.bf16 %v3929_v48  ;;  %v3930_v12 = vunpack.i.l.bf16 %v3929_v48  ;;  %v1864_v23 = vsel %vm1853_vm12, %v1827_v5, %v3920_v49  ;;  %v1865_v27 = vsel %vm1853_vm12, %v1828_v10, %v3921_v4  ;;  %4218 = vrot.lane.b32.xlu1 %v4217_v32, %s4252_s26  ;;  %v3939_v26 = vpop.permute.xlu1 %3938  ;;  %v7344_v32 = vld [vmem:[#allocation27_spill] sm:$0xff]  ;;  %v7352_v4 = vld [vmem:[#allocation14_spill] sm:$0xff] }
 0x137   : > { %v3926_v9 = vunpack.i.h.bf16 %v3924_v39  ;;  %v3925_v30 = vunpack.i.l.bf16 %v3924_v39  ;;  %v1862_v59 = vsel %vm1853_vm12, %v1825_v42, %v3915_v45  ;;  %v1863_v33 = vsel %vm1853_vm12, %v1826_v55, %v3916_v57  ;;  %4213 = vrot.lane.b32.xlu0 %v4212_v29, %s4252_s26 }
 0x138   : > { %v1901_v41 = vsel %vm1890_vm13, %v1864_v23, %v3930_v12  ;;  %v1902_v17 = vsel %vm1890_vm13, %v1865_v27, %v3931_v3  ;;  %v3551_v25 = vunpack.i.h.bf16 %v7344_v32  ;;  %v3550_v52 = vunpack.i.l.bf16 %v7344_v32 }
 0x139   : > { %v1932_v40 = vpack.c.bf16 %v1902_v17, %v1901_v41  ;;  %v1899_v24 = vsel %vm1890_vm13, %v1862_v59, %v3925_v30  ;;  %v1900_v46 = vsel %vm1890_vm13, %v1863_v33, %v3926_v9  ;;  %v3546_v29 = vunpack.i.h.bf16 %v7345_v11  ;;  %v3944_v37 = vpop.permute.xlu0 %3943 }
 0x13a   : > { %v1931_v61 = vpack.c.bf16 %v1900_v46, %v1899_v24  ;;  %4228 = vrot.lane.b32.xlu1 %v4227_v36, %s4253_s27  ;;  %v3545_v20 = vunpack.i.l.bf16 %v7345_v11  ;;  %v3641_v1 = vunpack.i.h.bf16 %v7346_v14  ;;  %v3640_v51 = vunpack.i.l.bf16 %v7346_v14  ;;  %v3949_v50 = vpop.permute.xlu1 %3948  ;;  %v7347_v36 = vld [vmem:[#allocation54_spill] sm:$0xff] }
 0x13b   : > { %4223 = vrot.lane.b32.xlu0 %v4222_v7, %s4253_s27  ;;  %v3636_v53 = vunpack.i.h.bf16 %v7347_v36  ;;  %v3635_v38 = vunpack.i.l.bf16 %v7347_v36  ;;  %v3731_v7 = vunpack.i.h.bf16 %v7348_v22  ;;  %v3730_v18 = vunpack.i.l.bf16 %v7348_v22 }
 0x13c   : > { %3381 = vmatprep.mubr.msk.bf16.mxu0 %vm1972_vm14, %v1931_v61  ;;  %v1647_v13 = vsel %vm1631_vm6, %v7349_v2, %v3551_v25  ;;  %v1646_v58 = vsel %vm1631_vm6, %v7350_v43, %v3550_v52  ;;  %v3726_v47 = vunpack.i.h.bf16 %v7351_v19  ;;  %v3725_v56 = vunpack.i.l.bf16 %v7351_v19 }
 0x13d   : > { %3382 = vmatmul.mubr.msk.bf16.gmra.mxu0 %vm1972_vm14, %v1932_v40  ;;  %v1645_v49 = vsel %vm1631_vm6, %v7352_v4, %v3546_v29  ;;  %v1644_v54 = vsel %vm1631_vm6, %v7353_v15, %v3545_v20  ;;  %v1684_v57 = vsel %vm1668_vm7, %v1647_v13, %v3641_v1  ;;  %v1683_v45 = vsel %vm1668_vm7, %v1646_v58, %v3640_v51  ;;  %v3954_v42 = vpop.permute.xlu0 %3953 }
 0x13e   : > { %v3959_v44 = vpop.permute.xlu1 %3958  ;;  %v1681_v28 = vsel %vm1668_vm7, %v1644_v54, %v3635_v38  ;;  %v1682_v5 = vsel %vm1668_vm7, %v1645_v49, %v3636_v53  ;;  %v3941_v10 = vunpack.i.h.bf16 %v3939_v26  ;;  %v3940_v48 = vunpack.i.l.bf16 %v3939_v26 }
 0x13f   : > { %v1720_v55 = vsel %vm1705_vm8, %v1683_v45, %v3730_v18  ;;  %v1721_v3 = vsel %vm1705_vm8, %v1684_v57, %v3731_v7  ;;  %v3936_v12 = vunpack.i.h.bf16 %v3934_v8  ;;  %v3935_v39 = vunpack.i.l.bf16 %v3934_v8 }
 0x140   : > { %v1718_v23 = vsel %vm1705_vm8, %v1681_v28, %v3725_v56  ;;  %v1719_v27 = vsel %vm1705_vm8, %v1682_v5, %v3726_v47  ;;  %v3951_v9 = vunpack.i.h.bf16 %v3949_v50  ;;  %v3950_v30 = vunpack.i.l.bf16 %v3949_v50 }
 0x141   : > { %v3946_v59 = vunpack.i.h.bf16 %v3944_v37  ;;  %v3945_v33 = vunpack.i.l.bf16 %v3944_v37  ;;  %v3961_v41 = vunpack.i.h.bf16 %v3959_v44  ;;  %v3960_v17 = vunpack.i.l.bf16 %v3959_v44  ;;  %v3964_v32 = vpop.permute.xlu0 %3963 }
 0x142   : > { %v3969_v40 = vpop.permute.xlu1 %3968  ;;  %v1757_v24 = vsel %vm1742_vm9, %v1720_v55, %v3940_v48  ;;  %v1758_v46 = vsel %vm1742_vm9, %v1721_v3, %v3941_v10  ;;  %v3956_v26 = vunpack.i.h.bf16 %v3954_v42  ;;  %v3955_v61 = vunpack.i.l.bf16 %v3954_v42 }
 0x143   : > { %v1755_v8 = vsel %vm1742_vm9, %v1718_v23, %v3935_v39  ;;  %v1756_v25 = vsel %vm1742_vm9, %v1719_v27, %v3936_v12  ;;  %v3971_v52 = vunpack.i.h.bf16 %v3969_v40  ;;  %v3970_v11 = vunpack.i.l.bf16 %v3969_v40 }
 0x144   : > { %v1794_v29 = vsel %vm1779_vm10, %v1757_v24, %v3950_v30  ;;  %v1795_v20 = vsel %vm1779_vm10, %v1758_v46, %v3951_v9  ;;  %v3966_v14 = vunpack.i.h.bf16 %v3964_v32  ;;  %v3965_v1 = vunpack.i.l.bf16 %v3964_v32 }
 0x145   : > { %v1792_v51 = vsel %vm1779_vm10, %v1755_v8, %v3945_v33  ;;  %v1793_v50 = vsel %vm1779_vm10, %v1756_v25, %v3946_v59  ;;  %v1831_v36 = vsel %vm1816_vm11, %v1794_v29, %v3960_v17  ;;  %v1832_v53 = vsel %vm1816_vm11, %v1795_v20, %v3961_v41  ;;  %v3974_v2 = vpop.permute.xlu0 %3973 }
 0x146   : > { %v3979_v38 = vpop.permute.xlu1 %3978  ;;  %v1829_v37 = vsel %vm1816_vm11, %v1792_v51, %v3955_v61  ;;  %v1830_v22 = vsel %vm1816_vm11, %v1793_v50, %v3956_v26  ;;  %v1868_v13 = vsel %vm1853_vm12, %v1831_v36, %v3970_v11  ;;  %v1869_v43 = vsel %vm1853_vm12, %v1832_v53, %v3971_v52 }
 0x147   : > { %v3981_v7 = vunpack.i.h.bf16 %v3979_v38  ;;  %v3980_v18 = vunpack.i.l.bf16 %v3979_v38  ;;  %v3976_v58 = vunpack.i.h.bf16 %v3974_v2  ;;  %v3975_v19 = vunpack.i.l.bf16 %v3974_v2 }
 0x148   : > { %v1866_v47 = vsel %vm1853_vm12, %v1829_v37, %v3965_v1  ;;  %v1867_v56 = vsel %vm1853_vm12, %v1830_v22, %v3966_v14 }
 0x149   : > { %v1905_v4 = vsel %vm1890_vm13, %v1868_v13, %v3980_v18  ;;  %v1906_v49 = vsel %vm1890_vm13, %v1869_v43, %v3981_v7  ;;  %v1903_v54 = vsel %vm1890_vm13, %v1866_v47, %v3975_v19  ;;  %v1904_v57 = vsel %vm1890_vm13, %v1867_v56, %v3976_v58  ;;  %v3984_v28 = vpop.permute.xlu0 %3983 }
 0x14a   : > { %v1934_v15 = vpack.c.bf16 %v1906_v49, %v1905_v4  ;;  %v3989_v45 = vpop.permute.xlu1 %3988  ;;  %v1933_v44 = vpack.c.bf16 %v1904_v57, %v1903_v54  ;;  %v3986_v12 = vunpack.i.h.bf16 %v3984_v28  ;;  %v3985_v39 = vunpack.i.l.bf16 %v3984_v28 }
 0x14b   : > { %v3991_v42 = vunpack.i.h.bf16 %v3989_v45  ;;  %v3990_v55 = vunpack.i.l.bf16 %v3989_v45 }
 0x14c   : > { %3385 = vmatprep.mubr.msk.bf16.mxu0 %vm1972_vm14, %v1933_v44  ;;  %v1759_v61 = vsel %vm1742_vm9, %v5627_v62, %v3985_v39  ;;  %v1760_v32 = vsel %vm1742_vm9, %v5630_v60, %v3986_v12 }
 0x14d   : > { %3386 = vmatmul.mubr.msk.bf16.gmra.mxu0 %vm1972_vm14, %v1934_v15  ;;  %v3994_v10 = vpop.permute.xlu0 %3993  ;;  %v1761_v17 = vsel %vm1742_vm9, %v5613_v31, %v3990_v55  ;;  %v1762_v40 = vsel %vm1742_vm9, %v5616_v34, %v3991_v42 }
 0x14e   : > { %v3999_v5 = vpop.permute.xlu1 %3998  ;;  %v3996_v9 = vunpack.i.h.bf16 %v3994_v10  ;;  %v3995_v30 = vunpack.i.l.bf16 %v3994_v10 }
 0x14f   : > { %v4001_v23 = vunpack.i.h.bf16 %v3999_v5  ;;  %v4000_v27 = vunpack.i.l.bf16 %v3999_v5 }
 0x150   : > { %v1796_v20 = vsel %vm1779_vm10, %v1759_v61, %v3995_v30  ;;  %v1797_v34 = vsel %vm1779_vm10, %v1760_v32, %v3996_v9 }
 0x151   : > { %v4004_v3 = vpop.permute.xlu0 %4003  ;;  %v1798_v52 = vsel %vm1779_vm10, %v1761_v17, %v4000_v27  ;;  %v1799_v11 = vsel %vm1779_vm10, %v1762_v40, %v4001_v23 }
 0x152   : > { %v4009_v48 = vpop.permute.xlu1 %4008  ;;  %v4006_v24 = vunpack.i.h.bf16 %v4004_v3  ;;  %v4005_v46 = vunpack.i.l.bf16 %v4004_v3 }
 0x153   : > { %v4011_v59 = vunpack.i.h.bf16 %v4009_v48  ;;  %v4010_v33 = vunpack.i.l.bf16 %v4009_v48 }
 0x154   : > { %v1833_v51 = vsel %vm1816_vm11, %v1796_v20, %v4005_v46  ;;  %v1834_v60 = vsel %vm1816_vm11, %v1797_v34, %v4006_v24 }
 0x155   : > { %v4014_v26 = vpop.permute.xlu0 %4013  ;;  %v1835_v14 = vsel %vm1816_vm11, %v1798_v52, %v4010_v33  ;;  %v1836_v1 = vsel %vm1816_vm11, %v1799_v11, %v4011_v59 }
 0x156   : > { %v4019_v41 = vpop.permute.xlu1 %4018  ;;  %v4016_v29 = vunpack.i.h.bf16 %v4014_v26  ;;  %v4015_v31 = vunpack.i.l.bf16 %v4014_v26 }
 0x157   : > { %v4021_v8 = vunpack.i.h.bf16 %v4019_v41  ;;  %v4020_v25 = vunpack.i.l.bf16 %v4019_v41 }
 0x158   : > { %v1870_v18 = vsel %vm1853_vm12, %v1833_v51, %v4015_v31  ;;  %v1871_v2 = vsel %vm1853_vm12, %v1834_v60, %v4016_v29 }
 0x159   : > { %v4024_v53 = vpop.permute.xlu0 %4023  ;;  %v1872_v38 = vsel %vm1853_vm12, %v1835_v14, %v4020_v25  ;;  %v1873_v37 = vsel %vm1853_vm12, %v1836_v1, %v4021_v8 }
 0x15a   : > { %v4029_v62 = vpop.permute.xlu1 %4028  ;;  %v4026_v22 = vunpack.i.h.bf16 %v4024_v53  ;;  %v4025_v7 = vunpack.i.l.bf16 %v4024_v53 }
 0x15b   : > { %v4031_v50 = vunpack.i.h.bf16 %v4029_v62  ;;  %v4030_v36 = vunpack.i.l.bf16 %v4029_v62 }
 0x15c   : > { %v1907_v19 = vsel %vm1890_vm13, %v1870_v18, %v4025_v7  ;;  %v1908_v47 = vsel %vm1890_vm13, %v1871_v2, %v4026_v22 }
 0x15d   : > { %v1909_v13 = vsel %vm1890_vm13, %v1872_v38, %v4030_v36  ;;  %v1910_v43 = vsel %vm1890_vm13, %v1873_v37, %v4031_v50  ;;  %v1935_v4 = vpack.c.bf16 %v1908_v47, %v1907_v19  ;;  %v4034_v49 = vpop.permute.xlu0 %4033 }
 0x15e   : > { %v1936_v58 = vpack.c.bf16 %v1910_v43, %v1909_v13  ;;  %v4039_v56 = vpop.permute.xlu1 %4038  ;;  %v4036_v5 = vunpack.i.h.bf16 %v4034_v49  ;;  %v4035_v10 = vunpack.i.l.bf16 %v4034_v49 }
 0x15f   : > { %3389 = vmatprep.mubr.msk.bf16.mxu0 %vm1972_vm14, %v1935_v4  ;;  %v4041_v45 = vunpack.i.h.bf16 %v4039_v56  ;;  %v4040_v44 = vunpack.i.l.bf16 %v4039_v56 }
 0x160   : > { %3390 = vmatmul.mubr.msk.bf16.gmra.mxu0 %vm1972_vm14, %v1936_v58  ;;  %v1763_v41 = vsel %vm1742_vm9, %v5657_v35, %v4035_v10  ;;  %v1764_v17 = vsel %vm1742_vm9, %v5660_v6, %v4036_v5 }
 0x161   : > { %v4044_v54 = vpop.permute.xlu0 %4043  ;;  %v1765_v27 = vsel %vm1742_vm9, %v5645_v16, %v4040_v44  ;;  %v1766_v9 = vsel %vm1742_vm9, %v5648_v21, %v4041_v45 }
 0x162   : > { %v4049_v15 = vpop.permute.xlu1 %4048  ;;  %v4046_v55 = vunpack.i.h.bf16 %v4044_v54  ;;  %v4045_v3 = vunpack.i.l.bf16 %v4044_v54 }
 0x163   : > { %v4051_v48 = vunpack.i.h.bf16 %v4049_v15  ;;  %v4050_v42 = vunpack.i.l.bf16 %v4049_v15 }
 0x164   : > { %v1800_v32 = vsel %vm1779_vm10, %v1763_v41, %v4045_v3  ;;  %v1801_v21 = vsel %vm1779_vm10, %v1764_v17, %v4046_v55  ;;  %v7354_v55 = vld [vmem:[#allocation19_spill] sm:$0xff] }
 0x165   : > { %v4054_v28 = vpop.permute.xlu0 %4053  ;;  %v1802_v46 = vsel %vm1779_vm10, %v1765_v27, %v4050_v42  ;;  %v1803_v26 = vsel %vm1779_vm10, %v1766_v9, %v4051_v48 }
 0x166   : > { %v4059_v57 = vpop.permute.xlu1 %4058  ;;  %v4056_v30 = vunpack.i.h.bf16 %v4054_v28  ;;  %v4055_v59 = vunpack.i.l.bf16 %v4054_v28 }
 0x167   : > { %v4061_v12 = vunpack.i.h.bf16 %v4059_v57  ;;  %v4060_v39 = vunpack.i.l.bf16 %v4059_v57 }
 0x168   : > { %v1837_v52 = vsel %vm1816_vm11, %v1800_v32, %v4055_v59  ;;  %v1838_v6 = vsel %vm1816_vm11, %v1801_v21, %v4056_v30 }
 0x169   : > { %v1839_v8 = vsel %vm1816_vm11, %v1802_v46, %v4060_v39  ;;  %v1840_v25 = vsel %vm1816_vm11, %v1803_v26, %v4061_v12  ;;  %v7355_v12 = vld [vmem:[#allocation38_spill] sm:$0xff] }
 0x16a   : > { %v4069_v23 = vpop.permute.xlu1 %4068 }
 0x16b   : > { %v4064_v33 = vpop.permute.xlu0 %4063  ;;  %v4071_v40 = vunpack.i.h.bf16 %v4069_v23  ;;  %v4070_v24 = vunpack.i.l.bf16 %v4069_v23 }
 0x16c   : > { %v4066_v61 = vunpack.i.h.bf16 %v4064_v33  ;;  %v4065_v16 = vunpack.i.l.bf16 %v4064_v33 }
 0x16d   : > { %v1876_v20 = vsel %vm1853_vm12, %v1839_v8, %v4070_v24  ;;  %v1877_v34 = vsel %vm1853_vm12, %v1840_v25, %v4071_v40 }
 0x16e   : > { %v4079_v35 = vpop.permute.xlu1 %4078  ;;  %v1874_v60 = vsel %vm1853_vm12, %v1837_v52, %v4065_v16  ;;  %v1875_v50 = vsel %vm1853_vm12, %v1838_v6, %v4066_v61 }
 0x16f   : > { %v4081_v11 = vunpack.i.h.bf16 %v4079_v35  ;;  %v4080_v29 = vunpack.i.l.bf16 %v4079_v35 }
 0x170   : > { %v4074_v31 = vpop.permute.xlu0 %4073 }
 0x171   : > { %v4076_v14 = vunpack.i.h.bf16 %v4074_v31  ;;  %v4075_v1 = vunpack.i.l.bf16 %v4074_v31  ;;  %v1913_v62 = vsel %vm1890_vm13, %v1876_v20, %v4080_v29  ;;  %v1914_v51 = vsel %vm1890_vm13, %v1877_v34, %v4081_v11 }
 0x172   : > { %v1938_v36 = vpack.c.bf16 %v1914_v51, %v1913_v62  ;;  %v4089_v53 = vpop.permute.xlu1 %4088 }
 0x173   : > { %v1911_v38 = vsel %vm1890_vm13, %v1874_v60, %v4075_v1  ;;  %v1912_v37 = vsel %vm1890_vm13, %v1875_v50, %v4076_v14  ;;  %v4091_v43 = vunpack.i.h.bf16 %v4089_v53  ;;  %v4090_v58 = vunpack.i.l.bf16 %v4089_v53 }
 0x174   : > { %v4084_v22 = vpop.permute.xlu0 %4083  ;;  %v1937_v7 = vpack.c.bf16 %v1912_v37, %v1911_v38 }
 0x175   : > { %v4086_v47 = vunpack.i.h.bf16 %v4084_v22  ;;  %v4085_v56 = vunpack.i.l.bf16 %v4084_v22  ;;  %v1769_v28 = vsel %vm1742_vm9, %v5675_v63, %v4090_v58  ;;  %v1770_v5 = vsel %vm1742_vm9, %v5678_v0, %v4091_v43 }
 0x176   : > { %3393 = vmatprep.mubr.msk.bf16.mxu1 %vm1972_vm14, %v1937_v7  ;;  %v4099_v18 = vpop.permute.xlu1 %4098 }
 0x177   : > { %3394 = vmatmul.mubr.msk.bf16.vlgmr.msra.gmra.mxu1 %vm1972_vm14, %v1938_v36  ;;  %v4101_v4 = vunpack.i.h.bf16 %v4099_v18  ;;  %v4100_v49 = vunpack.i.l.bf16 %v4099_v18  ;;  %v1767_v3 = vsel %vm1742_vm9, %v7354_v55, %v4085_v56  ;;  %v1768_v39 = vsel %vm1742_vm9, %v7355_v12, %v4086_v47  ;;  %v7357_v56 = vld [vmem:[#allocation39_spill] sm:$0xff] }
 0x178   : > { %v4094_v2 = vpop.permute.xlu0 %4093 }
 0x179   : > { %v4096_v15 = vunpack.i.h.bf16 %v4094_v2  ;;  %v4095_v54 = vunpack.i.l.bf16 %v4094_v2  ;;  %v1806_v9 = vsel %vm1779_vm10, %v1769_v28, %v4100_v49  ;;  %v1807_v30 = vsel %vm1779_vm10, %v1770_v5, %v4101_v4 }
 0x17a   : > { %v4109_v13 = vpop.permute.xlu1 %4108 }
 0x17b   : > { %v4111_v57 = vunpack.i.h.bf16 %v4109_v13  ;;  %v4110_v45 = vunpack.i.l.bf16 %v4109_v13  ;;  %v1804_v33 = vsel %vm1779_vm10, %v1767_v3, %v4095_v54  ;;  %v1805_v0 = vsel %vm1779_vm10, %v1768_v39, %v4096_v15 }
 0x17c   : > { %v4104_v19 = vpop.permute.xlu0 %4103 }
 0x17d   : > { %v4106_v10 = vunpack.i.h.bf16 %v4104_v19  ;;  %v4105_v48 = vunpack.i.l.bf16 %v4104_v19  ;;  %v1843_v41 = vsel %vm1816_vm11, %v1806_v9, %v4110_v45  ;;  %v1844_v17 = vsel %vm1816_vm11, %v1807_v30, %v4111_v57  ;;  %v7356_v19 = vld [vmem:[#allocation20_spill] sm:$0xff]  ;;  %v7358_v57 = vld [vmem:[#allocation43_spill] sm:$0xff] }
 0x17e   : > { %v4119_v44 = vpop.permute.xlu1 %4118 }
 0x17f   : > { %v4121_v23 = vunpack.i.h.bf16 %v4119_v44  ;;  %v4120_v27 = vunpack.i.l.bf16 %v4119_v44  ;;  %v1841_v24 = vsel %vm1816_vm11, %v1804_v33, %v4105_v48  ;;  %v1842_v46 = vsel %vm1816_vm11, %v1805_v0, %v4106_v10  ;;  %v7359_v44 = vld [vmem:[#allocation49_spill] sm:$0xff] }
 0x180   : > { %v4114_v42 = vpop.permute.xlu0 %4113 }
 0x181   : > { %v4116_v59 = vunpack.i.h.bf16 %v4114_v42  ;;  %v4115_v63 = vunpack.i.l.bf16 %v4114_v42  ;;  %v1880_v32 = vsel %vm1853_vm12, %v1843_v41, %v4120_v27  ;;  %v1881_v21 = vsel %vm1853_vm12, %v1844_v17, %v4121_v23 }
 0x183   : > { %v4129_v40 = vpop.permute.xlu1 %4128  ;;  %v1878_v35 = vsel %vm1853_vm12, %v1841_v24, %v4115_v63  ;;  %v1879_v52 = vsel %vm1853_vm12, %v1842_v46, %v4116_v59 }
 0x184   : > { %v4131_v26 = vunpack.i.h.bf16 %v4129_v40  ;;  %v4130_v61 = vunpack.i.l.bf16 %v4129_v40  ;;  %v4124_v16 = vpop.permute.xlu0 %4123 }
 0x185   : > { %v4126_v8 = vunpack.i.h.bf16 %v4124_v16  ;;  %v4125_v25 = vunpack.i.l.bf16 %v4124_v16 }
 0x186   : > { %v1917_v6 = vsel %vm1890_vm13, %v1880_v32, %v4130_v61  ;;  %v1918_v11 = vsel %vm1890_vm13, %v1881_v21, %v4131_v26 }
 0x187   : > { %v1940_v29 = vpack.c.bf16 %v1918_v11, %v1917_v6  ;;  %v1915_v31 = vsel %vm1890_vm13, %v1878_v35, %v4125_v25  ;;  %v1916_v20 = vsel %vm1890_vm13, %v1879_v52, %v4126_v8  ;;  %v4139_v34 = vpop.permute.xlu1 %4138 }
 0x188   : > { %v1939_v14 = vpack.c.bf16 %v1916_v20, %v1915_v31  ;;  %v4141_v50 = vunpack.i.h.bf16 %v4139_v34  ;;  %v4140_v36 = vunpack.i.l.bf16 %v4139_v34 }
 0x189   : > { %v4134_v1 = vpop.permute.xlu0 %4133 }
 0x18a   : > { %3397 = vmatprep.mubr.msk.bf16.mxu1 %vm1972_vm14, %v1939_v14  ;;  %v4136_v38 = vunpack.i.h.bf16 %v4134_v1  ;;  %v4135_v37 = vunpack.i.l.bf16 %v4134_v1  ;;  %v1773_v47 = vsel %vm1742_vm9, %v7356_v19, %v4140_v36  ;;  %v1774_v4 = vsel %vm1742_vm9, %v7357_v56, %v4141_v50 }
 0x18b   : > { %3398 = vmatmul.mubr.msk.bf16.gmra.mxu1 %vm1972_vm14, %v1940_v29  ;;  %v4149_v62 = vpop.permute.xlu1 %4148  ;;  %v2388_v29 = vlaneseq }
 0x18c   : > { %v4151_v22 = vunpack.i.h.bf16 %v4149_v62  ;;  %v4150_v7 = vunpack.i.l.bf16 %v4149_v62  ;;  %v1771_v45 = vsel %vm1742_vm9, %v7358_v57, %v4135_v37  ;;  %v1772_v28 = vsel %vm1742_vm9, %v7359_v44, %v4136_v38 }
 0x18d   : > { %v4144_v51 = vpop.permute.xlu0 %4143  ;;  %v6342_v50 = vshrl.u32 %v2388_v29, 7 }
 0x18e   : > { %v4146_v18 = vunpack.i.h.bf16 %v4144_v51  ;;  %v4145_v2 = vunpack.i.l.bf16 %v4144_v51  ;;  %v1810_v48 = vsel %vm1779_vm10, %v1773_v47, %v4150_v7  ;;  %v1811_v42 = vsel %vm1779_vm10, %v1774_v4, %v4151_v22  ;;  %v7360_v7 = vld [vmem:[#allocation48_spill] sm:$0xff]  ;;  %v7362_v47 = vld [vmem:[#allocation29_spill] sm:$0xff]  ;;  %v7363_v4 = vld [vmem:[#allocation55_spill] sm:$0xff] }
 0x18f   : > { %v4159_v60 = vpop.permute.xlu1 %4158 }
 0x190   : > { %v4161_v13 = vunpack.i.h.bf16 %v4159_v60  ;;  %v4160_v43 = vunpack.i.l.bf16 %v4159_v60  ;;  %v1808_v12 = vsel %vm1779_vm10, %v1771_v45, %v4145_v2  ;;  %v1809_v39 = vsel %vm1779_vm10, %v1772_v28, %v4146_v18  ;;  %v7361_v2 = vld [vmem:[#allocation53_spill] sm:$0xff] }
 0x191   : > { %v4154_v53 = vpop.permute.xlu0 %4153 }
 0x192   : > { %v4156_v49 = vunpack.i.h.bf16 %v4154_v53  ;;  %v4155_v15 = vunpack.i.l.bf16 %v4154_v53  ;;  %v1847_v23 = vsel %vm1816_vm11, %v1810_v48, %v4160_v43  ;;  %v1848_v27 = vsel %vm1816_vm11, %v1811_v42, %v4161_v13 }
 0x194   : > { %v4169_v58 = vpop.permute.xlu1 %4168  ;;  %v1845_v30 = vsel %vm1816_vm11, %v1808_v12, %v4155_v15  ;;  %v1846_v59 = vsel %vm1816_vm11, %v1809_v39, %v4156_v49 }
 0x195   : > { %v4164_v54 = vpop.permute.xlu0 %4163  ;;  %v4171_v5 = vunpack.i.h.bf16 %v4169_v58  ;;  %v4170_v10 = vunpack.i.l.bf16 %v4169_v58 }
 0x196   : > { %v4166_v55 = vunpack.i.h.bf16 %v4164_v54  ;;  %v4165_v3 = vunpack.i.l.bf16 %v4164_v54 }
 0x197   : > { %v1884_v41 = vsel %vm1853_vm12, %v1847_v23, %v4170_v10  ;;  %v1885_v17 = vsel %vm1853_vm12, %v1848_v27, %v4171_v5 }
 0x198   : > { %v4179_v9 = vpop.permute.xlu1 %4178  ;;  %v1882_v46 = vsel %vm1853_vm12, %v1845_v30, %v4165_v3  ;;  %v1883_v26 = vsel %vm1853_vm12, %v1846_v59, %v4166_v55 }
 0x199   : > { %v4181_v63 = vunpack.i.h.bf16 %v4179_v9  ;;  %v4180_v33 = vunpack.i.l.bf16 %v4179_v9  ;;  %v4174_v0 = vpop.permute.xlu0 %4173 }
 0x19a   : > { %v4176_v40 = vunpack.i.h.bf16 %v4174_v0  ;;  %v4175_v24 = vunpack.i.l.bf16 %v4174_v0 }
 0x19b   : > { %v1921_v61 = vsel %vm1890_vm13, %v1884_v41, %v4180_v33  ;;  %v1922_v16 = vsel %vm1890_vm13, %v1885_v17, %v4181_v63 }
 0x19c   : > { %v1942_v32 = vpack.c.bf16 %v1922_v16, %v1921_v61  ;;  %v1919_v21 = vsel %vm1890_vm13, %v1882_v46, %v4175_v24  ;;  %v1920_v8 = vsel %vm1890_vm13, %v1883_v26, %v4176_v40  ;;  %v4189_v25 = vpop.permute.xlu1 %4188  ;;  %v6369_v26 = vadd.s32 16, %v6342_v50 }
 0x19d   : > { %v1941_v35 = vpack.c.bf16 %v1920_v8, %v1919_v21  ;;  %v4184_v52 = vpop.permute.xlu0 %4183  ;;  %v4191_v20 = vunpack.i.h.bf16 %v4189_v25  ;;  %v4190_v34 = vunpack.i.l.bf16 %v4189_v25  ;;  %v6372_v16 = vadd.s32 24, %v6342_v50 }
 0x19e   : > { %v4186_v1 = vunpack.i.h.bf16 %v4184_v52  ;;  %v4185_v62 = vunpack.i.l.bf16 %v4184_v52  ;;  %v2425_v21 = vcvt.s32.f32 %v6342_v50  ;;  %v2427_v8 = vcvt.s32.f32 %v6369_v26 }
 0x19f   : > { %3401 = vmatprep.mubr.msk.bf16.mxu1 %vm1972_vm14, %v1941_v35  ;;  %v1777_v18 = vsel %vm1742_vm9, %v7360_v7, %v4190_v34  ;;  %v1778_v13 = vsel %vm1742_vm9, %v7361_v2, %v4191_v20  ;;  %v2428_v25 = vcvt.s32.f32 %v6372_v16  ;;  %v6384_v34 = vadd.s32 48, %v6342_v50 }
 0x1a0   : > { %3402 = vmatmul.mubr.msk.bf16.gmra.mxu1 %vm1972_vm14, %v1942_v32  ;;  %v4199_v6 = vpop.permute.xlu1 %4198  ;;  %v1775_v56 = vsel %vm1742_vm9, %v7362_v47, %v4185_v62  ;;  %v1776_v49 = vsel %vm1742_vm9, %v7363_v4, %v4186_v1  ;;  %v6375_v32 = vadd.s32 8, %v6342_v50  ;;  %v2461_v52 = vadd.f32 0.5, %v2425_v21 }
 0x1a1   : > { %v4194_v11 = vpop.permute.xlu0 %4193  ;;  %v4201_v51 = vunpack.i.h.bf16 %v4199_v6  ;;  %v4200_v60 = vunpack.i.l.bf16 %v4199_v6  ;;  %v2463_v6 = vadd.f32 0.5, %v2427_v8 }
 0x1a2   : > { %v4196_v36 = vunpack.i.h.bf16 %v4194_v11  ;;  %v4195_v53 = vunpack.i.l.bf16 %v4194_v11  ;;  %v2426_v35 = vcvt.s32.f32 %v6375_v32  ;;  %v2464_v11 = vadd.f32 0.5, %v2428_v25 }
 0x1a3   : > { %v1814_v57 = vsel %vm1779_vm10, %v1777_v18, %v4200_v60  ;;  %v1815_v45 = vsel %vm1779_vm10, %v1778_v13, %v4201_v51  ;;  %v2499_v20 = vmul.f32 0.055555556, %v2463_v6  ;;  %v6395_v18 = vadd.s32 40, %v6342_v50 }
 0x1a4   : > { %v4209_v31 = vpop.permute.xlu1 %4208  ;;  %v1812_v5 = vsel %vm1779_vm10, %v1775_v56, %v4195_v53  ;;  %v1813_v10 = vsel %vm1779_vm10, %v1776_v49, %v4196_v36  ;;  %v2462_v29 = vadd.f32 0.5, %v2426_v35  ;;  %v2500_v1 = vmul.f32 0.055555556, %v2464_v11 }
 0x1a5   : > { %v4204_v14 = vpop.permute.xlu0 %4203  ;;  %v4211_v38 = vunpack.i.h.bf16 %v4209_v31  ;;  %v4210_v37 = vunpack.i.l.bf16 %v4209_v31  ;;  %v2497_v31 = vmul.f32 0.055555556, %v2461_v52  ;;  %v2535_v60 = vfloor.f32 %v2499_v20 }
 0x1a6   : > { %v4206_v43 = vunpack.i.h.bf16 %v4204_v14  ;;  %v4205_v58 = vunpack.i.l.bf16 %v4204_v14  ;;  %v6387_v14 = vadd.s32 32, %v6342_v50  ;;  %v2498_v62 = vmul.f32 0.055555556, %v2462_v29 }
 0x1a7   : > { %v1851_v48 = vsel %vm1816_vm11, %v1814_v57, %v4210_v37  ;;  %v1852_v42 = vsel %vm1816_vm11, %v1815_v45, %v4211_v38  ;;  %v2533_v51 = vfloor.f32 %v2497_v31  ;;  %v2431_v36 = vcvt.s32.f32 %v6384_v34 }
 0x1a8   : > { %v4219_v22 = vpop.permute.xlu1 %4218  ;;  %v1849_v3 = vsel %vm1816_vm11, %v1812_v5, %v4205_v58  ;;  %v1850_v12 = vsel %vm1816_vm11, %v1813_v10, %v4206_v43  ;;  %v2429_v53 = vcvt.s32.f32 %v6387_v14  ;;  %v6392_v38 = vadd.s32 56, %v6342_v50 }
 0x1a9   : > { %v4214_v19 = vpop.permute.xlu0 %4213  ;;  %v4221_v15 = vunpack.i.h.bf16 %v4219_v22  ;;  %v4220_v54 = vunpack.i.l.bf16 %v4219_v22  ;;  %v2536_v37 = vfloor.f32 %v2500_v1  ;;  %v2534_v22 = vfloor.f32 %v2498_v62 }
 0x1aa   : > { %v4216_v44 = vunpack.i.h.bf16 %v4214_v19  ;;  %v4215_v28 = vunpack.i.l.bf16 %v4214_v19  ;;  %v3423_v7 = vtrunc.f32 %v2533_v51  ;;  %v3427_v2 = vtrunc.f32 %v2535_v60 }
 0x1ab   : > { %v1888_v9 = vsel %vm1853_vm12, %v1851_v48, %v4220_v54  ;;  %v1889_v30 = vsel %vm1853_vm12, %v1852_v42, %v4221_v15  ;;  %v2467_v13 = vadd.f32 0.5, %v2431_v36  ;;  %v2465_v43 = vadd.f32 0.5, %v2429_v53 }
 0x1ac   : > { %v4229_v55 = vpop.permute.xlu1 %4228  ;;  %v1886_v33 = vsel %vm1853_vm12, %v1849_v3, %v4215_v28  ;;  %v1887_v0 = vsel %vm1853_vm12, %v1850_v12, %v4216_v44  ;;  %v2432_v58 = vcvt.s32.f32 %v6392_v38  ;;  %v3429_v19 = vtrunc.f32 %v2536_v37 }
 0x1ad   : > { %v4231_v39 = vunpack.i.h.bf16 %v4229_v55  ;;  %v4230_v23 = vunpack.i.l.bf16 %v4229_v55  ;;  %v4224_v27 = vpop.permute.xlu0 %4223  ;;  %v3425_v47 = vtrunc.f32 %v2534_v22  ;;  %v3424_v56 = vcvt.f32.s32 %v3423_v7 }
 0x1ae   : > { %v4226_v59 = vunpack.i.h.bf16 %v4224_v27  ;;  %v4225_v63 = vunpack.i.l.bf16 %v4224_v27  ;;  %v2430_v4 = vcvt.s32.f32 %v6395_v18  ;;  %v3428_v49 = vcvt.f32.s32 %v3427_v2 }
 0x1af   : > { %v1925_v41 = vsel %vm1890_vm13, %v1888_v9, %v4230_v23  ;;  %v1926_v17 = vsel %vm1890_vm13, %v1889_v30, %v4231_v39  ;;  %v2503_v15 = vmul.f32 0.055555556, %v2467_v13  ;;  %v2501_v54 = vmul.f32 0.055555556, %v2465_v43 }
 0x1b0   : > { %v1944_v40 = vpack.c.bf16 %v1926_v17, %v1925_v41  ;;  %v1923_v24 = vsel %vm1890_vm13, %v1886_v33, %v4225_v63  ;;  %v1924_v46 = vsel %vm1890_vm13, %v1887_v0, %v4226_v59  ;;  %v2468_v57 = vadd.f32 0.5, %v2432_v58 }
 0x1b1   : > { %v1943_v61 = vpack.c.bf16 %v1924_v46, %v1923_v24  ;;  %v3430_v45 = vcvt.f32.s32 %v3429_v19  ;;  %v3426_v44 = vcvt.f32.s32 %v3425_v47  ;;  %v2605_v28 = vmul.u32 18, %v3424_v56 }
 0x1b2   : > { %v2466_v5 = vadd.f32 0.5, %v2430_v4  ;;  %v2607_v10 = vmul.u32 18, %v3428_v49  ;;  %v2539_v48 = vfloor.f32 %v2503_v15  ;;  %v2537_v42 = vfloor.f32 %v2501_v54 }
 0x1b3   : > { %3405 = vmatprep.mubr.msk.bf16.mxu1 %vm1972_vm14, %v1943_v61  ;;  %v2504_v55 = vmul.f32 0.055555556, %v2468_v57  ;;  %v2608_v3 = vmul.u32 18, %v3430_v45  ;;  %v2606_v12 = vmul.u32 18, %v3426_v44  ;;  %v2641_v39 = vsub.s32 %v6342_v50, %v2605_v28 }
 0x1b4   : > { %3406 = vmatmul.mubr.msk.bf16.gmra.mxu1 %vm1972_vm14, %v1944_v40  ;;  %v2502_v23 = vmul.f32 0.055555556, %v2466_v5  ;;  %v2643_v27 = vsub.s32 %v6369_v26, %v2607_v10  ;;  %v3435_v9 = vtrunc.f32 %v2539_v48  ;;  %v3431_v30 = vtrunc.f32 %v2537_v42 }
 0x1b5   : > { %v2540_v59 = vfloor.f32 %v2504_v55  ;;  %v6402_v63 = vadd.s32 64, %v6342_v50  ;;  %v2644_v33 = vsub.s32 %v6372_v16, %v2608_v3  ;;  %v2642_v0 = vsub.s32 %v6375_v32, %v2606_v12 }
 0x1b6   : > { %vm2677_vm15 = vcmp.lt.s32.totalorder %v2641_v39, 16  ;;  %v2538_v41 = vfloor.f32 %v2502_v23  ;;  %v6408_v17 = vadd.s32 80, %v6342_v50  ;;  %v6411_v40 = vadd.s32 88, %v6342_v50 }
 0x1b7   : > { %vm6413_vm0 = vcmp.lt.s32.totalorder %v2643_v27, 16  ;;  %v3436_v46 = vcvt.f32.s32 %v3435_v9  ;;  %v3432_v26 = vcvt.f32.s32 %v3431_v30  ;;  %v3437_v61 = vtrunc.f32 %v2540_v59 }
 0x1b8   : > { %v2433_v16 = vcvt.s32.f32 %v6402_v63  ;;  %v4254_v32 = vmov 0.0   ;;  %vm6419_vm2 = vcmp.lt.s32.totalorder %v2644_v33, 16  ;;  %vm6423_vm3 = vcmp.lt.s32.totalorder %v2642_v0, 16 }
 0x1b9   : > { %v3167_v21 = vsel %vm2677_vm15, 1.0, %v4254_v32  ;;  %v3433_v52 = vtrunc.f32 %v2538_v41  ;;  %v2435_v6 = vcvt.s32.f32 %v6408_v17  ;;  %v2436_v11 = vcvt.s32.f32 %v6411_v40 }
 0x1ba   : > { %v6435_v29 = vadd.s32 72, %v6342_v50  ;;  %v3169_v20 = vsel %vm6413_vm0, 1.0, %v4254_v32  ;;  %v2611_v62 = vmul.u32 18, %v3436_v46  ;;  %v2609_v51 = vmul.u32 18, %v3432_v26 }
 0x1bb   : > { %v3438_v60 = vcvt.f32.s32 %v3437_v61  ;;  %v2469_v36 = vadd.f32 0.5, %v2433_v16  ;;  %v3170_v22 = vsel %vm6419_vm2, 1.0, %v4254_v32  ;;  %v3168_v7 = vsel %vm6423_vm3, 1.0, %v4254_v32 }
 0x1bc   : > { %v3434_v13 = vcvt.f32.s32 %v3433_v52  ;;  %v2471_v43 = vadd.f32 0.5, %v2435_v6  ;;  %v2472_v58 = vadd.f32 0.5, %v2436_v11  ;;  %v2434_v19 = vcvt.s32.f32 %v6435_v29 }
 0x1bd   : > { %v2647_v49 = vsub.s32 %v6384_v34, %v2611_v62  ;;  %v2645_v15 = vsub.s32 %v6387_v14, %v2609_v51  ;;  %v2612_v54 = vmul.u32 18, %v3438_v60  ;;  %v2505_v57 = vmul.f32 0.055555556, %v2469_v36 }
 0x1be   : > { %v2610_v10 = vmul.u32 18, %v3434_v13  ;;  %v2507_v48 = vmul.f32 0.055555556, %v2471_v43  ;;  %v2508_v42 = vmul.f32 0.055555556, %v2472_v58  ;;  %v2470_v55 = vadd.f32 0.5, %v2434_v19 }
 0x1bf   : > { %vm6459_vm4 = vcmp.lt.s32.totalorder %v2645_v15, 16  ;;  %v2648_v27 = vsub.s32 %v6392_v38, %v2612_v54  ;;  %v2541_v9 = vfloor.f32 %v2505_v57  ;;  %vm2683_vm5 = vcmp.lt.s32.totalorder %v2647_v49, 16 }
 0x1c0   : > { %v2646_v46 = vsub.s32 %v6395_v18, %v2610_v10  ;;  %v2543_v26 = vfloor.f32 %v2507_v48  ;;  %v2506_v8 = vmul.f32 0.055555556, %v2470_v55  ;;  %v3171_v6 = vsel %vm6459_vm4, 1.0, %v4254_v32 }
 0x1c1   : > { %v3439_v52 = vtrunc.f32 %v2541_v9  ;;  %vm2684_vm7 = vcmp.lt.s32.totalorder %v2648_v27, 16  ;;  %v6475_v62 = vadd.s32 96, %v6342_v50  ;;  %v3173_v60 = vsel %vm2683_vm5, 1.0, %v4254_v32 }
 0x1c2   : > { %v3443_v18 = vtrunc.f32 %v2543_v26  ;;  %vm2682_vm8 = vcmp.lt.s32.totalorder %v2646_v46, 16  ;;  %v6490_v49 = vadd.s32 104, %v6342_v50 }
 0x1c3   : > { %v3172_v43 = vsel %vm2682_vm8, 1.0, %v4254_v32 }
 0x1c4   : > { %v3444_v58 = vcvt.f32.s32 %v3443_v18  ;;  %v2438_v23 = vcvt.s32.f32 %v6490_v49 }
 0x1d4   : > { %v3375_v35 = vpop.f32.mrf.mxu0 }
 0x1d5   : > { %v3207_v31 = vpack.c.bf16 %v3375_v35, %v3375_v35  ;;  %v2787_v47 = vmul.f32 %v3375_v35, %v3169_v20 }
 0x1d6   : > { %v2064_v1 = vpop.f32.mrf.mxu0 }
 0x1d7   : > { %2354 = vst.msk [vmem:[%s6430_s14 + $0x14] sm:$0xf] %vm2351_vm1, %v3207_v31  ;;  %v3205_v53 = vpack.c.bf16 %v2064_v1, %v2064_v1  ;;  %v2785_v37 = vmul.f32 %v3167_v21, %v2064_v1  ;;  %v2902_v3 = vmul.f32 %v3375_v35, %v2787_v47  ;;  %v2824_v30 = vsel %vm1631_vm6, %v2787_v47, 0.0 }
 0x1d8   : > { %v3376_v2 = vpop.f32.mrf.mxu0  ;;  %v2544_v21 = vfloor.f32 %v2508_v42 }
 0x1d9   : > { %2352 = vst.msk [vmem:[%s6430_s14 + $0xc] sm:$0xf] %vm2351_vm1, %v3205_v53  ;;  %v3208_v56 = vpack.c.bf16 %v3376_v2, %v3376_v2  ;;  %v2900_v45 = vmul.f32 %v2785_v37, %v2064_v1  ;;  %v2788_v44 = vmul.f32 %v3376_v2, %v3170_v22  ;;  %v2821_v12 = vsel %vm1631_vm6, %v2785_v37, 0.0 }
 0x1da   : > { %v2067_v4 = vpop.f32.mrf.mxu0  ;;  %v2939_v61 = vsel %vm1631_vm6, %v2902_v3, 0.0  ;;  %v3445_v20 = vtrunc.f32 %v2544_v21  ;;  %v2542_v1 = vfloor.f32 %v2506_v8  ;;  %v3174_v53 = vsel %vm2684_vm7, 1.0, %v4254_v32 }
 0x1db   : > { %2355 = vst.msk [vmem:[%s6430_s14 + $0x18] sm:$0xf] %vm2351_vm1, %v3208_v56  ;;  %v3206_v28 = vpack.c.bf16 %v2067_v4, %v2067_v4  ;;  %v2786_v5 = vmul.f32 %v3168_v7, %v2067_v4  ;;  %v2936_v59 = vsel %vm1631_vm6, %v2900_v45, 0.0  ;;  %v2903_v33 = vmul.f32 %v3376_v2, %v2788_v44 }
 0x1dc   : > { %v2826_v16 = vsel %vm1631_vm6, %v2788_v44, 0.0  ;;  %v3440_v37 = vcvt.f32.s32 %v3439_v52  ;;  %v6480_v22 = vadd.s32 112, %v6342_v50  ;;  %v6483_v7 = vadd.s32 120, %v6342_v50 }
 0x1dd   : > { %2353 = vst.msk [vmem:[%s6430_s14 + $0x10] sm:$0xf] %vm2351_vm1, %v3206_v28  ;;  %v2822_v34 = vsel %vm1631_vm6, %v2786_v5, 0.0  ;;  %v2901_v14 = vmul.f32 %v2786_v5, %v2067_v4  ;;  %v2941_v35 = vsel %vm1631_vm6, %v2903_v33, 0.0  ;;  %v3446_v47 = vcvt.f32.s32 %v3445_v20 }
 0x1de   : > { %v2823_v39 = vadd.f32 %v2822_v34, %v2821_v12  ;;  %v3441_v56 = vtrunc.f32 %v2542_v1  ;;  %v2437_v4 = vcvt.s32.f32 %v6475_v62  ;;  %v2613_v5 = vmul.u32 18, %v3440_v37 }
 0x1df   : > { %v2937_v0 = vsel %vm1631_vm6, %v2901_v14, 0.0  ;;  %v2439_v10 = vcvt.s32.f32 %v6480_v22  ;;  %v2440_v48 = vcvt.s32.f32 %v6483_v7  ;;  %v2615_v14 = vmul.u32 18, %v3444_v58 }
 0x1e0   : > { %v2825_v41 = vadd.f32 %v2824_v30, %v2823_v39  ;;  %v2938_v24 = vadd.f32 %v2937_v0, %v2936_v59  ;;  %v2473_v39 = vadd.f32 0.5, %v2437_v4  ;;  %v3442_v59 = vcvt.f32.s32 %v3441_v56 }
 0x1e1   : > { %v2649_v0 = vsub.s32 %v6402_v63, %v2613_v5  ;;  %v2651_v20 = vsub.s32 %v6408_v17, %v2615_v14 }
 0x1e2   : > { %v2940_v38 = vadd.f32 %v2939_v61, %v2938_v24  ;;  %v2827_v25 = vadd.f32 %v2826_v16, %v2825_v41  ;;  %v2616_v41 = vmul.u32 18, %v3446_v47  ;;  %v2475_v24 = vadd.f32 0.5, %v2439_v10 }
 0x1e3   : > { %v2476_v16 = vadd.f32 0.5, %v2440_v48  ;;  %vm2685_vm9 = vcmp.lt.s32.totalorder %v2649_v0, 16  ;;  %vm2687_vm10 = vcmp.lt.s32.totalorder %v2651_v20, 16 }
 0x1e4   : > { %v2942_v11 = vadd.f32 %v2941_v35, %v2940_v38  ;;  %v2509_v38 = vmul.f32 0.055555556, %v2473_v39  ;;  %v2511_v63 = vmul.f32 0.055555556, %v2475_v24  ;;  %v2652_v1 = vsub.s32 %v6411_v40, %v2616_v41 }
 0x1e5   : > { %v3177_v40 = vsel %vm2687_vm10, 1.0, %v4254_v32 }
 0x1e6   : > { %v3379_v31 = vpop.f32.mrf.mxu0  ;;  %vm2688_vm11 = vcmp.lt.s32.totalorder %v2652_v1, 16 }
 0x1e7   : > { %v3211_v51 = vpack.c.bf16 %v3379_v31, %v3379_v31  ;;  %v2791_v15 = vmul.f32 %v3379_v31, %v3173_v60  ;;  %v2545_v60 = vfloor.f32 %v2509_v38 }
 0x1e8   : > { %v2080_v36 = vpop.f32.mrf.mxu0 }
 0x1e9   : > { %2358 = vst.msk [vmem:[%s6430_s14 + $0x24] sm:$0xf] %vm2351_vm1, %v3211_v51  ;;  %v3209_v2 = vpack.c.bf16 %v2080_v36, %v2080_v36  ;;  %v2789_v13 = vmul.f32 %v3171_v6, %v2080_v36  ;;  %v2906_v27 = vmul.f32 %v3379_v31, %v2791_v15  ;;  %v2832_v46 = vsel %vm1631_vm6, %v2791_v15, 0.0 }
 0x1ea   : > { %v3380_v19 = vpop.f32.mrf.mxu0  ;;  %v2614_v6 = vmul.u32 18, %v3442_v59  ;;  %v3447_v58 = vtrunc.f32 %v2545_v60 }
 0x1eb   : > { %2356 = vst.msk [vmem:[%s6430_s14 + $0x1c] sm:$0xf] %vm2351_vm1, %v3209_v2  ;;  %v2828_v54 = vsel %vm1631_vm6, %v2789_v13, 0.0  ;;  %v2904_v57 = vmul.f32 %v2789_v13, %v2080_v36  ;;  %v3212_v45 = vpack.c.bf16 %v3380_v19, %v3380_v19  ;;  %v2792_v55 = vmul.f32 %v3380_v19, %v3174_v53 }
 0x1ec   : > { %v2829_v44 = vadd.f32 %v2828_v54, %v2827_v25  ;;  %v2083_v28 = vpop.f32.mrf.mxu0  ;;  %v2474_v25 = vadd.f32 0.5, %v2438_v23  ;;  %v2947_v35 = vsel %vm1631_vm6, %v2906_v27, 0.0  ;;  %v2512_v36 = vmul.f32 0.055555556, %v2476_v16 }
 0x1ed   : > { %v2943_v42 = vsel %vm1631_vm6, %v2904_v57, 0.0  ;;  %2359 = vst.msk [vmem:[%s6430_s14 + $0x28] sm:$0xf] %vm2351_vm1, %v3212_v45  ;;  %v3210_v3 = vpack.c.bf16 %v2083_v28, %v2083_v28  ;;  %v2790_v12 = vmul.f32 %v3172_v43, %v2083_v28  ;;  %v2907_v26 = vmul.f32 %v3380_v19, %v2792_v55 }
 0x1ee   : > { %v2944_v34 = vadd.f32 %v2943_v42, %v2942_v11  ;;  %v2834_v52 = vsel %vm1631_vm6, %v2792_v55, 0.0  ;;  %v2510_v53 = vmul.f32 0.055555556, %v2474_v25  ;;  %v2650_v37 = vsub.s32 %v6435_v29, %v2614_v6 }
 0x1ef   : > { %2357 = vst.msk [vmem:[%s6430_s14 + $0x20] sm:$0xf] %vm2351_vm1, %v3210_v3  ;;  %v2830_v9 = vsel %vm1631_vm6, %v2790_v12, 0.0  ;;  %v2905_v30 = vmul.f32 %v2790_v12, %v2083_v28  ;;  %v2949_v31 = vsel %vm1631_vm6, %v2907_v26, 0.0  ;;  %v2547_v2 = vfloor.f32 %v2511_v63 }
 0x1f0   : > { %v2831_v33 = vadd.f32 %v2830_v9, %v2829_v44  ;;  %v3175_v13 = vsel %vm2685_vm9, 1.0, %v4254_v32  ;;  %v2548_v19 = vfloor.f32 %v2512_v36  ;;  %v2546_v47 = vfloor.f32 %v2510_v53 }
 0x1f1   : > { %v2945_v61 = vsel %vm1631_vm6, %v2905_v30, 0.0  ;;  %vm2686_vm12 = vcmp.lt.s32.totalorder %v2650_v37, 16  ;;  %v3451_v4 = vtrunc.f32 %v2547_v2  ;;  %v3178_v54 = vsel %vm2688_vm11, 1.0, %v4254_v32 }
 0x1f2   : > { %v2833_v21 = vadd.f32 %v2832_v46, %v2831_v33  ;;  %v2946_v8 = vadd.f32 %v2945_v61, %v2944_v34  ;;  %v3176_v45 = vsel %vm2686_vm12, 1.0, %v4254_v32  ;;  %v3448_v44 = vcvt.f32.s32 %v3447_v58 }
 0x1f3   : > { %v3453_v28 = vtrunc.f32 %v2548_v19  ;;  %v3449_v5 = vtrunc.f32 %v2546_v47  ;;  %v3452_v34 = vcvt.f32.s32 %v3451_v4  ;;  %v6544_v58 = vadd.s32 144, %v6342_v50 }
 0x1f4   : > { %v2948_v11 = vadd.f32 %v2947_v35, %v2946_v8  ;;  %v2835_v18 = vadd.f32 %v2834_v52, %v2833_v21  ;;  %v2617_v30 = vmul.u32 18, %v3448_v44 }
 0x1f5   : > { %v3454_v59 = vcvt.f32.s32 %v3453_v28  ;;  %v3450_v24 = vcvt.f32.s32 %v3449_v5  ;;  %v2619_v21 = vmul.u32 18, %v3452_v34  ;;  %v2443_v44 = vcvt.s32.f32 %v6544_v58 }
 0x1f6   : > { %v2950_v51 = vadd.f32 %v2949_v31, %v2948_v11  ;;  %v2653_v6 = vsub.s32 %v6475_v62, %v2617_v30  ;;  %v6554_v28 = vadd.s32 128, %v6342_v50 }
 0x1f7   : > { %v2620_v25 = vmul.u32 18, %v3454_v59  ;;  %v2618_v11 = vmul.u32 18, %v3450_v24  ;;  %v2655_v20 = vsub.s32 %v6480_v22, %v2619_v21  ;;  %v2479_v59 = vadd.f32 0.5, %v2443_v44 }
 0x1f8   : > { %vm2689_vm13 = vcmp.lt.s32.totalorder %v2653_v6, 16  ;;  %v6574_v24 = vadd.s32 176, %v6342_v50  ;;  %v6589_v6 = vadd.s32 168, %v6342_v50 }
 0x1f9   : > { %v2654_v60 = vsub.s32 %v6490_v49, %v2618_v11  ;;  %vm2691_vm14 = vcmp.lt.s32.totalorder %v2655_v20, 16  ;;  %v3179_v53 = vsel %vm2689_vm13, 1.0, %v4254_v32  ;;  %v6592_v11 = vadd.s32 208, %v6342_v50 }
 0x1fa   : > { %v3181_v37 = vsel %vm2691_vm14, 1.0, %v4254_v32  ;;  %v6597_v20 = vadd.s32 192, %v6342_v50 }
 0x1fb   : > { %vm2690_vm0 = vcmp.lt.s32.totalorder %v2654_v60, 16 }
 0x1fc   : > { %v3180_v49 = vsel %vm2690_vm0, 1.0, %v4254_v32 }
 0x1fd   : > { %v3383_v43 = vpop.f32.mrf.mxu0 }
 0x1fe   : > { %v3215_v17 = vpack.c.bf16 %v3383_v43, %v3383_v43  ;;  %v2795_v10 = vmul.f32 %v3383_v43, %v3177_v40 }
 0x1ff   : > { %v2096_v56 = vpop.f32.mrf.mxu0 }
 0x200   : > { %2362 = vst.msk [vmem:[%s6430_s14 + $0x34] sm:$0xf] %vm2351_vm1, %v3215_v17  ;;  %v3213_v15 = vpack.c.bf16 %v2096_v56, %v2096_v56  ;;  %v2793_v29 = vmul.f32 %v3175_v13, %v2096_v56  ;;  %v2910_v33 = vmul.f32 %v3383_v43, %v2795_v10  ;;  %v2840_v26 = vsel %vm1631_vm6, %v2795_v10, 0.0 }
 0x201   : > { %v3384_v57 = vpop.f32.mrf.mxu0 }
 0x202   : > { %2360 = vst.msk [vmem:[%s6430_s14 + $0x2c] sm:$0xf] %vm2351_vm1, %v3213_v15  ;;  %v2836_v48 = vsel %vm1631_vm6, %v2793_v29, 0.0  ;;  %v2908_v42 = vmul.f32 %v2793_v29, %v2096_v56  ;;  %v3216_v55 = vpack.c.bf16 %v3384_v57, %v3384_v57  ;;  %v2796_v39 = vmul.f32 %v3384_v57, %v3178_v54 }
 0x203   : > { %v2837_v3 = vadd.f32 %v2836_v48, %v2835_v18  ;;  %v2099_v12 = vpop.f32.mrf.mxu0  ;;  %v2955_v35 = vsel %vm1631_vm6, %v2910_v33, 0.0 }
 0x204   : > { %v2951_v14 = vsel %vm1631_vm6, %v2908_v42, 0.0  ;;  %2363 = vst.msk [vmem:[%s6430_s14 + $0x38] sm:$0xf] %vm2351_vm1, %v3216_v55  ;;  %v3214_v23 = vpack.c.bf16 %v2099_v12, %v2099_v12  ;;  %v2794_v27 = vmul.f32 %v3176_v45, %v2099_v12  ;;  %v2911_v61 = vmul.f32 %v3384_v57, %v2796_v39 }
 0x205   : > { %v2952_v9 = vadd.f32 %v2951_v14, %v2950_v51  ;;  %v2842_v52 = vsel %vm1631_vm6, %v2796_v39, 0.0  ;;  %v2656_v51 = vsub.s32 %v6483_v7, %v2620_v25  ;;  %v6560_v42 = vadd.s32 136, %v6342_v50 }
 0x206   : > { %2361 = vst.msk [vmem:[%s6430_s14 + $0x30] sm:$0xf] %vm2351_vm1, %v3214_v23  ;;  %v2838_v0 = vsel %vm1631_vm6, %v2794_v27, 0.0  ;;  %v2909_v41 = vmul.f32 %v2794_v27, %v2099_v12  ;;  %v2957_v31 = vsel %vm1631_vm6, %v2911_v61, 0.0  ;;  %v2441_v23 = vcvt.s32.f32 %v6554_v28 }
 0x207   : > { %v2839_v46 = vadd.f32 %v2838_v0, %v2837_v3  ;;  %vm2692_vm15 = vcmp.lt.s32.totalorder %v2656_v51, 16  ;;  %v6566_v27 = vadd.s32 152, %v6342_v50  ;;  %v2442_v33 = vcvt.s32.f32 %v6560_v42 }
 0x208   : > { %v2953_v16 = vsel %vm1631_vm6, %v2909_v41, 0.0  ;;  %v3182_v7 = vsel %vm2692_vm15, 1.0, %v4254_v32  ;;  %v2477_v61 = vadd.f32 0.5, %v2441_v23 }
 0x209   : > { %v2841_v8 = vadd.f32 %v2840_v26, %v2839_v46  ;;  %v2954_v38 = vadd.f32 %v2953_v16, %v2952_v9  ;;  %v6577_v46 = vadd.s32 160, %v6342_v50  ;;  %v2444_v21 = vcvt.s32.f32 %v6566_v27 }
 0x20a   : > { %v2478_v25 = vadd.f32 0.5, %v2442_v33 }
 0x20b   : > { %v2956_v18 = vadd.f32 %v2955_v35, %v2954_v38  ;;  %v2843_v63 = vadd.f32 %v2842_v52, %v2841_v8  ;;  %v2515_v8 = vmul.f32 0.055555556, %v2479_v59  ;;  %v6584_v38 = vadd.s32 184, %v6342_v50 }
 0x20c   : > { %v2447_v35 = vcvt.s32.f32 %v6574_v24  ;;  %v2445_v52 = vcvt.s32.f32 %v6577_v46 }
 0x20d   : > { %v2958_v1 = vadd.f32 %v2957_v31, %v2956_v18  ;;  %v3387_v36 = vpop.f32.mrf.mxu0  ;;  %v2480_v31 = vadd.f32 0.5, %v2444_v21  ;;  %v2551_v51 = vfloor.f32 %v2515_v8  ;;  %v2448_v60 = vcvt.s32.f32 %v6584_v38 }
 0x20e   : > { %v3219_v62 = vpack.c.bf16 %v3387_v36, %v3387_v36  ;;  %v2799_v19 = vmul.f32 %v3387_v36, %v3181_v37  ;;  %v2481_v37 = vadd.f32 0.5, %v2445_v52 }
 0x20f   : > { %v2112_v2 = vpop.f32.mrf.mxu0 }
 0x210   : > { %2366 = vst.msk [vmem:[%s6430_s14 + $0x44] sm:$0xf] %vm2351_vm1, %v3219_v62  ;;  %v3217_v22 = vpack.c.bf16 %v2112_v2, %v2112_v2  ;;  %v2797_v13 = vmul.f32 %v3179_v53, %v2112_v2  ;;  %v2914_v5 = vmul.f32 %v3387_v36, %v2799_v19  ;;  %v2848_v3 = vsel %vm1631_vm6, %v2799_v19, 0.0 }
 0x211   : > { %v3388_v43 = vpop.f32.mrf.mxu0  ;;  %v2514_v53 = vmul.f32 0.055555556, %v2478_v25  ;;  %v2483_v62 = vadd.f32 0.5, %v2447_v35  ;;  %v2449_v19 = vcvt.s32.f32 %v6597_v20 }
 0x212   : > { %2364 = vst.msk [vmem:[%s6430_s14 + $0x3c] sm:$0xf] %vm2351_vm1, %v3217_v22  ;;  %v2844_v47 = vsel %vm1631_vm6, %v2797_v13, 0.0  ;;  %v2912_v17 = vmul.f32 %v2797_v13, %v2112_v2  ;;  %v3220_v40 = vpack.c.bf16 %v3388_v43, %v3388_v43  ;;  %v2800_v15 = vmul.f32 %v3388_v43, %v3182_v7 }
 0x213   : > { %v2115_v56 = vpop.f32.mrf.mxu0  ;;  %v2845_v57 = vadd.f32 %v2844_v47, %v2843_v63  ;;  %v2963_v9 = vsel %vm1631_vm6, %v2914_v5, 0.0  ;;  %v2513_v63 = vmul.f32 0.055555556, %v2477_v61  ;;  %v2446_v22 = vcvt.s32.f32 %v6589_v6 }
 0x214   : > { %v2959_v4 = vsel %vm1631_vm6, %v2912_v17, 0.0  ;;  %2367 = vst.msk [vmem:[%s6430_s14 + $0x48] sm:$0xf] %vm2351_vm1, %v3220_v40  ;;  %v3218_v29 = vpack.c.bf16 %v2115_v56, %v2115_v56  ;;  %v2798_v54 = vmul.f32 %v3180_v49, %v2115_v56  ;;  %v2915_v12 = vmul.f32 %v3388_v43, %v2800_v15 }
 0x215   : > { %v2960_v45 = vadd.f32 %v2959_v4, %v2958_v1  ;;  %v2850_v30 = vsel %vm1631_vm6, %v2800_v15, 0.0  ;;  %v2451_v13 = vcvt.s32.f32 %v6592_v11  ;;  %v2549_v43 = vfloor.f32 %v2513_v63 }
 0x216   : > { %2365 = vst.msk [vmem:[%s6430_s14 + $0x40] sm:$0xf] %vm2351_vm1, %v3218_v29  ;;  %v2846_v10 = vsel %vm1631_vm6, %v2798_v54, 0.0  ;;  %v2913_v48 = vmul.f32 %v2798_v54, %v2115_v56  ;;  %v2965_v26 = vsel %vm1631_vm6, %v2915_v12, 0.0  ;;  %v2516_v49 = vmul.f32 0.055555556, %v2480_v31 }
 0x217   : > { %v2847_v55 = vadd.f32 %v2846_v10, %v2845_v57  ;;  %v3459_v47 = vtrunc.f32 %v2551_v51  ;;  %v2484_v40 = vadd.f32 0.5, %v2448_v60  ;;  %v2550_v4 = vfloor.f32 %v2514_v53 }
 0x218   : > { %v2961_v34 = vsel %vm1631_vm6, %v2913_v48, 0.0  ;;  %v2519_v15 = vmul.f32 0.055555556, %v2483_v62  ;;  %v2517_v29 = vmul.f32 0.055555556, %v2481_v37  ;;  %v6620_v54 = vadd.s32 200, %v6342_v50 }
 0x219   : > { %v2849_v14 = vadd.f32 %v2848_v3, %v2847_v55  ;;  %v2962_v39 = vadd.f32 %v2961_v34, %v2960_v45  ;;  %v2482_v45 = vadd.f32 0.5, %v2446_v22  ;;  %v2487_v44 = vadd.f32 0.5, %v2451_v13 }
 0x21a   : > { %v6627_v5 = vadd.s32 216, %v6342_v50  ;;  %v3455_v10 = vtrunc.f32 %v2549_v43  ;;  %v2552_v48 = vfloor.f32 %v2516_v49  ;;  %v2485_v55 = vadd.f32 0.5, %v2449_v19 }
 0x21b   : > { %v2964_v0 = vadd.f32 %v2963_v9, %v2962_v39  ;;  %v6571_v41 = vadd.f32 %v2850_v30, %v2849_v14  ;;  %v3460_v3 = vcvt.f32.s32 %v3459_v47  ;;  %v2520_v12 = vmul.f32 0.055555556, %v2484_v40 }
 0x21c   : > { %v3457_v34 = vtrunc.f32 %v2550_v4  ;;  %v2555_v14 = vfloor.f32 %v2519_v15  ;;  %v2553_v39 = vfloor.f32 %v2517_v29  ;;  %v2450_v23 = vcvt.s32.f32 %v6620_v54 }
 0x21d   : > { %v6580_v16 = vadd.f32 %v2965_v26, %v2964_v0  ;;  %v2518_v9 = vmul.f32 0.055555556, %v2482_v45  ;;  %v2523_v30 = vmul.f32 0.055555556, %v2487_v44  ;;  %v2452_v59 = vcvt.s32.f32 %v6627_v5 }
 0x21e   : > { %v3456_v33 = vcvt.f32.s32 %v3455_v10  ;;  %v3461_v0 = vtrunc.f32 %v2552_v48  ;;  %v2521_v26 = vmul.f32 0.055555556, %v2485_v55  ;;  %v2623_v61 = vmul.u32 18, %v3460_v3 }
 0x21f   : > { %v2556_v21 = vfloor.f32 %v2520_v12  ;;  %v3458_v8 = vcvt.f32.s32 %v3457_v34  ;;  %v3467_v25 = vtrunc.f32 %v2555_v14  ;;  %v3463_v35 = vtrunc.f32 %v2553_v39 }
 0x220   : > { %v6594_v18 = vpop.f32.mrf.mxu0  ;;  %v2486_v52 = vadd.f32 0.5, %v2450_v23  ;;  %v2554_v63 = vfloor.f32 %v2518_v9  ;;  %v2559_v31 = vfloor.f32 %v2523_v30  ;;  %v2621_v51 = vmul.u32 18, %v3456_v33 }
 0x221   : > { %v3223_v1 = vpack.c.bf16 %v6594_v18, %v6594_v18  ;;  %v3462_v60 = vcvt.f32.s32 %v3461_v0  ;;  %v2557_v53 = vfloor.f32 %v2521_v26  ;;  %v6634_v62 = vadd.s32 240, %v6342_v50 }
 0x222   : > { %v6602_v36 = vpop.f32.mrf.mxu0  ;;  %v2659_v37 = vsub.s32 %v6544_v58, %v2623_v61  ;;  %v6638_v22 = vadd.s32 224, %v6342_v50  ;;  %v2622_v13 = vmul.u32 18, %v3458_v8  ;;  %v3468_v43 = vcvt.f32.s32 %v3467_v25 }
 0x223   : > { %2370 = vst.msk [vmem:[%s6430_s14 + $0x54] sm:$0xf] %vm2351_vm1, %v3223_v1  ;;  %v3221_v2 = vpack.c.bf16 %v6602_v36, %v6602_v36  ;;  %v2488_v1 = vadd.f32 0.5, %v2452_v59  ;;  %v3464_v49 = vcvt.f32.s32 %v3463_v35  ;;  %v2522_v19 = vmul.f32 0.055555556, %v2486_v52 }
 0x224   : > { %v6610_v7 = vpop.f32.mrf.mxu0  ;;  %v3465_v47 = vtrunc.f32 %v2554_v63  ;;  %v2657_v4 = vsub.s32 %v6554_v28, %v2621_v51  ;;  %v2624_v15 = vmul.u32 18, %v3462_v60  ;;  %v2455_v58 = vcvt.s32.f32 %v6634_v62 }
 0x225   : > { %2368 = vst.msk [vmem:[%s6430_s14 + $0x4c] sm:$0xf] %vm2351_vm1, %v3221_v2  ;;  %v3224_v17 = vpack.c.bf16 %v6610_v7, %v6610_v7  ;;  %v3469_v2 = vtrunc.f32 %v2556_v21  ;;  %v2524_v40 = vmul.f32 0.055555556, %v2488_v1  ;;  %vm6644_vm2 = vcmp.lt.s32.totalorder %v2659_v37, 16 }
 0x226   : > { %v6617_v56 = vpop.f32.mrf.mxu0  ;;  %v2453_v48 = vcvt.s32.f32 %v6638_v22  ;;  %v2658_v55 = vsub.s32 %v6560_v42, %v2622_v13  ;;  %v2627_v28 = vmul.u32 18, %v3468_v43  ;;  %v2625_v12 = vmul.u32 18, %v3464_v49 }
 0x227   : > { %2371 = vst.msk [vmem:[%s6430_s14 + $0x58] sm:$0xf] %vm2351_vm1, %v3224_v17  ;;  %v3222_v57 = vpack.c.bf16 %v6617_v56, %v6617_v56  ;;  %v3475_v17 = vtrunc.f32 %v2559_v31  ;;  %v3470_v10 = vcvt.f32.s32 %v3469_v2  ;;  %v2558_v34 = vfloor.f32 %v2522_v19 }
 0x228   : > { %v3466_v39 = vcvt.f32.s32 %v3465_v47  ;;  %v2560_v9 = vfloor.f32 %v2524_v40  ;;  %vm6658_vm3 = vcmp.lt.s32.totalorder %v2657_v4, 16  ;;  %v2660_v42 = vsub.s32 %v6566_v27, %v2624_v15 }
 0x229   : > { %2369 = vst.msk [vmem:[%s6430_s14 + $0x50] sm:$0xf] %vm2351_vm1, %v3222_v57  ;;  %v3471_v57 = vtrunc.f32 %v2557_v53  ;;  %v3476_v23 = vcvt.f32.s32 %v3475_v17  ;;  %v2491_v0 = vadd.f32 0.5, %v2455_v58  ;;  %v2628_v61 = vmul.u32 18, %v3470_v10 }
 0x22a   : > { %v2489_v21 = vadd.f32 0.5, %v2453_v48  ;;  %v6670_v8 = vadd.s32 232, %v6342_v50  ;;  %vm6672_vm4 = vcmp.lt.s32.totalorder %v2658_v55, 16  ;;  %v2663_v27 = vsub.s32 %v6574_v24, %v2627_v28 }
 0x22b   : > { %v3472_v33 = vcvt.f32.s32 %v3471_v57  ;;  %v2661_v35 = vsub.s32 %v6577_v46, %v2625_v12  ;;  %v3473_v63 = vtrunc.f32 %v2558_v34  ;;  %v2626_v1 = vmul.u32 18, %v3466_v39 }
 0x22c   : > { %v2631_v51 = vmul.u32 18, %v3476_v23  ;;  %v3477_v60 = vtrunc.f32 %v2560_v9  ;;  %v3183_v53 = vsel %vm6658_vm3, 1.0, %v4254_v32  ;;  %v2527_v2 = vmul.f32 0.055555556, %v2491_v0 }
 0x22d   : > { %v2629_v37 = vmul.u32 18, %v3472_v33  ;;  %v6688_v24 = vadd.s32 248, %v6342_v50  ;;  %vm6690_vm5 = vcmp.lt.s32.totalorder %v2660_v42, 16  ;;  %v2664_v13 = vsub.s32 %v6584_v38, %v2628_v61 }
 0x22e   : > { %v2525_v43 = vmul.f32 0.055555556, %v2489_v21  ;;  %v2454_v49 = vcvt.s32.f32 %v6670_v8  ;;  %v3184_v19 = vsel %vm6672_vm4, 1.0, %v4254_v32  ;;  %vm6701_vm7 = vcmp.lt.s32.totalorder %v2663_v27, 16 }
 0x22f   : > { %vm6705_vm8 = vcmp.lt.s32.totalorder %v2661_v35, 16  ;;  %v3474_v40 = vcvt.f32.s32 %v3473_v63  ;;  %v2801_v38 = vmul.f32 %v3183_v53, %v6602_v36  ;;  %v2662_v4 = vsub.s32 %v6589_v6, %v2626_v1 }
 0x230   : > { %v2667_v15 = vsub.s32 %v6592_v11, %v2631_v51  ;;  %v3478_v57 = vcvt.f32.s32 %v3477_v60  ;;  %v3185_v58 = vsel %vm6644_vm2, 1.0, %v4254_v32  ;;  %v2563_v10 = vfloor.f32 %v2527_v2 }
 0x231   : > { %v2456_v48 = vcvt.s32.f32 %v6688_v24  ;;  %v2802_v55 = vmul.f32 %v3184_v19, %v6617_v56  ;;  %vm2700_vm9 = vcmp.lt.s32.totalorder %v2664_v13, 16  ;;  %v2561_v28 = vfloor.f32 %v2525_v43 }
 0x232   : > { %v2490_v12 = vadd.f32 0.5, %v2454_v49  ;;  %v3186_v6 = vsel %vm6690_vm5, 1.0, %v4254_v32  ;;  %v6724_v11 = vsel %vm6701_vm7, 1.0, %v4254_v32  ;;  %v2630_v45 = vmul.u32 18, %v3474_v40 }
 0x233   : > { %v2916_v34 = vmul.f32 %v2801_v38, %v6602_v36  ;;  %vm2698_vm10 = vcmp.lt.s32.totalorder %v2662_v4, 16  ;;  %vm2703_vm11 = vcmp.lt.s32.totalorder %v2667_v15, 16  ;;  %v6731_v39 = vsel %vm2700_vm9, 1.0, %v4254_v32 }
 0x234   : > { %v6737_v9 = vtrunc.f32 %v2563_v10  ;;  %v2492_v30 = vadd.f32 0.5, %v2456_v48  ;;  %v2852_v42 = vsel %vm1631_vm6, %v2801_v38, 0.0  ;;  %v2917_v33 = vmul.f32 %v2802_v55, %v6617_v56 }
 0x235   : > { %v3479_v0 = vtrunc.f32 %v2561_v28  ;;  %v3188_v36 = vsel %vm2698_vm10, 1.0, %v4254_v32  ;;  %v6743_v61 = vsel %vm2703_vm11, 1.0, %v4254_v32  ;;  %v2666_v21 = vsub.s32 %v6620_v54, %v2630_v45 }
 0x236   : > { %v6747_v25 = vadd.s32 256, %v6342_v50  ;;  %v2803_v27 = vmul.f32 %v6594_v18, %v3185_v58  ;;  %v2967_v35 = vsel %vm1631_vm6, %v2916_v34, 0.0  ;;  %v2854_v63 = vsel %vm1631_vm6, %v2802_v55, 0.0 }
 0x237   : > { %v6641_v29 = vpop.f32.mrf.mxu1  ;;  %v3484_v54 = vcvt.f32.s32 %v6737_v9  ;;  %v2528_v60 = vmul.f32 0.055555556, %v2492_v30  ;;  %v2969_v53 = vsel %vm1631_vm6, %v2917_v33, 0.0  ;;  %v3480_v2 = vcvt.f32.s32 %v3479_v0 }
 0x238   : > { %v3227_v44 = vpack.c.bf16 %v6641_v29, %v6641_v29  ;;  %vm6768_vm13 = vcmp.lt.s32.totalorder %v2666_v21, 16  ;;  %v6773_v49 = vadd.s32 272, %v6342_v50  ;;  %v2457_v19 = vcvt.s32.f32 %v6747_v25 }
 0x239   : > { %v6652_v3 = vpop.f32.mrf.mxu1  ;;  %v2918_v47 = vmul.f32 %v6594_v18, %v2803_v27  ;;  %v2804_v17 = vmul.f32 %v6610_v7, %v3186_v6  ;;  %v2564_v15 = vfloor.f32 %v2528_v60  ;;  %v6789_v58 = vadd.s32 264, %v6342_v50 }
 0x23a   : > { %2374 = vst.msk [vmem:[%s6430_s14 + $0x64] sm:$0xf] %vm2351_vm1, %v3227_v44  ;;  %v3225_v14 = vpack.c.bf16 %v6652_v3, %v6652_v3  ;;  %v2665_v44 = vsub.s32 %v6597_v20, %v2629_v37  ;;  %v3187_v20 = vsel %vm6705_vm8, 1.0, %v4254_v32  ;;  %v2856_v18 = vsel %vm1631_vm6, %v2803_v27, 0.0 }
 0x23b   : > { %v6663_v59 = vpop.f32.mrf.mxu1  ;;  %v2805_v40 = vmul.f32 %v3187_v20, %v6652_v3  ;;  %v2459_v6 = vcvt.s32.f32 %v6773_v49  ;;  %v2493_v20 = vadd.f32 0.5, %v2457_v19  ;;  %v2971_v45 = vsel %vm1631_vm6, %v2918_v47, 0.0 }
 0x23c   : > { %2372 = vst.msk [vmem:[%s6430_s14 + $0x5c] sm:$0xf] %vm2351_vm1, %v3225_v14  ;;  %v3228_v26 = vpack.c.bf16 %v6663_v59, %v6663_v59  ;;  %v2632_v14 = vmul.u32 18, %v3478_v57  ;;  %vm6733_vm12 = vcmp.lt.s32.totalorder %v2665_v44, 16  ;;  %v6786_v57 = vadd.s32 280, %v6342_v50 }
 0x23d   : > { %v6678_v52 = vpop.f32.mrf.mxu1  ;;  %v6759_v51 = vsel %vm6733_vm12, 1.0, %v4254_v32  ;;  %v2633_v50 = vmul.u32 18, %v3480_v2  ;;  %v2919_v34 = vmul.f32 %v6610_v7, %v2804_v17  ;;  %v3485_v30 = vtrunc.f32 %v2564_v15 }
 0x23e   : > { %2375 = vst.msk [vmem:[%s6430_s14 + $0x68] sm:$0xf] %vm2351_vm1, %v3228_v26  ;;  %v3226_v31 = vpack.c.bf16 %v6678_v52, %v6678_v52  ;;  %v2526_v26 = vmul.f32 0.055555556, %v2490_v12  ;;  %v2668_v56 = vsub.s32 %v6627_v5, %v2632_v14  ;;  %v2806_v44 = vmul.f32 %v3188_v36, %v6678_v52 }
 0x23f   : > { %v2920_v14 = vmul.f32 %v2805_v40, %v6652_v3  ;;  %v2458_v33 = vcvt.s32.f32 %v6789_v58  ;;  %v2858_v0 = vsel %vm1631_vm6, %v2804_v17, 0.0  ;;  %v2669_v21 = vsub.s32 %v6638_v22, %v2633_v50 }
 0x240   : > { %2373 = vst.msk [vmem:[%s6430_s14 + $0x60] sm:$0xf] %vm2351_vm1, %v3226_v31  ;;  %v2853_v31 = vadd.f32 %v2852_v42, %v6571_v41  ;;  %v2562_v5 = vfloor.f32 %v2526_v26  ;;  %v2968_v41 = vadd.f32 %v2967_v35, %v6580_v16  ;;  %vm6797_vm14 = vcmp.lt.s32.totalorder %v2668_v56, 16 }
 0x241   : > { %v2460_v42 = vcvt.s32.f32 %v6786_v57  ;;  %v2860_v26 = vsel %vm1631_vm6, %v2805_v40, 0.0  ;;  %v2921_v36 = vmul.f32 %v2806_v44, %v6678_v52  ;;  %v2495_v27 = vadd.f32 0.5, %v2459_v6 }
 0x242   : > { %v2855_v46 = vadd.f32 %v2854_v63, %v2853_v31  ;;  %v2970_v38 = vadd.f32 %v2969_v53, %v2968_v41  ;;  %v3481_v48 = vtrunc.f32 %v2562_v5  ;;  %v2529_v35 = vmul.f32 0.055555556, %v2493_v20 }
 0x243   : > { %v2973_v63 = vsel %vm1631_vm6, %v2919_v34, 0.0  ;;  %v2807_v56 = vmul.f32 %v6641_v29, %v6724_v11  ;;  %v2975_v31 = vsel %vm1631_vm6, %v2920_v14, 0.0  ;;  %v2862_v60 = vsel %vm1631_vm6, %v2806_v44, 0.0 }
 0x244   : > { %v2857_v55 = vadd.f32 %v2856_v18, %v2855_v46  ;;  %v2972_v9 = vadd.f32 %v2971_v45, %v2970_v38  ;;  %v3482_v7 = vcvt.f32.s32 %v3481_v48  ;;  %v2496_v52 = vadd.f32 0.5, %v2460_v42 }
 0x245   : > { %v2494_v2 = vadd.f32 0.5, %v2458_v33  ;;  %v2977_v5 = vsel %vm1631_vm6, %v2921_v36, 0.0  ;;  %v3192_v22 = vsel %vm6768_vm13, 1.0, %v4254_v32  ;;  %v6828_v41 = vmul.u32 18, %v3484_v54 }
 0x246   : > { %v2859_v3 = vadd.f32 %v2858_v0, %v2857_v55  ;;  %v2634_v46 = vmul.u32 18, %v3482_v7  ;;  %v2808_v11 = vmul.f32 %v6663_v59, %v6731_v39  ;;  %v2531_v17 = vmul.f32 0.055555556, %v2495_v27 }
 0x247   : > { %v2922_v40 = vmul.f32 %v6641_v29, %v2807_v56  ;;  %vm6835_vm15 = vcmp.lt.s32.totalorder %v2669_v21, 16  ;;  %v3486_v43 = vcvt.f32.s32 %v3485_v30  ;;  %v2565_v54 = vfloor.f32 %v2529_v35 }
 0x248   : > { %v2861_v53 = vadd.f32 %v2860_v26, %v2859_v3  ;;  %v2532_v18 = vmul.f32 0.055555556, %v2496_v52  ;;  %v2530_v44 = vmul.f32 0.055555556, %v2494_v2  ;;  %v3194_v39 = vsel %vm6797_vm14, 1.0, %v4254_v32 }
 0x249   : > { %v2923_v48 = vmul.f32 %v6663_v59, %v2808_v11  ;;  %v2670_v50 = vsub.s32 %v6670_v8, %v2634_v46  ;;  %v2567_v6 = vfloor.f32 %v2531_v17  ;;  %v2979_v20 = vsel %vm1631_vm6, %v2922_v40, 0.0 }
 0x24a   : > { %v2863_v47 = vadd.f32 %v2862_v60, %v2861_v53  ;;  %v3195_v28 = vsel %vm6835_vm15, 1.0, %v4254_v32  ;;  %v2636_v34 = vmul.u32 18, %v3486_v43  ;;  %v2566_v59 = vfloor.f32 %v2530_v44 }
 0x24b   : > { %v6754_v1 = vpop.f32.mrf.mxu1  ;;  %v2866_v30 = vsel %vm1631_vm6, %v2808_v11, 0.0  ;;  %v2981_v33 = vsel %vm1631_vm6, %v2923_v48, 0.0  ;;  %vm6861_vm0 = vcmp.lt.s32.totalorder %v2670_v50, 16  ;;  %v3491_v7 = vtrunc.f32 %v2567_v6 }
 0x24c   : > { %v3231_v37 = vpack.c.bf16 %v6754_v1, %v6754_v1  ;;  %v2811_v3 = vmul.f32 %v6754_v1, %v6743_v61  ;;  %v3489_v52 = vtrunc.f32 %v2566_v59 }
 0x24d   : > { %v6766_v13 = vpop.f32.mrf.mxu1  ;;  %v3492_v46 = vcvt.f32.s32 %v3491_v7 }
 0x24e   : > { %2378 = vst.msk [vmem:[%s6430_s14 + $0x74] sm:$0xf] %vm2351_vm1, %v3231_v37  ;;  %v3229_v16 = vpack.c.bf16 %v6766_v13, %v6766_v13  ;;  %v2974_v37 = vadd.f32 %v2973_v63, %v2972_v9  ;;  %v2568_v9 = vfloor.f32 %v2532_v18  ;;  %v2872_v38 = vsel %vm1631_vm6, %v2811_v3, 0.0 }
 0x24f   : > { %v6783_v4 = vpop.f32.mrf.mxu1  ;;  %v2639_v18 = vmul.u32 18, %v3492_v46 }
 0x250   : > { %2376 = vst.msk [vmem:[%s6430_s14 + $0x6c] sm:$0xf] %vm2351_vm1, %v3229_v16  ;;  %v3232_v10 = vpack.c.bf16 %v6783_v4, %v6783_v4  ;;  %v2976_v19 = vadd.f32 %v2975_v31, %v2974_v37  ;;  %v2809_v16 = vmul.f32 %v6759_v51, %v6766_v13  ;;  %v2671_v51 = vsub.s32 %v6634_v62, %v6828_v41 }
 0x251   : > { %v6801_v12 = vpop.f32.mrf.mxu1  ;;  %v3487_v62 = vtrunc.f32 %v2565_v54  ;;  %v3493_v60 = vtrunc.f32 %v2568_v9  ;;  %v2672_v37 = vsub.s32 %v6688_v24, %v2636_v34  ;;  %v3196_v41 = vsel %vm6861_vm0, 1.0, %v4254_v32 }
 0x252   : > { %2379 = vst.msk [vmem:[%s6430_s14 + $0x78] sm:$0xf] %vm2351_vm1, %v3232_v10  ;;  %v3230_v23 = vpack.c.bf16 %v6801_v12, %v6801_v12  ;;  %v2978_v15 = vadd.f32 %v2977_v5, %v2976_v19  ;;  %v2864_v10 = vsel %vm1631_vm6, %v2807_v56, 0.0  ;;  %v2810_v29 = vmul.f32 %v3192_v22, %v6801_v12 }
 0x253   : > { %v2865_v55 = vadd.f32 %v2864_v10, %v2863_v47  ;;  %v2924_v45 = vmul.f32 %v2809_v16, %v6766_v13  ;;  %v2868_v8 = vsel %vm1631_vm6, %v2809_v16, 0.0  ;;  %v3488_v31 = vcvt.f32.s32 %v3487_v62 }
 0x254   : > { %2377 = vst.msk [vmem:[%s6430_s14 + $0x70] sm:$0xf] %vm2351_vm1, %v3230_v23  ;;  %v2980_v14 = vadd.f32 %v2979_v20, %v2978_v15  ;;  %v2925_v42 = vmul.f32 %v2810_v29, %v6801_v12  ;;  %v2870_v12 = vsel %vm1631_vm6, %v2810_v29, 0.0  ;;  %v2926_v19 = vmul.f32 %v6754_v1, %v2811_v3 }
 0x255   : > { %v2867_v0 = vadd.f32 %v2866_v30, %v2865_v55  ;;  %v2983_v21 = vsel %vm1631_vm6, %v2924_v45, 0.0  ;;  %v2812_v11 = vmul.f32 %v6783_v4, %v3194_v39  ;;  %v2637_v24 = vmul.u32 18, %v3488_v31 }
 0x256   : > { %v2982_v63 = vadd.f32 %v2981_v33, %v2980_v14  ;;  %v2985_v53 = vsel %vm1631_vm6, %v2925_v42, 0.0  ;;  %v3494_v16 = vcvt.f32.s32 %v3493_v60  ;;  %vm2707_vm2 = vcmp.lt.s32.totalorder %v2671_v51, 16 }
 0x257   : > { %v2869_v35 = vadd.f32 %v2868_v8, %v2867_v0  ;;  %v3490_v15 = vcvt.f32.s32 %v3489_v52  ;;  %v2987_v1 = vsel %vm1631_vm6, %v2926_v19, 0.0  ;;  %v2927_v44 = vmul.f32 %v6783_v4, %v2812_v11 }
 0x258   : > { %v2984_v2 = vadd.f32 %v2983_v21, %v2982_v63  ;;  %vm2708_vm3 = vcmp.lt.s32.totalorder %v2672_v37, 16  ;;  %v3197_v29 = vsel %vm2707_vm2, 1.0, %v4254_v32  ;;  %v2673_v48 = vsub.s32 %v6747_v25, %v2637_v24 }
 0x259   : > { %v2871_v5 = vadd.f32 %v2870_v12, %v2869_v35  ;;  %v2640_v55 = vmul.u32 18, %v3494_v16  ;;  %v2874_v51 = vsel %vm1631_vm6, %v2812_v11, 0.0  ;;  %v2638_v20 = vmul.u32 18, %v3490_v15 }
 0x25a   : > { %v2986_v40 = vadd.f32 %v2985_v53, %v2984_v2  ;;  %v2675_v34 = vsub.s32 %v6773_v49, %v2639_v18  ;;  %v2989_v4 = vsel %vm1631_vm6, %v2927_v44, 0.0  ;;  %vm2709_vm4 = vcmp.lt.s32.totalorder %v2673_v48, 16 }
 0x25b   : > { %v2873_v54 = vadd.f32 %v2872_v38, %v2871_v5  ;;  %v2676_v8 = vsub.s32 %v6786_v57, %v2640_v55  ;;  %v2674_v42 = vsub.s32 %v6789_v58, %v2638_v20  ;;  %v3199_v7 = vsel %vm2709_vm4, 1.0, %v4254_v32 }
 0x25c   : > { %v2988_v39 = vadd.f32 %v2987_v1, %v2986_v40  ;;  %vm2711_vm5 = vcmp.lt.s32.totalorder %v2675_v34, 16 }
 0x25d   : > { %v2875_v45 = vadd.f32 %v2874_v51, %v2873_v54  ;;  %vm2712_vm7 = vcmp.lt.s32.totalorder %v2676_v8, 16  ;;  %vm2710_vm8 = vcmp.lt.s32.totalorder %v2674_v42, 16  ;;  %v3201_v12 = vsel %vm2711_vm5, 1.0, %v4254_v32 }
 0x25e   : > { %v2990_v59 = vadd.f32 %v2989_v4, %v2988_v39  ;;  %v3200_v37 = vsel %vm2710_vm8, 1.0, %v4254_v32 }
 0x260   : > { %v6853_v23 = vpop.f32.mrf.mxu1 }
 0x261   : > { %v3235_v13 = vpack.c.bf16 %v6853_v23, %v6853_v23  ;;  %v2815_v14 = vmul.f32 %v6853_v23, %v3197_v29 }
 0x262   : > { %v2176_v26 = vpop.f32.mrf.mxu1 }
 0x263   : > { %2382 = vst.msk [vmem:[%s6430_s14 + $0x84] sm:$0xf] %vm2351_vm1, %v3235_v13  ;;  %v3233_v27 = vpack.c.bf16 %v2176_v26, %v2176_v26  ;;  %v2813_v47 = vmul.f32 %v3195_v28, %v2176_v26  ;;  %v3198_v28 = vsel %vm2708_vm3, 1.0, %v4254_v32  ;;  %v2930_v0 = vmul.f32 %v6853_v23, %v2815_v14 }
 0x264   : > { %v6871_v56 = vpop.f32.mrf.mxu1  ;;  %v2880_v3 = vsel %vm1631_vm6, %v2815_v14, 0.0 }
 0x265   : > { %2380 = vst.msk [vmem:[%s6430_s14 + $0x7c] sm:$0xf] %vm2351_vm1, %v3233_v27  ;;  %v3236_v61 = vpack.c.bf16 %v6871_v56, %v6871_v56  ;;  %v2928_v10 = vmul.f32 %v2813_v47, %v2176_v26  ;;  %v2876_v50 = vsel %vm1631_vm6, %v2813_v47, 0.0  ;;  %v2816_v49 = vmul.f32 %v6871_v56, %v3198_v28 }
 0x266   : > { %v2179_v22 = vpop.f32.mrf.mxu1  ;;  %v2877_v9 = vadd.f32 %v2876_v50, %v2875_v45  ;;  %v2995_v35 = vsel %vm1631_vm6, %v2930_v0, 0.0 }
 0x267   : > { %2383 = vst.msk [vmem:[%s6430_s14 + $0x88] sm:$0xf] %vm2351_vm1, %v3236_v61  ;;  %v3234_v17 = vpack.c.bf16 %v2179_v22, %v2179_v22  ;;  %v2814_v43 = vmul.f32 %v3196_v41, %v2179_v22  ;;  %v2991_v62 = vsel %vm1631_vm6, %v2928_v10, 0.0  ;;  %v2931_v57 = vmul.f32 %v6871_v56, %v2816_v49 }
 0x268   : > { %v2992_v13 = vadd.f32 %v2991_v62, %v2990_v59  ;;  %v2882_v31 = vsel %vm1631_vm6, %v2816_v49, 0.0  ;;  %v3202_v61 = vsel %vm2712_vm7, 1.0, %v4254_v32 }
 0x269   : > { %2381 = vst.msk [vmem:[%s6430_s14 + $0x80] sm:$0xf] %vm2351_vm1, %v3234_v17  ;;  %v2929_v6 = vmul.f32 %v2814_v43, %v2179_v22  ;;  %v2878_v25 = vsel %vm1631_vm6, %v2814_v43, 0.0  ;;  %v2997_v22 = vsel %vm1631_vm6, %v2931_v57, 0.0 }
 0x26a   : > { %v2879_v33 = vadd.f32 %v2878_v25, %v2877_v9 }
 0x26b   : > { %v2993_v30 = vsel %vm1631_vm6, %v2929_v6, 0.0 }
 0x26c   : > { %v2994_v26 = vadd.f32 %v2993_v30, %v2992_v13  ;;  %v2881_v58 = vadd.f32 %v2880_v3, %v2879_v33 }
 0x26e   : > { %v2996_v60 = vadd.f32 %v2995_v35, %v2994_v26  ;;  %v2883_v41 = vadd.f32 %v2882_v31, %v2881_v58 }
 0x270   : > { %v2998_v40 = vadd.f32 %v2997_v22, %v2996_v60 }
 0x274   : > { %v3407_v36 = vpop.f32.mrf.mxu1 }
 0x275   : > { %v3239_v21 = vpack.c.bf16 %v3407_v36, %v3407_v36  ;;  %v2819_v56 = vmul.f32 %v3407_v36, %v3201_v12 }
 0x276   : > { %v2192_v27 = vpop.f32.mrf.mxu1 }
 0x277   : > { %2386 = vst.msk [vmem:[%s6430_s14 + $0x94] sm:$0xf] %vm2351_vm1, %v3239_v21  ;;  %v3237_v23 = vpack.c.bf16 %v2192_v27, %v2192_v27  ;;  %v2817_v63 = vmul.f32 %v3199_v7, %v2192_v27  ;;  %v2934_v24 = vmul.f32 %v3407_v36, %v2819_v56  ;;  %v2888_v54 = vsel %vm1631_vm6, %v2819_v56, 0.0 }
 0x278   : > { %v3408_v53 = vpop.f32.mrf.mxu1 }
 0x279   : > { %2384 = vst.msk [vmem:[%s6430_s14 + $0x8c] sm:$0xf] %vm2351_vm1, %v3237_v23  ;;  %v2884_v52 = vsel %vm1631_vm6, %v2817_v63, 0.0  ;;  %v2932_v2 = vmul.f32 %v2817_v63, %v2192_v27  ;;  %v3240_v5 = vpack.c.bf16 %v3408_v53, %v3408_v53  ;;  %v2820_v11 = vmul.f32 %v3408_v53, %v3202_v61 }
 0x27a   : > { %v2195_v46 = vpop.f32.mrf.mxu1  ;;  %v2885_v32 = vadd.f32 %v2884_v52, %v2883_v41  ;;  %v3003_v39 = vsel %vm1631_vm6, %v2934_v24, 0.0 }
 0x27b   : > { %v2999_v19 = vsel %vm1631_vm6, %v2932_v2, 0.0  ;;  %2387 = vst.msk [vmem:[%s6430_s14 + $0x98] sm:$0xf] %vm2351_vm1, %v3240_v5  ;;  %v3238_v47 = vpack.c.bf16 %v2195_v46, %v2195_v46  ;;  %v2818_v17 = vmul.f32 %v3200_v37, %v2195_v46  ;;  %v2935_v18 = vmul.f32 %v3408_v53, %v2820_v11 }
 0x27c   : > { %v3000_v43 = vadd.f32 %v2999_v19, %v2998_v40  ;;  %v2890_v29 = vsel %vm1631_vm6, %v2820_v11, 0.0 }
 0x27d   : > { %2385 = vst.msk [vmem:[%s6430_s14 + $0x90] sm:$0xf] %vm2351_vm1, %v3238_v47  ;;  %v2886_v16 = vsel %vm1631_vm6, %v2818_v17, 0.0  ;;  %v2933_v38 = vmul.f32 %v2818_v17, %v2195_v46  ;;  %v3005_v51 = vsel %vm1631_vm6, %v2935_v18, 0.0  ;;  %vm2898_vm1 = vcmask 57344  }
 0x27e   : > { %v2887_v15 = vadd.f32 %v2886_v16, %v2885_v32 }
 0x27f   : > { %v3001_v1 = vsel %vm1631_vm6, %v2933_v38, 0.0 }
 0x280   : > { %v2889_v44 = vadd.f32 %v2888_v54, %v2887_v15  ;;  %v3002_v10 = vadd.f32 %v3001_v1, %v3000_v43 }
 0x282   : > { %v2891_v48 = vadd.f32 %v2890_v29, %v2889_v44  ;;  %v3004_v55 = vadd.f32 %v3003_v39, %v3002_v10 }
 0x284   : > { %v2892_v50 = vrot.slane %v2891_v48, 4  ;;  %v3006_v6 = vadd.f32 %v3005_v51, %v3004_v55 }
 0x286   : > { %v2893_v20 = vadd.f32 %v2892_v50, %v2891_v48  ;;  %v3007_v45 = vrot.slane %v3006_v6, 4 }
 0x288   : > { %v2894_v28 = vrot.slane %v2893_v20, 2  ;;  %v3008_v34 = vadd.f32 %v3007_v45, %v3006_v6 }
 0x28a   : > { %v2895_v4 = vadd.f32 %v2894_v28, %v2893_v20  ;;  %v3009_v14 = vrot.slane %v3008_v34, 2 }
 0x28c   : > { %v2896_v62 = vrot.slane %v2895_v4, 1  ;;  %v3010_v25 = vadd.f32 %v3009_v14, %v3008_v34 }
 0x28e   : > { %v2897_v9 = vadd.f32 %v2896_v62, %v2895_v4  ;;  %v3011_v59 = vrot.slane %v3010_v25, 1 }
 0x290   : > { %2899 = vst.msk [vmem:[%s181_s18] sm:$0x1] %vm2898_vm1, %v2897_v9  ;;  %v3012_v30 = vadd.f32 %v3011_v59, %v3010_v25 }
 0x292   : > { %3013 = vst.msk [vmem:[%s181_s18 + $0x1] sm:$0x1] %vm2898_vm1, %v3012_v30 }
 0x293 PF: > { %s14_s12 = sadd.s32 1, %s4244_s12  }
 0x294   : > { %p11_p4 = scmp.ge.s32.totalorder %s14_s12, 4  }
 0x296   :  { %13 = sbr.rel (!%p11_p4) target bundleno = 1 (0x1), region = 70 }

// kernel: basic_block_forward.4
= control target key start
LH: loop header
LB: loop body
LE: loop exit
PB: predicated region body
PF: predicated region fallthrough
CT: control target
= control target key end

     0   :  { %s5580_s18 = smov 0   ;;  %s9234_s0 = inlined_call_operand.vmem [shape: bf16[2,331,8], index: 0, kind: input, shape index: {}]   ;;  %s9235_s1 = inlined_call_operand.vmem [shape: f32[1,8], index: 1, kind: input, shape index: {}]   ;;  %s9236_s2 = inlined_call_operand.vmem [shape: f32[1,8], index: 2, kind: input, shape index: {}]   ;;  %s9237_s3 = inlined_call_operand.vmem [shape: bf16[72,8], index: 3, kind: input, shape index: {}]   ;;  %s9238_s4 = inlined_call_operand.vmem [shape: bf16[2,288,8], index: 4, kind: output, shape index: {0}]   ;;  %s9239_s5 = inlined_call_operand.vmem [shape: f32[2,2,8], index: 5, kind: output, shape index: {1}]  }
   0x1 LB: > { %s4261_s19 = sadd.s32 4294967295, %s5539_s18   ;;  %p4265_p0 = scmp.ge.s32.totalorder %s5539_s18, 1  ;;  %s5539_s18 = sphi %s5580_s18, %s16_s18  }
   0x2   : > { %p190_p1 = scmp.lt.s32.totalorder %s5539_s18, 3 }
   0x4   : > { %p191_p2 = pnand %p4265_p0, %p190_p1 }
   0x6   : > { %194 = sbr.rel (%p191_p2) target bundleno = 859 (0x35b), region = 36 }
   0xb   : > { %p222_p3 = scmp.lt.s32.totalorder %s4261_s19, 1  ;;  %v321_v0 = vlaneseq  ;;  %v5638_v15 = vld [vmem:[%s9235_s1] ss:$0 sm:$0xff]  ;;  %vm9313_vm7 = vcmask 1046528   ;;  %s5541_s28 = smov 8  }
   0xc   : > { %v5658_v27 = vld [vmem:[%s9236_s2] ss:$0 sm:$0xff]  ;;  %s5542_s8 = smov 16   ;;  %s5543_s9 = smov 24  }
   0xd   : > { %s10098_s19 = smov (!%p222_p3, %s4261_s19), 1  ;;  %v5590_v1 = vshrl.u32 %v321_v0, 7  ;;  %s5544_s14 = smov 32  }
   0xe   : > { %s4626_s20 = smul.u32 168, %s10098_s19  ;;  %s5545_s15 = smov 40  }
   0xf   : > { %9415 = vst [vmem:[#allocation2_spill] sm:$0xff] %v5590_v1  ;;  %v5594_v2 = vadd.s32 32, %v5590_v1  ;;  %v5597_v3 = vadd.s32 40, %v5590_v1  ;;  %v5600_v4 = vadd.s32 48, %v5590_v1  ;;  %v5603_v5 = vadd.s32 8, %v5590_v1  ;;  %s5546_s16 = smov 48  }
  0x10   : > { %v5606_v6 = vadd.s32 16, %v5590_v1  ;;  %v5609_v7 = vadd.s32 4294967291, %v5590_v1  ;;  %v5612_v8 = vadd.s32 56, %v5590_v1  ;;  %v5615_v9 = vadd.s32 64, %v5590_v1  ;;  %s5620_s23 = scalar_lea.vmem %s9234_s0, %s4626_s20  ;;  %s5547_s21 = smov 56  }
  0x11   : > { %9416 = vst [vmem:[#allocation3_spill] sm:$0xff] %v5594_v2  ;;  %9417 = vst [vmem:[#allocation4_spill] sm:$0xff] %v5597_v3  ;;  %v5623_v10 = vadd.s32 4294967291, %v5594_v2  ;;  %v5626_v11 = vadd.s32 4294967291, %v5597_v3  ;;  %v5629_v12 = vadd.s32 4294967291, %v5600_v4  ;;  %v4527_v13 = vld [vmem:[%s5620_s23 + $0x10] sm:$0xff]  }
  0x12   : > { %9418 = vst [vmem:[#allocation5_spill] sm:$0xff] %v5600_v4  ;;  %9419 = vst [vmem:[#allocation6_spill] sm:$0xff] %v5603_v5  ;;  %v5633_v14 = vld [vmem:[%s5620_s23 + $0x18] sm:$0xff]   ;;  %v5641_v16 = vadd.s32 4294967291, %v5603_v5  ;;  %v5644_v17 = vadd.s32 4294967291, %v5606_v6  ;;  %v406_v18 = vcvt.s32.f32 %v5609_v7  ;;  %v4456_v19 = vunpack.c.l.bf16 %v4527_v13  ;;  %v4447_v22 = vld [vmem:[%s5620_s23] sm:$0xff]  }
  0x13   : > { %9420 = vst [vmem:[#allocation7_spill] sm:$0xff] %v5606_v6  ;;  %9421 = vst [vmem:[#allocation8_spill] sm:$0xff] %v5612_v8  ;;  %v4457_v20 = vunpack.c.h.bf16 %v4527_v13  ;;  %v4460_v21 = vunpack.c.l.bf16 %v5633_v14  ;;  %v5650_v23 = vadd.s32 4294967291, %v5612_v8  ;;  %v410_v24 = vcvt.s32.f32 %v5623_v10  ;;  %v5661_v28 = vld [vmem:[%s5620_s23 + $0x8] sm:$0xff]   ;;  %s5548_s22 = smov 64   ;;  %s4627_s10 = smul.u32 144, %s10098_s19 }
  0x14   : > { %9422 = vst [vmem:[#allocation9_spill] sm:$0xff] %v5615_v9  ;;  %v411_v25 = vcvt.s32.f32 %v5626_v11  ;;  %v412_v26 = vcvt.s32.f32 %v5629_v12  ;;  %v5664_v29 = vadd.s32 4294967291, %v5615_v9  ;;  %v4461_v30 = vunpack.c.h.bf16 %v5633_v14 }
  0x15   : > { %v1005_v31 = vmul.f32 %v4456_v19, %v5638_v15  ;;  %v1006_v32 = vmul.f32 %v4457_v20, %v5638_v15  ;;  %v1007_v33 = vmul.f32 %v4460_v21, %v5638_v15  ;;  %v452_v34 = vadd.f32 0.5, %v410_v24  ;;  %s8832_s13 = scalar_lea.vmem %s9238_s4, %s4627_s10 }
  0x16   : > { %v453_v35 = vadd.f32 0.5, %v411_v25  ;;  %v454_v36 = vadd.f32 0.5, %v412_v26  ;;  %v4448_v37 = vunpack.c.l.bf16 %v4447_v22  ;;  %v4449_v40 = vunpack.c.h.bf16 %v4447_v22 }
  0x17   : > { %v5671_v38 = vadd.f32 %v5658_v27, %v1005_v31  ;;  %v5674_v39 = vadd.f32 %v5658_v27, %v1006_v32  ;;  %v4452_v41 = vunpack.c.l.bf16 %v5661_v28  ;;  %v494_v42 = vmul.f32 0.055555556, %v452_v34 }
  0x18   : > { %v495_v43 = vmul.f32 0.055555556, %v453_v35  ;;  %v496_v44 = vmul.f32 0.055555556, %v454_v36  ;;  %v407_v45 = vcvt.s32.f32 %v5641_v16  ;;  %v5679_v46 = vadd.f32 %v5658_v27, %v1007_v33 }
  0x19   : > { %v1096_v47 = vmax.f32 %v5671_v38, 0.0  ;;  %v4453_v48 = vunpack.c.h.bf16 %v5661_v28  ;;  %v408_v49 = vcvt.s32.f32 %v5644_v17  ;;  %v536_v50 = vfloor.f32 %v494_v42 }
  0x1a   : > { %v537_v51 = vfloor.f32 %v495_v43  ;;  %v538_v52 = vfloor.f32 %v496_v44  ;;  %v448_v53 = vadd.f32 0.5, %v406_v18  ;;  %v1097_v54 = vmax.f32 %v5674_v39, 0.0 }
  0x1b   : > { %v449_v55 = vadd.f32 0.5, %v407_v45  ;;  %v450_v56 = vadd.f32 0.5, %v408_v49  ;;  %v1001_v57 = vmul.f32 %v4448_v37, %v5638_v15  ;;  %v4636_v58 = vtrunc.f32 %v536_v50 }
  0x1c   : > { %v4638_v59 = vtrunc.f32 %v537_v51  ;;  %v4640_v60 = vtrunc.f32 %v538_v52  ;;  %v490_v61 = vmul.f32 0.055555556, %v448_v53  ;;  %v1098_v62 = vmax.f32 %v5679_v46, 0.0  ;;  %v5722_v53 = vld [vmem:[%s5620_s23 + $0x20] sm:$0xff]  }
  0x1d   : > { %v491_v63 = vmul.f32 0.055555556, %v449_v55  ;;  %v492_v0 = vmul.f32 0.055555556, %v450_v56  ;;  %v1002_v13 = vmul.f32 %v4449_v40, %v5638_v15  ;;  %v4637_v19 = vcvt.f32.s32 %v4636_v58 }
  0x1e   : > { %v4639_v20 = vcvt.f32.s32 %v4638_v59  ;;  %v4641_v21 = vcvt.f32.s32 %v4640_v60  ;;  %v532_v18 = vfloor.f32 %v490_v61  ;;  %v1003_v25 = vmul.f32 %v4452_v41, %v5638_v15 }
  0x1f   : > { %v533_v22 = vfloor.f32 %v491_v63  ;;  %v534_v24 = vfloor.f32 %v492_v0  ;;  %v5690_v26 = vadd.f32 %v5658_v27, %v1001_v57  ;;  %v620_v28 = vmul.u32 18, %v4637_v19 }
  0x20   : > { %v621_v31 = vmul.u32 18, %v4639_v20  ;;  %vm704_vm0 = vcmp.ge.s32.totalorder %v4637_v19, 1  ;;  %vm705_vm1 = vcmp.ge.s32.totalorder %v4639_v20, 1  ;;  %v622_v32 = vmul.u32 18, %v4641_v21 }
  0x21   : > { %vm706_vm2 = vcmp.ge.s32.totalorder %v4641_v21, 1  ;;  %vm746_vm3 = vcmp.le.s32.totalorder %v4637_v19, 16  ;;  %vm747_vm4 = vcmp.le.s32.totalorder %v4639_v20, 16  ;;  %v662_v33 = vsub.s32 %v5623_v10, %v620_v28  ;;  %v5794_v28 = vld [vmem:[%s5620_s23 + $0x28] sm:$0xff]  }
  0x22   : > { %v663_v34 = vsub.s32 %v5626_v11, %v621_v31  ;;  %vm748_vm5 = vcmp.le.s32.totalorder %v4641_v21, 16  ;;  %vm788_vm6 = vmand %vm704_vm0, %vm746_vm3  ;;  %v4628_v35 = vtrunc.f32 %v532_v18  ;;  %v664_v36 = vsub.s32 %v5629_v12, %v622_v32 }
  0x23   : > { %vm789_vm8 = vmand %vm705_vm1, %vm747_vm4  ;;  %v4630_v37 = vtrunc.f32 %v533_v22  ;;  %v4632_v40 = vtrunc.f32 %v534_v24  ;;  %v1004_v41 = vmul.f32 %v4453_v48, %v5638_v15  ;;  %vm830_vm10 = vcmp.ge.s32.totalorder %v662_v33, 1 }
  0x24   : > { %vm5696_vm9 = vmand %vm706_vm2, %vm748_vm5  ;;  %vm831_vm11 = vcmp.ge.s32.totalorder %v663_v34, 1  ;;  %v5701_v10 = vadd.f32 %v5658_v27, %v1002_v13  ;;  %v5704_v11 = vadd.f32 %v5658_v27, %v1003_v25  ;;  %vm832_vm12 = vcmp.ge.s32.totalorder %v664_v36, 1 }
  0x25   : > { %vm5706_vm13 = vmand %vm788_vm6, %vm830_vm10  ;;  %vm914_vm14 = vcmp.le.s32.totalorder %v662_v33, 16  ;;  %v4629_v43 = vcvt.f32.s32 %v4628_v35  ;;  %v4631_v44 = vcvt.f32.s32 %v4630_v37  ;;  %vm915_vm0 = vcmp.le.s32.totalorder %v663_v34, 16 }
  0x26   : > { %vm5710_vm15 = vmand %vm789_vm8, %vm831_vm11  ;;  %vm916_vm1 = vcmp.le.s32.totalorder %v664_v36, 16  ;;  %v4633_v48 = vcvt.f32.s32 %v4632_v40  ;;  %v1092_v49 = vmax.f32 %v5690_v26, 0.0  ;;  %v4464_v38 = vunpack.c.l.bf16 %v5722_v53 }
  0x27   : > { %vm5717_vm2 = vmand %vm5696_vm9, %vm832_vm12  ;;  %v616_v51 = vmul.u32 18, %v4629_v43  ;;  %v617_v52 = vmul.u32 18, %v4631_v44  ;;  %vm700_vm3 = vcmp.ge.s32.totalorder %v4629_v43, 1  ;;  %vm701_vm4 = vcmp.ge.s32.totalorder %v4631_v44, 1 }
  0x28   : > { %vm956_vm5 = vmand %vm5706_vm13, %vm914_vm14  ;;  %v618_v55 = vmul.u32 18, %v4633_v48  ;;  %vm702_vm6 = vcmp.ge.s32.totalorder %v4633_v48, 1  ;;  %vm742_vm8 = vcmp.le.s32.totalorder %v4629_v43, 16  ;;  %vm743_vm10 = vcmp.le.s32.totalorder %v4631_v44, 16 }
  0x29   : > { %vm957_vm9 = vmand %vm5710_vm15, %vm915_vm0  ;;  %v5731_v56 = vsel %vm956_vm5, %v1096_v47, 0.0  ;;  %v658_v57 = vsub.s32 %v5609_v7, %v616_v51  ;;  %v659_v58 = vsub.s32 %v5641_v16, %v617_v52  ;;  %vm744_vm11 = vcmp.le.s32.totalorder %v4633_v48, 16 }
  0x2a   : > { %vm958_vm12 = vmand %vm5717_vm2, %vm916_vm1  ;;  %v5740_v59 = vsel %vm957_vm9, %v1097_v54, 0.0  ;;  %v1314_v60 = vrot.slane %v5731_v56, 1  ;;  %v660_v61 = vsub.s32 %v5644_v17, %v618_v55  ;;  %v1093_v47 = vmax.f32 %v5701_v10, 0.0 }
  0x2b   : > { %v5747_v7 = vsel %vm958_vm12, %v1098_v62, 0.0  ;;  %v1316_v16 = vrot.slane %v5740_v59, 1  ;;  %vm784_vm13 = vmand %vm700_vm3, %vm742_vm8  ;;  %vm826_vm14 = vcmp.ge.s32.totalorder %v658_v57, 1  ;;  %vm827_vm0 = vcmp.ge.s32.totalorder %v659_v58, 1 }
  0x2c   : > { %v1318_v39 = vrot.slane %v5747_v7, 1  ;;  %vm5755_vm15 = vmand %vm701_vm4, %vm743_vm10  ;;  %vm828_vm1 = vcmp.ge.s32.totalorder %v660_v61, 1  ;;  %vm910_vm2 = vcmp.le.s32.totalorder %v658_v57, 16  ;;  %vm911_vm5 = vcmp.le.s32.totalorder %v659_v58, 16 }
  0x2d   : > { %v1317_v17 = vsel %vm9313_vm7, %v1314_v60, %v1316_v16  ;;  %vm5764_vm3 = vmand %vm702_vm6, %vm744_vm11  ;;  %v413_v62 = vcvt.s32.f32 %v5650_v23  ;;  %v414_v63 = vcvt.s32.f32 %v5664_v29  ;;  %v1008_v19 = vmul.f32 %v4461_v30, %v5638_v15 }
  0x2e   : > { %v1319_v0 = vsel %vm9313_vm7, %v1316_v16, %v1318_v39  ;;  %vm5773_vm4 = vmand %vm784_vm13, %vm826_vm14  ;;  %v1009_v20 = vmul.f32 %v4464_v38, %v5638_v15  ;;  %v5782_v21 = vadd.s32 24, %v5590_v1  ;;  %v5791_v26 = vadd.f32 %v5658_v27, %v1004_v41 }
  0x2f   : > { %v4811_v18 = vpack.i.bf16 %v1319_v0, %v1317_v17  ;;  %vm5786_vm6 = vmand %vm5755_vm15, %vm827_vm0  ;;  %v455_v24 = vadd.f32 0.5, %v413_v62  ;;  %v456_v25 = vadd.f32 0.5, %v414_v63  ;;  %vm912_vm10 = vcmp.le.s32.totalorder %v660_v61, 16 }
  0x30   : > { %9437 = vst [vmem:[#allocation10_spill] sm:$0xff] %v5782_v21  ;;  %vm5799_vm8 = vmand %vm5764_vm3, %vm828_vm1  ;;  %v1094_v30 = vmax.f32 %v5704_v11, 0.0  ;;  %v5805_v31 = vadd.s32 4294967291, %v5782_v21  ;;  %v5812_v34 = vadd.f32 %v5658_v27, %v1008_v19  ;;  %v5815_v35 = vadd.f32 %v5658_v27, %v1009_v20  ;;  %v5859_v19 = vld [vmem:[%s5620_s23 + $0x30] sm:$0xff]  }
  0x31   : > { %4812 = vrot.lane.b32.xlu1 %v4811_v18, %s5541_s28  ;;  %vm952_vm9 = vmand %vm5773_vm4, %vm910_vm2  ;;  %v497_v32 = vmul.f32 0.055555556, %v455_v24  ;;  %v498_v33 = vmul.f32 0.055555556, %v456_v25  ;;  %v1095_v40 = vmax.f32 %v5791_v26, 0.0  ;;  %v4468_v41 = vunpack.c.l.bf16 %v5794_v28 }
  0x32   : > { %vm953_vm11 = vmand %vm5786_vm6, %vm911_vm5  ;;  %v5820_v36 = vsel %vm952_vm9, %v1092_v49, 0.0  ;;  %v409_v37 = vcvt.s32.f32 %v5805_v31  ;;  %v4469_v48 = vunpack.c.h.bf16 %v5794_v28  ;;  %v5837_v52 = vadd.s32 80, %v5590_v1 }
  0x33   : > { %vm954_vm12 = vmand %vm5799_vm8, %vm912_vm10  ;;  %v5828_v42 = vsel %vm953_vm11, %v1093_v47, 0.0  ;;  %v1307_v10 = vrot.slane %v5820_v36, 1  ;;  %v539_v11 = vfloor.f32 %v497_v32  ;;  %v540_v12 = vfloor.f32 %v498_v33 }
  0x34   : > { %v5831_v43 = vsel %vm954_vm12, %v1094_v30, 0.0  ;;  %v1308_v44 = vrot.slane %v5828_v42, 1  ;;  %v451_v45 = vadd.f32 0.5, %v409_v37  ;;  %9442 = vst [vmem:[#allocation11_spill] sm:$0xff] %v5837_v52  ;;  %v5841_v58 = vadd.s32 88, %v5590_v1 }
  0x35   : > { %v1310_v49 = vrot.slane %v5831_v43, 1  ;;  %v4642_v50 = vtrunc.f32 %v539_v11  ;;  %v4644_v51 = vtrunc.f32 %v540_v12  ;;  %v5844_v61 = vadd.s32 96, %v5590_v1 }
  0x36   : > { %v1309_v55 = vsel %vm9313_vm7, %v1307_v10, %v1308_v44  ;;  %v493_v57 = vmul.f32 0.055555556, %v451_v45  ;;  %9443 = vst [vmem:[#allocation12_spill] sm:$0xff] %v5841_v58  ;;  %v5850_v54 = vadd.s32 4294967291, %v5837_v52  ;;  %v5853_v62 = vadd.s32 4294967291, %v5841_v58 }
  0x37   : > { %9444 = vst [vmem:[#allocation13_spill] sm:$0xff] %v5844_v61  ;;  %v1311_v38 = vsel %vm9313_vm7, %v1308_v44, %v1310_v49  ;;  %v4643_v16 = vcvt.f32.s32 %v4642_v50  ;;  %v4645_v47 = vcvt.f32.s32 %v4644_v51  ;;  %v5856_v63 = vadd.s32 4294967291, %v5844_v61 }
  0x38   : > { %v4801_v17 = vpack.i.bf16 %v1311_v38, %v1309_v55  ;;  %v535_v46 = vfloor.f32 %v493_v57  ;;  %v416_v18 = vcvt.s32.f32 %v5850_v54  ;;  %v417_v25 = vcvt.s32.f32 %v5853_v62 }
  0x39   : > { %v623_v0 = vmul.u32 18, %v4643_v16  ;;  %v624_v13 = vmul.u32 18, %v4645_v47  ;;  %vm707_vm13 = vcmp.ge.s32.totalorder %v4643_v16, 1  ;;  %vm708_vm14 = vcmp.ge.s32.totalorder %v4645_v47, 1 }
  0x3a   : > { %4802 = vrot.lane.b32.xlu0 %v4801_v17, %s5541_s28  ;;  %vm749_vm15 = vcmp.le.s32.totalorder %v4643_v16, 16  ;;  %vm750_vm0 = vcmp.le.s32.totalorder %v4645_v47, 16  ;;  %v4634_v20 = vtrunc.f32 %v535_v46  ;;  %v418_v28 = vcvt.s32.f32 %v5856_v63 }
  0x3b   : > { %v665_v22 = vsub.s32 %v5650_v23, %v623_v0  ;;  %v666_v24 = vsub.s32 %v5664_v29, %v624_v13  ;;  %vm791_vm1 = vmand %vm707_vm13, %vm749_vm15  ;;  %v1099_v14 = vmax.f32 %v5812_v34, 0.0  ;;  %v4472_v32 = vunpack.c.l.bf16 %v5859_v19 }
  0x3c   : > { %vm792_vm2 = vmand %vm708_vm14, %vm750_vm0  ;;  %v4635_v30 = vcvt.f32.s32 %v4634_v20  ;;  %v458_v33 = vadd.f32 0.5, %v416_v18  ;;  %v1011_v37 = vmul.f32 %v4468_v41, %v5638_v15  ;;  %v1100_v23 = vmax.f32 %v5815_v35, 0.0 }
  0x3d   : > { %vm833_vm3 = vcmp.ge.s32.totalorder %v665_v22, 1  ;;  %vm834_vm5 = vcmp.ge.s32.totalorder %v666_v24, 1  ;;  %vm917_vm4 = vcmp.le.s32.totalorder %v665_v22, 16  ;;  %vm918_vm8 = vcmp.le.s32.totalorder %v666_v24, 16 }
  0x3e   : > { %vm875_vm6 = vmand %vm791_vm1, %vm833_vm3  ;;  %v619_v29 = vmul.u32 18, %v4635_v30  ;;  %v459_v10 = vadd.f32 0.5, %v417_v25  ;;  %vm703_vm9 = vcmp.ge.s32.totalorder %v4635_v30, 1  ;;  %vm745_vm11 = vcmp.le.s32.totalorder %v4635_v30, 16 }
  0x3f   : > { %vm876_vm10 = vmand %vm792_vm2, %vm834_vm5  ;;  %v460_v11 = vadd.f32 0.5, %v418_v28  ;;  %v500_v34 = vmul.f32 0.055555556, %v458_v33  ;;  %v1012_v45 = vmul.f32 %v4469_v48, %v5638_v15  ;;  %v1013_v50 = vmul.f32 %v4472_v32, %v5638_v15 }
  0x40   : > { %vm959_vm12 = vmand %vm875_vm6, %vm917_vm4  ;;  %v661_v12 = vsub.s32 %v5805_v31, %v619_v29  ;;  %v501_v44 = vmul.f32 0.055555556, %v459_v10  ;;  %v5877_v55 = vadd.f32 %v5658_v27, %v1011_v37  ;;  %v4465_v13 = vunpack.c.h.bf16 %v5722_v53  ;;  %v4532_v10 = vld [vmem:[%s5620_s23 + $0x38] sm:$0xff]  }
  0x41   : > { %vm960_vm13 = vmand %vm876_vm10, %vm918_vm8  ;;  %v5874_v41 = vsel %vm959_vm12, %v1099_v14, 0.0  ;;  %v502_v51 = vmul.f32 0.055555556, %v460_v11  ;;  %v542_v35 = vfloor.f32 %v500_v34  ;;  %v5889_v46 = vadd.f32 %v5658_v27, %v1012_v45 }
  0x42   : > { %v5879_v57 = vsel %vm960_vm13, %v1100_v23, 0.0  ;;  %v1320_v38 = vrot.slane %v5874_v41, 1  ;;  %vm787_vm14 = vmand %vm703_vm9, %vm745_vm11  ;;  %vm829_vm15 = vcmp.ge.s32.totalorder %v661_v12, 1  ;;  %vm913_vm0 = vcmp.le.s32.totalorder %v661_v12, 16 }
  0x43   : > { %v1322_v31 = vrot.slane %v5879_v57, 1  ;;  %vm871_vm1 = vmand %vm787_vm14, %vm829_vm15  ;;  %v543_v48 = vfloor.f32 %v501_v44  ;;  %v544_v16 = vfloor.f32 %v502_v51  ;;  %v4648_v47 = vtrunc.f32 %v542_v35 }
  0x44   : > { %v1321_v17 = vsel %vm9313_vm7, %v1318_v39, %v1320_v38  ;;  %vm955_vm2 = vmand %vm871_vm1, %vm913_vm0  ;;  %v5892_v0 = vadd.f32 %v5658_v27, %v1013_v50  ;;  %v5904_v14 = vadd.s32 72, %v5590_v1  ;;  %v1103_v45 = vmax.f32 %v5889_v46, 0.0 }
  0x45   : > { %v1323_v20 = vsel %vm9313_vm7, %v1320_v38, %v1322_v31  ;;  %v5900_v18 = vsel %vm955_vm2, %v1095_v40, 0.0  ;;  %v4649_v22 = vcvt.f32.s32 %v4648_v47  ;;  %v4650_v24 = vtrunc.f32 %v543_v48  ;;  %v5941_v38 = vld [vmem:[%s5620_s23 + $0x40] sm:$0xff]  }
  0x46   : > { %v4816_v39 = vpack.i.bf16 %v1323_v20, %v1321_v17  ;;  %v1312_v25 = vrot.slane %v5900_v18, 1  ;;  %v4652_v28 = vtrunc.f32 %v544_v16  ;;  %9445 = vst [vmem:[#allocation14_spill] sm:$0xff] %v5904_v14  ;;  %v5914_v33 = vadd.s32 4294967291, %v5904_v14 }
  0x47   : > { %v4651_v30 = vcvt.f32.s32 %v4650_v24  ;;  %v626_v53 = vmul.u32 18, %v4649_v22  ;;  %vm710_vm3 = vcmp.ge.s32.totalorder %v4649_v22, 1  ;;  %vm752_vm5 = vcmp.le.s32.totalorder %v4649_v22, 16 }
  0x48   : > { %4817 = vrot.lane.b32.xlu1 %v4816_v39, %s5541_s28  ;;  %v1313_v26 = vsel %vm9313_vm7, %v1310_v49, %v1312_v25  ;;  %v1315_v40 = vsel %vm9313_vm7, %v1312_v25, %v1314_v60  ;;  %v4653_v32 = vcvt.f32.s32 %v4652_v28  ;;  %vm794_vm9 = vmand %vm710_vm3, %vm752_vm5  ;;  %v415_v34 = vcvt.s32.f32 %v5914_v33 }
  0x49   : > { %v4806_v37 = vpack.i.bf16 %v1315_v40, %v1313_v26  ;;  %v627_v23 = vmul.u32 18, %v4651_v30  ;;  %v668_v29 = vsub.s32 %v5850_v54, %v626_v53  ;;  %vm711_vm4 = vcmp.ge.s32.totalorder %v4651_v30, 1 }
  0x4a   : > { %v628_v11 = vmul.u32 18, %v4653_v32  ;;  %vm712_vm6 = vcmp.ge.s32.totalorder %v4653_v32, 1  ;;  %vm753_vm8 = vcmp.le.s32.totalorder %v4651_v30, 16  ;;  %vm754_vm10 = vcmp.le.s32.totalorder %v4653_v32, 16 }
  0x4b   : > { %4807 = vrot.lane.b32.xlu0 %v4806_v37, %s5541_s28  ;;  %v669_v60 = vsub.s32 %v5853_v62, %v627_v23  ;;  %vm5922_vm11 = vmand %vm711_vm4, %vm753_vm8  ;;  %vm836_vm12 = vcmp.ge.s32.totalorder %v668_v29, 1  ;;  %v1102_v54 = vmax.f32 %v5877_v55, 0.0  ;;  %v1010_v50 = vmul.f32 %v4465_v13, %v5638_v15 }
  0x4c   : > { %v670_v12 = vsub.s32 %v5856_v63, %v628_v11  ;;  %vm5929_vm13 = vmand %vm712_vm6, %vm754_vm10  ;;  %v4476_v62 = vunpack.c.l.bf16 %v4532_v10  ;;  %vm920_vm0 = vcmp.le.s32.totalorder %v668_v29, 16  ;;  %v1104_v35 = vmax.f32 %v5892_v0, 0.0 }
  0x4d   : > { %vm837_vm14 = vcmp.ge.s32.totalorder %v669_v60, 1  ;;  %vm5935_vm15 = vmand %vm794_vm9, %vm836_vm12  ;;  %v457_v55 = vadd.f32 0.5, %v415_v34  ;;  %vm921_vm3 = vcmp.le.s32.totalorder %v669_v60, 16  ;;  %v5946_v63 = vadd.f32 %v5658_v27, %v1010_v50 }
  0x4e   : > { %vm838_vm1 = vcmp.ge.s32.totalorder %v670_v12, 1  ;;  %vm879_vm2 = vmand %vm5922_vm11, %vm837_vm14  ;;  %v5949_v48 = vadd.s32 112, %v5590_v1  ;;  %vm922_vm4 = vcmp.le.s32.totalorder %v670_v12, 16  ;;  %v5958_v17 = vadd.s32 120, %v5590_v1 }
  0x4f   : > { %vm5953_vm5 = vmand %vm5929_vm13, %vm838_vm1  ;;  %v499_v47 = vmul.f32 0.055555556, %v457_v55  ;;  %v5961_v46 = vadd.s32 128, %v5590_v1  ;;  %v4477_v0 = vunpack.c.h.bf16 %v4532_v10  ;;  %v4480_v13 = vunpack.c.l.bf16 %v5941_v38 }
  0x50   : > { %9452 = vst [vmem:[#allocation15_spill] sm:$0xff] %v5949_v48  ;;  %9455 = vst [vmem:[#allocation16_spill] sm:$0xff] %v5958_v17  ;;  %v5967_v20 = vadd.s32 4294967291, %v5949_v48  ;;  %v1015_v22 = vmul.f32 %v4476_v62, %v5638_v15  ;;  %v5973_v25 = vadd.s32 4294967291, %v5958_v17  ;;  %v1101_v26 = vmax.f32 %v5946_v63, 0.0  ;;  %v6263_v17 = vld [vmem:[%s5620_s23 + $0x70] sm:$0xff]  }
  0x51   : > { %9456 = vst [vmem:[#allocation17_spill] sm:$0xff] %v5961_v46  ;;  %vm962_vm6 = vmand %vm5935_vm15, %vm920_vm0  ;;  %v541_v39 = vfloor.f32 %v499_v47  ;;  %v5976_v28 = vadd.s32 4294967291, %v5961_v46  ;;  %v1016_v49 = vmul.f32 %v4477_v0, %v5638_v15  ;;  %v1017_v44 = vmul.f32 %v4480_v13, %v5638_v15  ;;  %v6115_v46 = vld [vmem:[%s5620_s23 + $0x58] sm:$0xff]  }
  0x52   : > { %vm963_vm8 = vmand %vm879_vm2, %vm921_vm3  ;;  %v5970_v24 = vsel %vm962_vm6, %v1102_v54, 0.0  ;;  %v420_v40 = vcvt.s32.f32 %v5967_v20  ;;  %v421_v29 = vcvt.s32.f32 %v5973_v25  ;;  %v6000_v51 = vadd.f32 %v5658_v27, %v1015_v22 }
  0x53   : > { %vm964_vm10 = vmand %vm5953_vm5, %vm922_vm4  ;;  %v5980_v30 = vsel %vm963_vm8, %v1103_v45, 0.0  ;;  %v1326_v53 = vrot.slane %v5970_v24, 1  ;;  %v4646_v23 = vtrunc.f32 %v541_v39  ;;  %v422_v11 = vcvt.s32.f32 %v5976_v28 }
  0x54   : > { %v5985_v32 = vsel %vm964_vm10, %v1104_v35, 0.0  ;;  %v1328_v37 = vrot.slane %v5980_v30, 1  ;;  %v462_v60 = vadd.f32 0.5, %v420_v40  ;;  %v463_v12 = vadd.f32 0.5, %v421_v29 }
  0x55   : > { %v9240_v10 = vrot.slane %v5985_v32, 1  ;;  %v4647_v34 = vcvt.f32.s32 %v4646_v23  ;;  %v464_v50 = vadd.f32 0.5, %v422_v11  ;;  %v6003_v0 = vadd.f32 %v5658_v27, %v1016_v49 }
  0x56   : > { %v1329_v54 = vsel %vm9313_vm7, %v1326_v53, %v1328_v37  ;;  %v504_v62 = vmul.f32 0.055555556, %v462_v60  ;;  %v505_v63 = vmul.f32 0.055555556, %v463_v12  ;;  %v6008_v39 = vadd.f32 %v5658_v27, %v1017_v44  ;;  %v6016_v60 = vld [vmem:[%s5620_s23 + $0x48] sm:$0xff]  }
  0x57   : > { %v1331_v45 = vsel %vm9313_vm7, %v1328_v37, %v9240_v10  ;;  %v625_v55 = vmul.u32 18, %v4647_v34  ;;  %vm709_vm9 = vcmp.ge.s32.totalorder %v4647_v34, 1  ;;  %vm751_vm11 = vcmp.le.s32.totalorder %v4647_v34, 16 }
  0x58   : > { %v4826_v35 = vpack.i.bf16 %v1331_v45, %v1329_v54  ;;  %v506_v16 = vmul.f32 0.055555556, %v464_v50  ;;  %v546_v47 = vfloor.f32 %v504_v62  ;;  %vm793_vm12 = vmand %vm709_vm9, %vm751_vm11  ;;  %v4473_v22 = vunpack.c.h.bf16 %v5859_v19 }
  0x59   : > { %v667_v13 = vsub.s32 %v5914_v33, %v625_v55  ;;  %v6012_v40 = vadd.s32 104, %v5590_v1  ;;  %v547_v37 = vfloor.f32 %v505_v63  ;;  %v1106_v11 = vmax.f32 %v6000_v51, 0.0 }
  0x5a   : > { %4827 = vrot.lane.b32.xlu1 %v4826_v35, %s5541_s28  ;;  %v548_v23 = vfloor.f32 %v506_v16  ;;  %v4656_v29 = vtrunc.f32 %v546_v47  ;;  %v1014_v49 = vmul.f32 %v4473_v22, %v5638_v15  ;;  %v1107_v12 = vmax.f32 %v6003_v0, 0.0 }
  0x5b   : > { %9457 = vst [vmem:[#allocation18_spill] sm:$0xff] %v6012_v40  ;;  %vm835_vm13 = vcmp.ge.s32.totalorder %v667_v13, 1  ;;  %vm919_vm14 = vcmp.le.s32.totalorder %v667_v13, 16  ;;  %v6019_v33 = vadd.s32 4294967291, %v6012_v40  ;;  %v4658_v19 = vtrunc.f32 %v547_v37  ;;  %v6145_v40 = vld [vmem:[%s5620_s23 + $0x60] sm:$0xff]  }
  0x5c   : > { %vm877_vm15 = vmand %vm793_vm12, %vm835_vm13  ;;  %v4657_v54 = vcvt.f32.s32 %v4656_v29  ;;  %v4660_v34 = vtrunc.f32 %v548_v23  ;;  %v6025_v45 = vadd.f32 %v5658_v27, %v1014_v49  ;;  %v4484_v50 = vunpack.c.l.bf16 %v6016_v60  ;;  %v6036_v23 = vld [vmem:[%s5620_s23 + $0x50] sm:$0xff]  }
  0x5d   : > { %vm961_vm0 = vmand %vm877_vm15, %vm919_vm14  ;;  %v419_v44 = vcvt.s32.f32 %v6019_v33  ;;  %v6029_v62 = vadd.s32 144, %v5590_v1  ;;  %v4659_v55 = vcvt.f32.s32 %v4658_v19  ;;  %v4481_v10 = vunpack.c.h.bf16 %v5941_v38 }
  0x5e   : > { %v6031_v35 = vsel %vm961_vm0, %v1101_v26, 0.0  ;;  %v4661_v63 = vcvt.f32.s32 %v4660_v34  ;;  %v630_v16 = vmul.u32 18, %v4657_v54  ;;  %vm714_vm1 = vcmp.ge.s32.totalorder %v4657_v54, 1 }
  0x5f   : > { %9458 = vst [vmem:[#allocation19_spill] sm:$0xff] %v6029_v62  ;;  %v1324_v47 = vrot.slane %v6031_v35, 1  ;;  %vm756_vm2 = vcmp.le.s32.totalorder %v4657_v54, 16  ;;  %v461_v0 = vadd.f32 0.5, %v419_v44  ;;  %v631_v13 = vmul.u32 18, %v4659_v55 }
  0x60   : > { %v632_v22 = vmul.u32 18, %v4661_v63  ;;  %v672_v37 = vsub.s32 %v5967_v20, %v630_v16  ;;  %vm715_vm3 = vcmp.ge.s32.totalorder %v4659_v55, 1  ;;  %vm716_vm5 = vcmp.ge.s32.totalorder %v4661_v63, 1  ;;  %vm798_vm6 = vmand %vm714_vm1, %vm756_vm2 }
  0x61   : > { %v1325_v26 = vsel %vm9313_vm7, %v1322_v31, %v1324_v47  ;;  %v1327_v29 = vsel %vm9313_vm7, %v1324_v47, %v1326_v53  ;;  %vm757_vm4 = vcmp.le.s32.totalorder %v4659_v55, 16  ;;  %v673_v54 = vsub.s32 %v5973_v25, %v631_v13 }
  0x62   : > { %v4821_v49 = vpack.i.bf16 %v1327_v29, %v1325_v26  ;;  %v674_v19 = vsub.s32 %v5976_v28, %v632_v22  ;;  %vm758_vm8 = vcmp.le.s32.totalorder %v4661_v63, 16  ;;  %vm799_vm10 = vmand %vm715_vm3, %vm757_vm4  ;;  %vm840_vm11 = vcmp.ge.s32.totalorder %v672_v37, 1 }
  0x63   : > { %vm6046_vm9 = vmand %vm716_vm5, %vm758_vm8  ;;  %v503_v31 = vmul.f32 0.055555556, %v461_v0  ;;  %v4485_v34 = vunpack.c.h.bf16 %v6016_v60  ;;  %v4488_v53 = vunpack.c.l.bf16 %v6036_v23  ;;  %vm841_vm12 = vcmp.ge.s32.totalorder %v673_v54, 1 }
  0x64   : > { %4822 = vrot.lane.b32.xlu0 %v4821_v49, %s5541_s28  ;;  %vm842_vm13 = vcmp.ge.s32.totalorder %v674_v19, 1  ;;  %vm882_vm14 = vmand %vm798_vm6, %vm840_vm11  ;;  %vm924_vm15 = vcmp.le.s32.totalorder %v672_v37, 16  ;;  %vm925_vm0 = vcmp.le.s32.totalorder %v673_v54, 16  ;;  %v6058_v44 = vadd.s32 152, %v5590_v1 }
  0x65   : > { %vm6053_vm1 = vmand %vm799_vm10, %vm841_vm12  ;;  %v545_v28 = vfloor.f32 %v503_v31  ;;  %v6061_v55 = vadd.s32 160, %v5590_v1  ;;  %v6064_v60 = vadd.s32 4294967291, %v6029_v62  ;;  %vm926_vm3 = vcmp.le.s32.totalorder %v674_v19, 16 }
  0x66   : > { %9463 = vst [vmem:[#allocation20_spill] sm:$0xff] %v6058_v44  ;;  %vm6068_vm2 = vmand %vm6046_vm9, %vm842_vm13  ;;  %v1108_v16 = vmax.f32 %v6008_v39, 0.0  ;;  %v1105_v47 = vmax.f32 %v6025_v45, 0.0  ;;  %v1019_v0 = vmul.f32 %v4484_v50, %v5638_v15  ;;  %v6076_v22 = vadd.s32 4294967291, %v6058_v44 }
  0x67   : > { %9464 = vst [vmem:[#allocation21_spill] sm:$0xff] %v6061_v55  ;;  %vm966_vm5 = vmand %vm882_vm14, %vm924_vm15  ;;  %v4654_v13 = vtrunc.f32 %v545_v28  ;;  %v6079_v37 = vadd.s32 4294967291, %v6061_v55  ;;  %v424_v26 = vcvt.s32.f32 %v6064_v60  ;;  %v1020_v45 = vmul.f32 %v4485_v34, %v5638_v15 }
  0x68   : > { %vm967_vm4 = vmand %vm6053_vm1, %vm925_vm0  ;;  %v6087_v39 = vsel %vm966_vm5, %v1106_v11, 0.0  ;;  %v1021_v50 = vmul.f32 %v4488_v53, %v5638_v15  ;;  %v6092_v29 = vadd.f32 %v5658_v27, %v1019_v0  ;;  %v425_v20 = vcvt.s32.f32 %v6076_v22 }
  0x69   : > { %9467 = vst [vmem:[#allocation22_spill] sm:$0xff] %v6087_v39  ;;  %vm968_vm6 = vmand %vm6068_vm2, %vm926_vm3  ;;  %v6096_v49 = vsel %vm967_vm4, %v1107_v12, 0.0  ;;  %v1334_v54 = vrot.slane %v6087_v39, 1  ;;  %v4655_v19 = vcvt.f32.s32 %v4654_v13  ;;  %v426_v31 = vcvt.s32.f32 %v6079_v37 }
  0x6a   : > { %9468 = vst [vmem:[#allocation23_spill] sm:$0xff] %v6096_v49  ;;  %v6100_v51 = vsel %vm968_vm6, %v1108_v16, 0.0  ;;  %v1336_v11 = vrot.slane %v6096_v49, 1  ;;  %v466_v34 = vadd.f32 0.5, %v424_v26  ;;  %v467_v28 = vadd.f32 0.5, %v425_v20 }
  0x6b   : > { %v9249_v53 = vrot.slane %v6100_v51, 1  ;;  %v629_v25 = vmul.u32 18, %v4655_v19  ;;  %vm713_vm8 = vcmp.ge.s32.totalorder %v4655_v19, 1  ;;  %vm755_vm10 = vcmp.le.s32.totalorder %v4655_v19, 16 }
  0x6c   : > { %v1337_v12 = vsel %vm9313_vm7, %v1334_v54, %v1336_v11  ;;  %v468_v63 = vadd.f32 0.5, %v426_v31  ;;  %v508_v0 = vmul.f32 0.055555556, %v466_v34  ;;  %vm797_vm9 = vmand %vm713_vm8, %vm755_vm10  ;;  %v6111_v26 = vadd.f32 %v5658_v27, %v1020_v45 }
  0x6d   : > { %v1339_v16 = vsel %vm9313_vm7, %v1336_v11, %v9249_v53  ;;  %v671_v13 = vsub.s32 %v6019_v33, %v629_v25  ;;  %v509_v44 = vmul.f32 0.055555556, %v467_v28  ;;  %v6118_v20 = vadd.f32 %v5658_v27, %v1021_v50 }
  0x6e   : > { %v4836_v55 = vpack.i.bf16 %v1339_v16, %v1337_v12  ;;  %v510_v19 = vmul.f32 0.055555556, %v468_v63  ;;  %v550_v62 = vfloor.f32 %v508_v0  ;;  %v6121_v11 = vadd.s32 136, %v5590_v1 }
  0x6f   : > { %vm839_vm11 = vcmp.ge.s32.totalorder %v671_v13, 1  ;;  %vm923_vm12 = vcmp.le.s32.totalorder %v671_v13, 16  ;;  %v551_v33 = vfloor.f32 %v509_v44  ;;  %v1018_v50 = vmul.f32 %v4481_v10, %v5638_v15 }
  0x70   : > { %9469 = vst [vmem:[#allocation24_spill] sm:$0xff] %v6121_v11  ;;  %4837 = vrot.lane.b32.xlu1 %v4836_v55, %s5541_s28  ;;  %vm881_vm13 = vmand %vm797_vm9, %vm839_vm11  ;;  %v552_v45 = vfloor.f32 %v510_v19  ;;  %v4664_v38 = vtrunc.f32 %v550_v62  ;;  %v6127_v25 = vadd.s32 4294967291, %v6121_v11  ;;  %v4492_v12 = vunpack.c.l.bf16 %v6115_v46 }
  0x71   : > { %vm965_vm14 = vmand %vm881_vm13, %vm923_vm12  ;;  %v4666_v55 = vtrunc.f32 %v551_v33  ;;  %v4493_v16 = vunpack.c.h.bf16 %v6115_v46  ;;  %v6137_v13 = vadd.s32 176, %v5590_v1 }
  0x72   : > { %v6131_v28 = vsel %vm965_vm14, %v1105_v47, 0.0  ;;  %v4665_v63 = vcvt.f32.s32 %v4664_v38  ;;  %v4668_v0 = vtrunc.f32 %v552_v45  ;;  %v423_v62 = vcvt.s32.f32 %v6127_v25 }
  0x73   : > { %v1332_v44 = vrot.slane %v6131_v28, 1  ;;  %9470 = vst [vmem:[#allocation25_spill] sm:$0xff] %v6137_v13  ;;  %v4667_v19 = vcvt.f32.s32 %v4666_v55  ;;  %v9471_v47 = vrot.slane %v5985_v32, 1 }
  0x74   : > { %v4669_v53 = vcvt.f32.s32 %v4668_v0  ;;  %v634_v10 = vmul.u32 18, %v4665_v63  ;;  %vm718_vm15 = vcmp.ge.s32.totalorder %v4665_v63, 1  ;;  %vm760_vm0 = vcmp.le.s32.totalorder %v4665_v63, 16 }
  0x75   : > { %v1333_v38 = vsel %vm9313_vm7, %v9471_v47, %v1332_v44  ;;  %v1335_v33 = vsel %vm9313_vm7, %v1332_v44, %v1334_v54  ;;  %v465_v45 = vadd.f32 0.5, %v423_v62  ;;  %v635_v31 = vmul.u32 18, %v4667_v19  ;;  %vm802_vm4 = vmand %vm718_vm15, %vm760_vm0 }
  0x76   : > { %v4831_v34 = vpack.i.bf16 %v1335_v33, %v1333_v38  ;;  %v636_v11 = vmul.u32 18, %v4669_v53  ;;  %v676_v46 = vsub.s32 %v6064_v60, %v634_v10  ;;  %vm719_vm1 = vcmp.ge.s32.totalorder %v4667_v19, 1 }
  0x77   : > { %vm720_vm2 = vcmp.ge.s32.totalorder %v4669_v53, 1  ;;  %vm761_vm3 = vcmp.le.s32.totalorder %v4667_v19, 16  ;;  %vm762_vm5 = vcmp.le.s32.totalorder %v4669_v53, 16  ;;  %v677_v55 = vsub.s32 %v6076_v22, %v635_v31 }
  0x78   : > { %4832 = vrot.lane.b32.xlu0 %v4831_v34, %s5541_s28  ;;  %v678_v54 = vsub.s32 %v6079_v37, %v636_v11  ;;  %vm803_vm6 = vmand %vm719_vm1, %vm761_vm3  ;;  %vm844_vm8 = vcmp.ge.s32.totalorder %v676_v46, 1  ;;  %v6151_v63 = vadd.f32 %v5658_v27, %v1018_v50  ;;  %v507_v0 = vmul.f32 0.055555556, %v465_v45 }
  0x79   : > { %vm6153_vm10 = vmand %vm720_vm2, %vm762_vm5  ;;  %v4496_v44 = vunpack.c.l.bf16 %v6145_v40  ;;  %v6159_v53 = vadd.s32 184, %v5590_v1  ;;  %v6162_v34 = vadd.s32 192, %v5590_v1  ;;  %vm845_vm9 = vcmp.ge.s32.totalorder %v677_v55, 1 }
  0x7a   : > { %vm846_vm11 = vcmp.ge.s32.totalorder %v678_v54, 1  ;;  %vm886_vm12 = vmand %vm802_vm4, %vm844_vm8  ;;  %vm928_vm13 = vcmp.le.s32.totalorder %v676_v46, 16  ;;  %vm929_vm14 = vcmp.le.s32.totalorder %v677_v55, 16  ;;  %v549_v22 = vfloor.f32 %v507_v0 }
  0x7b   : > { %9474 = vst [vmem:[#allocation26_spill] sm:$0xff] %v6159_v53  ;;  %9475 = vst [vmem:[#allocation27_spill] sm:$0xff] %v6162_v34  ;;  %v6169_v37 = vadd.s32 4294967291, %v6137_v13  ;;  %v6172_v11 = vadd.s32 4294967291, %v6159_v53  ;;  %v6175_v31 = vadd.s32 4294967291, %v6162_v34  ;;  %vm930_vm1 = vcmp.le.s32.totalorder %v678_v54, 16 }
  0x7c   : > { %vm6164_vm15 = vmand %vm803_vm6, %vm845_vm9  ;;  %v1112_v62 = vmax.f32 %v6118_v20, 0.0  ;;  %v1109_v19 = vmax.f32 %v6151_v63, 0.0  ;;  %v1023_v10 = vmul.f32 %v4492_v12, %v5638_v15  ;;  %v4662_v47 = vtrunc.f32 %v549_v22  ;;  %v6199_v15 = vld [vmem:[%s9235_s1] ss:$0 sm:$0xff] }
  0x7d   : > { %vm6179_vm0 = vmand %vm6153_vm10, %vm846_vm11  ;;  %v428_v38 = vcvt.s32.f32 %v6169_v37  ;;  %v429_v33 = vcvt.s32.f32 %v6172_v11  ;;  %v430_v45 = vcvt.s32.f32 %v6175_v31  ;;  %v9480_v46 = vmax.f32 %v6092_v29, 0.0 }
  0x7e   : > { %vm970_vm2 = vmand %vm886_vm12, %vm928_vm13  ;;  %v1024_v20 = vmul.f32 %v6199_v15, %v4493_v16  ;;  %v1025_v12 = vmul.f32 %v6199_v15, %v4496_v44  ;;  %v4489_v63 = vunpack.c.h.bf16 %v6036_v23  ;;  %v9481_v55 = vmax.f32 %v6111_v26, 0.0 }
  0x7f   : > { %vm971_vm3 = vmand %vm6164_vm15, %vm929_vm14  ;;  %v6194_v60 = vsel %vm970_vm2, %v9480_v46, 0.0  ;;  %v4663_v27 = vcvt.f32.s32 %v4662_v47  ;;  %v470_v22 = vadd.f32 0.5, %v428_v38  ;;  %v471_v34 = vadd.f32 0.5, %v429_v33  ;;  %v6224_v38 = vld [vmem:[%s9236_s2] ss:$0 sm:$0xff] }
  0x80   : > { %vm972_vm5 = vmand %vm6179_vm0, %vm930_vm1  ;;  %v6209_v29 = vsel %vm971_vm3, %v9481_v55, 0.0  ;;  %v1342_v0 = vrot.slane %v6194_v60, 1  ;;  %v472_v44 = vadd.f32 0.5, %v430_v45  ;;  %v6227_v33 = vadd.f32 %v6224_v38, %v1023_v10 }
  0x81   : > { %v6212_v46 = vsel %vm972_vm5, %v1112_v62, 0.0  ;;  %v1344_v16 = vrot.slane %v6209_v29, 1  ;;  %v633_v54 = vmul.u32 18, %v4663_v27  ;;  %vm717_vm4 = vcmp.ge.s32.totalorder %v4663_v27, 1 }
  0x82   : > { %9482 = vst [vmem:[#allocation28_spill] sm:$0xff] %v6212_v46  ;;  %v9258_v23 = vrot.slane %v6212_v46, 1  ;;  %vm759_vm6 = vcmp.le.s32.totalorder %v4663_v27, 16  ;;  %v512_v26 = vmul.f32 0.055555556, %v470_v22  ;;  %v6230_v45 = vadd.f32 %v6224_v38, %v1024_v20 }
  0x83   : > { %v1345_v50 = vsel %vm9313_vm7, %v1342_v0, %v1344_v16  ;;  %v513_v55 = vmul.f32 0.055555556, %v471_v34  ;;  %v514_v53 = vmul.f32 0.055555556, %v472_v44  ;;  %v675_v62 = vsub.s32 %v6127_v25, %v633_v54  ;;  %vm801_vm8 = vmand %vm717_vm4, %vm759_vm6 }
  0x84   : > { %v1347_v47 = vsel %vm9313_vm7, %v1344_v16, %v9258_v23  ;;  %v554_v27 = vfloor.f32 %v512_v26  ;;  %v6233_v25 = vadd.s32 168, %v5590_v1  ;;  %v1022_v10 = vmul.f32 %v6199_v15, %v4489_v63 }
  0x85   : > { %v4846_v34 = vpack.i.bf16 %v1347_v47, %v1345_v50  ;;  %v555_v22 = vfloor.f32 %v513_v55  ;;  %v556_v44 = vfloor.f32 %v514_v53  ;;  %vm843_vm10 = vcmp.ge.s32.totalorder %v675_v62, 1  ;;  %v4538_v53 = vld [vmem:[%s5620_s23 + $0x68] sm:$0xff]  }
  0x86   : > { %vm927_vm9 = vcmp.le.s32.totalorder %v675_v62, 16  ;;  %9483 = vst [vmem:[#allocation29_spill] sm:$0xff] %v6233_v25  ;;  %vm885_vm11 = vmand %vm801_vm8, %vm843_vm10  ;;  %v4672_v16 = vtrunc.f32 %v554_v27  ;;  %v6238_v20 = vadd.f32 %v6224_v38, %v1025_v12  ;;  %v1114_v50 = vmax.f32 %v6227_v33, 0.0 }
  0x87   : > { %4847 = vrot.lane.b32.xlu1 %v4846_v34, %s5541_s28  ;;  %v4674_v54 = vtrunc.f32 %v555_v22  ;;  %v4676_v23 = vtrunc.f32 %v556_v44  ;;  %vm969_vm12 = vmand %vm885_vm11, %vm927_vm9  ;;  %v6243_v26 = vadd.s32 4294967291, %v6233_v25  ;;  %v6250_v12 = vadd.f32 %v6224_v38, %v1022_v10 }
  0x88   : > { %v6245_v55 = vsel %vm969_vm12, %v1109_v19, 0.0  ;;  %v4673_v47 = vcvt.f32.s32 %v4672_v16  ;;  %v6253_v33 = vadd.s32 208, %v5590_v1  ;;  %v9486_v19 = vrot.slane %v6100_v51, 1 }
  0x89   : > { %9484 = vst [vmem:[#allocation30_spill] sm:$0xff] %v6245_v55  ;;  %v4675_v62 = vcvt.f32.s32 %v4674_v54  ;;  %v4677_v34 = vcvt.f32.s32 %v4676_v23  ;;  %v1340_v27 = vrot.slane %v6245_v55, 1  ;;  %v427_v63 = vcvt.s32.f32 %v6243_v26 }
  0x8a   : > { %9485 = vst [vmem:[#allocation31_spill] sm:$0xff] %v6253_v33  ;;  %v638_v22 = vmul.u32 18, %v4673_v47  ;;  %vm722_vm13 = vcmp.ge.s32.totalorder %v4673_v47, 1  ;;  %vm764_vm0 = vcmp.le.s32.totalorder %v4673_v47, 16 }
  0x8b   : > { %v639_v44 = vmul.u32 18, %v4675_v62  ;;  %vm723_vm14 = vcmp.ge.s32.totalorder %v4675_v62, 1  ;;  %v1341_v16 = vsel %vm9313_vm7, %v9486_v19, %v1340_v27  ;;  %v1343_v23 = vsel %vm9313_vm7, %v1340_v27, %v1342_v0  ;;  %vm806_vm3 = vmand %vm722_vm13, %vm764_vm0 }
  0x8c   : > { %v640_v54 = vmul.u32 18, %v4677_v34  ;;  %vm724_vm15 = vcmp.ge.s32.totalorder %v4677_v34, 1  ;;  %v4841_v25 = vpack.i.bf16 %v1343_v23, %v1341_v16  ;;  %v680_v10 = vsub.s32 %v6169_v37, %v638_v22 }
  0x8d   : > { %v681_v13 = vsub.s32 %v6172_v11, %v639_v44  ;;  %vm765_vm1 = vcmp.le.s32.totalorder %v4675_v62, 16  ;;  %vm766_vm2 = vcmp.le.s32.totalorder %v4677_v34, 16  ;;  %v469_v19 = vadd.f32 0.5, %v427_v63 }
  0x8e   : > { %v682_v48 = vsub.s32 %v6175_v31, %v640_v54  ;;  %4842 = vrot.lane.b32.xlu0 %v4841_v25, %s5541_s28  ;;  %vm6269_vm5 = vmand %vm723_vm14, %vm765_vm1  ;;  %vm848_vm4 = vcmp.ge.s32.totalorder %v680_v10, 1  ;;  %v1116_v37 = vmax.f32 %v6238_v20, 0.0  ;;  %v4500_v11 = vunpack.c.l.bf16 %v4538_v53 }
  0x8f   : > { %vm849_vm6 = vcmp.ge.s32.totalorder %v681_v13, 1  ;;  %vm6275_vm8 = vmand %vm724_vm15, %vm766_vm2  ;;  %v511_v47 = vmul.f32 0.055555556, %v469_v19  ;;  %v4501_v27 = vunpack.c.h.bf16 %v4538_v53  ;;  %v4504_v25 = vunpack.c.l.bf16 %v6263_v17 }
  0x90   : > { %vm850_vm10 = vcmp.ge.s32.totalorder %v682_v48, 1  ;;  %vm6280_vm9 = vmand %vm806_vm3, %vm848_vm4  ;;  %vm932_vm11 = vcmp.le.s32.totalorder %v680_v10, 16  ;;  %v6285_v63 = vadd.s32 216, %v5590_v1  ;;  %v6288_v20 = vadd.s32 224, %v5590_v1 }
  0x91   : > { %v6291_v34 = vadd.s32 4294967291, %v6253_v33  ;;  %vm6295_vm12 = vmand %vm6269_vm5, %vm849_vm6  ;;  %vm933_vm13 = vcmp.le.s32.totalorder %v681_v13, 16  ;;  %vm934_vm14 = vcmp.le.s32.totalorder %v682_v48, 16  ;;  %v553_v22 = vfloor.f32 %v511_v47 }
  0x92   : > { %9493 = vst [vmem:[#allocation32_spill] sm:$0xff] %v6285_v63  ;;  %9494 = vst [vmem:[#allocation33_spill] sm:$0xff] %v6288_v20  ;;  %v1113_v44 = vmax.f32 %v6250_v12, 0.0  ;;  %v6307_v23 = vadd.s32 4294967291, %v6285_v63  ;;  %v6310_v54 = vadd.s32 4294967291, %v6288_v20  ;;  %v1027_v13 = vmul.f32 %v6199_v15, %v4500_v11 }
  0x93   : > { %vm6302_vm15 = vmand %vm6275_vm8, %vm850_vm10  ;;  %v432_v10 = vcvt.s32.f32 %v6291_v34  ;;  %v4670_v12 = vtrunc.f32 %v553_v22  ;;  %v1028_v19 = vmul.f32 %v6199_v15, %v4501_v27  ;;  %v1029_v0 = vmul.f32 %v6199_v15, %v4504_v25 }
  0x94   : > { %vm974_vm0 = vmand %vm6280_vm9, %vm932_vm11  ;;  %v4497_v31 = vunpack.c.h.bf16 %v6145_v40  ;;  %v433_v20 = vcvt.s32.f32 %v6307_v23  ;;  %v434_v63 = vcvt.s32.f32 %v6310_v54  ;;  %v9499_v27 = vmax.f32 %v6230_v45, 0.0 }
  0x95   : > { %vm975_vm1 = vmand %vm6295_vm12, %vm933_vm13  ;;  %v6321_v47 = vsel %vm974_vm0, %v1114_v50, 0.0  ;;  %v474_v11 = vadd.f32 0.5, %v432_v10  ;;  %v4671_v25 = vcvt.f32.s32 %v4670_v12  ;;  %v6334_v53 = vadd.s32 200, %v5590_v1 }
  0x96   : > { %vm976_vm2 = vmand %vm6302_vm15, %vm934_vm14  ;;  %v6330_v62 = vsel %vm975_vm1, %v9499_v27, 0.0  ;;  %v1350_v40 = vrot.slane %v6321_v47, 1  ;;  %v475_v33 = vadd.f32 0.5, %v433_v20  ;;  %v476_v10 = vadd.f32 0.5, %v434_v63 }
  0x97   : > { %9500 = vst [vmem:[#allocation34_spill] sm:$0xff] %v6334_v53  ;;  %v6336_v50 = vsel %vm976_vm2, %v1116_v37, 0.0  ;;  %v1352_v22 = vrot.slane %v6330_v62, 1  ;;  %v637_v16 = vmul.u32 18, %v4671_v25  ;;  %vm721_vm3 = vcmp.ge.s32.totalorder %v4671_v25, 1 }
  0x98   : > { %9501 = vst [vmem:[#allocation35_spill] sm:$0xff] %v6336_v50  ;;  %v9283_v48 = vrot.slane %v6336_v50, 1  ;;  %vm763_vm5 = vcmp.le.s32.totalorder %v4671_v25, 16  ;;  %v516_v27 = vmul.f32 0.055555556, %v474_v11  ;;  %v6346_v20 = vadd.f32 %v6224_v38, %v1027_v13 }
  0x99   : > { %v1353_v45 = vsel %vm9313_vm7, %v1350_v40, %v1352_v22  ;;  %v517_v61 = vmul.f32 0.055555556, %v475_v33  ;;  %v518_v14 = vmul.f32 0.055555556, %v476_v10  ;;  %v679_v37 = vsub.s32 %v6243_v26, %v637_v16  ;;  %vm805_vm4 = vmand %vm721_vm3, %vm763_vm5 }
  0x9a   : > { %v1355_v12 = vsel %vm9313_vm7, %v1352_v22, %v9283_v48  ;;  %v6349_v63 = vadd.f32 %v6224_v38, %v1028_v19  ;;  %v558_v25 = vfloor.f32 %v516_v27  ;;  %v6352_v33 = vadd.s32 4294967291, %v6334_v53  ;;  %v6379_v48 = vld [vmem:[%s5620_s23 + $0x80] sm:$0xff]  }
  0x9b   : > { %v4856_v58 = vpack.i.bf16 %v1355_v12, %v1353_v45  ;;  %v559_v52 = vfloor.f32 %v517_v61  ;;  %v560_v9 = vfloor.f32 %v518_v14  ;;  %vm847_vm6 = vcmp.ge.s32.totalorder %v679_v37, 1 }
  0x9c   : > { %vm931_vm8 = vcmp.le.s32.totalorder %v679_v37, 16  ;;  %v1026_v11 = vmul.f32 %v6199_v15, %v4497_v31  ;;  %vm889_vm10 = vmand %vm805_vm4, %vm847_vm6  ;;  %v4680_v26 = vtrunc.f32 %v558_v25  ;;  %v6357_v19 = vadd.f32 %v6224_v38, %v1029_v0 }
  0x9d   : > { %4857 = vrot.lane.b32.xlu1 %v4856_v58, %s5541_s28  ;;  %v4682_v13 = vtrunc.f32 %v559_v52  ;;  %v4684_v22 = vtrunc.f32 %v560_v9  ;;  %vm973_vm9 = vmand %vm889_vm10, %vm931_vm8  ;;  %v1118_v61 = vmax.f32 %v6346_v20, 0.0  ;;  %v431_v10 = vcvt.s32.f32 %v6352_v33 }
  0x9e   : > { %v6362_v16 = vsel %vm973_vm9, %v1113_v44, 0.0  ;;  %v4681_v31 = vcvt.f32.s32 %v4680_v26  ;;  %v6366_v9 = vadd.f32 %v6224_v38, %v1026_v11  ;;  %v6369_v0 = vadd.s32 240, %v5590_v1 }
  0x9f   : > { %v4683_v45 = vcvt.f32.s32 %v4682_v13  ;;  %v4685_v58 = vcvt.f32.s32 %v4684_v22  ;;  %v1348_v27 = vrot.slane %v6362_v16, 1  ;;  %v473_v52 = vadd.f32 0.5, %v431_v10  ;;  %v4540_v13 = vld [vmem:[%s5620_s23 + $0x78] sm:$0xff]  }
  0xa0   : > { %9502 = vst [vmem:[#allocation36_spill] sm:$0xff] %v6369_v0  ;;  %v642_v12 = vmul.u32 18, %v4681_v31  ;;  %vm726_vm11 = vcmp.ge.s32.totalorder %v4681_v31, 1  ;;  %v9503_v44 = vrot.slane %v6212_v46, 1  ;;  %vm768_vm14 = vcmp.le.s32.totalorder %v4681_v31, 16 }
  0xa1   : > { %v643_v37 = vmul.u32 18, %v4683_v45  ;;  %vm727_vm12 = vcmp.ge.s32.totalorder %v4683_v45, 1  ;;  %v1351_v25 = vsel %vm9313_vm7, %v1348_v27, %v1350_v40  ;;  %v644_v26 = vmul.u32 18, %v4685_v58  ;;  %vm810_vm1 = vmand %vm726_vm11, %vm768_vm14 }
  0xa2   : > { %v1349_v20 = vsel %vm9313_vm7, %v9503_v44, %v1348_v27  ;;  %vm728_vm13 = vcmp.ge.s32.totalorder %v4685_v58, 1  ;;  %v684_v11 = vsub.s32 %v6291_v34, %v642_v12  ;;  %vm769_vm15 = vcmp.le.s32.totalorder %v4683_v45, 16 }
  0xa3   : > { %v4851_v22 = vpack.i.bf16 %v1351_v25, %v1349_v20  ;;  %v685_v10 = vsub.s32 %v6307_v23, %v643_v37  ;;  %v686_v14 = vsub.s32 %v6310_v54, %v644_v26  ;;  %vm770_vm0 = vcmp.le.s32.totalorder %v4685_v58, 16  ;;  %vm6385_vm2 = vmand %vm727_vm12, %vm769_vm15 }
  0xa4   : > { %v515_v44 = vmul.f32 0.055555556, %v473_v52  ;;  %vm852_vm3 = vcmp.ge.s32.totalorder %v684_v11, 1  ;;  %v4508_v34 = vunpack.c.l.bf16 %v4540_v13  ;;  %v4509_v23 = vunpack.c.h.bf16 %v4540_v13  ;;  %vm6390_vm4 = vmand %vm728_vm13, %vm770_vm0 }
  0xa5   : > { %4852 = vrot.lane.b32.xlu0 %v4851_v22, %s5541_s28  ;;  %vm853_vm5 = vcmp.ge.s32.totalorder %v685_v10, 1  ;;  %vm854_vm6 = vcmp.ge.s32.totalorder %v686_v14, 1  ;;  %v4512_v31 = vunpack.c.l.bf16 %v6379_v48  ;;  %v6396_v52 = vadd.s32 248, %v5590_v1  ;;  %vm6398_vm8 = vmand %vm810_vm1, %vm852_vm3 }
  0xa6   : > { %v557_v54 = vfloor.f32 %v515_v44  ;;  %vm936_vm10 = vcmp.le.s32.totalorder %v684_v11, 16  ;;  %v1120_v12 = vmax.f32 %v6357_v19, 0.0  ;;  %v6404_v58 = vadd.s32 256, %v5590_v1  ;;  %vm6411_vm9 = vmand %vm6385_vm2, %vm853_vm5 }
  0xa7   : > { %9508 = vst [vmem:[#allocation37_spill] sm:$0xff] %v6396_v52  ;;  %v6407_v37 = vadd.s32 4294967291, %v6369_v0  ;;  %vm937_vm11 = vcmp.le.s32.totalorder %v685_v10, 16  ;;  %v1117_v26 = vmax.f32 %v6366_v9, 0.0  ;;  %v6417_v13 = vadd.s32 4294967291, %v6396_v52  ;;  %vm6421_vm12 = vmand %vm6390_vm4, %vm854_vm6 }
  0xa8   : > { %9511 = vst [vmem:[#allocation38_spill] sm:$0xff] %v6404_v58  ;;  %v4678_v25 = vtrunc.f32 %v557_v54  ;;  %vm938_vm13 = vcmp.le.s32.totalorder %v686_v14, 16  ;;  %v6426_v22 = vadd.s32 4294967291, %v6404_v58  ;;  %v1031_v10 = vmul.f32 %v6199_v15, %v4508_v34  ;;  %vm978_vm14 = vmand %vm6398_vm8, %vm936_vm10 }
  0xa9   : > { %v436_v11 = vcvt.s32.f32 %v6407_v37  ;;  %v437_v44 = vcvt.s32.f32 %v6417_v13  ;;  %v1032_v40 = vmul.f32 %v6199_v15, %v4509_v23  ;;  %v1033_v27 = vmul.f32 %v6199_v15, %v4512_v31  ;;  %vm979_vm15 = vmand %vm6411_vm9, %vm937_vm11 }
  0xaa   : > { %v4679_v9 = vcvt.f32.s32 %v4678_v25  ;;  %v6437_v14 = vsel %vm978_vm14, %v1118_v61, 0.0  ;;  %v438_v54 = vcvt.s32.f32 %v6426_v22  ;;  %v6441_v34 = vadd.s32 232, %v5590_v1  ;;  %vm980_vm0 = vmand %vm6421_vm12, %vm938_vm13 }
  0xab   : > { %9516 = vst [vmem:[#allocation39_spill] sm:$0xff] %v6437_v14  ;;  %v478_v58 = vadd.f32 0.5, %v436_v11  ;;  %v9518_v45 = vmax.f32 %v6349_v63, 0.0  ;;  %v1358_v23 = vrot.slane %v6437_v14, 1  ;;  %v6450_v20 = vsel %vm980_vm0, %v1120_v12, 0.0 }
  0xac   : > { %9517 = vst [vmem:[#allocation40_spill] sm:$0xff] %v6441_v34  ;;  %v641_v31 = vmul.u32 18, %v4679_v9  ;;  %vm725_vm1 = vcmp.ge.s32.totalorder %v4679_v9, 1  ;;  %9519 = vst [vmem:[#allocation41_spill] sm:$0xff] %v6450_v20  ;;  %vm767_vm2 = vcmp.le.s32.totalorder %v4679_v9, 16  ;;  %v479_v11 = vadd.f32 0.5, %v437_v44 }
  0xad   : > { %v6447_v25 = vsel %vm979_vm15, %v9518_v45, 0.0  ;;  %v9296_v52 = vrot.slane %v6450_v20, 1  ;;  %vm809_vm3 = vmand %vm725_vm1, %vm767_vm2  ;;  %v480_v19 = vadd.f32 0.5, %v438_v54  ;;  %v520_v53 = vmul.f32 0.055555556, %v478_v58 }
  0xae   : > { %v1360_v61 = vrot.slane %v6447_v25, 1  ;;  %v683_v0 = vsub.s32 %v6352_v33, %v641_v31  ;;  %v521_v45 = vmul.f32 0.055555556, %v479_v11  ;;  %v6457_v3 = vadd.f32 %v6224_v38, %v1031_v10 }
  0xaf   : > { %v4505_v12 = vunpack.c.h.bf16 %v6263_v17  ;;  %v522_v44 = vmul.f32 0.055555556, %v480_v19  ;;  %v562_v33 = vfloor.f32 %v520_v53  ;;  %v6464_v58 = vadd.s32 4294967291, %v6441_v34 }
  0xb0   : > { %v1361_v63 = vsel %vm9313_vm7, %v1358_v23, %v1360_v61  ;;  %v1363_v9 = vsel %vm9313_vm7, %v1360_v61, %v9296_v52  ;;  %vm851_vm5 = vcmp.ge.s32.totalorder %v683_v0, 1  ;;  %vm935_vm4 = vcmp.le.s32.totalorder %v683_v0, 16 }
  0xb1   : > { %v4866_v8 = vpack.i.bf16 %v1363_v9, %v1361_v63  ;;  %vm893_vm6 = vmand %vm809_vm3, %vm851_vm5  ;;  %v563_v54 = vfloor.f32 %v521_v45  ;;  %v564_v31 = vfloor.f32 %v522_v44  ;;  %v6467_v10 = vadd.f32 %v6224_v38, %v1032_v40 }
  0xb2   : > { %vm977_vm8 = vmand %vm893_vm6, %vm935_vm4  ;;  %v4688_v61 = vtrunc.f32 %v562_v33  ;;  %v435_v0 = vcvt.s32.f32 %v6464_v58  ;;  %v6475_v63 = vadd.f32 %v6224_v38, %v1033_v27  ;;  %v1122_v45 = vmax.f32 %v6457_v3, 0.0 }
  0xb3   : > { %4867 = vrot.lane.b32.xlu1 %v4866_v8, %s5541_s28  ;;  %v6470_v17 = vsel %vm977_vm8, %v1117_v26, 0.0  ;;  %v4690_v11 = vtrunc.f32 %v563_v54  ;;  %v4692_v53 = vtrunc.f32 %v564_v31  ;;  %v1030_v52 = vmul.f32 %v6199_v15, %v4505_v12 }
  0xb4   : > { %9520 = vst [vmem:[#allocation42_spill] sm:$0xff] %v6470_v17  ;;  %v1356_v19 = vrot.slane %v6470_v17, 1  ;;  %v4689_v9 = vcvt.f32.s32 %v4688_v61  ;;  %v477_v40 = vadd.f32 0.5, %v435_v0  ;;  %v9521_v8 = vrot.slane %v6336_v50, 1 }
  0xb5   : > { %v4691_v44 = vcvt.f32.s32 %v4690_v11  ;;  %v4693_v54 = vcvt.f32.s32 %v4692_v53  ;;  %v6484_v34 = vadd.s32 272, %v5590_v1  ;;  %v358_v53 = vadd.s32 288, %v5590_v1 }
  0xb6   : > { %v1357_v26 = vsel %vm9313_vm7, %v9521_v8, %v1356_v19  ;;  %v1359_v33 = vsel %vm9313_vm7, %v1356_v19, %v1358_v23  ;;  %v646_v27 = vmul.u32 18, %v4689_v9  ;;  %vm730_vm10 = vcmp.ge.s32.totalorder %v4689_v9, 1 }
  0xb7   : > { %9522 = vst [vmem:[#allocation43_spill] sm:$0xff] %v6484_v34  ;;  %v4861_v31 = vpack.i.bf16 %v1359_v33, %v1357_v26  ;;  %v647_v2 = vmul.u32 18, %v4691_v44  ;;  %v648_v3 = vmul.u32 18, %v4693_v54  ;;  %vm731_vm9 = vcmp.ge.s32.totalorder %v4691_v44, 1 }
  0xb8   : > { %vm732_vm11 = vcmp.ge.s32.totalorder %v4693_v54, 1  ;;  %vm772_vm12 = vcmp.le.s32.totalorder %v4689_v9, 16  ;;  %v688_v12 = vsub.s32 %v6407_v37, %v646_v27  ;;  %vm773_vm13 = vcmp.le.s32.totalorder %v4691_v44, 16 }
  0xb9   : > { %4862 = vrot.lane.b32.xlu0 %v4861_v31, %s5541_s28  ;;  %v689_v61 = vsub.s32 %v6417_v13, %v647_v2  ;;  %vm774_vm14 = vcmp.le.s32.totalorder %v4693_v54, 16  ;;  %vm814_vm15 = vmand %vm730_vm10, %vm772_vm12  ;;  %v690_v23 = vsub.s32 %v6426_v22, %v648_v3  ;;  %v519_v0 = vmul.f32 0.055555556, %v477_v40  ;;  %v4542_v22 = vld [vmem:[%s5620_s23 + $0x88] sm:$0xff]   ;;  %v6512_v40 = vld [vmem:[%s5620_s23 + $0x90] sm:$0xff]  }
  0xba   : > { %vm6490_vm0 = vmand %vm731_vm9, %vm773_vm13  ;;  %v6495_v19 = vadd.s32 280, %v5590_v1  ;;  %vm856_vm2 = vcmp.ge.s32.totalorder %v688_v12, 1  ;;  %v1123_v2 = vmax.f32 %v6467_v10, 0.0  ;;  %v6504_v13 = vadd.f32 %v6224_v38, %v1030_v52 }
  0xbb   : > { %vm6498_vm1 = vmand %vm732_vm11, %vm774_vm14  ;;  %vm857_vm3 = vcmp.ge.s32.totalorder %v689_v61, 1  ;;  %vm858_vm5 = vcmp.ge.s32.totalorder %v690_v23, 1  ;;  %vm940_vm6 = vcmp.le.s32.totalorder %v688_v12, 16  ;;  %v561_v44 = vfloor.f32 %v519_v0 }
  0xbc   : > { %9525 = vst [vmem:[#allocation44_spill] sm:$0xff] %v6495_v19  ;;  %vm6507_vm4 = vmand %vm814_vm15, %vm856_vm2  ;;  %v6515_v8 = vadd.s32 4294967291, %v6484_v34  ;;  %vm941_vm10 = vcmp.le.s32.totalorder %v689_v61, 16  ;;  %v1124_v52 = vmax.f32 %v6475_v63, 0.0  ;;  %v6525_v26 = vadd.s32 4294967291, %v6495_v19 }
  0xbd   : > { %vm6519_vm8 = vmand %vm6490_vm0, %vm857_vm3  ;;  %v6527_v33 = vadd.s32 4294967291, %v358_v53  ;;  %vm942_vm11 = vcmp.le.s32.totalorder %v690_v23, 16  ;;  %v4686_v31 = vtrunc.f32 %v561_v44  ;;  %v4516_v27 = vunpack.c.l.bf16 %v4542_v22 }
  0xbe   : > { %vm6531_vm9 = vmand %vm6498_vm1, %vm858_vm5  ;;  %v440_v3 = vcvt.s32.f32 %v6515_v8  ;;  %v4517_v63 = vunpack.c.h.bf16 %v4542_v22  ;;  %v4520_v12 = vunpack.c.l.bf16 %v6512_v40  ;;  %v441_v61 = vcvt.s32.f32 %v6525_v26 }
  0xbf   : > { %vm982_vm12 = vmand %vm6507_vm4, %vm940_vm6  ;;  %v442_v11 = vcvt.s32.f32 %v6527_v33  ;;  %v4687_v23 = vcvt.f32.s32 %v4686_v31  ;;  %v1121_v53 = vmax.f32 %v6504_v13, 0.0 }
  0xc0   : > { %vm983_vm13 = vmand %vm6519_vm8, %vm941_vm10  ;;  %v6543_v0 = vsel %vm982_vm12, %v1122_v45, 0.0  ;;  %v482_v37 = vadd.f32 0.5, %v440_v3  ;;  %v483_v44 = vadd.f32 0.5, %v441_v61  ;;  %v1035_v61 = vmul.f32 %v6199_v15, %v4516_v27 }
  0xc1   : > { %9534 = vst [vmem:[#allocation45_spill] sm:$0xff] %v6543_v0  ;;  %vm984_vm14 = vmand %vm6531_vm9, %vm942_vm11  ;;  %v6548_v9 = vsel %vm983_vm13, %v1123_v2, 0.0  ;;  %v1366_v22 = vrot.slane %v6543_v0, 1  ;;  %v484_v19 = vadd.f32 0.5, %v442_v11  ;;  %v645_v4 = vmul.u32 18, %v4687_v23 }
  0xc2   : > { %v6551_v34 = vsel %vm984_vm14, %v1124_v52, 0.0  ;;  %v1368_v10 = vrot.slane %v6548_v9, 1  ;;  %vm729_vm15 = vcmp.ge.s32.totalorder %v4687_v23, 1  ;;  %vm771_vm0 = vcmp.le.s32.totalorder %v4687_v23, 16 }
  0xc3   : > { %9535 = vst [vmem:[#allocation46_spill] sm:$0xff] %v6551_v34  ;;  %v1370_v45 = vrot.slane %v6551_v34, 1  ;;  %v524_v13 = vmul.f32 0.055555556, %v482_v37  ;;  %v525_v31 = vmul.f32 0.055555556, %v483_v44  ;;  %v687_v2 = vsub.s32 %v6464_v58, %v645_v4  ;;  %vm813_vm1 = vmand %vm729_vm15, %vm771_vm0 }
  0xc4   : > { %v1369_v54 = vsel %vm9313_vm7, %v1366_v22, %v1368_v10  ;;  %v526_v3 = vmul.f32 0.055555556, %v484_v19  ;;  %v1036_v21 = vmul.f32 %v6199_v15, %v4517_v63  ;;  %v6563_v4 = vadd.s32 264, %v5590_v1 }
  0xc5   : > { %v1371_v52 = vsel %vm9313_vm7, %v1368_v10, %v1370_v45  ;;  %v566_v11 = vfloor.f32 %v524_v13  ;;  %v567_v5 = vfloor.f32 %v525_v31  ;;  %vm855_vm2 = vcmp.ge.s32.totalorder %v687_v2, 1 }
  0xc6   : > { %v4876_v6 = vpack.i.bf16 %v1371_v52, %v1369_v54  ;;  %vm939_vm3 = vcmp.le.s32.totalorder %v687_v2, 16  ;;  %v568_v23 = vfloor.f32 %v526_v3  ;;  %vm897_vm5 = vmand %vm813_vm1, %vm855_vm2  ;;  %9536 = vst [vmem:[#allocation47_spill] sm:$0xff] %v6563_v4  ;;  %v1037_v19 = vmul.f32 %v6199_v15, %v4520_v12 }
  0xc7   : > { %v4696_v37 = vtrunc.f32 %v566_v11  ;;  %v4698_v44 = vtrunc.f32 %v567_v5  ;;  %vm981_vm4 = vmand %vm897_vm5, %vm939_vm3  ;;  %v1084_v13 = vadd.f32 %v6224_v38, %v1035_v61  ;;  %v1085_v5 = vadd.f32 %v6224_v38, %v1036_v21 }
  0xc8   : > { %4877 = vrot.lane.b32.xlu1 %v4876_v6, %s5541_s28  ;;  %v4700_v58 = vtrunc.f32 %v568_v23  ;;  %v6567_v27 = vsel %vm981_vm4, %v1121_v53, 0.0  ;;  %v6573_v2 = vadd.s32 4294967291, %v6563_v4  ;;  %v9538_v12 = vrot.slane %v6450_v20, 1 }
  0xc9   : > { %9537 = vst [vmem:[#allocation48_spill] sm:$0xff] %v6567_v27  ;;  %v4697_v10 = vcvt.f32.s32 %v4696_v37  ;;  %v4699_v63 = vcvt.f32.s32 %v4698_v44  ;;  %v1364_v31 = vrot.slane %v6567_v27, 1 }
  0xca   : > { %v4701_v54 = vcvt.f32.s32 %v4700_v58  ;;  %v439_v44 = vcvt.s32.f32 %v6573_v2  ;;  %v1127_v58 = vmax.f32 %v1085_v5, 0.0 }
  0xcb   : > { %v650_v3 = vmul.u32 18, %v4697_v10  ;;  %v651_v6 = vmul.u32 18, %v4699_v63  ;;  %vm734_vm6 = vcmp.ge.s32.totalorder %v4697_v10, 1  ;;  %vm735_vm8 = vcmp.ge.s32.totalorder %v4699_v63, 1 }
  0xcc   : > { %v1365_v53 = vsel %vm9313_vm7, %v9538_v12, %v1364_v31  ;;  %v1367_v52 = vsel %vm9313_vm7, %v1364_v31, %v1366_v22  ;;  %v652_v11 = vmul.u32 18, %v4701_v54  ;;  %vm736_vm10 = vcmp.ge.s32.totalorder %v4701_v54, 1 }
  0xcd   : > { %v4871_v61 = vpack.i.bf16 %v1367_v52, %v1365_v53  ;;  %v692_v23 = vsub.s32 %v6515_v8, %v650_v3  ;;  %v693_v21 = vsub.s32 %v6525_v26, %v651_v6  ;;  %vm776_vm9 = vcmp.le.s32.totalorder %v4697_v10, 16 }
  0xce   : > { %v694_v37 = vsub.s32 %v6527_v33, %v652_v11  ;;  %vm777_vm11 = vcmp.le.s32.totalorder %v4699_v63, 16  ;;  %vm778_vm12 = vcmp.le.s32.totalorder %v4701_v54, 16  ;;  %vm818_vm13 = vmand %vm734_vm6, %vm776_vm9  ;;  %v1086_v22 = vadd.f32 %v6224_v38, %v1037_v19 }
  0xcf   : > { %4872 = vrot.lane.b32.xlu0 %v4871_v61, %s5541_s28  ;;  %vm819_vm14 = vmand %vm735_vm8, %vm777_vm11  ;;  %vm860_vm15 = vcmp.ge.s32.totalorder %v692_v23, 1  ;;  %vm861_vm0 = vcmp.ge.s32.totalorder %v693_v21, 1  ;;  %v4513_v8 = vunpack.c.h.bf16 %v6379_v48  ;;  %v481_v26 = vadd.f32 0.5, %v439_v44 }
  0xd0   : > { %vm820_vm1 = vmand %vm736_vm10, %vm778_vm12  ;;  %vm862_vm2 = vcmp.ge.s32.totalorder %v694_v37, 1  ;;  %vm944_vm5 = vcmp.le.s32.totalorder %v692_v23, 16  ;;  %v1126_v33 = vmax.f32 %v1084_v13, 0.0  ;;  %vm945_vm6 = vcmp.le.s32.totalorder %v693_v21, 16 }
  0xd1   : > { %vm902_vm3 = vmand %vm818_vm13, %vm860_vm15  ;;  %v523_v10 = vmul.f32 0.055555556, %v481_v26  ;;  %vm946_vm7 = vcmp.le.s32.totalorder %v694_v37, 16  ;;  %v1128_v63 = vmax.f32 %v1086_v22, 0.0  ;;  %v1034_v31 = vmul.f32 %v6199_v15, %v4513_v8 }
  0xd2   : > { %vm903_vm4 = vmand %vm819_vm14, %vm861_vm0  ;;  %v1492_v48 = vrot.slane %v5820_v36, 2  ;;  %v1493_v54 = vrot.slane %v5828_v42, 2  ;;  %vm1491_vm11 = vcmask 1045504   ;;  %v1495_v13 = vrot.slane %v5831_v43, 2 }
  0xd3   : > { %vm904_vm9 = vmand %vm820_vm1, %vm862_vm2  ;;  %v565_v19 = vfloor.f32 %v523_v10  ;;  %v1083_v52 = vadd.f32 %v6224_v38, %v1034_v31  ;;  %v1499_v21 = vrot.slane %v5731_v56, 2  ;;  %vm9541_vm13 = vcmask 1046528  }
  0xd4   : > { %vm986_vm8 = vmand %vm902_vm3, %vm944_vm5  ;;  %v1494_v23 = vsel %vm1491_vm11, %v1492_v48, %v1493_v54  ;;  %v1496_v44 = vsel %vm1491_vm11, %v1493_v54, %v1495_v13  ;;  %v1501_v22 = vrot.slane %v5740_v59, 2  ;;  %v1503_v8 = vrot.slane %v5747_v7, 2 }
  0xd5   : > { %vm987_vm10 = vmand %vm903_vm4, %vm945_vm6  ;;  %v6591_v3 = vsel %vm986_vm8, %v1126_v33, 0.0  ;;  %v4694_v12 = vtrunc.f32 %v565_v19  ;;  %v1125_v10 = vmax.f32 %v1083_v52, 0.0  ;;  %v1507_v19 = vrot.slane %v5879_v57, 2 }
  0xd6   : > { %9539 = vst [vmem:[#allocation49_spill] sm:$0xff] %v6591_v3  ;;  %vm988_vm12 = vmand %vm904_vm9, %vm946_vm7  ;;  %v6594_v5 = vsel %vm987_vm10, %v1127_v58, 0.0  ;;  %v1374_v6 = vrot.slane %v6591_v3, 1  ;;  %v1502_v31 = vsel %vm1491_vm11, %v1499_v21, %v1501_v22  ;;  %v1509_v48 = vrot.slane %v6031_v35, 2 }
  0xd7   : > { %v6597_v53 = vsel %vm988_vm12, %v1128_v63, 0.0  ;;  %v1376_v15 = vrot.slane %v6594_v5, 1  ;;  %v4695_v61 = vcvt.f32.s32 %v4694_v12  ;;  %vm9542_vm7 = vmmov %vm9541_vm13  ;;  %v4891_v63 = vpack.i.bf16 %v1496_v44, %v1494_v23 }
  0xd8   : > { %9540 = vst [vmem:[#allocation50_spill] sm:$0xff] %v6597_v53  ;;  %v1378_v11 = vrot.slane %v6597_v53, 1  ;;  %v1504_v54 = vsel %vm1491_vm11, %v1501_v22, %v1503_v8  ;;  %v1511_v12 = vrot.slane %v5970_v24, 2  ;;  %v1515_v52 = vrot.slane %v5985_v32, 2  ;;  %vm9544_vm4 = vmmov %vm9542_vm7 }
  0xd9   : > { %v1377_v37 = vsel %vm9541_vm13, %v1374_v6, %v1376_v15  ;;  %v649_v33 = vmul.u32 18, %v4695_v61  ;;  %vm733_vm14 = vcmp.ge.s32.totalorder %v4695_v61, 1  ;;  %vm775_vm15 = vcmp.le.s32.totalorder %v4695_v61, 16  ;;  %vm9545_vm6 = vmmov %vm9544_vm4 }
  0xda   : > { %v1379_v26 = vsel %vm9542_vm7, %v1376_v15, %v1378_v11  ;;  %vm817_vm0 = vmand %vm733_vm14, %vm775_vm15  ;;  %v6619_v15 = vpack.i.bf16 %v1504_v54, %v1502_v31  ;;  %v1517_v61 = vrot.slane %v6131_v28, 2  ;;  %v1512_v44 = vsel %vm1491_vm11, %v1509_v48, %v1511_v12 }
  0xdb   : > { %v4886_v38 = vpack.i.bf16 %v1379_v26, %v1377_v37  ;;  %v691_v58 = vsub.s32 %v6573_v2, %v649_v33  ;;  %v1510_v37 = vsel %vm1491_vm11, %v1507_v19, %v1509_v48  ;;  %v1519_v22 = vrot.slane %v6087_v39, 2 }
  0xdc   : > { %v1523_v48 = vrot.slane %v6100_v51, 2  ;;  %v1525_v54 = vrot.slane %v6245_v55, 2 }
  0xdd   : > { %4887 = vrot.lane.b32.xlu1 %v4886_v38, %s5541_s28  ;;  %vm859_vm1 = vcmp.ge.s32.totalorder %v691_v58, 1  ;;  %vm943_vm2 = vcmp.le.s32.totalorder %v691_v58, 16  ;;  %v1497_v38 = vrot.slane %v5900_v18, 2  ;;  %v1520_v31 = vsel %vm1491_vm11, %v1517_v61, %v1519_v22 }
  0xde   : > { %vm901_vm3 = vmand %vm817_vm0, %vm859_vm1 }
  0xdf   : > { %vm985_vm5 = vmand %vm901_vm3, %vm943_vm2 }
  0xe0   : > { %v6616_v2 = vsel %vm985_vm5, %v1125_v10, 0.0  ;;  %v6634_v10 = vpack.i.bf16 %v1512_v44, %v1510_v37  ;;  %v1533_v44 = vrot.slane %v6362_v16, 2 }
  0xe1   : > { %9543 = vst [vmem:[#allocation51_spill] sm:$0xff] %v6616_v2  ;;  %4892 = vrot.lane.b32.xlu1 %v4891_v63, %s5542_s8  ;;  %v1372_v23 = vrot.slane %v6616_v2, 1  ;;  %v1518_v63 = vsel %vm1491_vm11, %v1515_v52, %v1517_v61  ;;  %v1531_v61 = vrot.slane %v6212_v46, 2  ;;  %v1539_v46 = vrot.slane %v6336_v50, 2 }
  0xe2   : > { %v6647_v37 = vpack.i.bf16 %v1520_v31, %v1518_v63  ;;  %v1513_v63 = vrot.slane %v5980_v30, 2  ;;  %v359_v50 = vadd.s32 296, %v5590_v1 }
  0xe3   : > { %v1373_v26 = vsel %vm9544_vm4, %v1370_v45, %v1372_v23  ;;  %v1375_v33 = vsel %vm9545_vm6, %v1372_v23, %v1374_v6  ;;  %v1527_v45 = vrot.slane %v6194_v60, 2  ;;  %v1498_v6 = vsel %vm1491_vm11, %v1495_v13, %v1497_v38 }
  0xe4   : > { %v4881_v58 = vpack.i.bf16 %v1375_v33, %v1373_v26  ;;  %v1500_v23 = vsel %vm1491_vm11, %v1497_v38, %v1499_v21  ;;  %v1505_v26 = vrot.slane %v5874_v41, 2  ;;  %v1526_v33 = vsel %vm1491_vm11, %v1523_v48, %v1525_v54 }
  0xe5   : > { %4902 = vrot.lane.b32.xlu1 %v6619_v15, %s5542_s8  ;;  %v1528_v4 = vsel %vm1491_vm11, %v1525_v54, %v1527_v45  ;;  %v6655_v13 = vpack.i.bf16 %v1500_v23, %v1498_v6  ;;  %v1534_v55 = vsel %vm1491_vm11, %v1531_v61, %v1533_v44  ;;  %v1543_v6 = vrot.slane %v6437_v14, 2 }
  0xe6   : > { %4882 = vrot.lane.b32.xlu0 %v4881_v58, %s5541_s28  ;;  %v1535_v58 = vrot.slane %v6321_v47, 2  ;;  %v1506_v21 = vsel %vm1491_vm11, %v1503_v8, %v1505_v26  ;;  %v1508_v38 = vsel %vm1491_vm11, %v1505_v26, %v1507_v19  ;;  %v6662_v31 = vpack.i.bf16 %v1528_v4, %v1526_v33 }
  0xe7   : > { %v6671_v8 = vpack.i.bf16 %v1508_v38, %v1506_v21  ;;  %v1514_v19 = vsel %vm1491_vm11, %v1511_v12, %v1513_v63  ;;  %v1516_v4 = vsel %vm1491_vm11, %v1513_v63, %v1515_v52  ;;  %v1521_v23 = vrot.slane %v6096_v49, 2 }
  0xe8   : > { %v1536_v54 = vsel %vm1491_vm11, %v1533_v44, %v1535_v58  ;;  %v1547_v44 = vrot.slane %v6450_v20, 2  ;;  %v1549_v33 = vrot.slane %v6567_v27, 2  ;;  %v1551_v12 = vrot.slane %v6543_v0, 2 }
  0xe9   : > { %4912 = vrot.lane.b32.xlu1 %v6634_v10, %s5542_s8  ;;  %v6678_v26 = vpack.i.bf16 %v1536_v54, %v1534_v55  ;;  %v360_v52 = vadd.s32 304, %v5590_v1  ;;  %v6689_v63 = vpack.i.bf16 %v1516_v4, %v1514_v19  ;;  %v6691_v55 = vadd.s32 4294967291, %v359_v50 }
  0xea   : > { %1452 = vrot.lane.b32.xlu0 %v1378_v11, %s5541_s28  ;;  %v1541_v11 = vrot.slane %v6470_v17, 2  ;;  %v1522_v54 = vsel %vm1491_vm11, %v1519_v22, %v1521_v23  ;;  %v1524_v27 = vsel %vm1491_vm11, %v1521_v23, %v1523_v48  ;;  %v1529_v20 = vrot.slane %v6209_v29, 2 }
  0xeb   : > { %v6696_v17 = vadd.s32 4294967291, %v360_v52  ;;  %v1550_v1 = vsel %vm1491_vm11, %v1547_v44, %v1549_v33  ;;  %v1555_v19 = vrot.slane %v6551_v34, 2  ;;  %v443_v50 = vcvt.s32.f32 %v6691_v55 }
  0xec   : > { %v1542_v21 = vsel %vm1491_vm11, %v1539_v46, %v1541_v11  ;;  %v1544_v38 = vsel %vm1491_vm11, %v1541_v11, %v1543_v6  ;;  %v1552_v4 = vsel %vm1491_vm11, %v1549_v33, %v1551_v12  ;;  %v1557_v22 = vrot.slane %v6616_v2, 2 }
  0xed   : > { %4922 = vrot.lane.b32.xlu1 %v6647_v37, %s5542_s8  ;;  %v6700_v11 = vpack.i.bf16 %v1544_v38, %v1542_v21  ;;  %v1559_v48 = vrot.slane %v6591_v3, 2  ;;  %v444_v23 = vcvt.s32.f32 %v6696_v17  ;;  %v6711_v52 = vpack.i.bf16 %v1524_v27, %v1522_v54 }
  0xee   : > { %4897 = vrot.lane.b32.xlu0 %v6655_v13, %s5542_s8  ;;  %v485_v21 = vadd.f32 0.5, %v443_v50  ;;  %v1530_v38 = vsel %vm1491_vm11, %v1527_v45, %v1529_v20  ;;  %v1532_v34 = vsel %vm1491_vm11, %v1529_v20, %v1531_v61  ;;  %v1537_v0 = vrot.slane %v6330_v62, 2 }
  0xef   : > { %v486_v14 = vadd.f32 0.5, %v444_v23  ;;  %v6718_v33 = vpack.i.bf16 %v1552_v4, %v1550_v1  ;;  %v1558_v3 = vsel %vm1491_vm11, %v1555_v19, %v1557_v22  ;;  %v1560_v49 = vsel %vm1491_vm11, %v1557_v22, %v1559_v48 }
  0xf0   : > { %v527_v2 = vmul.f32 0.055555556, %v485_v21  ;;  %v6724_v45 = vpack.i.bf16 %v1532_v34, %v1530_v38  ;;  %v1538_v20 = vsel %vm1491_vm11, %v1535_v58, %v1537_v0  ;;  %v1540_v61 = vsel %vm1491_vm11, %v1537_v0, %v1539_v46 }
  0xf1   : > { %4932 = vrot.lane.b32.xlu1 %v6662_v31, %s5542_s8  ;;  %v528_v27 = vmul.f32 0.055555556, %v486_v14  ;;  %v1545_v54 = vrot.slane %v6447_v25, 2  ;;  %v6731_v1 = vpack.i.bf16 %v1560_v49, %v1558_v3  ;;  %v6735_v14 = vpack.i.bf16 %v1540_v61, %v1538_v20 }
  0xf2   : > { %4907 = vrot.lane.b32.xlu0 %v6671_v8, %s5542_s8  ;;  %v569_v50 = vfloor.f32 %v527_v2  ;;  %v1553_v46 = vrot.slane %v6548_v9, 2  ;;  %v6747_v2 = vrot.slane %v6597_v53, 2  ;;  %v1561_v22 = vrot.slane %v6594_v5, 2 }
  0xf3   : > { %v570_v4 = vfloor.f32 %v528_v27  ;;  %v1546_v34 = vsel %vm1491_vm11, %v1543_v6, %v1545_v54  ;;  %v1548_v58 = vsel %vm1491_vm11, %v1545_v54, %v1547_v44  ;;  %vm1793_vm6 = vcmask 1044480  }
  0xf4   : > { %v4702_v0 = vtrunc.f32 %v569_v50  ;;  %v6744_v3 = vpack.i.bf16 %v1548_v58, %v1546_v34  ;;  %v1554_v6 = vsel %vm1491_vm11, %v1551_v12, %v1553_v46  ;;  %v1556_v44 = vsel %vm1491_vm11, %v1553_v46, %v1555_v19  ;;  %v4544_v12 = vld [vmem:[%s5620_s23 + $0x98] sm:$0xff]  }
  0xf5   : > { %4942 = vrot.lane.b32.xlu1 %v6678_v26, %s5542_s8  ;;  %v4704_v49 = vtrunc.f32 %v570_v4  ;;  %v6756_v38 = vpack.i.bf16 %v1556_v44, %v1554_v6  ;;  %v1562_v27 = vsel %vm1491_vm11, %v1559_v48, %v1561_v22  ;;  %v1564_v20 = vsel %vm1491_vm11, %v1561_v22, %v6747_v2 }
  0xf6   : > { %4917 = vrot.lane.b32.xlu0 %v6689_v63, %s5542_s8  ;;  %v4703_v23 = vcvt.f32.s32 %v4702_v0  ;;  %v6766_v54 = vpack.i.bf16 %v1564_v20, %v1562_v27  ;;  %v4521_v50 = vunpack.c.h.bf16 %v6512_v40  ;;  %v4524_v4 = vunpack.c.l.bf16 %v4544_v12  ;;  %v4803_v0 = vpop.permute.xlu0 %4802 }
  0xf7   : > { %v4705_v21 = vcvt.f32.s32 %v4704_v49  ;;  %v1795_v22 = vrot.slane %v5731_v56, 3  ;;  %v1801_v27 = vrot.slane %v5874_v41, 3  ;;  %v1797_v12 = vrot.slane %v5740_v59, 3 }
  0xf8   : > { %v653_v19 = vmul.u32 18, %v4703_v23  ;;  %vm737_vm9 = vcmp.ge.s32.totalorder %v4703_v23, 1  ;;  %vm779_vm8 = vcmp.le.s32.totalorder %v4703_v23, 16  ;;  %v9592_v53 = vrot.slane %v6087_v39, 6 }
  0xf9   : > { %4952 = vrot.lane.b32.xlu1 %v6700_v11, %s5542_s8  ;;  %v654_v61 = vmul.u32 18, %v4705_v21  ;;  %vm738_vm10 = vcmp.ge.s32.totalorder %v4705_v21, 1  ;;  %vm780_vm12 = vcmp.le.s32.totalorder %v4705_v21, 16  ;;  %vm821_vm13 = vmand %vm737_vm9, %vm779_vm8  ;;  %v1799_v21 = vrot.slane %v5747_v7, 3 }
  0xfa   : > { %4927 = vrot.lane.b32.xlu0 %v6711_v52, %s5542_s8  ;;  %v695_v48 = vsub.s32 %v6691_v55, %v653_v19  ;;  %vm822_vm14 = vmand %vm738_vm10, %vm780_vm12  ;;  %v6805_v44 = vpop.permute.xlu0 %4807  ;;  %vm9412_vm9 = vcmask 1043456   ;;  %vm9411_vm8 = vcmask 1042432   ;;  %vm9410_vm10 = vcmask 1041408  }
  0xfb   : > { %v696_v34 = vsub.s32 %v6696_v17, %v654_v61  ;;  %v5529_v17 = vld [vmem:[%s9236_s2] ss:$0 sm:$0xff]  ;;  %vm9409_vm12 = vcmask 130048  }
  0xfc   : > { %vm863_vm7 = vcmp.ge.s32.totalorder %v695_v48, 1  ;;  %vm947_vm1 = vcmp.le.s32.totalorder %v695_v48, 16 }
  0xfd   : > { %4962 = vrot.lane.b32.xlu1 %v6718_v33, %s5542_s8  ;;  %vm864_vm15 = vcmp.ge.s32.totalorder %v696_v34, 1  ;;  %vm905_vm0 = vmand %vm821_vm13, %vm863_vm7  ;;  %vm948_vm3 = vcmp.le.s32.totalorder %v696_v34, 16  ;;  %vm9413_vm13 = vcmask 195584   ;;  %vm2763_vm7 = vcmask 261120  }
  0xfe   : > { %4937 = vrot.lane.b32.xlu0 %v6724_v45, %s5542_s8  ;;  %vm906_vm2 = vmand %vm822_vm14, %vm864_vm15  ;;  %v4823_v61 = vpop.permute.xlu0 %4822  ;;  %vm2801_vm14 = vcmask 326656   ;;  %vm2839_vm15 = vcmask 392192  }
  0xff   : > { %vm989_vm5 = vmand %vm905_vm0, %vm947_vm1  ;;  %vm2877_vm0 = vcmask 457728   ;;  %vm9414_vm1 = vcmask 523264  }
 0x100   : > { %vm990_vm4 = vmand %vm906_vm2, %vm948_vm3 }
 0x101   : > { %4972 = vrot.lane.b32.xlu1 %v6731_v1, %s5542_s8 }
 0x102   : > { %4947 = vrot.lane.b32.xlu0 %v6735_v14, %s5542_s8 }
 0x105   : > { %1637 = vrot.lane.b32.xlu1 %v6747_v2, %s5542_s8 }
 0x106   : > { %4957 = vrot.lane.b32.xlu0 %v6744_v3, %s5542_s8 }
 0x109   : > { %4987 = vrot.lane.b32.xlu1 %v6619_v15, %s5543_s9  ;;  %v5528_v15 = vld [vmem:[%s9235_s1] ss:$0 sm:$0xff] }
 0x10a   : > { %4967 = vrot.lane.b32.xlu0 %v6756_v38, %s5542_s8  ;;  %v1038_v40 = vmul.f32 %v5528_v15, %v4521_v50  ;;  %v1039_v58 = vmul.f32 %v5528_v15, %v4524_v4  ;;  %v4804_v4 = vunpack.i.l.bf16 %v4803_v0  ;;  %v1802_v15 = vsel %vm1793_vm6, %v1799_v21, %v1801_v27 }
 0x10c   : > { %v1088_v55 = vadd.f32 %v5529_v17, %v1039_v58  ;;  %v6839_v58 = vsel %vm1793_vm6, %v1797_v12, %v1799_v21 }
 0x10d   : > { %4997 = vrot.lane.b32.xlu1 %v6634_v10, %s5543_s9  ;;  %v1087_v10 = vadd.f32 %v5529_v17, %v1038_v40  ;;  %v6836_v40 = vsel %vm1793_vm6, %v1795_v22, %v1797_v12 }
 0x10e   : > { %4977 = vrot.lane.b32.xlu0 %v6766_v54, %s5542_s8  ;;  %v1130_v46 = vmax.f32 %v1088_v55, 0.0  ;;  %v1983_v55 = vrot.slane %v5747_v7, 4 }
 0x111   : > { %5007 = vrot.lane.b32.xlu1 %v6647_v37, %s5543_s9  ;;  %v1129_v37 = vmax.f32 %v1087_v10, 0.0  ;;  %v6845_v10 = vrot.slane %v5740_v59, 4 }
 0x112   : > { %4982 = vrot.lane.b32.xlu0 %v6655_v13, %s5543_s9  ;;  %v4813_v13 = vpop.permute.xlu1 %4812 }
 0x113   : > { %v6793_v49 = vsel %vm989_vm5, %v1129_v37, 0.0  ;;  %v4814_v50 = vunpack.i.l.bf16 %v4813_v13  ;;  %v1978_v37 = vrot.slane %v5900_v18, 4 }
 0x114   : > { %9546 = vst [vmem:[#allocation52_spill] sm:$0xff] %v6793_v49 }
 0x115   : > { %5017 = vrot.lane.b32.xlu1 %v6662_v31, %s5543_s9  ;;  %v6795_v31 = vsel %vm990_vm4, %v1130_v46, 0.0 }
 0x116   : > { %4992 = vrot.lane.b32.xlu0 %v6671_v8, %s5543_s9  ;;  %9547 = vst [vmem:[#allocation53_spill] sm:$0xff] %v6795_v31  ;;  %v1678_v8 = vrot.slane %v6793_v49, 2  ;;  %v1680_v6 = vrot.slane %v6795_v31, 2 }
 0x118   : > { %v1681_v23 = vsel %vm1491_vm11, %v1678_v8, %v1680_v6 }
 0x119   : > { %5027 = vrot.lane.b32.xlu1 %v6678_v26, %s5543_s9  ;;  %v6803_v26 = vpop.permute.xlu1 %4817 }
 0x11a   : > { %5002 = vrot.lane.b32.xlu0 %v6689_v63, %s5543_s9  ;;  %v1794_v63 = vrot.slane %v5900_v18, 3  ;;  %v4820_v17 = vunpack.i.h.bf16 %v6803_v26 }
 0x11c   : > { %v1796_v20 = vsel %vm1793_vm6, %v1794_v63, %v1795_v22  ;;  %v1985_v22 = vrot.slane %v5874_v41, 4 }
 0x11d   : > { %5037 = vrot.lane.b32.xlu1 %v6700_v11, %s5543_s9  ;;  %v1679_v11 = vsel %vm1491_vm11, %v6747_v2, %v1678_v8  ;;  %v4828_v19 = vpop.permute.xlu1 %4827  ;;  %vm9408_vm11 = vcmask 64512   ;;  %v5071_v48 = vpack.i.bf16 %v1796_v20, %v1794_v63  ;;  %v5076_v63 = vpack.i.bf16 %v6839_v58, %v6836_v40 }
 0x11e   : > { %5012 = vrot.lane.b32.xlu0 %v6711_v52, %s5543_s9  ;;  %v4815_v52 = vunpack.i.h.bf16 %v4813_v13  ;;  %v5066_v2 = vpack.i.bf16 %v1681_v23, %v1679_v11  ;;  %v6851_v46 = vsel %vm9408_vm11, %v5731_v56, %v4814_v50  ;;  %v6871_v23 = vsel %vm9408_vm11, %v5874_v41, %v4820_v17 }
 0x11f   : > { %9549 = vst [vmem:[#allocation55_spill] sm:$0xff] %v6851_v46  ;;  %9552 = vst [vmem:[#allocation58_spill] sm:$0xff] %v6871_v23  ;;  %v4830_v12 = vunpack.i.h.bf16 %v4828_v19  ;;  %v4825_v50 = vunpack.i.h.bf16 %v4823_v61  ;;  %v9346_v40 = vrot.slane %v5985_v32, 3 }
 0x120   : > { %v6829_v34 = vsel %vm9408_vm11, %v5740_v59, %v4815_v52  ;;  %v4810_v52 = vunpack.i.h.bf16 %v6805_v44 }
 0x121   : > { %5047 = vrot.lane.b32.xlu1 %v6718_v33, %s5543_s9  ;;  %v9343_v33 = vrot.slane %v5879_v57, 3  ;;  %9548 = vst [vmem:[#allocation54_spill] sm:$0xff] %v6829_v34  ;;  %v6867_v11 = vpop.permute.xlu1 %4837 }
 0x122   : > { %5022 = vrot.lane.b32.xlu0 %v6724_v45, %s5543_s9  ;;  %v4805_v45 = vunpack.i.h.bf16 %v4803_v0  ;;  %v6859_v0 = vsel %vm9408_vm11, %v5820_v36, %v4804_v4  ;;  %9551 = vst [vmem:[#allocation57_spill] sm:$0xff] %v6867_v11  ;;  %v4819_v36 = vunpack.i.l.bf16 %v6803_v26  ;;  %v1807_v11 = vrot.slane %v5970_v24, 3 }
 0x124   : > { %v6855_v13 = vsel %vm9408_vm11, %v5828_v42, %v4805_v45  ;;  %v4833_v42 = vpop.permute.xlu0 %4832  ;;  %v4824_v45 = vunpack.i.l.bf16 %v4823_v61 }
 0x125   : > { %5057 = vrot.lane.b32.xlu1 %v6731_v1, %s5543_s9  ;;  %v1804_v1 = vsel %vm1793_vm6, %v1801_v27, %v9343_v33  ;;  %9550 = vst [vmem:[#allocation56_spill] sm:$0xff] %v6855_v13  ;;  %v1984_v27 = vsel %vm9412_vm9, %v6845_v10, %v1983_v55  ;;  %v4835_v26 = vunpack.i.h.bf16 %v4833_v42 }
 0x126   : > { %5032 = vrot.lane.b32.xlu0 %v6735_v14, %s5543_s9  ;;  %v1979_v14 = vrot.slane %v5731_v56, 4  ;;  %v5081_v8 = vpack.i.bf16 %v1804_v1, %v1802_v15  ;;  %v1987_v56 = vrot.slane %v5879_v57, 4  ;;  %v1989_v15 = vrot.slane %v6031_v35, 4 }
 0x127   : > { %v6889_v1 = vsel %vm9408_vm11, %v5747_v7, %v4819_v36 }
 0x128   : > { %v1982_v21 = vsel %vm9412_vm9, %v1979_v14, %v6845_v10  ;;  %v1980_v20 = vsel %vm9412_vm9, %v1978_v37, %v1979_v14  ;;  %v1988_v4 = vsel %vm9412_vm9, %v1985_v22, %v1987_v56  ;;  %9553 = vst [vmem:[#allocation59_spill] sm:$0xff] %v6889_v1 }
 0x129   : > { %5067 = vrot.lane.b32.xlu1 %v5066_v2, %s5543_s9  ;;  %v4829_v2 = vunpack.i.l.bf16 %v4828_v19  ;;  %v6893_v19 = vsel %vm9408_vm11, %v5900_v18, %v4810_v52  ;;  %v5091_v17 = vpack.i.bf16 %v1984_v27, %v1982_v21  ;;  %v6901_v14 = vpack.i.bf16 %v1980_v20, %v1978_v37  ;;  %v6936_v20 = vpop.permute.xlu0 %4842 }
 0x12a   : > { %5042 = vrot.lane.b32.xlu0 %v6744_v3, %s5543_s9  ;;  %v4809_v3 = vunpack.i.l.bf16 %v6805_v44  ;;  %v1986_v44 = vsel %vm9412_vm9, %v1983_v55, %v1985_v22  ;;  %9554 = vst [vmem:[#allocation60_spill] sm:$0xff] %v6893_v19  ;;  %v6905_v55 = vsel %vm9408_vm11, %v5980_v30, %v4830_v12  ;;  %v5101_v22 = vpack.i.bf16 %v1984_v27, %v6845_v10  ;;  %v9584_v19 = vld [vmem:[#allocation39_spill] sm:$0xff] }
 0x12b   : > { %9556 = vst [vmem:[#allocation62_spill] sm:$0xff] %v6905_v55  ;;  %v6910_v18 = vsel %vm9408_vm11, %v5970_v24, %v4829_v2  ;;  %v6920_v37 = vpack.i.bf16 %v1988_v4, %v1986_v44  ;;  %v6926_v10 = vsel %vm9408_vm11, %v6131_v28, %v4835_v26  ;;  %v1990_v52 = vsel %vm9412_vm9, %v1987_v56, %v1989_v15 }
 0x12c   : > { %v6897_v61 = vsel %vm9408_vm11, %v5831_v43, %v4809_v3  ;;  %9557 = vst [vmem:[#allocation63_spill] sm:$0xff] %v6910_v18  ;;  %v6914_v43 = vsel %vm9408_vm11, %v6031_v35, %v4825_v50  ;;  %9560 = vst [vmem:[#allocation66_spill] sm:$0xff] %v6926_v10  ;;  %v2283_v12 = vrot.slane %v5874_v41, 5  ;;  %v2285_v2 = vrot.slane %v5879_v57, 5 }
 0x12d   : > { %5072 = vrot.lane.b32.xlu1 %v5071_v48, %s5544_s14  ;;  %v4834_v48 = vunpack.i.l.bf16 %v4833_v42  ;;  %9555 = vst [vmem:[#allocation61_spill] sm:$0xff] %v6897_v61  ;;  %v4848_v42 = vpop.permute.xlu1 %4847  ;;  %9558 = vst [vmem:[#allocation64_spill] sm:$0xff] %v6914_v43  ;;  %v2280_v56 = vrot.slane %v5740_v59, 5  ;;  %v2465_v50 = vrot.slane %v5740_v59, 6  ;;  %v2287_v26 = vrot.slane %v6031_v35, 5 }
 0x12e   : > { %5052 = vrot.lane.b32.xlu0 %v6756_v38, %s5543_s9  ;;  %v9342_v38 = vrot.slane %v5970_v24, 4  ;;  %v4850_v3 = vunpack.i.h.bf16 %v4848_v42  ;;  %v4849_v27 = vunpack.i.l.bf16 %v4848_v42  ;;  %9562 = vst [vmem:[#allocation68_spill] sm:$0xff] %v6936_v20  ;;  %v9345_v44 = vrot.slane %v5970_v24, 5 }
 0x12f   : > { %v6930_v36 = vsel %vm9408_vm11, %v5985_v32, %v4834_v48  ;;  %v1809_v55 = vrot.slane %v5980_v30, 3 }
 0x130   : > { %9561 = vst [vmem:[#allocation67_spill] sm:$0xff] %v6930_v36  ;;  %v1992_v21 = vsel %vm9412_vm9, %v1989_v15, %v9342_v38  ;;  %v6954_v48 = vsel %vm9408_vm11, %v6209_v29, %v4850_v3  ;;  %v4844_v15 = vunpack.i.l.bf16 %v6936_v20  ;;  %v6959_v59 = vsel %vm9408_vm11, %v6194_v60, %v4849_v27 }
 0x131   : > { %5082 = vrot.lane.b32.xlu1 %v5081_v8, %s5544_s14  ;;  %v6918_v8 = vsel %vm9408_vm11, %v5879_v57, %v4824_v45  ;;  %v2466_v45 = vrot.slane %v5747_v7, 6  ;;  %v6950_v4 = vpack.i.bf16 %v1992_v21, %v1990_v52  ;;  %9563 = vst [vmem:[#allocation69_spill] sm:$0xff] %v6954_v48  ;;  %9564 = vst [vmem:[#allocation70_spill] sm:$0xff] %v6959_v59  ;;  %v2470_v3 = vrot.slane %v5879_v57, 6 }
 0x132   : > { %9559 = vst [vmem:[#allocation65_spill] sm:$0xff] %v6918_v8  ;;  %5062 = vrot.lane.b32.xlu0 %v6766_v54, %s5543_s9  ;;  %v2281_v54 = vrot.slane %v5747_v7, 5  ;;  %v2472_v21 = vrot.slane %v6031_v35, 6  ;;  %v6969_v27 = vsel %vm9411_vm8, %v2285_v2, %v2287_v26  ;;  %v9579_v59 = vrot.slane %v6100_v51, 3 }
 0x133   : > { %v2467_v33 = vsel %vm9410_vm10, %v2465_v50, %v2466_v45  ;;  %v2009_v8 = vrot.slane %v6209_v29, 4 }
 0x134   : > { %v2284_v7 = vsel %vm9411_vm8, %v2281_v54, %v2283_v12  ;;  %v2282_v52 = vsel %vm9411_vm8, %v2280_v56, %v2281_v54  ;;  %v6983_v54 = vsel %vm9408_vm11, %v6100_v51, %v4844_v15  ;;  %v7007_v15 = vld [vmem:[%s9237_s3 + $0x20] ss:$0 sps:$4 sm:$0xff]  }
 0x135   : > { %5092 = vrot.lane.b32.xlu1 %v5091_v17, %s5545_s15  ;;  %v4858_v17 = vpop.permute.xlu1 %4857  ;;  %9565 = vst [vmem:[#allocation71_spill] sm:$0xff] %v6983_v54  ;;  %4624 = vmatprep.subr.msk.bf16.mxu0 %vm9412_vm9, %v7007_v15 }
 0x136   : > { %1754 = vrot.lane.b32.xlu0 %v1680_v6, %s5543_s9  ;;  %v4860_v42 = vunpack.i.h.bf16 %v4858_v17  ;;  %v4859_v38 = vunpack.i.l.bf16 %v4858_v17  ;;  %v2286_v6 = vsel %vm9411_vm8, %v2283_v12, %v2285_v2  ;;  %v6974_v17 = vsel %vm9411_vm8, %v2287_v26, %v9345_v44  ;;  %v4853_v12 = vpop.permute.xlu0 %4852  ;;  %4625 = vmatprep.subr.msk.bf16.mxu1 %vm9412_vm9, %v7007_v15 }
 0x137   : > { %v2468_v2 = vrot.slane %v5874_v41, 6  ;;  %v5121_v26 = vpack.i.bf16 %v2286_v6, %v2284_v7  ;;  %v6988_v44 = vpack.i.bf16 %v2282_v52, %v2280_v56  ;;  %v5131_v41 = vpack.i.bf16 %v2467_v33, %v2465_v50 }
 0x138   : > { %v6999_v58 = vsel %vm9408_vm11, %v6321_v47, %v4859_v38  ;;  %v2473_v56 = vsel %vm9410_vm10, %v2470_v3, %v2472_v21  ;;  %v4855_v7 = vunpack.i.h.bf16 %v4853_v12  ;;  %v9568_v6 = vrot.slane %v5970_v24, 6 }
 0x139   : > { %5102 = vrot.lane.b32.xlu1 %v5101_v22, %s5546_s16  ;;  %v6992_v22 = vsel %vm9408_vm11, %v6330_v62, %v4860_v42  ;;  %9567 = vst [vmem:[#allocation73_spill] sm:$0xff] %v6999_v58  ;;  %v4854_v42 = vunpack.i.l.bf16 %v4853_v12  ;;  %v1805_v38 = vrot.slane %v6031_v35, 3  ;;  %v7016_v33 = vsel %vm9410_vm10, %v2466_v45, %v2468_v2 }
 0x13a   : > { %5077 = vrot.lane.b32.xlu0 %v5076_v63, %s5544_s14  ;;  %9566 = vst [vmem:[#allocation72_spill] sm:$0xff] %v6992_v22  ;;  %v2475_v52 = vsel %vm9410_vm10, %v2472_v21, %v9568_v6  ;;  %v7019_v50 = vsel %vm9410_vm10, %v2468_v2, %v2470_v3  ;;  %v7022_v63 = vsel %vm1793_vm6, %v1807_v11, %v1809_v55  ;;  %v1993_v12 = vrot.slane %v5980_v30, 4 }
 0x13b   : > { %v1812_v35 = vsel %vm1793_vm6, %v1809_v55, %v9346_v40  ;;  %v1997_v45 = vrot.slane %v6131_v28, 4  ;;  %v1999_v21 = vrot.slane %v6087_v39, 4  ;;  %v5141_v3 = vpack.i.bf16 %v2475_v52, %v2473_v56  ;;  %v9570_v40 = vld [vmem:[#allocation28_spill] sm:$0xff]  ;;  %v4868_v52 = vpop.permute.xlu1 %4867 }
 0x13c   : > { %v2293_v2 = vrot.slane %v5985_v32, 5  ;;  %v2295_v6 = vrot.slane %v6131_v28, 5  ;;  %v7041_v55 = vsel %vm9408_vm11, %v6362_v16, %v4855_v7  ;;  %v7045_v18 = vsel %vm9408_vm11, %v9570_v40, %v4854_v42 }
 0x13d   : > { %5112 = vrot.lane.b32.xlu1 %v6950_v4, %s5546_s16  ;;  %9569 = vst [vmem:[#allocation74_spill] sm:$0xff] %v7041_v55  ;;  %9571 = vst [vmem:[#allocation28_spill] sm:$0xff] %v7045_v18  ;;  %v5151_v54 = vpack.i.bf16 %v1812_v35, %v7022_v63  ;;  %v7058_v7 = vsel %vm1793_vm6, %v1805_v38, %v1807_v11  ;;  %v9573_v42 = vrot.slane %v5970_v24, 4  ;;  %v2291_v55 = vrot.slane %v5980_v30, 5  ;;  %v9575_v18 = vld [vmem:[#allocation23_spill] sm:$0xff] }
 0x13e   : > { %5087 = vrot.lane.b32.xlu0 %v6901_v14, %s5545_s15  ;;  %v1995_v14 = vrot.slane %v5985_v32, 4  ;;  %v7069_v63 = vsel %vm9411_vm8, %v2293_v2, %v2295_v6  ;;  %v9574_v11 = vrot.slane %v6087_v39, 5  ;;  %v2478_v35 = vrot.slane %v5985_v32, 6 }
 0x13f   : > { %v1994_v49 = vsel %vm9412_vm9, %v9573_v42, %v1993_v12  ;;  %v1815_v42 = vrot.slane %v6087_v39, 3  ;;  %v1813_v22 = vrot.slane %v6131_v28, 3  ;;  %v7096_v23 = vpop.permute.xlu1 %4877 }
 0x140   : > { %v1996_v31 = vsel %vm9412_vm9, %v1993_v12, %v1995_v14  ;;  %v2480_v12 = vrot.slane %v6131_v28, 6 }
 0x141   : > { %5122 = vrot.lane.b32.xlu1 %v5121_v26, %s5547_s21  ;;  %v9572_v26 = vrot.slane %v5879_v57, 3  ;;  %v1998_v57 = vsel %vm9412_vm9, %v1995_v14, %v1997_v45  ;;  %v2001_v14 = vrot.slane %v9575_v18, 4 }
 0x142   : > { %5097 = vrot.lane.b32.xlu0 %v6920_v37, %s5545_s15  ;;  %v7107_v28 = vsel %vm9410_vm10, %v2478_v35, %v2480_v12 }
 0x143   : > { %v7052_v56 = vsel %vm1793_vm6, %v9572_v26, %v1805_v38  ;;  %v2000_v26 = vsel %vm9412_vm9, %v1997_v45, %v1999_v21  ;;  %v7074_v38 = vsel %vm9411_vm8, %v2295_v6, %v9574_v11  ;;  %v2476_v45 = vrot.slane %v5980_v30, 6 }
 0x144   : > { %v7086_v6 = vpack.i.bf16 %v1996_v31, %v1994_v49  ;;  %v7090_v1 = vpack.i.bf16 %v2000_v26, %v1998_v57  ;;  %v7104_v31 = vsel %vm9411_vm8, %v2291_v55, %v2293_v2  ;;  %v2003_v57 = vrot.slane %v6100_v51, 4 }
 0x145   : > { %5132 = vrot.lane.b32.xlu1 %v5131_v41, %s5548_s22  ;;  %v1817_v41 = vrot.slane %v9575_v18, 3  ;;  %v9577_v26 = vrot.slane %v6087_v39, 6  ;;  %v4869_v11 = vunpack.i.l.bf16 %v4868_v52 }
 0x146   : > { %5107 = vrot.lane.b32.xlu0 %v6920_v37, %s5546_s16  ;;  %v9576_v37 = vrot.slane %v5970_v24, 5 }
 0x147   : > { %v7113_v30 = vsel %vm9410_vm10, %v2480_v12, %v9577_v26  ;;  %v7124_v2 = vsel %vm1793_vm6, %v1815_v42, %v1817_v41  ;;  %v7131_v12 = vsel %vm1793_vm6, %v1817_v41, %v9579_v59  ;;  %v2004_v59 = vsel %vm9412_vm9, %v2001_v14, %v2003_v57 }
 0x148   : > { %v7101_v49 = vsel %vm9411_vm8, %v9576_v37, %v2291_v55  ;;  %v7121_v37 = vsel %vm9410_vm10, %v2476_v45, %v2478_v35  ;;  %v4870_v55 = vunpack.i.h.bf16 %v4868_v52  ;;  %v7139_v35 = vsel %vm1793_vm6, %v1813_v22, %v1815_v42  ;;  %v7144_v52 = vpop.permute.xlu0 %4862 }
 0x149   : > { %5142 = vrot.lane.b32.xlu1 %v5141_v3, %s5548_s22  ;;  %v9578_v3 = vrot.slane %v5970_v24, 6  ;;  %v9580_v24 = vrot.slane %v5985_v32, 3  ;;  %v2301_v32 = vrot.slane %v6100_v51, 5  ;;  %v2484_v42 = vrot.slane %v9575_v18, 6 }
 0x14a   : > { %5117 = vrot.lane.b32.xlu0 %v6988_v44, %s5547_s21  ;;  %v2007_v44 = vrot.slane %v6194_v60, 4 }
 0x14b   : > { %v7118_v58 = vsel %vm9410_vm10, %v9578_v3, %v2476_v45  ;;  %v7136_v26 = vsel %vm1793_vm6, %v9580_v24, %v1813_v22  ;;  %v2002_v45 = vsel %vm9412_vm9, %v1999_v21, %v2001_v14  ;;  %v9581_v3 = vld [vmem:[#allocation30_spill] sm:$0xff]  ;;  %v9582_v14 = vpack.i.bf16 %v6974_v17, %v6969_v27 }
 0x14c   : > { %v2005_v48 = vrot.slane %v9581_v3, 4  ;;  %v2303_v41 = vrot.slane %v9581_v3, 5  ;;  %v7165_v24 = vsel %vm9408_vm11, %v6447_v25, %v4870_v55  ;;  %v7169_v22 = vsel %vm9408_vm11, %v9584_v19, %v4869_v11 }
 0x14d   : > { %5152 = vrot.lane.b32.xlu1 %v5151_v54, %s5544_s14  ;;  %9583 = vst [vmem:[#allocation75_spill] sm:$0xff] %v7165_v24  ;;  %9585 = vst [vmem:[#allocation39_spill] sm:$0xff] %v7169_v22  ;;  %v7175_v61 = vpack.i.bf16 %v2004_v59, %v2002_v45  ;;  %v4865_v17 = vunpack.i.h.bf16 %v7144_v52  ;;  %v9586_v11 = vrot.slane %v6194_v60, 5  ;;  %v2299_v45 = vrot.slane %v9575_v18, 5  ;;  %v7199_v24 = vpop.permute.xlu0 %4872 }
 0x14e   : > { %5127 = vrot.lane.b32.xlu0 %v9582_v14, %s5547_s21  ;;  %v2006_v54 = vsel %vm9412_vm9, %v2003_v57, %v2005_v48  ;;  %v2008_v27 = vsel %vm9412_vm9, %v2005_v48, %v2007_v44  ;;  %v7183_v55 = vsel %vm9411_vm8, %v2301_v32, %v2303_v41  ;;  %v2486_v59 = vrot.slane %v6100_v51, 6 }
 0x14f   : > { %v7171_v21 = vpop.permute.xlu1 %4887  ;;  %v7188_v14 = vsel %vm9411_vm8, %v2303_v41, %v9586_v11  ;;  %v2488_v57 = vrot.slane %v9581_v3, 6  ;;  %v9587_v22 = vpack.i.bf16 %v7019_v50, %v7016_v33  ;;  %v1823_v41 = vrot.slane %v6194_v60, 3  ;;  %v9588_v50 = vld [vmem:[#allocation42_spill] sm:$0xff] }
 0x150   : > { %v1825_v11 = vrot.slane %v6209_v29, 3  ;;  %v1821_v43 = vrot.slane %v9581_v3, 3  ;;  %v4864_v48 = vunpack.i.l.bf16 %v7144_v52  ;;  %v7208_v18 = vpack.i.bf16 %v2008_v27, %v2006_v54 }
 0x151   : > { %5162 = vrot.lane.b32.xlu1 %v7086_v6, %s5545_s15  ;;  %v2011_v33 = vrot.slane %v9570_v40, 4  ;;  %v9590_v3 = vrot.slane %v6087_v39, 5  ;;  %v7226_v54 = vsel %vm9411_vm8, %v2299_v45, %v2301_v32  ;;  %v7229_v27 = vsel %vm9410_vm10, %v2486_v59, %v2488_v57 }
 0x152   : > { %5137 = vrot.lane.b32.xlu0 %v9587_v22, %s5548_s22  ;;  %v7214_v22 = vsel %vm9408_vm11, %v9588_v50, %v4865_v17  ;;  %v9591_v17 = vrot.slane %v6194_v60, 6  ;;  %v7239_v36 = vsel %vm9410_vm10, %v9592_v53, %v2484_v42  ;;  %v7242_v46 = vsel %vm9410_vm10, %v2484_v42, %v2486_v59 }
 0x153   : > { %v7201_v10 = vpop.permute.xlu1 %4892  ;;  %9589 = vst [vmem:[#allocation42_spill] sm:$0xff] %v7214_v22  ;;  %v7223_v52 = vsel %vm9411_vm8, %v9590_v3, %v2299_v45  ;;  %v9593_v3 = vpack.i.bf16 %v7058_v7, %v7052_v56  ;;  %v7251_v45 = vsel %vm1793_vm6, %v1823_v41, %v1825_v11  ;;  %v9596_v53 = vrot.slane %v6100_v51, 3  ;;  %v5522_v56 = vld [vmem:[%s9237_s3 + $0x18] sm:$0xff]  }
 0x154   : > { %v7234_v22 = vsel %vm9410_vm10, %v2488_v57, %v9591_v17  ;;  %v9595_v57 = vrot.slane %v9570_v40, 3  ;;  %v7264_v59 = vsel %vm1793_vm6, %v1821_v43, %v1823_v41  ;;  %v2010_v7 = vsel %vm9412_vm9, %v2007_v44, %v2009_v8  ;;  %v9601_v44 = vld [vmem:[#allocation35_spill] sm:$0xff] }
 0x155   : > { %5172 = vrot.lane.b32.xlu1 %v7090_v1, %s5546_s16  ;;  %v7261_v42 = vsel %vm1793_vm6, %v9596_v53, %v1821_v43  ;;  %9598 = vst [vmem:[#allocation78_spill] sm:$0xff] %v7264_v59  ;;  %v2013_v39 = vrot.slane %v6362_v16, 4  ;;  %v9600_v51 = vpack.i.bf16 %v7074_v38, %v7069_v63  ;;  %v2309_v43 = vrot.slane %v9570_v40, 5 }
 0x156   : > { %5147 = vrot.lane.b32.xlu0 %v9593_v3, %s5544_s14  ;;  %v7256_v17 = vsel %vm1793_vm6, %v1825_v11, %v9595_v57  ;;  %9597 = vst [vmem:[#allocation77_spill] sm:$0xff] %v7261_v42  ;;  %v2012_v3 = vsel %vm9412_vm9, %v2009_v8, %v2011_v33  ;;  %v2311_v41 = vrot.slane %v6362_v16, 5  ;;  %v3226_v8 = vsel %vm9412_vm9, %v7007_v15, 0 }
 0x157   : > { %v7248_v32 = vpop.permute.xlu1 %4902  ;;  %v7286_v34 = vsel %vm9408_vm11, %v9601_v44, %v4864_v48  ;;  %v2307_v11 = vrot.slane %v6209_v29, 5  ;;  %v2496_v63 = vrot.slane %v6362_v16, 6  ;;  %4569 = vmatpush3.bf16.msra.mxu0 %v3226_v8  ;;  %4619 = vmatpush3.bf16.msra.mxu1 %v3226_v8  ;;  %v5523_v8 = vld [vmem:[%s9237_s3 + $0x10] sm:$0xff]   ;;  %v7309_v15 = vpack.i.bf16 %v2012_v3, %v2010_v7 }
 0x158   : > { %9594 = vst [vmem:[#allocation76_spill] sm:$0xff] %v7248_v32  ;;  %v7273_v57 = vpop.permute.xlu0 %4882  ;;  %9602 = vst [vmem:[#allocation35_spill] sm:$0xff] %v7286_v34  ;;  %4570 = vmatprep.subr.bf16.mxu0 %v5522_v56  ;;  %4615 = vmatprep.subr.bf16.mxu1 %v5522_v56  ;;  %v2014_v53 = vsel %vm9412_vm9, %v2011_v33, %v2013_v39  ;;  %v9607_v7 = vrot.slane %v6321_v47, 5  ;;  %v9608_v34 = vrot.slane %v6194_v60, 5  ;;  %v2502_v59 = vrot.slane %v9601_v44, 6 }
 0x159   : > { %9599 = vst [vmem:[#allocation79_spill] sm:$0xff] %v7273_v57  ;;  %5182 = vrot.lane.b32.xlu1 %v9600_v51, %s5547_s21  ;;  %v2494_v57 = vrot.slane %v9570_v40, 6  ;;  %v9605_v51 = vpack.i.bf16 %v7113_v30, %v7107_v28  ;;  %v7335_v30 = vsel %vm9411_vm8, %v2307_v11, %v2309_v43  ;;  %v9625_v42 = vpack.i.bf16 %v7121_v37, %v7118_v58 }
 0x15a   : > { %5157 = vrot.lane.b32.xlu0 %v6950_v4, %s5545_s15  ;;  %v7322_v4 = vsel %vm9411_vm8, %v2309_v43, %v2311_v41  ;;  %v7327_v3 = vsel %vm9411_vm8, %v2311_v41, %v9607_v7  ;;  %v9610_v41 = vrot.slane %v6321_v47, 6  ;;  %v2019_v7 = vrot.slane %v9601_v44, 4 }
 0x15b   : > { %v7293_v38 = vpop.permute.xlu1 %4912  ;;  %v7338_v28 = vsel %vm9410_vm10, %v2494_v57, %v2496_v63  ;;  %4571 = vmatpush3.bf16.msra.mxu0 %v5522_v56  ;;  %4620 = vmatpush3.bf16.msra.mxu1 %v5522_v56  ;;  %v9612_v43 = vpack.i.bf16 %v7131_v12, %v7124_v2  ;;  %v9615_v2 = vpack.i.bf16 %v7104_v31, %v7101_v49  ;;  %v5525_v49 = vld [vmem:[%s9237_s3] sm:$0xff]   ;;  %v9618_v31 = vrot.slane %v9570_v40, 3 }
 0x15c   : > { %9603 = vst [vmem:[#allocation80_spill] sm:$0xff] %v7293_v38  ;;  %v7311_v48 = vpop.permute.xlu0 %1452  ;;  %v9606_v38 = vrot.slane %v6321_v47, 4  ;;  %4572 = vmatprep.subr.bf16.mxu0 %v5523_v8  ;;  %4616 = vmatprep.subr.bf16.mxu1 %v5523_v8  ;;  %v2023_v40 = vrot.slane %v9584_v19, 4  ;;  %v2504_v20 = vrot.slane %v9588_v50, 6  ;;  %v4875_v37 = vunpack.i.h.bf16 %v7199_v24 }
 0x15d   : > { %9604 = vst [vmem:[#allocation81_spill] sm:$0xff] %v7311_v48  ;;  %5192 = vrot.lane.b32.xlu1 %v9605_v51, %s5548_s22  ;;  %v7332_v48 = vsel %vm9411_vm8, %v9608_v34, %v2307_v11  ;;  %v1831_v34 = vrot.slane %v6321_v47, 3  ;;  %v1833_v11 = vrot.slane %v6330_v62, 3  ;;  %v2017_v51 = vrot.slane %v6330_v62, 4 }
 0x15e   : > { %v2016_v32 = vsel %vm9412_vm9, %v2013_v39, %v9606_v38  ;;  %v2492_v39 = vrot.slane %v6209_v29, 6  ;;  %5167 = vrot.lane.b32.xlu0 %v7086_v6, %s5546_s16  ;;  %v7348_v38 = vsel %vm9410_vm10, %v2496_v63, %v9610_v41  ;;  %v5524_v29 = vld [vmem:[%s9237_s3 + $0x8] sm:$0xff]   ;;  %v1829_v6 = vrot.slane %v6362_v16, 3 }
 0x15f   : > { %v7343_v33 = vpop.permute.xlu1 %4922  ;;  %v4880_v63 = vunpack.i.h.bf16 %v7096_v23  ;;  %v4879_v16 = vunpack.i.l.bf16 %v7096_v23  ;;  %4573 = vmatpush3.bf16.msra.mxu0 %v5523_v8  ;;  %4621 = vmatpush3.bf16.msra.mxu1 %v5523_v8 }
 0x160   : > { %9609 = vst [vmem:[#allocation82_spill] sm:$0xff] %v7343_v33  ;;  %v7360_v41 = vpop.permute.xlu0 %4897  ;;  %v7366_v33 = vpack.i.bf16 %v2016_v32, %v2014_v53  ;;  %v7387_v23 = vsel %vm9410_vm10, %v2492_v39, %v2494_v57  ;;  %v7390_v32 = vsel %vm1793_vm6, %v1831_v34, %v1833_v11  ;;  %v9617_v53 = vrot.slane %v9601_v44, 3  ;;  %4574 = vmatprep.subr.bf16.mxu0 %v5524_v29 }
 0x161   : > { %9611 = vst [vmem:[#allocation83_spill] sm:$0xff] %v7360_v41  ;;  %5202 = vrot.lane.b32.xlu1 %v9612_v43, %s5544_s14  ;;  %v9613_v41 = vrot.slane %v6194_v60, 6  ;;  %v2021_v43 = vrot.slane %v9588_v50, 4  ;;  %v7404_v57 = vsel %vm1793_vm6, %v9618_v31, %v1829_v6  ;;  %4617 = vmatprep.subr.bf16.mxu1 %v5524_v29  ;;  %v9623_v31 = vld [vmem:[#allocation45_spill] sm:$0xff] }
 0x162   : > { %5177 = vrot.lane.b32.xlu0 %v9615_v2, %s5547_s21  ;;  %v7395_v60 = vsel %vm1793_vm6, %v1833_v11, %v9617_v53  ;;  %9619 = vst [vmem:[#allocation86_spill] sm:$0xff] %v7404_v57  ;;  %v2020_v2 = vsel %vm9412_vm9, %v2017_v51, %v2019_v7  ;;  %v7415_v53 = vsel %vm9408_vm11, %v6548_v9, %v4880_v63  ;;  %v2500_v57 = vrot.slane %v6330_v62, 6 }
 0x163   : > { %v7378_v13 = vsel %vm9410_vm10, %v9613_v41, %v2492_v39  ;;  %v7384_v12 = vpop.permute.xlu1 %4932  ;;  %v7407_v39 = vsel %vm1793_vm6, %v1829_v6, %v1831_v34  ;;  %v9621_v41 = vrot.slane %v6321_v47, 4  ;;  %9622 = vst [vmem:[#allocation88_spill] sm:$0xff] %v7415_v53  ;;  %v2317_v34 = vrot.slane %v9601_v44, 5  ;;  %4575 = vmatpush3.bf16.msra.mxu0 %v5524_v29  ;;  %4622 = vmatpush3.bf16.msra.mxu1 %v5524_v29 }
 0x164   : > { %9614 = vst [vmem:[#allocation84_spill] sm:$0xff] %v7378_v13  ;;  %9616 = vst [vmem:[#allocation85_spill] sm:$0xff] %v7384_v12  ;;  %v7417_v56 = vpop.permute.xlu0 %4907  ;;  %v2319_v6 = vrot.slane %v9588_v50, 5  ;;  %4576 = vmatprep.subr.bf16.mxu0 %v5525_v49  ;;  %v2022_v63 = vsel %vm9412_vm9, %v2019_v7, %v2021_v43  ;;  %4618 = vmatprep.subr.bf16.mxu1 %v5525_v49  ;;  %v9628_v29 = vrot.slane %v6321_v47, 5  ;;  %v1837_v13 = vrot.slane %v9588_v50, 3 }
 0x165   : > { %9620 = vst [vmem:[#allocation87_spill] sm:$0xff] %v7407_v39  ;;  %v2018_v11 = vsel %vm9412_vm9, %v9621_v41, %v2017_v51  ;;  %5212 = vrot.lane.b32.xlu1 %v7175_v61, %s5545_s15  ;;  %v7426_v51 = vsel %vm9408_vm11, %v9623_v31, %v4879_v16  ;;  %v2315_v41 = vrot.slane %v6330_v62, 5  ;;  %v9633_v62 = vrot.slane %v9584_v19, 6 }
 0x166   : > { %9624 = vst [vmem:[#allocation45_spill] sm:$0xff] %v7426_v51  ;;  %5187 = vrot.lane.b32.xlu0 %v9625_v42, %s5548_s22  ;;  %v7443_v51 = vpack.i.bf16 %v2020_v2, %v2018_v11  ;;  %v4874_v42 = vunpack.i.l.bf16 %v7199_v24  ;;  %v2024_v11 = vsel %vm9412_vm9, %v2021_v43, %v2023_v40  ;;  %v7457_v7 = vsel %vm9411_vm8, %v2317_v34, %v2319_v6 }
 0x167   : > { %v7437_v53 = vpop.permute.xlu1 %4942  ;;  %v9627_v2 = vrot.slane %v9584_v19, 5  ;;  %v7467_v24 = vsel %vm9411_vm8, %v9628_v29, %v2315_v41  ;;  %v7470_v58 = vsel %vm9411_vm8, %v2315_v41, %v2317_v34  ;;  %4577 = vmatpush3.bf16.msra.mxu0 %v5525_v49  ;;  %v9630_v43 = vpack.i.bf16 %v7139_v35, %v7136_v26  ;;  %4623 = vmatpush3.bf16.msra.mxu1 %v5525_v49 }
 0x168   : > { %v7451_v16 = vpop.permute.xlu0 %4917  ;;  %9629 = vst [vmem:[#allocation90_spill] sm:$0xff] %v7467_v24  ;;  %v7484_v34 = vsel %vm9410_vm10, %v2502_v59, %v2504_v20  ;;  %v7489_v41 = vsel %vm9410_vm10, %v2504_v20, %v9633_v62  ;;  %v2025_v26 = vrot.slane %v6447_v25, 4  ;;  %v9638_v20 = vpack.i.bf16 %v7188_v14, %v7183_v55 }
 0x169   : > { %9626 = vst [vmem:[#allocation89_spill] sm:$0xff] %v7451_v16  ;;  %5222 = vrot.lane.b32.xlu1 %v7208_v18, %s5546_s16  ;;  %v7462_v8 = vsel %vm9411_vm8, %v2319_v6, %v9627_v2  ;;  %v1839_v6 = vrot.slane %v9584_v19, 3  ;;  %v1841_v2 = vrot.slane %v6447_v25, 3  ;;  %v9632_v16 = vld [vmem:[#allocation41_spill] sm:$0xff]  ;;  %v7507_v62 = vpack.i.bf16 %v2024_v11, %v2022_v63 }
 0x16a   : > { %5197 = vrot.lane.b32.xlu0 %v9630_v43, %s5544_s14  ;;  %v2027_v35 = vrot.slane %v9632_v16, 4  ;;  %v9634_v43 = vld [vmem:[#allocation48_spill] sm:$0xff]  ;;  %v7499_v50 = vsel %vm9408_vm11, %v9632_v16, %v4874_v42  ;;  %v9642_v11 = vrot.slane %v9632_v16, 3 }
 0x16b   : > { %v7477_v39 = vpop.permute.xlu1 %4952  ;;  %9636 = vst [vmem:[#allocation48_spill] sm:$0xff] %v7499_v50  ;;  %v7528_v63 = vsel %vm1793_vm6, %v1839_v6, %v1841_v2  ;;  %v2512_v49 = vrot.slane %v9634_v43, 6  ;;  %v4890_v50 = vunpack.i.h.bf16 %v7171_v21  ;;  %v9721_v12 = vld [vmem:[#allocation84_spill] sm:$0xff] }
 0x16c   : > { %9631 = vst [vmem:[#allocation91_spill] sm:$0xff] %v7477_v39  ;;  %v7495_v39 = vsel %vm9408_vm11, %v9634_v43, %v4875_v37  ;;  %v7501_v29 = vpop.permute.xlu0 %4927  ;;  %v2029_v37 = vrot.slane %v9634_v43, 4 }
 0x16d   : > { %9635 = vst [vmem:[#allocation41_spill] sm:$0xff] %v7495_v39  ;;  %9637 = vst [vmem:[#allocation92_spill] sm:$0xff] %v7501_v29  ;;  %5232 = vrot.lane.b32.xlu1 %v9638_v20, %s5547_s21  ;;  %v9639_v39 = vrot.slane %v6321_v47, 6  ;;  %v7519_v29 = vsel %vm9410_vm10, %v2500_v57, %v2502_v59  ;;  %v7533_v47 = vsel %vm1793_vm6, %v1841_v2, %v9642_v11  ;;  %v2325_v11 = vrot.slane %v9632_v16, 5 }
 0x16e   : > { %9641 = vst [vmem:[#allocation94_spill] sm:$0xff] %v7519_v29  ;;  %5207 = vrot.lane.b32.xlu0 %v7090_v1, %s5545_s15  ;;  %v7541_v1 = vsel %vm1793_vm6, %v1837_v13, %v1839_v6  ;;  %v2028_v20 = vsel %vm9412_vm9, %v2025_v26, %v2027_v35  ;;  %v9646_v2 = vpack.i.bf16 %v7234_v22, %v7229_v27  ;;  %v2508_v29 = vrot.slane %v6447_v25, 6 }
 0x16f   : > { %v7516_v42 = vsel %vm9410_vm10, %v9639_v39, %v2500_v57  ;;  %v7523_v55 = vpop.permute.xlu1 %4962  ;;  %v9643_v39 = vrot.slane %v9601_v44, 3  ;;  %9645 = vst [vmem:[#allocation96_spill] sm:$0xff] %v7541_v1  ;;  %v2026_v57 = vsel %vm9412_vm9, %v2023_v40, %v2025_v26  ;;  %v2031_v44 = vrot.slane %v9623_v31, 4 }
 0x170   : > { %9640 = vst [vmem:[#allocation93_spill] sm:$0xff] %v7516_v42  ;;  %v7546_v14 = vpop.permute.xlu0 %4937  ;;  %v2323_v26 = vrot.slane %v6447_v25, 5  ;;  %v7570_v40 = vpack.i.bf16 %v2028_v20, %v2026_v57  ;;  %v2030_v42 = vsel %vm9412_vm9, %v2027_v35, %v2029_v37  ;;  %v9649_v57 = vrot.slane %v9623_v31, 5 }
 0x171   : > { %v7538_v59 = vsel %vm1793_vm6, %v9643_v39, %v1837_v13  ;;  %5242 = vrot.lane.b32.xlu1 %v9646_v2, %s5548_s22  ;;  %v2327_v13 = vrot.slane %v9634_v43, 5  ;;  %v2510_v39 = vrot.slane %v9632_v16, 6  ;;  %v2032_v27 = vsel %vm9412_vm9, %v2029_v37, %v2031_v44 }
 0x172   : > { %9644 = vst [vmem:[#allocation95_spill] sm:$0xff] %v7538_v59  ;;  %5217 = vrot.lane.b32.xlu0 %v7175_v61, %s5546_s16  ;;  %v9647_v61 = vpack.i.bf16 %v7256_v17, %v7251_v45  ;;  %v4889_v25 = vunpack.i.l.bf16 %v7171_v21  ;;  %v9651_v20 = vrot.slane %v9584_v19, 5  ;;  %v7597_v45 = vsel %vm9411_vm8, %v2323_v26, %v2325_v11 }
 0x173   : > { %v7563_v22 = vpop.permute.xlu1 %4972  ;;  %v7583_v2 = vsel %vm9411_vm8, %v2325_v11, %v2327_v13  ;;  %v7588_v35 = vsel %vm9411_vm8, %v2327_v13, %v9649_v57  ;;  %9653 = vst [vmem:[#allocation100_spill] sm:$0xff] %v7597_v45  ;;  %v7600_v17 = vsel %vm9410_vm10, %v2510_v39, %v2512_v49  ;;  %v4894_v37 = vunpack.i.l.bf16 %v7201_v10 }
 0x174   : > { %v7575_v24 = vpop.permute.xlu0 %4947  ;;  %9648 = vst [vmem:[#allocation97_spill] sm:$0xff] %v7583_v2  ;;  %9650 = vst [vmem:[#allocation98_spill] sm:$0xff] %v7588_v35  ;;  %v7594_v6 = vsel %vm9411_vm8, %v9651_v20, %v2323_v26  ;;  %v9655_v13 = vpack.i.bf16 %v7226_v54, %v7223_v52  ;;  %v9657_v21 = vrot.slane %v9623_v31, 6  ;;  %v1847_v11 = vrot.slane %v9623_v31, 3  ;;  %v9662_v54 = vld [vmem:[#allocation46_spill] sm:$0xff]  ;;  %v9684_v2 = vld [vmem:[#allocation55_spill] sm:$0xff] }
 0x175   : > { %5252 = vrot.lane.b32.xlu1 %v9647_v61, %s5544_s14  ;;  %9652 = vst [vmem:[#allocation99_spill] sm:$0xff] %v7594_v6  ;;  %9654 = vst [vmem:[#allocation101_spill] sm:$0xff] %v7600_v17  ;;  %v1849_v26 = vrot.slane %v6548_v9, 3  ;;  %v4895_v20 = vunpack.i.h.bf16 %v7201_v10  ;;  %v9659_v59 = vrot.slane %v9584_v19, 6  ;;  %v7623_v52 = vsel %vm9410_vm10, %v2508_v29, %v2510_v39  ;;  %v9663_v39 = vld [vmem:[#allocation49_spill] sm:$0xff]  ;;  %v9668_v6 = vld [vmem:[#allocation56_spill] sm:$0xff] }
 0x176   : > { %5227 = vrot.lane.b32.xlu0 %v9655_v13, %s5547_s21  ;;  %v7612_v57 = vsel %vm9410_vm10, %v2512_v49, %v9657_v21  ;;  %9661 = vst [vmem:[#allocation105_spill] sm:$0xff] %v7623_v52  ;;  %v7630_v49 = vpack.i.bf16 %v2032_v27, %v2030_v42  ;;  %v1845_v19 = vrot.slane %v9634_v43, 3  ;;  %v7642_v21 = vsel %vm9408_vm11, %v9663_v39, %v4889_v25  ;;  %v9679_v17 = vld [vmem:[#allocation77_spill] sm:$0xff] }
 0x177   : > { %v7607_v61 = vpop.permute.xlu1 %1637  ;;  %9658 = vst [vmem:[#allocation103_spill] sm:$0xff] %v7612_v57  ;;  %v7620_v1 = vsel %vm9410_vm10, %v9659_v59, %v2508_v29  ;;  %v2033_v59 = vrot.slane %v6548_v9, 4  ;;  %v7638_v29 = vsel %vm9408_vm11, %v6594_v5, %v4890_v50  ;;  %v2035_v42 = vrot.slane %v9662_v54, 4  ;;  %v9682_v57 = vld [vmem:[#allocation54_spill] sm:$0xff] }
 0x178   : > { %9656 = vst [vmem:[#allocation102_spill] sm:$0xff] %v7607_v61  ;;  %9660 = vst [vmem:[#allocation104_spill] sm:$0xff] %v7620_v1  ;;  %v7626_v61 = vpop.permute.xlu0 %4957  ;;  %v7649_v27 = vsel %vm9409_vm12, %v6859_v0, %v4894_v37  ;;  %v9665_v43 = vpack.i.bf16 %v7242_v46, %v7239_v36  ;;  %v7662_v13 = vsel %vm1793_vm6, %v1847_v11, %v1849_v26  ;;  %v9670_v37 = vld [vmem:[#allocation76_spill] sm:$0xff]  ;;  %v9671_v36 = vrot.slane %v9662_v54, 3 }
 0x179   : > { %5262 = vrot.lane.b32.xlu1 %v7309_v15, %s5545_s15  ;;  %9664 = vst [vmem:[#allocation46_spill] sm:$0xff] %v7649_v27  ;;  %9667 = vst [vmem:[#allocation106_spill] sm:$0xff] %v7662_v13  ;;  %v7666_v0 = vsel %vm9409_vm12, %v9668_v6, %v4895_v20  ;;  %v4905_v27 = vunpack.i.h.bf16 %v9670_v37  ;;  %v4904_v46 = vunpack.i.l.bf16 %v9670_v37  ;;  %v9673_v10 = vrot.slane %v9632_v16, 3  ;;  %v9676_v37 = vld [vmem:[#allocation79_spill] sm:$0xff] }
 0x17a   : > { %5237 = vrot.lane.b32.xlu0 %v9665_v43, %s5548_s22  ;;  %9669 = vst [vmem:[#allocation56_spill] sm:$0xff] %v7666_v0  ;;  %v7673_v43 = vsel %vm1793_vm6, %v1849_v26, %v9671_v36  ;;  %v7685_v6 = vsel %vm1793_vm6, %v1845_v19, %v1847_v11  ;;  %v2034_v20 = vsel %vm9412_vm9, %v2031_v44, %v2033_v59  ;;  %v4885_v52 = vunpack.i.h.bf16 %v9676_v37  ;;  %v9677_v0 = vld [vmem:[#allocation51_spill] sm:$0xff] }
 0x17b   : > { %v7655_v50 = vpop.permute.xlu1 %4987  ;;  %9672 = vst [vmem:[#allocation76_spill] sm:$0xff] %v7673_v43  ;;  %v7682_v1 = vsel %vm1793_vm6, %v9673_v10, %v1845_v19  ;;  %9675 = vst [vmem:[#allocation108_spill] sm:$0xff] %v7685_v6  ;;  %v4884_v26 = vunpack.i.l.bf16 %v9676_v37  ;;  %v2036_v36 = vsel %vm9412_vm9, %v2033_v59, %v2035_v42  ;;  %v2037_v45 = vrot.slane %v9677_v0, 4 }
 0x17c   : > { %9666 = vst [vmem:[#allocation49_spill] sm:$0xff] %v7655_v50  ;;  %v7675_v25 = vpop.permute.xlu0 %4967  ;;  %9674 = vst [vmem:[#allocation107_spill] sm:$0xff] %v7682_v1  ;;  %v9678_v50 = vld [vmem:[#allocation78_spill] sm:$0xff]  ;;  %v2333_v19 = vrot.slane %v9662_v54, 5  ;;  %v2335_v37 = vrot.slane %v9677_v0, 5  ;;  %v7705_v59 = vsel %vm9409_vm12, %v9682_v57, %v4905_v27  ;;  %v7709_v35 = vsel %vm9409_vm12, %v9684_v2, %v4904_v46 }
 0x17d   : > { %5272 = vrot.lane.b32.xlu1 %v7366_v33, %s5546_s16  ;;  %v9680_v16 = vpack.i.bf16 %v9678_v50, %v9679_v17  ;;  %9683 = vst [vmem:[#allocation51_spill] sm:$0xff] %v7705_v59  ;;  %9685 = vst [vmem:[#allocation78_spill] sm:$0xff] %v7709_v35  ;;  %v9687_v57 = vpack.i.bf16 %v7327_v3, %v7322_v4  ;;  %v7722_v27 = vpack.i.bf16 %v2036_v36, %v2034_v20  ;;  %v9689_v50 = vld [vmem:[#allocation82_spill] sm:$0xff]  ;;  %v9697_v59 = vld [vmem:[#allocation64_spill] sm:$0xff] }
 0x17e   : > { %v7726_v2 = vsel %vm9408_vm11, %v9677_v0, %v4885_v52  ;;  %v7730_v46 = vsel %vm9408_vm11, %v9662_v54, %v4884_v26  ;;  %v2038_v17 = vsel %vm9412_vm9, %v2035_v42, %v2037_v45  ;;  %v4925_v1 = vunpack.i.h.bf16 %v9689_v50 }
 0x17f   : > { %5247 = vrot.lane.b32.xlu0 %v9680_v16, %s5544_s14  ;;  %v7696_v10 = vpop.permute.xlu1 %4997  ;;  %v9686_v16 = vld [vmem:[#allocation80_spill] sm:$0xff]  ;;  %9688 = vst [vmem:[#allocation77_spill] sm:$0xff] %v7722_v27  ;;  %v4924_v6 = vunpack.i.l.bf16 %v9689_v50  ;;  %v9691_v3 = vrot.slane %v9663_v39, 4  ;;  %v7744_v20 = vsel %vm9411_vm8, %v2333_v19, %v2335_v37  ;;  %v9692_v42 = vrot.slane %v9663_v39, 5 }
 0x180   : > { %9681 = vst [vmem:[#allocation79_spill] sm:$0xff] %v7696_v10  ;;  %v4915_v11 = vunpack.i.h.bf16 %v9686_v16  ;;  %v4914_v44 = vunpack.i.l.bf16 %v9686_v16  ;;  %v7716_v10 = vpop.permute.xlu0 %4977  ;;  %v2331_v16 = vrot.slane %v6548_v9, 5  ;;  %v2518_v36 = vrot.slane %v9662_v54, 6 }
 0x181   : > { %5282 = vrot.lane.b32.xlu1 %v9687_v57, %s5547_s21  ;;  %v2040_v52 = vsel %vm9412_vm9, %v2037_v45, %v9691_v3  ;;  %v7749_v26 = vsel %vm9411_vm8, %v2335_v37, %v9692_v42  ;;  %v2520_v50 = vrot.slane %v9677_v0, 6  ;;  %v9693_v57 = vld [vmem:[#allocation81_spill] sm:$0xff]  ;;  %v9699_v42 = vpack.i.bf16 %v7348_v38, %v7338_v28 }
 0x182   : > { %v9695_v45 = vld [vmem:[#allocation65_spill] sm:$0xff]  ;;  %v7765_v27 = vsel %vm9409_vm12, %v9697_v59, %v4915_v11  ;;  %v9702_v59 = vld [vmem:[#allocation67_spill] sm:$0xff] }
 0x183   : > { %5257 = vrot.lane.b32.xlu0 %v7208_v18, %s5545_s15  ;;  %v7738_v4 = vpop.permute.xlu1 %5007  ;;  %v7761_v3 = vsel %vm9409_vm12, %v9695_v45, %v4914_v44  ;;  %9698 = vst [vmem:[#allocation80_spill] sm:$0xff] %v7765_v27  ;;  %v2516_v18 = vrot.slane %v6548_v9, 6  ;;  %v7776_v44 = vpack.i.bf16 %v2040_v52, %v2038_v17  ;;  %v9701_v45 = vrot.slane %v9623_v31, 5 }
 0x184   : > { %9690 = vst [vmem:[#allocation54_spill] sm:$0xff] %v7738_v4  ;;  %v9694_v4 = vld [vmem:[#allocation50_spill] sm:$0xff]  ;;  %9696 = vst [vmem:[#allocation55_spill] sm:$0xff] %v7761_v3  ;;  %v7767_v37 = vpop.permute.xlu0 %4982  ;;  %v7785_v27 = vsel %vm9409_vm12, %v9702_v59, %v4924_v6  ;;  %v7798_v17 = vsel %vm9411_vm8, %v2331_v16, %v2333_v19  ;;  %v7801_v52 = vsel %vm9410_vm10, %v2518_v36, %v2520_v50  ;;  %v9707_v6 = vrot.slane %v9663_v39, 6 }
 0x185   : > { %v7757_v35 = vsel %vm9408_vm11, %v9694_v4, %v9693_v57  ;;  %5292 = vrot.lane.b32.xlu1 %v9699_v42, %s5548_s22  ;;  %v9700_v57 = vld [vmem:[#allocation83_spill] sm:$0xff]  ;;  %v7781_v11 = vsel %vm9411_vm8, %v9701_v45, %v2331_v16  ;;  %9703 = vst [vmem:[#allocation82_spill] sm:$0xff] %v7785_v27  ;;  %v9704_v3 = vld [vmem:[#allocation66_spill] sm:$0xff]  ;;  %v9708_v19 = vpack.i.bf16 %v7395_v60, %v7390_v32  ;;  %v9709_v16 = vrot.slane %v9623_v31, 6 }
 0x186   : > { %v4900_v13 = vunpack.i.h.bf16 %v9700_v57  ;;  %v4899_v43 = vunpack.i.l.bf16 %v9700_v57  ;;  %v7789_v28 = vsel %vm9409_vm12, %v9704_v3, %v4925_v1  ;;  %v7806_v42 = vsel %vm9410_vm10, %v2520_v50, %v9707_v6  ;;  %v9710_v6 = vld [vmem:[#allocation61_spill] sm:$0xff]  ;;  %v9714_v32 = vld [vmem:[#allocation70_spill] sm:$0xff] }
 0x187   : > { %9705 = vst [vmem:[#allocation81_spill] sm:$0xff] %v7789_v28  ;;  %5267 = vrot.lane.b32.xlu0 %v7309_v15, %s5546_s16  ;;  %v7793_v9 = vpop.permute.xlu1 %5017  ;;  %v1855_v1 = vrot.slane %v9663_v39, 3  ;;  %v1857_v15 = vrot.slane %v6594_v5, 3  ;;  %v4940_v3 = vunpack.i.h.bf16 %v7546_v14  ;;  %v4939_v57 = vunpack.i.l.bf16 %v7546_v14  ;;  %v9711_v14 = vld [vmem:[#allocation60_spill] sm:$0xff] }
 0x188   : > { %9706 = vst [vmem:[#allocation50_spill] sm:$0xff] %v7793_v9  ;;  %v7812_v45 = vpop.permute.xlu0 %4992  ;;  %v7821_v50 = vsel %vm9410_vm10, %v9709_v16, %v2516_v18  ;;  %v7824_v59 = vsel %vm9410_vm10, %v2516_v18, %v2518_v36  ;;  %v7828_v38 = vsel %vm9409_vm12, %v9710_v6, %v4899_v43  ;;  %v7832_v9 = vsel %vm9409_vm12, %v9711_v14, %v4900_v13 }
 0x189   : > { %5302 = vrot.lane.b32.xlu1 %v9708_v19, %s5544_s14  ;;  %v4910_v60 = vunpack.i.h.bf16 %v7417_v56  ;;  %v4909_v31 = vunpack.i.l.bf16 %v7417_v56  ;;  %v9712_v36 = vpack.i.bf16 %v7335_v30, %v7332_v48  ;;  %v7849_v14 = vsel %vm1793_vm6, %v1855_v1, %v1857_v15  ;;  %v9713_v56 = vld [vmem:[#allocation69_spill] sm:$0xff] }
 0x18a   : > { %v2707_v28 = vsel %vm9409_vm12, %v9713_v56, %v4940_v3  ;;  %v2706_v48 = vsel %vm9409_vm12, %v9714_v32, %v4939_v57  ;;  %v4950_v30 = vunpack.i.h.bf16 %v7575_v24  ;;  %v4944_v6 = vunpack.i.l.bf16 %v7437_v53  ;;  %v9717_v57 = vld [vmem:[#allocation58_spill] sm:$0xff] }
 0x18b   : > { %5277 = vrot.lane.b32.xlu0 %v9712_v36, %s5547_s21  ;;  %v5028_v43 = vpop.permute.xlu1 %5027  ;;  %v4949_v36 = vunpack.i.l.bf16 %v7575_v24  ;;  %v7871_v32 = vsel %vm9409_vm12, %v9717_v57, %v4910_v60  ;;  %v9719_v24 = vld [vmem:[#allocation59_spill] sm:$0xff]  ;;  %v9722_v27 = vpack.i.bf16 %v7387_v23, %v9721_v12  ;;  %v4960_v23 = vunpack.i.h.bf16 %v7626_v61  ;;  %v9729_v60 = vld [vmem:[#allocation74_spill] sm:$0xff] }
 0x18c   : > { %v5030_v19 = vunpack.i.h.bf16 %v5028_v43  ;;  %v5029_v16 = vunpack.i.l.bf16 %v5028_v43  ;;  %v7857_v18 = vpop.permute.xlu0 %5002  ;;  %v4945_v43 = vunpack.i.h.bf16 %v7437_v53  ;;  %9718 = vst [vmem:[#allocation83_spill] sm:$0xff] %v7871_v32  ;;  %v7875_v56 = vsel %vm9409_vm12, %v9719_v24, %v4909_v31  ;;  %v9725_v24 = vld [vmem:[#allocation72_spill] sm:$0xff]  ;;  %v9726_v32 = vld [vmem:[#allocation73_spill] sm:$0xff] }
 0x18d   : > { %5312 = vrot.lane.b32.xlu1 %v7443_v51, %s5545_s15  ;;  %9720 = vst [vmem:[#allocation67_spill] sm:$0xff] %v7875_v56  ;;  %v2710_v12 = vsel %vm9409_vm12, %v9726_v32, %v4949_v36  ;;  %v9732_v32 = vld [vmem:[#allocation87_spill] sm:$0xff] }
 0x18e   : > { %v7864_v13 = vsel %vm9413_vm13, %v2706_v48, %v5029_v16  ;;  %v7867_v3 = vsel %vm9413_vm13, %v2707_v28, %v5030_v19  ;;  %v9723_v16 = vrot.slane %v9694_v4, 3  ;;  %v1853_v28 = vrot.slane %v9677_v0, 3  ;;  %v9728_v0 = vld [vmem:[#allocation28_spill] sm:$0xff] }
 0x18f   : > { %9715 = vst [vmem:[#allocation65_spill] sm:$0xff] %v7864_v13  ;;  %9716 = vst [vmem:[#allocation64_spill] sm:$0xff] %v7867_v3  ;;  %5287 = vrot.lane.b32.xlu0 %v9722_v27, %s5548_s22  ;;  %v5038_v53 = vpop.permute.xlu1 %5037  ;;  %v2711_v13 = vsel %vm9409_vm12, %v9725_v24, %v4950_v30  ;;  %v4959_v27 = vunpack.i.l.bf16 %v7626_v61  ;;  %v9733_v61 = vld [vmem:[#allocation86_spill] sm:$0xff]  ;;  %v9735_v19 = vrot.slane %v9662_v54, 3  ;;  %v9738_v54 = vld [vmem:[#allocation39_spill] sm:$0xff] }
 0x190   : > { %v7884_v48 = vsel %vm1793_vm6, %v1857_v15, %v9723_v16  ;;  %v5040_v3 = vunpack.i.h.bf16 %v5038_v53  ;;  %v5039_v31 = vunpack.i.l.bf16 %v5038_v53  ;;  %v7895_v15 = vpop.permute.xlu0 %5012  ;;  %v2708_v16 = vsel %vm9409_vm12, %v9728_v0, %v4944_v6 }
 0x191   : > { %9727 = vst [vmem:[#allocation66_spill] sm:$0xff] %v7895_v15  ;;  %5322 = vrot.lane.b32.xlu1 %v7507_v62, %s5546_s16  ;;  %v2709_v53 = vsel %vm9409_vm12, %v9729_v60, %v4945_v43  ;;  %v9734_v24 = vpack.i.bf16 %v9732_v32, %v9733_v61  ;;  %v7916_v15 = vsel %vm1793_vm6, %v9735_v19, %v1853_v28  ;;  %v2041_v43 = vrot.slane %v6594_v5, 4  ;;  %v9736_v60 = vld [vmem:[#allocation2_spill] sm:$0xff]  ;;  %v9737_v32 = vld [vmem:[#allocation75_spill] sm:$0xff] }
 0x192   : > { %v7904_v30 = vsel %vm9413_vm13, %v2710_v12, %v5039_v31  ;;  %v7907_v36 = vsel %vm9413_vm13, %v2711_v13, %v5040_v3  ;;  %v7919_v6 = vsel %vm1793_vm6, %v1853_v28, %v1855_v1  ;;  %v361_v31 = vadd.s32 312, %v9736_v60 }
 0x193   : > { %9730 = vst [vmem:[#allocation61_spill] sm:$0xff] %v7904_v30  ;;  %9731 = vst [vmem:[#allocation60_spill] sm:$0xff] %v7907_v36  ;;  %5297 = vrot.lane.b32.xlu0 %v9734_v24, %s5544_s14  ;;  %v5048_v57 = vpop.permute.xlu1 %5047  ;;  %v4970_v13 = vunpack.i.h.bf16 %v7675_v25  ;;  %v4969_v3 = vunpack.i.l.bf16 %v7675_v25  ;;  %v2715_v61 = vsel %vm9409_vm12, %v9737_v32, %v4960_v23  ;;  %v2714_v19 = vsel %vm9409_vm12, %v9738_v54, %v4959_v27  ;;  %v9741_v25 = vld [vmem:[#allocation91_spill] sm:$0xff] }
 0x194   : > { %v5050_v12 = vunpack.i.h.bf16 %v5048_v57  ;;  %v5049_v0 = vunpack.i.l.bf16 %v5048_v57  ;;  %v7929_v24 = vpop.permute.xlu0 %5022  ;;  %v9740_v1 = vpack.i.bf16 %v7462_v8, %v7457_v7  ;;  %v362_v28 = vadd.s32 320, %v9736_v60 }
 0x195   : > { %9739 = vst [vmem:[#allocation69_spill] sm:$0xff] %v7929_v24  ;;  %v363_v36 = vadd.s32 328, %v9736_v60  ;;  %v4955_v30 = vunpack.i.h.bf16 %v9741_v25  ;;  %v4954_v32 = vunpack.i.l.bf16 %v9741_v25  ;;  %v9744_v54 = vrot.slane %v9663_v39, 4  ;;  %v9751_v24 = vld [vmem:[#allocation42_spill] sm:$0xff] }
 0x196   : > { %5332 = vrot.lane.b32.xlu1 %v9740_v1, %s5547_s21  ;;  %v7939_v57 = vsel %vm9413_vm13, %v2714_v19, %v5049_v0  ;;  %v7942_v23 = vsel %vm9413_vm13, %v2715_v61, %v5050_v12  ;;  %v7954_v19 = vadd.s32 4294967291, %v361_v31  ;;  %v9745_v12 = vld [vmem:[#allocation88_spill] sm:$0xff]  ;;  %v9746_v1 = vld [vmem:[#allocation45_spill] sm:$0xff]  ;;  %v9747_v7 = vpack.i.bf16 %v7489_v41, %v7484_v34 }
 0x197   : > { %9742 = vst [vmem:[#allocation70_spill] sm:$0xff] %v7939_v57  ;;  %9743 = vst [vmem:[#allocation58_spill] sm:$0xff] %v7942_v23  ;;  %5307 = vrot.lane.b32.xlu0 %v7366_v33, %s5545_s15  ;;  %v5058_v8 = vpop.permute.xlu1 %5057  ;;  %v2042_v0 = vsel %vm9412_vm9, %v9744_v54, %v2041_v43  ;;  %v2719_v61 = vsel %vm9409_vm12, %v9745_v12, %v4970_v13  ;;  %v2718_v27 = vsel %vm9409_vm12, %v9746_v1, %v4969_v3  ;;  %v9750_v1 = vld [vmem:[#allocation35_spill] sm:$0xff] }
 0x198   : > { %v5060_v25 = vunpack.i.h.bf16 %v5058_v8  ;;  %v5059_v60 = vunpack.i.l.bf16 %v5058_v8  ;;  %v4980_v33 = vunpack.i.h.bf16 %v7716_v10  ;;  %v4979_v23 = vunpack.i.l.bf16 %v7716_v10  ;;  %v5033_v57 = vpop.permute.xlu0 %5032 }
 0x199   : > { %v7966_v31 = vadd.s32 4294967291, %v362_v28  ;;  %v7968_v54 = vadd.s32 4294967291, %v363_v36  ;;  %v5035_v13 = vunpack.i.h.bf16 %v5033_v57  ;;  %v5034_v12 = vunpack.i.l.bf16 %v5033_v57 }
 0x19a   : > { %5342 = vrot.lane.b32.xlu1 %v9747_v7, %s5548_s22  ;;  %v7971_v3 = vsel %vm9413_vm13, %v2718_v27, %v5059_v60  ;;  %v7974_v8 = vsel %vm9413_vm13, %v2719_v61, %v5060_v25  ;;  %v2712_v10 = vsel %vm9409_vm12, %v9750_v1, %v4954_v32  ;;  %v2713_v56 = vsel %vm9409_vm12, %v9751_v24, %v4955_v30 }
 0x19b   : > { %9748 = vst [vmem:[#allocation59_spill] sm:$0xff] %v7971_v3  ;;  %9749 = vst [vmem:[#allocation84_spill] sm:$0xff] %v7974_v8  ;;  %5317 = vrot.lane.b32.xlu0 %v7443_v51, %s5546_s16  ;;  %v5068_v34 = vpop.permute.xlu1 %5067  ;;  %v2043_v41 = vrot.slane %v9694_v4, 4  ;;  %v445_v36 = vcvt.s32.f32 %v7954_v19  ;;  %v7985_v60 = vsel %vm9413_vm13, %v2708_v16, %v5034_v12  ;;  %v7988_v28 = vsel %vm9413_vm13, %v2709_v53, %v5035_v13  ;;  %v9759_v12 = vld [vmem:[#allocation52_spill] sm:$0xff]  ;;  %v9778_v3 = vld [vmem:[#allocation97_spill] sm:$0xff] }
 0x19c   : > { %9752 = vst [vmem:[#allocation72_spill] sm:$0xff] %v7985_v60  ;;  %9753 = vst [vmem:[#allocation73_spill] sm:$0xff] %v7988_v28  ;;  %v5070_v57 = vunpack.i.h.bf16 %v5068_v34  ;;  %v5069_v27 = vunpack.i.l.bf16 %v5068_v34  ;;  %v2723_v32 = vsel %vm9409_vm12, %v7638_v29, %v4980_v33  ;;  %v2722_v30 = vsel %vm9409_vm12, %v7642_v21, %v4979_v23  ;;  %v5043_v51 = vpop.permute.xlu0 %5042 }
 0x19d   : > { %v9754_v24 = vpack.i.bf16 %v7533_v47, %v7528_v63  ;;  %v446_v16 = vcvt.s32.f32 %v7966_v31  ;;  %v447_v7 = vcvt.s32.f32 %v7968_v54  ;;  %v5045_v53 = vunpack.i.h.bf16 %v5043_v51  ;;  %v9757_v63 = vld [vmem:[#allocation90_spill] sm:$0xff] }
 0x19e   : > { %v5044_v61 = vunpack.i.l.bf16 %v5043_v51  ;;  %v8001_v25 = vsel %vm9413_vm13, %v2722_v30, %v5069_v27  ;;  %v8004_v29 = vsel %vm9413_vm13, %v2723_v32, %v5070_v57  ;;  %v4965_v21 = vunpack.i.h.bf16 %v7523_v55  ;;  %v9762_v27 = vld [vmem:[#allocation53_spill] sm:$0xff] }
 0x19f   : > { %5352 = vrot.lane.b32.xlu1 %v9754_v24, %s5544_s14  ;;  %9755 = vst [vmem:[#allocation28_spill] sm:$0xff] %v8001_v25  ;;  %9756 = vst [vmem:[#allocation74_spill] sm:$0xff] %v8004_v29  ;;  %v4964_v23 = vunpack.i.l.bf16 %v7523_v55  ;;  %v9758_v47 = vpack.i.bf16 %v7470_v58, %v9757_v63  ;;  %v8012_v33 = vpop.permute.xlu1 %5072  ;;  %v2044_v13 = vsel %vm9412_vm9, %v2041_v43, %v2043_v41  ;;  %v2045_v1 = vrot.slane %v9759_v12, 4  ;;  %v9765_v29 = vld [vmem:[#allocation94_spill] sm:$0xff]  ;;  %v9766_v25 = vld [vmem:[#allocation93_spill] sm:$0xff] }
 0x1a0   : > { %v8017_v34 = vsel %vm9413_vm13, %v2712_v10, %v5044_v61  ;;  %v8020_v57 = vsel %vm9413_vm13, %v2713_v56, %v5045_v53  ;;  %v487_v55 = vadd.f32 0.5, %v445_v36  ;;  %v5053_v30 = vpop.permute.xlu0 %5052  ;;  %v2341_v58 = vrot.slane %v9694_v4, 5  ;;  %v9763_v61 = vld [vmem:[#allocation48_spill] sm:$0xff]  ;;  %v9764_v53 = vld [vmem:[#allocation41_spill] sm:$0xff] }
 0x1a1   : > { %5327 = vrot.lane.b32.xlu0 %v9758_v47, %s5547_s21  ;;  %9760 = vst [vmem:[#allocation87_spill] sm:$0xff] %v8017_v34  ;;  %9761 = vst [vmem:[#allocation86_spill] sm:$0xff] %v8020_v57  ;;  %v488_v51 = vadd.f32 0.5, %v446_v16  ;;  %v489_v24 = vadd.f32 0.5, %v447_v7  ;;  %v4974_v43 = vunpack.i.l.bf16 %v7563_v22  ;;  %v5055_v63 = vunpack.i.h.bf16 %v5053_v30  ;;  %v9804_v34 = vld [vmem:[#allocation99_spill] sm:$0xff] }
 0x1a2   : > { %v5054_v47 = vunpack.i.l.bf16 %v5053_v30  ;;  %v8027_v10 = vpack.i.bf16 %v2044_v13, %v2042_v0  ;;  %v2716_v56 = vsel %vm9409_vm12, %v9763_v61, %v4964_v23  ;;  %v2717_v36 = vsel %vm9409_vm12, %v9764_v53, %v4965_v21  ;;  %v9772_v53 = vld [vmem:[#allocation95_spill] sm:$0xff] }
 0x1a3   : > { %5362 = vrot.lane.b32.xlu1 %v7570_v40, %s5545_s15  ;;  %v4975_v32 = vunpack.i.h.bf16 %v7563_v22  ;;  %v9767_v8 = vpack.i.bf16 %v9765_v29, %v9766_v25  ;;  %v8038_v16 = vpop.permute.xlu1 %5082  ;;  %v2046_v7 = vsel %vm9412_vm9, %v2043_v41, %v2045_v1  ;;  %v8045_v13 = vsel %vm9413_vm13, %v2717_v36, %v5055_v63  ;;  %v9776_v25 = vld [vmem:[#allocation102_spill] sm:$0xff] }
 0x1a4   : > { %v8042_v0 = vsel %vm9413_vm13, %v2716_v56, %v5054_v47  ;;  %9769 = vst [vmem:[#allocation39_spill] sm:$0xff] %v8045_v13  ;;  %v9770_v23 = vrot.slane %v9762_v27, 4  ;;  %v529_v22 = vmul.f32 0.055555556, %v487_v55  ;;  %v5063_v30 = vpop.permute.xlu0 %5062  ;;  %v530_v41 = vmul.f32 0.055555556, %v488_v51 }
 0x1a5   : > { %5337 = vrot.lane.b32.xlu0 %v9767_v8, %s5548_s22  ;;  %9768 = vst [vmem:[#allocation75_spill] sm:$0xff] %v8042_v0  ;;  %v2343_v8 = vrot.slane %v9759_v12, 5  ;;  %v531_v29 = vmul.f32 0.055555556, %v489_v24  ;;  %v2720_v47 = vsel %vm9409_vm12, %v7730_v46, %v4974_v43  ;;  %v5065_v63 = vunpack.i.h.bf16 %v5063_v30  ;;  %v9771_v55 = vld [vmem:[#allocation96_spill] sm:$0xff]  ;;  %v5530_v24 = vld [vmem:[%s5620_s23 + $0x98] sm:$0xff]  }
 0x1a6   : > { %v2048_v21 = vsel %vm9412_vm9, %v2045_v1, %v9770_v23  ;;  %v5064_v61 = vunpack.i.l.bf16 %v5063_v30  ;;  %v2339_v56 = vrot.slane %v6594_v5, 5  ;;  %v2721_v1 = vsel %vm9409_vm12, %v7726_v2, %v4975_v32 }
 0x1a7   : > { %5372 = vrot.lane.b32.xlu1 %v7630_v49, %s5546_s16  ;;  %v9773_v36 = vpack.i.bf16 %v9771_v55, %v9772_v53  ;;  %v8063_v23 = vpop.permute.xlu1 %5092  ;;  %v2526_v51 = vrot.slane %v9694_v4, 6  ;;  %v2528_v46 = vrot.slane %v9759_v12, 6  ;;  %v8072_v30 = vsel %vm9413_vm13, %v2721_v1, %v5065_v63 }
 0x1a8   : > { %v8069_v43 = vsel %vm9413_vm13, %v2720_v47, %v5064_v61  ;;  %9775 = vst [vmem:[#allocation88_spill] sm:$0xff] %v8072_v30  ;;  %v2524_v2 = vrot.slane %v6594_v5, 6  ;;  %v571_v32 = vfloor.f32 %v529_v22  ;;  %v2724_v55 = vsel %vm9409_vm12, %v7757_v35, %v9776_v25  ;;  %v1755_v53 = vpop.permute.xlu0 %1754  ;;  %v277_v47 = vld [vmem:[%s5620_s23 + $0xa0] sm:$0xf] }
 0x1a9   : > { %5347 = vrot.lane.b32.xlu0 %v9773_v36, %s5544_s14  ;;  %9774 = vst [vmem:[#allocation91_spill] sm:$0xff] %v8069_v43  ;;  %v9777_v36 = vld [vmem:[#allocation98_spill] sm:$0xff]  ;;  %v4525_v0 = vunpack.c.h.bf16 %v5530_v24  ;;  %v572_v61 = vfloor.f32 %v530_v41  ;;  %v573_v63 = vfloor.f32 %v531_v29  ;;  %v8085_v1 = vsel %vm9413_vm13, %v2724_v55, %v1755_v53  ;;  %v9791_v24 = vld [vmem:[#allocation101_spill] sm:$0xff] }
 0x1aa   : > { %v9779_v13 = vpack.i.bf16 %v9777_v36, %v9778_v3  ;;  %9780 = vst [vmem:[#allocation45_spill] sm:$0xff] %v8085_v1  ;;  %v8088_v5 = vsel %vm9411_vm8, %v2341_v58, %v2343_v8  ;;  %v9781_v35 = vrot.slane %v9762_v27, 5  ;;  %v9782_v3 = vrot.slane %v9663_v39, 5  ;;  %v9790_v1 = vld [vmem:[#allocation103_spill] sm:$0xff] }
 0x1ab   : > { %v8102_v25 = vpop.permute.xlu1 %5102  ;;  %v8105_v41 = vsel %vm9411_vm8, %v2339_v56, %v2341_v58  ;;  %v8108_v29 = vsel %vm9410_vm10, %v2526_v51, %v2528_v46  ;;  %v9786_v55 = vrot.slane %v9762_v27, 6  ;;  %v9788_v36 = vrot.slane %v9663_v39, 6  ;;  %v5531_v39 = vld [vmem:[%s9235_s1] ss:$0 sm:$0xff] }
 0x1ac   : > { %5382 = vrot.lane.b32.xlu1 %v9779_v13, %s5547_s21  ;;  %v8093_v22 = vsel %vm9411_vm8, %v2343_v8, %v9781_v35  ;;  %v8098_v13 = vsel %vm9411_vm8, %v9782_v3, %v2339_v56  ;;  %9784 = vst [vmem:[#allocation42_spill] sm:$0xff] %v8105_v41  ;;  %9785 = vst [vmem:[#allocation90_spill] sm:$0xff] %v8108_v29  ;;  %v1861_v8 = vrot.slane %v9759_v12, 3  ;;  %v319_v35 = vunpack.c.l.bf16 %v277_v47  ;;  %v278_v56 = vld [vmem:[%s5620_s23 + $0xa4] sm:$0x3]  ;;  %v8123_v3 = vpop.permute.xlu0 %5077  ;;  %v9794_v47 = vld [vmem:[#allocation49_spill] sm:$0xff] }
 0x1ad   : > { %9783 = vst [vmem:[#allocation35_spill] sm:$0xff] %v8098_v13  ;;  %5357 = vrot.lane.b32.xlu0 %v7507_v62, %s5545_s15  ;;  %v8115_v53 = vsel %vm9410_vm10, %v2528_v46, %v9786_v55  ;;  %v8120_v62 = vsel %vm9410_vm10, %v9788_v36, %v2524_v2  ;;  %v4706_v58 = vtrunc.f32 %v571_v32  ;;  %v9792_v30 = vpack.i.bf16 %v9790_v1, %v9791_v24  ;;  %v9810_v41 = vld [vmem:[#allocation51_spill] sm:$0xff]  ;;  %v9811_v29 = vld [vmem:[#allocation105_spill] sm:$0xff] }
 0x1ae   : > { %9787 = vst [vmem:[#allocation52_spill] sm:$0xff] %v8115_v53  ;;  %9789 = vst [vmem:[#allocation48_spill] sm:$0xff] %v8120_v62  ;;  %v8130_v12 = vsel %vm9410_vm10, %v2524_v2, %v2526_v51  ;;  %v4708_v46 = vtrunc.f32 %v572_v61  ;;  %v1040_v55 = vmul.f32 %v5531_v39, %v4525_v0  ;;  %v4710_v36 = vtrunc.f32 %v573_v63  ;;  %v9798_v2 = vld [vmem:[#allocation106_spill] sm:$0xff]  ;;  %v9812_v53 = vld [vmem:[#allocation104_spill] sm:$0xff] }
 0x1af   : > { %9793 = vst [vmem:[#allocation41_spill] sm:$0xff] %v8130_v12  ;;  %v4990_v32 = vunpack.i.h.bf16 %v9794_v47  ;;  %v4989_v43 = vunpack.i.l.bf16 %v9794_v47  ;;  %v8137_v57 = vpack.i.bf16 %v2048_v21, %v2046_v7  ;;  %v320_v61 = vunpack.c.l.bf16 %v278_v56  ;;  %v9797_v47 = vld [vmem:[#allocation76_spill] sm:$0xff] }
 0x1b0   : > { %5392 = vrot.lane.b32.xlu1 %v9792_v30, %s5548_s22  ;;  %v8141_v30 = vpop.permute.xlu1 %5112  ;;  %v9795_v21 = vrot.slane %v9694_v4, 3  ;;  %v1041_v1 = vmul.f32 %v5531_v39, %v319_v35  ;;  %v8158_v24 = vpop.permute.xlu0 %5087  ;;  %v9799_v51 = vpack.i.bf16 %v9797_v47, %v9798_v2  ;;  %v9800_v56 = vrot.slane %v9762_v27, 3  ;;  %v5532_v4 = vld [vmem:[%s9236_s2] ss:$0 sm:$0xff]  ;;  %v9809_v12 = vld [vmem:[#allocation56_spill] sm:$0xff] }
 0x1b1   : > { %5367 = vrot.lane.b32.xlu0 %v7570_v40, %s5546_s16  ;;  %v8156_v40 = vcvt.f32.s32 %v4706_v58  ;;  %v8169_v7 = vcvt.f32.s32 %v4708_v46  ;;  %v8174_v58 = vadd.f32 %v5532_v4, %v1040_v55  ;;  %v8176_v35 = vcvt.f32.s32 %v4710_v36  ;;  %v9803_v36 = vld [vmem:[#allocation100_spill] sm:$0xff] }
 0x1b2   : > { %v8154_v63 = vsel %vm1793_vm6, %v9795_v21, %v1861_v8  ;;  %v8167_v0 = vsel %vm1793_vm6, %v1861_v8, %v9800_v56  ;;  %v2728_v21 = vsel %vm9413_vm13, %v7828_v38, %v4989_v43  ;;  %v4984_v8 = vunpack.i.l.bf16 %v7767_v37 }
 0x1b3   : > { %9796 = vst [vmem:[#allocation94_spill] sm:$0xff] %v8154_v63  ;;  %9801 = vst [vmem:[#allocation93_spill] sm:$0xff] %v8167_v0  ;;  %v4985_v47 = vunpack.i.h.bf16 %v7767_v37  ;;  %v4995_v55 = vunpack.i.h.bf16 %v7812_v45  ;;  %v9805_v28 = vpack.i.bf16 %v9803_v36, %v9804_v34  ;;  %v4994_v43 = vunpack.i.l.bf16 %v7812_v45  ;;  %v9807_v34 = vld [vmem:[#allocation77_spill] sm:$0xff]  ;;  %v9815_v63 = vld [vmem:[#allocation55_spill] sm:$0xff] }
 0x1b4   : > { %5402 = vrot.lane.b32.xlu1 %v9799_v51, %s5544_s14  ;;  %v8182_v51 = vsel %vm9413_vm13, %v7832_v9, %v4990_v32  ;;  %v8193_v38 = vpop.permute.xlu1 %5122  ;;  %v1042_v9 = vmul.f32 %v5531_v39, %v320_v61  ;;  %v5004_v32 = vunpack.i.l.bf16 %v7857_v18  ;;  %v655_v46 = vmul.u32 18, %v8156_v40  ;;  %v8201_v60 = vpop.permute.xlu0 %5097  ;;  %v9808_v61 = vld [vmem:[#allocation46_spill] sm:$0xff] }
 0x1b5   : > { %5377 = vrot.lane.b32.xlu0 %v9805_v28, %s5547_s21  ;;  %v8198_v37 = vadd.f32 %v5532_v4, %v1041_v1  ;;  %v5005_v56 = vunpack.i.h.bf16 %v7857_v18  ;;  %v656_v28 = vmul.u32 18, %v8169_v7  ;;  %v657_v45 = vmul.u32 18, %v8176_v35 }
 0x1b6   : > { %v2726_v36 = vsel %vm9413_vm13, %v9808_v61, %v4984_v8  ;;  %v5075_v1 = vunpack.i.h.bf16 %v8012_v33  ;;  %v5074_v62 = vunpack.i.l.bf16 %v8012_v33  ;;  %v5084_v18 = vunpack.i.l.bf16 %v8038_v16  ;;  %v9814_v33 = vld [vmem:[#allocation78_spill] sm:$0xff] }
 0x1b7   : > { %9806 = vst [vmem:[#allocation96_spill] sm:$0xff] %v8198_v37  ;;  %v2727_v13 = vsel %vm9413_vm13, %v9809_v12, %v4985_v47  ;;  %v2731_v27 = vsel %vm9413_vm13, %v9810_v41, %v4995_v55  ;;  %v5085_v39 = vunpack.i.h.bf16 %v8038_v16  ;;  %v9813_v37 = vpack.i.bf16 %v9811_v29, %v9812_v53  ;;  %v9816_v16 = vld [vmem:[#allocation80_spill] sm:$0xff] }
 0x1b8   : > { %5412 = vrot.lane.b32.xlu1 %v9807_v34, %s5545_s15  ;;  %v5133_v8 = vpop.permute.xlu1 %5132  ;;  %v8222_v61 = vadd.f32 %v5532_v4, %v1042_v9  ;;  %v2730_v0 = vsel %vm9413_vm13, %v9814_v33, %v4994_v43  ;;  %v8228_v2 = vsel %vm9413_vm13, %v9815_v63, %v5004_v32  ;;  %v5079_v12 = vunpack.i.l.bf16 %v8123_v3  ;;  %v8239_v53 = vpop.permute.xlu0 %5107 }
 0x1b9   : > { %5387 = vrot.lane.b32.xlu0 %v9813_v37, %s5548_s22  ;;  %v8232_v41 = vsub.s32 %v7954_v19, %v655_v46  ;;  %v8236_v47 = vsel %vm9413_vm13, %v9816_v16, %v5005_v56  ;;  %v5089_v29 = vunpack.i.l.bf16 %v8158_v24  ;;  %v8244_v4 = vsub.s32 %v7966_v31, %v656_v28  ;;  %v9817_v37 = vld [vmem:[#allocation108_spill] sm:$0xff] }
 0x1ba   : > { %v8247_v63 = vsub.s32 %v7968_v54, %v657_v45  ;;  %v2764_v19 = vsel %vm2763_vm7, %v2726_v36, %v5074_v62  ;;  %v2765_v46 = vsel %vm2763_vm7, %v2727_v13, %v5075_v1  ;;  %v2768_v56 = vsel %vm2763_vm7, %v2730_v0, %v5084_v18  ;;  %v9818_v54 = vld [vmem:[#allocation107_spill] sm:$0xff] }
 0x1bb   : > { %v5090_v55 = vunpack.i.h.bf16 %v8158_v24  ;;  %v2769_v9 = vsel %vm2763_vm7, %v2731_v27, %v5085_v39  ;;  %v5095_v43 = vunpack.i.h.bf16 %v8063_v23  ;;  %v5105_v32 = vunpack.i.h.bf16 %v8102_v25 }
 0x1bc   : > { %5422 = vrot.lane.b32.xlu1 %v7776_v44, %s5546_s16  ;;  %v5104_v31 = vunpack.i.l.bf16 %v8102_v25  ;;  %v9819_v28 = vpack.i.bf16 %v9817_v37, %v9818_v54  ;;  %v5143_v62 = vpop.permute.xlu1 %5142  ;;  %v5080_v13 = vunpack.i.h.bf16 %v8123_v3  ;;  %v2766_v0 = vsel %vm2763_vm7, %v2728_v21, %v5079_v12  ;;  %v5118_v36 = vpop.permute.xlu0 %5117 }
 0x1bd   : > { %v5094_v24 = vunpack.i.l.bf16 %v8063_v23  ;;  %v5099_v27 = vunpack.i.l.bf16 %v8201_v60  ;;  %v2802_v39 = vsel %vm2801_vm14, %v2764_v19, %v5089_v29  ;;  %v5115_v45 = vunpack.i.h.bf16 %v8141_v30 }
 0x1be   : > { %5397 = vrot.lane.b32.xlu0 %v9819_v28, %s5544_s14  ;;  %v5135_v25 = vunpack.i.h.bf16 %v5133_v8  ;;  %v5134_v1 = vunpack.i.l.bf16 %v5133_v8  ;;  %v9820_v18 = vpack.i.bf16 %v7749_v26, %v7744_v20  ;;  %v2803_v3 = vsel %vm2801_vm14, %v2765_v46, %v5090_v55 }
 0x1bf   : > { %v5100_v21 = vunpack.i.h.bf16 %v8201_v60  ;;  %v5120_v33 = vunpack.i.h.bf16 %v5118_v36  ;;  %v5119_v23 = vunpack.i.l.bf16 %v5118_v36  ;;  %vm739_vm2 = vcmp.ge.s32.totalorder %v8156_v40, 1 }
 0x1c0   : > { %5432 = vrot.lane.b32.xlu1 %v9820_v18, %s5547_s21  ;;  %vm781_vm3 = vcmp.le.s32.totalorder %v8156_v40, 16  ;;  %v2840_v12 = vsel %vm2839_vm15, %v2802_v39, %v5104_v31  ;;  %v2841_v16 = vsel %vm2839_vm15, %v2803_v3, %v5105_v32  ;;  %v5114_v8 = vunpack.i.l.bf16 %v8141_v30  ;;  %v8281_v20 = vpop.permute.xlu1 %5152  ;;  %v5128_v30 = vpop.permute.xlu0 %5127 }
 0x1c1   : > { %v5125_v29 = vunpack.i.h.bf16 %v8193_v38  ;;  %v2806_v26 = vsel %vm2801_vm14, %v2768_v56, %v5099_v27  ;;  %v5109_v60 = vunpack.i.l.bf16 %v8239_v53  ;;  %v2878_v19 = vsel %vm2877_vm0, %v2840_v12, %v5119_v23  ;;  %vm8340_vm13 = vmand %vm739_vm2, %vm781_vm3 }
 0x1c2   : > { %5407 = vrot.lane.b32.xlu0 %v7630_v49, %s5545_s15  ;;  %v2879_v46 = vsel %vm2877_vm0, %v2841_v16, %v5120_v33  ;;  %v2916_v55 = vsel %vm9414_vm1, %v2878_v19, %v5134_v1  ;;  %v5145_v31 = vunpack.i.h.bf16 %v5143_v62  ;;  %v5144_v37 = vunpack.i.l.bf16 %v5143_v62 }
 0x1c3   : > { %v2917_v32 = vsel %vm9414_vm1, %v2879_v46, %v5135_v25  ;;  %v9821_v49 = vpack.i.bf16 %v7806_v42, %v7801_v52  ;;  %vm865_vm5 = vcmp.ge.s32.totalorder %v8232_v41, 1  ;;  %v2807_v56 = vsel %vm2801_vm14, %v2769_v9, %v5100_v21 }
 0x1c4   : > { %v5110_v54 = vunpack.i.h.bf16 %v8239_v53  ;;  %v5130_v28 = vunpack.i.h.bf16 %v5128_v30  ;;  %v5129_v27 = vunpack.i.l.bf16 %v5128_v30  ;;  %vm741_vm4 = vcmp.ge.s32.totalorder %v8176_v35, 1  ;;  %v8302_v52 = vpop.permute.xlu1 %5162  ;;  %v5138_v3 = vpop.permute.xlu0 %5137  ;;  %vm8357_vm2 = vmand %vm8340_vm13, %vm865_vm5 }
 0x1c5   : > { %5442 = vrot.lane.b32.xlu1 %v9821_v49, %s5548_s22  ;;  %v2844_v39 = vsel %vm2839_vm15, %v2806_v26, %v5114_v8  ;;  %v2845_v36 = vsel %vm2839_vm15, %v2807_v56, %v5115_v45  ;;  %v5124_v62 = vunpack.i.l.bf16 %v8193_v38  ;;  %v2953_v25 = vpack.c.bf16 %v2917_v32, %v2916_v55 }
 0x1c6   : > { %5417 = vrot.lane.b32.xlu0 %v9807_v34, %s5546_s16  ;;  %vm740_vm6 = vcmp.ge.s32.totalorder %v8169_v7, 1  ;;  %vm782_vm11 = vcmp.le.s32.totalorder %v8169_v7, 16  ;;  %v2767_v42 = vsel %vm2763_vm7, %v8182_v51, %v5080_v13  ;;  %v2804_v53 = vsel %vm2801_vm14, %v2766_v0, %v5094_v24 }
 0x1c7   : > { %v2882_v9 = vsel %vm2877_vm0, %v2844_v39, %v5129_v27  ;;  %v2883_v45 = vsel %vm2877_vm0, %v2845_v36, %v5130_v28  ;;  %vm949_vm12 = vcmp.le.s32.totalorder %v8232_v41, 16  ;;  %v2805_v38 = vsel %vm2801_vm14, %v2767_v42, %v5095_v43  ;;  %vm8382_vm13 = vmand %vm740_vm6, %vm782_vm11  ;;  %v9860_v36 = vld [vmem:[#allocation66_spill] sm:$0xff] }
 0x1c8   : > { %v2842_v34 = vsel %vm2839_vm15, %v2804_v53, %v5109_v60  ;;  %v2920_v1 = vsel %vm9414_vm1, %v2882_v9, %v5144_v37  ;;  %v2921_v18 = vsel %vm9414_vm1, %v2883_v45, %v5145_v31  ;;  %v9822_v51 = vpack.i.bf16 %v7884_v48, %v7849_v14  ;;  %v5173_v12 = vpop.permute.xlu1 %5172  ;;  %v8332_v55 = vpop.permute.xlu0 %5147  ;;  %vm8398_vm11 = vmand %vm8357_vm2, %vm949_vm12 }
 0x1c9   : > { %v2843_v13 = vsel %vm2839_vm15, %v2805_v38, %v5110_v54  ;;  %v2955_v0 = vpack.c.bf16 %v2921_v18, %v2920_v1  ;;  %v5140_v24 = vunpack.i.h.bf16 %v5138_v3  ;;  %v5139_v21 = vunpack.i.l.bf16 %v5138_v3 }
 0x1ca   : > { %5452 = vrot.lane.b32.xlu1 %v9822_v51, %s5544_s14  ;;  %vm2972_vm10 = vsmask.f32 5376  ;;  %vm866_vm8 = vcmp.ge.s32.totalorder %v8244_v4, 1  ;;  %v2880_v43 = vsel %vm2877_vm0, %v2842_v34, %v5124_v62  ;;  %v2881_v33 = vsel %vm2877_vm0, %v2843_v13, %v5125_v29 }
 0x1cb   : > { %v9823_v23 = vpack.i.bf16 %v7798_v17, %v7781_v11  ;;  %v2974_v14 = vshrl.u32 %v2953_v25, 16  ;;  %v2977_v48 = vshll.u32 %v2953_v25, 16  ;;  %v2991_v16 = vshrl.u32 %v2955_v0, 16  ;;  %v9854_v11 = vld [vmem:[#allocation93_spill] sm:$0xff] }
 0x1cc   : > { %v2994_v8 = vshll.u32 %v2955_v0, 16  ;;  %v2918_v26 = vsel %vm9414_vm1, %v2880_v43, %v5139_v21  ;;  %v2919_v60 = vsel %vm9414_vm1, %v2881_v33, %v5140_v24  ;;  %v5155_v46 = vunpack.i.h.bf16 %v8281_v20  ;;  %v5183_v54 = vpop.permute.xlu1 %5182  ;;  %v9868_v33 = vld [vmem:[#allocation35_spill] sm:$0xff] }
 0x1cd   : > { %5427 = vrot.lane.b32.xlu0 %v9823_v23, %s5547_s21  ;;  %v2954_v19 = vpack.c.bf16 %v2919_v60, %v2918_v26  ;;  %v5154_v29 = vunpack.i.l.bf16 %v8281_v20  ;;  %vm783_vm1 = vcmp.le.s32.totalorder %v8176_v35, 16  ;;  %v2993_v17 = vrot.slane %v2991_v16, 2 }
 0x1ce   : > { %5462 = vrot.lane.b32.xlu1 %v8027_v10, %s5545_s15  ;;  %v2996_v32 = vrot.slane %v2994_v8, 3  ;;  %v5165_v30 = vunpack.i.h.bf16 %v8302_v52  ;;  %v5164_v20 = vunpack.i.l.bf16 %v8302_v52  ;;  %v9826_v31 = vpack.i.bf16 %v7824_v59, %v7821_v50  ;;  %v8362_v50 = vpop.permute.xlu0 %5157  ;;  %vm8370_vm9 = vmand %vm741_vm4, %vm783_vm1  ;;  %v9847_v8 = vld [vmem:[#allocation67_spill] sm:$0xff] }
 0x1cf   : > { %v2976_v37 = vrot.slane %v2974_v14, 2  ;;  %v2979_v49 = vrot.slane %v2977_v48, 3  ;;  %v2982_v40 = vshrl.u32 %v2954_v19, 16  ;;  %v2985_v56 = vshll.u32 %v2954_v19, 16  ;;  %v9845_v48 = vld [vmem:[#allocation79_spill] sm:$0xff] }
 0x1d0   : > { %v5175_v28 = vunpack.i.h.bf16 %v5173_v12  ;;  %v5174_v27 = vunpack.i.l.bf16 %v5173_v12  ;;  %v8351_v39 = vor.u32 %v2996_v32, %v2993_v17  ;;  %vm867_vm3 = vcmp.ge.s32.totalorder %v8247_v63, 1  ;;  %v5193_v7 = vpop.permute.xlu1 %5192  ;;  %v9850_v19 = vld [vmem:[#allocation83_spill] sm:$0xff]  ;;  %v9855_v17 = vld [vmem:[#allocation96_spill] sm:$0xff] }
 0x1d1   : > { %5437 = vrot.lane.b32.xlu0 %v9826_v31, %s5548_s22  ;;  %v2984_v59 = vrot.slane %v2982_v40, 2  ;;  %v2987_v62 = vrot.slane %v2985_v56, 3  ;;  %v5185_v25 = vunpack.i.h.bf16 %v5183_v54  ;;  %v5184_v52 = vunpack.i.l.bf16 %v5183_v54  ;;  %vm8408_vm4 = vmand %vm8370_vm9, %vm867_vm3  ;;  %v9857_v56 = vld [vmem:[#allocation52_spill] sm:$0xff]  ;;  %v9858_v54 = vld [vmem:[#allocation90_spill] sm:$0xff] }
 0x1d2   : > { %5472 = vrot.lane.b32.xlu1 %v8137_v57, %s5546_s16  ;;  %v2772_v53 = vsel %vm2763_vm7, %v8228_v2, %v5154_v29  ;;  %v2773_v9 = vsel %vm2763_vm7, %v8236_v47, %v5155_v46  ;;  %vm950_vm5 = vcmp.le.s32.totalorder %v8244_v4, 16  ;;  %vm951_vm1 = vcmp.le.s32.totalorder %v8247_v63, 16  ;;  %vm8425_vm9 = vmand %vm8382_vm13, %vm866_vm8  ;;  %v9853_v29 = vld [vmem:[#allocation94_spill] sm:$0xff] }
 0x1d3   : > { %v2810_v35 = vsel %vm2801_vm14, %v2772_v53, %v5164_v20  ;;  %v2811_v38 = vsel %vm2801_vm14, %v2773_v9, %v5165_v30  ;;  %v9833_v2 = vpack.i.bf16 %v7919_v6, %v7916_v15  ;;  %v2980_v47 = vor.u32 %v2979_v49, %v2976_v37  ;;  %v5168_v6 = vpop.permute.xlu0 %5167  ;;  %v9856_v30 = vld [vmem:[#allocation54_spill] sm:$0xff] }
 0x1d4   : > { %v2988_v34 = vor.u32 %v2987_v62, %v2984_v59  ;;  %v2848_v18 = vsel %vm2839_vm15, %v2810_v35, %v5174_v27  ;;  %v2849_v3 = vsel %vm2839_vm15, %v2811_v38, %v5175_v28  ;;  %v5195_v51 = vunpack.i.h.bf16 %v5193_v7 }
 0x1d5   : > { %5447 = vrot.lane.b32.xlu0 %v9833_v2, %s5544_s14  ;;  %v5194_v13 = vunpack.i.l.bf16 %v5193_v7  ;;  %v2886_v24 = vsel %vm2877_vm0, %v2848_v18, %v5184_v52  ;;  %v2887_v21 = vsel %vm2877_vm0, %v2849_v3, %v5185_v25  ;;  %v9838_v43 = vpack.i.bf16 %v8093_v22, %v8088_v5  ;;  %v9861_v7 = vld [vmem:[#allocation53_spill] sm:$0xff] }
 0x1d6   : > { %v2989_v41 = vsel %vm2972_vm10, %v2980_v47, %v2988_v34  ;;  %v2998_v0 = vsel %vm2972_vm10, %v2988_v34, %v8351_v39  ;;  %vm9841_vm12 = vcmask 588800   ;;  %vm9842_vm6 = vcmask 523264  }
 0x1d7   : > { %5482 = vrot.lane.b32.xlu1 %v9838_v43, %s5547_s21  ;;  %4578 = vmatprep.mubr.msk.bf16.mxu0 %vm9841_vm12, %v2989_v41  ;;  %v2924_v23 = vsel %vm9842_vm6, %v2886_v24, %v5194_v13  ;;  %vm9843_vm2 = vmmov %vm9842_vm6  ;;  %v9844_v14 = vmax.f32 %v8174_v58, 0.0  ;;  %v1133_v22 = vmax.f32 %v8222_v61, 0.0  ;;  %v9846_v16 = vunpack.i.l.bf16 %v9845_v48  ;;  %v8450_v58 = vpop.permute.xlu1 %5202  ;;  %v5178_v63 = vpop.permute.xlu0 %5177  ;;  %v9865_v41 = vld [vmem:[#allocation82_spill] sm:$0xff] }
 0x1d8   : > { %v2925_v12 = vsel %vm9843_vm2, %v2887_v21, %v5195_v51  ;;  %vm9848_vm8 = vcmask 195584   ;;  %v9849_v60 = vunpack.i.h.bf16 %v9845_v48  ;;  %vm9852_vm13 = vmmov %vm9841_vm12  ;;  %v5496_v61 = vpack.i.bf16 %v9854_v11, %v9853_v29  ;;  %v9867_v43 = vld [vmem:[#allocation42_spill] sm:$0xff] }
 0x1d9   : > { %v8436_v5 = vsel %vm8398_vm11, %v9844_v14, 0.0  ;;  %v2732_v26 = vsel %vm9848_vm8, %v9847_v8, %v9846_v16  ;;  %vm9851_vm3 = vmmov %vm9848_vm8  ;;  %5457 = vrot.lane.b32.xlu0 %v7776_v44, %s5545_s15  ;;  %4579 = vmatmul.mubr.msk.bf16.vlgmr.msra.gmra.mxu0 %vm9852_vm13, %v2998_v0  ;;  %v1132_v32 = vmax.f32 %v9855_v17, 0.0  ;;  %v5009_v20 = vunpack.i.l.bf16 %v9856_v30 }
 0x1da   : > { %v2733_v46 = vsel %vm9851_vm3, %v9850_v19, %v9849_v60  ;;  %vm993_vm11 = vmand %vm8408_vm4, %vm951_vm1  ;;  %v5150_v31 = vunpack.i.h.bf16 %v8332_v55  ;;  %v5149_v44 = vunpack.i.l.bf16 %v8332_v55  ;;  %v2957_v37 = vpack.c.bf16 %v2925_v12, %v2924_v23 }
 0x1db   : > { %vm992_vm12 = vmand %vm8425_vm9, %vm950_vm5  ;;  %v5160_v49 = vunpack.i.h.bf16 %v8362_v50  ;;  %v5159_v40 = vunpack.i.l.bf16 %v8362_v50  ;;  %v9859_v28 = vpack.i.bf16 %v9857_v56, %v9858_v54  ;;  %v2049_v27 = vrot.slane %v8436_v5, 4  ;;  %v5213_v50 = vpop.permute.xlu1 %5212  ;;  %v5188_v34 = vpop.permute.xlu0 %5187  ;;  %v9875_v56 = vld [vmem:[#allocation41_spill] sm:$0xff]  ;;  %v9876_v54 = vld [vmem:[#allocation48_spill] sm:$0xff] }
 0x1dc   : > { %v5015_v55 = vunpack.i.h.bf16 %v9860_v36  ;;  %v5170_v59 = vunpack.i.h.bf16 %v5168_v6  ;;  %v5169_v62 = vunpack.i.l.bf16 %v5168_v6  ;;  %v8474_v4 = vsel %vm993_vm11, %v1133_v22, 0.0  ;;  %vm9866_vm1 = vmmov %vm9851_vm3 }
 0x1dd   : > { %5492 = vrot.lane.b32.xlu1 %v9859_v28, %s5548_s22  ;;  %v5014_v25 = vunpack.i.l.bf16 %v9860_v36  ;;  %v5180_v52 = vunpack.i.h.bf16 %v5178_v63  ;;  %v5179_v42 = vunpack.i.l.bf16 %v5178_v63  ;;  %5467 = vrot.lane.b32.xlu0 %v8027_v10, %s5546_s16  ;;  %v8479_v53 = vsel %vm992_vm12, %v1132_v32, 0.0  ;;  %vm9870_vm4 = vmmov %vm9843_vm2 }
 0x1de   : > { %v2770_v9 = vsel %vm2763_vm7, %v2732_v26, %v5149_v44  ;;  %v2771_v45 = vsel %vm2763_vm7, %v2733_v46, %v5150_v31  ;;  %v3009_v35 = vshrl.u32 %v2957_v37, 16  ;;  %v3012_v38 = vshll.u32 %v2957_v37, 16  ;;  %vm9871_vm9 = vmmov %vm9843_vm2  ;;  %v9872_v26 = vld [vmem:[#allocation81_spill] sm:$0xff] }
 0x1df   : > { %v2808_v2 = vsel %vm2801_vm14, %v2770_v9, %v5159_v40  ;;  %v2809_v47 = vsel %vm2801_vm14, %v2771_v45, %v5160_v49  ;;  %v9862_v1 = vrot.slane %v9861_v7, 3  ;;  %v9863_v10 = vrot.slane %v9861_v7, 4  ;;  %v5223_v12 = vpop.permute.xlu1 %5222  ;;  %vm9873_vm6 = vmmov %vm9866_vm1  ;;  %v8509_v46 = vpop.permute.xlu0 %5197 }
 0x1e0   : > { %vm9864_vm5 = vcmask 1043456   ;;  %v2166_v3 = vrot.slane %v8474_v4, 4  ;;  %v2846_v51 = vsel %vm2839_vm15, %v2808_v2, %v5169_v62  ;;  %v2847_v13 = vsel %vm2839_vm15, %v2809_v47, %v5170_v59  ;;  %vm9880_vm11 = vmmov %vm9870_vm4 }
 0x1e1   : > { %1937 = vrot.lane.b32.xlu1 %v9862_v1, %s5544_s14  ;;  %v8491_v18 = vsel %vm9864_vm5, %v9863_v10, %v2049_v27  ;;  %v5190_v15 = vunpack.i.h.bf16 %v5188_v34  ;;  %v5189_v6 = vunpack.i.l.bf16 %v5188_v34  ;;  %v2738_v0 = vsel %vm9866_vm1, %v9865_v41, %v5014_v25  ;;  %vm9874_vm2 = vmmov %vm9864_vm5 }
 0x1e2   : > { %v2884_v24 = vsel %vm2877_vm0, %v2846_v51, %v5179_v42  ;;  %v2885_v21 = vsel %vm2877_vm0, %v2847_v13, %v5180_v52  ;;  %v9869_v23 = vpack.i.bf16 %v9867_v43, %v9868_v33  ;;  %v2164_v14 = vrot.slane %v8479_v53, 4  ;;  %vm9878_vm8 = vmmov %vm9874_vm2 }
 0x1e3   : > { %v3011_v22 = vrot.slane %v3009_v35, 2  ;;  %v3014_v48 = vrot.slane %v3012_v38, 3  ;;  %v2922_v16 = vsel %vm9870_vm4, %v2884_v24, %v5189_v6  ;;  %v2923_v8 = vsel %vm9871_vm9, %v2885_v21, %v5190_v15  ;;  %v5233_v59 = vpop.permute.xlu1 %5232  ;;  %v8526_v45 = vpop.permute.xlu0 %5207  ;;  %vm9881_vm12 = vmmov %vm9870_vm4 }
 0x1e4   : > { %5477 = vrot.lane.b32.xlu0 %v9869_v23, %s5547_s21  ;;  %v2739_v60 = vsel %vm9873_vm6, %v9872_v26, %v5015_v55  ;;  %v2956_v19 = vpack.c.bf16 %v2923_v8, %v2922_v16  ;;  %v2347_v17 = vrot.slane %v8436_v5, 5  ;;  %v2349_v32 = vrot.slane %v8479_v53, 5  ;;  %vm9883_vm1 = vmmov %vm9852_vm13  ;;  %v9889_v8 = vld [vmem:[#allocation63_spill] sm:$0xff] }
 0x1e5   : > { %2123 = vrot.lane.b32.xlu1 %v8491_v18, %s5545_s15  ;;  %v5205_v31 = vunpack.i.h.bf16 %v8450_v58  ;;  %v5204_v44 = vunpack.i.l.bf16 %v8450_v58  ;;  %v2167_v37 = vsel %vm9874_vm2, %v2164_v14, %v2166_v3  ;;  %v2351_v49 = vrot.slane %v8474_v4, 5 }
 0x1e6   : > { %v3000_v40 = vshrl.u32 %v2956_v19, 16  ;;  %v3003_v63 = vshll.u32 %v2956_v19, 16  ;;  %v9877_v28 = vpack.i.bf16 %v9875_v56, %v9876_v54  ;;  %v5215_v36 = vunpack.i.h.bf16 %v5213_v50  ;;  %v9892_v19 = vld [vmem:[#allocation62_spill] sm:$0xff] }
 0x1e7   : > { %v5214_v55 = vunpack.i.l.bf16 %v5213_v50  ;;  %v5225_v62 = vunpack.i.h.bf16 %v5223_v12  ;;  %v5224_v25 = vunpack.i.l.bf16 %v5223_v12  ;;  %v2165_v52 = vsel %vm9878_vm8, %v2049_v27, %v2164_v14  ;;  %v5243_v3 = vpop.permute.xlu1 %5242 }
 0x1e8   : > { %5487 = vrot.lane.b32.xlu0 %v9877_v28, %s5548_s22  ;;  %v8524_v42 = vor.u32 %v3014_v48, %v3011_v22  ;;  %v3002_v58 = vrot.slane %v3000_v40, 2  ;;  %v3005_v9 = vrot.slane %v3003_v63, 3  ;;  %v5235_v35 = vunpack.i.h.bf16 %v5233_v59  ;;  %v9887_v48 = vld [vmem:[#allocation89_spill] sm:$0xff] }
 0x1e9   : > { %v5234_v38 = vunpack.i.l.bf16 %v5233_v59  ;;  %2240 = vrot.lane.b32.xlu1 %v2167_v37, %s5546_s16  ;;  %v2776_v2 = vsel %vm2763_vm7, %v2738_v0, %v5204_v44  ;;  %v2777_v47 = vsel %vm2763_vm7, %v2739_v60, %v5205_v31  ;;  %vm9879_vm3 = vcmask 1042432  }
 0x1ea   : > { %v2352_v50 = vsel %vm9879_vm3, %v2349_v32, %v2351_v49  ;;  %v2536_v34 = vrot.slane %v8474_v4, 6  ;;  %v2814_v27 = vsel %vm2801_vm14, %v2776_v2, %v5214_v55  ;;  %v2815_v1 = vsel %vm2801_vm14, %v2777_v47, %v5215_v36  ;;  %v5218_v4 = vpop.permute.xlu0 %5217  ;;  %vm9885_vm4 = vmmov %vm9879_vm3 }
 0x1eb   : > { %v3006_v10 = vor.u32 %v3005_v9, %v3002_v58  ;;  %v2534_v51 = vrot.slane %v8479_v53, 6  ;;  %v2852_v13 = vsel %vm2839_vm15, %v2814_v27, %v5224_v25  ;;  %v2853_v15 = vsel %vm2839_vm15, %v2815_v1, %v5225_v62  ;;  %vm9886_vm9 = vmmov %vm9879_vm3  ;;  %v8563_v22 = vpop.permute.xlu1 %5252  ;;  %v9900_v9 = vld [vmem:[#allocation69_spill] sm:$0xff] }
 0x1ec   : > { %5497 = vrot.lane.b32.xlu0 %v5496_v61, %s5544_s14  ;;  %v5245_v6 = vunpack.i.h.bf16 %v5243_v3  ;;  %v5244_v41 = vunpack.i.l.bf16 %v5243_v3  ;;  %v2890_v29 = vsel %vm2877_vm0, %v2852_v13, %v5234_v38  ;;  %v2891_v11 = vsel %vm2877_vm0, %v2853_v15, %v5235_v35  ;;  %s4268_s14 = sshll.u32 %s10098_s19, 1 }
 0x1ed   : > { %v3007_v0 = vsel %vm2972_vm10, %v8351_v39, %v3006_v10  ;;  %v3016_v24 = vsel %vm2972_vm10, %v3006_v10, %v8524_v42  ;;  %2425 = vrot.lane.b32.xlu1 %v2352_v50, %s5547_s21  ;;  %v5010_v61 = vunpack.i.h.bf16 %v9856_v30  ;;  %vm9882_vm5 = vcmask 1041408   ;;  %s235_s17 = scalar_lea.vmem %s9239_s5, %s4268_s14 }
 0x1ee   : > { %4582 = vmatprep.mubr.msk.bf16.mxu0 %vm9852_vm13, %v3007_v0  ;;  %v2928_v53 = vsel %vm9880_vm11, %v2890_v29, %v5244_v41  ;;  %v2929_v21 = vsel %vm9881_vm12, %v2891_v11, %v5245_v6  ;;  %v2537_v43 = vsel %vm9882_vm5, %v2534_v51, %v2536_v34  ;;  %v2532_v39 = vrot.slane %v8436_v5, 6  ;;  %v5228_v37 = vpop.permute.xlu0 %5227  ;;  %vm9897_vm13 = vmmov %vm9882_vm5  ;;  %v9906_v11 = vld [vmem:[#allocation71_spill] sm:$0xff] }
 0x1ef   : > { %v5506_v33 = vpack.i.bf16 %v2165_v52, %v8491_v18  ;;  %4583 = vmatmul.mubr.msk.bf16.gmra.mxu0 %vm9883_vm1, %v3016_v24  ;;  %v9884_v23 = vrot.slane %v9861_v7, 5  ;;  %v2350_v14 = vsel %vm9886_vm9, %v2347_v17, %v2349_v32  ;;  %v9888_v16 = vunpack.i.l.bf16 %v9887_v48  ;;  %vm9898_vm11 = vmmov %vm9882_vm5  ;;  %v5263_v36 = vpop.permute.xlu1 %5262  ;;  %v9899_v52 = vld [vmem:[#allocation85_spill] sm:$0xff]  ;;  %v9904_v24 = vld [vmem:[#allocation30_spill] sm:$0xff] }
 0x1f0   : > { %5502 = vrot.lane.b32.xlu0 %v8137_v57, %s5545_s15  ;;  %vm9890_vm6 = vcmask 130048   ;;  %v5200_v18 = vunpack.i.h.bf16 %v8509_v46  ;;  %v5199_v26 = vunpack.i.l.bf16 %v8509_v46  ;;  %v2959_v57 = vpack.c.bf16 %v2929_v21, %v2928_v53  ;;  %vm9901_vm5 = vmmov %vm9881_vm12 }
 0x1f1   : > { %v2348_v12 = vsel %vm9885_vm4, %v9884_v23, %v2347_v17  ;;  %v2698_v5 = vsel %vm9890_vm6, %v9889_v8, %v9888_v16  ;;  %v9891_v60 = vunpack.i.h.bf16 %v9887_v48  ;;  %vm9893_vm2 = vmmov %vm9890_vm6  ;;  %vm9894_vm8 = vcmask 195584   ;;  %2610 = vrot.lane.b32.xlu1 %v2537_v43, %s5548_s22 }
 0x1f2   : > { %v2736_v17 = vsel %vm9894_vm8, %v2698_v5, %v5009_v20  ;;  %v5210_v32 = vunpack.i.h.bf16 %v8526_v45  ;;  %v5209_v44 = vunpack.i.l.bf16 %v8526_v45  ;;  %vm9895_vm3 = vmmov %vm9894_vm8  ;;  %v5220_v46 = vunpack.i.h.bf16 %v5218_v4 }
 0x1f3   : > { %v2699_v31 = vsel %vm9893_vm2, %v9892_v19, %v9891_v60  ;;  %v5219_v40 = vunpack.i.l.bf16 %v5218_v4  ;;  %v5511_v63 = vpack.i.bf16 %v2350_v14, %v2348_v12  ;;  %v5230_v56 = vunpack.i.h.bf16 %v5228_v37  ;;  %v9902_v4 = vld [vmem:[#allocation68_spill] sm:$0xff]  ;;  %vm9907_vm4 = vmmov %vm9893_vm2 }
 0x1f4   : > { %v2737_v49 = vsel %vm9895_vm3, %v2699_v31, %v5010_v61  ;;  %v5229_v54 = vunpack.i.l.bf16 %v5228_v37  ;;  %5507 = vrot.lane.b32.xlu0 %v5506_v33, %s5546_s16  ;;  %v9896_v30 = vrot.slane %v9861_v7, 6  ;;  %v2535_v28 = vsel %vm9898_vm11, %v2532_v39, %v2534_v51  ;;  %v5238_v7 = vpop.permute.xlu0 %5237  ;;  %v5273_v51 = vpop.permute.xlu1 %5272  ;;  %vm9909_vm9 = vmmov %vm9893_vm2  ;;  %v9912_v37 = vld [vmem:[#allocation57_spill] sm:$0xff] }
 0x1f5   : > { %v2774_v55 = vsel %vm2763_vm7, %v2736_v17, %v5199_v26  ;;  %v2775_v59 = vsel %vm2763_vm7, %v2737_v49, %v5200_v18  ;;  %v3027_v62 = vshrl.u32 %v2959_v57, 16  ;;  %v3030_v25 = vshll.u32 %v2959_v57, 16  ;;  %vm9910_vm6 = vmmov %vm9895_vm3 }
 0x1f6   : > { %v2533_v20 = vsel %vm9897_vm13, %v9896_v30, %v2532_v39  ;;  %v4934_v58 = vunpack.i.l.bf16 %v9899_v52  ;;  %v5024_v45 = vunpack.i.l.bf16 %v9900_v9  ;;  %v2812_v35 = vsel %vm2801_vm14, %v2774_v55, %v5209_v44  ;;  %vm9911_vm2 = vmmov %vm9895_vm3 }
 0x1f7   : > { %v2813_v38 = vsel %vm2801_vm14, %v2775_v59, %v5210_v32  ;;  %v2850_v2 = vsel %vm2839_vm15, %v2812_v35, %v5219_v40  ;;  %v5240_v50 = vunpack.i.h.bf16 %v5238_v7  ;;  %v5239_v34 = vunpack.i.l.bf16 %v5238_v7  ;;  %vm9915_vm3 = vmmov %vm9901_vm5 }
 0x1f8   : > { %v2851_v47 = vsel %vm2839_vm15, %v2813_v38, %v5220_v46  ;;  %v5025_v27 = vunpack.i.h.bf16 %v9900_v9  ;;  %v2888_v1 = vsel %vm2877_vm0, %v2850_v2, %v5229_v54  ;;  %5512 = vrot.lane.b32.xlu0 %v5511_v63, %s5547_s21  ;;  %v5516_v3 = vpack.i.bf16 %v2535_v28, %v2533_v20  ;;  %v8607_v21 = vpop.permute.xlu0 %5247  ;;  %v5283_v5 = vpop.permute.xlu1 %5282  ;;  %v9913_v9 = vld [vmem:[#allocation92_spill] sm:$0xff]  ;;  %vm9916_vm13 = vmmov %vm9915_vm3  ;;  %v9917_v2 = vld [vmem:[#allocation50_spill] sm:$0xff] }
 0x1f9   : > { %v2889_v10 = vsel %vm2877_vm0, %v2851_v47, %v5230_v56  ;;  %v3029_v13 = vrot.slane %v3027_v62, 2  ;;  %v3032_v15 = vrot.slane %v3030_v25, 3  ;;  %v2926_v6 = vsel %vm9881_vm12, %v2888_v1, %v5239_v34 }
 0x1fa   : > { %v2927_v41 = vsel %vm9901_vm5, %v2889_v10, %v5240_v50  ;;  %v9903_v0 = vunpack.i.h.bf16 %v9902_v4  ;;  %vm9905_vm1 = vcmask 64512   ;;  %v2704_v61 = vsel %vm9907_vm4, %v9906_v11, %v4934_v58  ;;  %v9919_v10 = vld [vmem:[#allocation23_spill] sm:$0xff] }
 0x1fb   : > { %v2958_v53 = vpack.c.bf16 %v2927_v41, %v2926_v6  ;;  %v9908_v43 = vunpack.i.h.bf16 %v9899_v52  ;;  %v2742_v33 = vsel %vm9910_vm6, %v2704_v61, %v5024_v45  ;;  %v5255_v23 = vunpack.i.h.bf16 %v8563_v22  ;;  %vm9920_vm12 = vmmov %vm9905_vm1 }
 0x1fc   : > { %v2667_v29 = vsel %vm9905_vm1, %v9904_v24, %v9903_v0  ;;  %v5254_v12 = vunpack.i.l.bf16 %v8563_v22  ;;  %5517 = vrot.lane.b32.xlu0 %v5516_v3, %s5548_s22  ;;  %v5265_v16 = vunpack.i.h.bf16 %v5263_v36  ;;  %v5264_v8 = vunpack.i.l.bf16 %v5263_v36  ;;  %v5258_v17 = vpop.permute.xlu0 %5257  ;;  %v5293_v30 = vpop.permute.xlu1 %5292  ;;  %vm9922_vm5 = vmmov %vm9905_vm1 }
 0x1fd   : > { %v2705_v39 = vsel %vm9909_vm9, %v2667_v29, %v9908_v43  ;;  %v3018_v14 = vshrl.u32 %v2958_v53, 16  ;;  %v3021_v48 = vshll.u32 %v2958_v53, 16  ;;  %v5275_v26 = vunpack.i.h.bf16 %v5273_v51  ;;  %vm9923_vm1 = vmmov %vm9907_vm4 }
 0x1fe   : > { %v2743_v18 = vsel %vm9911_vm2, %v2705_v39, %v5025_v27  ;;  %v5274_v57 = vunpack.i.l.bf16 %v5273_v51  ;;  %v8617_v60 = vor.u32 %v3032_v15, %v3029_v13  ;;  %v5285_v32 = vunpack.i.h.bf16 %v5283_v5  ;;  %v9921_v51 = vld [vmem:[#allocation22_spill] sm:$0xff]  ;;  %vm9924_vm4 = vmmov %vm9923_vm1 }
 0x1ff   : > { %v3020_v19 = vrot.slane %v3018_v14, 2  ;;  %v3023_v31 = vrot.slane %v3021_v48, 3  ;;  %v5284_v44 = vunpack.i.l.bf16 %v5283_v5  ;;  %v4840_v22 = vunpack.i.h.bf16 %v9912_v37  ;;  %vm9925_vm9 = vmmov %vm9911_vm2 }
 0x200   : > { %v2780_v49 = vsel %vm2763_vm7, %v2742_v33, %v5254_v12  ;;  %v2781_v46 = vsel %vm2763_vm7, %v2743_v18, %v5255_v23  ;;  %v4839_v40 = vunpack.i.l.bf16 %v9912_v37  ;;  %v5295_v36 = vunpack.i.h.bf16 %v5293_v30  ;;  %v5268_v59 = vpop.permute.xlu0 %5267  ;;  %v5303_v50 = vpop.permute.xlu1 %5302  ;;  %vm9926_vm6 = vmmov %vm9911_vm2 }
 0x201   : > { %v2818_v63 = vsel %vm2801_vm14, %v2780_v49, %v5264_v8  ;;  %v2819_v56 = vsel %vm2801_vm14, %v2781_v46, %v5265_v16  ;;  %v3024_v54 = vor.u32 %v3023_v31, %v3020_v19  ;;  %v5294_v55 = vunpack.i.l.bf16 %v5293_v30  ;;  %vm9927_vm2 = vmmov %vm9915_vm3 }
 0x202   : > { %v2856_v20 = vsel %vm2839_vm15, %v2818_v63, %v5274_v57  ;;  %v2857_v28 = vsel %vm2839_vm15, %v2819_v56, %v5275_v26  ;;  %v4930_v45 = vunpack.i.h.bf16 %v9913_v9  ;;  %v4929_v35 = vunpack.i.l.bf16 %v9913_v9  ;;  %v9929_v9 = vld [vmem:[#allocation72_spill] sm:$0xff] }
 0x203   : > { %v3025_v62 = vsel %vm2972_vm10, %v8524_v42, %v3024_v54  ;;  %v3034_v25 = vsel %vm2972_vm10, %v3024_v54, %v8617_v60  ;;  %v2894_v52 = vsel %vm2877_vm0, %v2856_v20, %v5284_v44  ;;  %v2895_v58 = vsel %vm2877_vm0, %v2857_v28, %v5285_v32 }
 0x204   : > { %vm9914_vm8 = vcmask 588800   ;;  %v2932_v38 = vsel %vm9915_vm3, %v2894_v52, %v5294_v55  ;;  %v2933_v7 = vsel %vm9916_vm13, %v2895_v58, %v5295_v36  ;;  %v5020_v47 = vunpack.i.h.bf16 %v9917_v2  ;;  %v5278_v41 = vpop.permute.xlu0 %5277  ;;  %v5313_v43 = vpop.permute.xlu1 %5312  ;;  %vm9932_vm13 = vmmov %vm9927_vm2 }
 0x205   : > { %4586 = vmatprep.mubr.msk.bf16.mxu0 %vm9914_vm8, %v3025_v62  ;;  %v5019_v42 = vunpack.i.l.bf16 %v9917_v2  ;;  %vm9918_vm11 = vmmov %vm9914_vm8  ;;  %v5250_v34 = vunpack.i.h.bf16 %v8607_v21  ;;  %v5249_v27 = vunpack.i.l.bf16 %v8607_v21  ;;  %v2961_v1 = vpack.c.bf16 %v2933_v7, %v2932_v38 }
 0x206   : > { %4587 = vmatmul.mubr.msk.bf16.gmra.mxu0 %vm9918_vm11, %v3034_v25  ;;  %v2665_v3 = vsel %vm9920_vm12, %v9919_v10, %v4840_v22  ;;  %v2664_v13 = vsel %vm9922_vm5, %v9921_v51, %v4839_v40  ;;  %v5260_v15 = vunpack.i.h.bf16 %v5258_v17  ;;  %v5259_v6 = vunpack.i.l.bf16 %v5258_v17  ;;  %vm9928_vm8 = vmmov %vm9927_vm2 }
 0x207   : > { %v2703_v4 = vsel %vm9923_vm1, %v2665_v3, %v4930_v45  ;;  %v2702_v0 = vsel %vm9924_vm4, %v2664_v13, %v4929_v35  ;;  %v5270_v24 = vunpack.i.h.bf16 %v5268_v59  ;;  %v5269_v29 = vunpack.i.l.bf16 %v5268_v59  ;;  %v9930_v35 = vld [vmem:[#allocation73_spill] sm:$0xff]  ;;  %vm9931_vm3 = vmmov %vm9918_vm11 }
 0x208   : > { %v2740_v11 = vsel %vm9925_vm9, %v2702_v0, %v5019_v42  ;;  %v2741_v61 = vsel %vm9926_vm6, %v2703_v4, %v5020_v47  ;;  %v5280_v53 = vunpack.i.h.bf16 %v5278_v41  ;;  %v5279_v21 = vunpack.i.l.bf16 %v5278_v41  ;;  %v5288_v16 = vpop.permute.xlu0 %5287  ;;  %v5323_v31 = vpop.permute.xlu1 %5322  ;;  %vm9933_vm11 = vmmov %vm9927_vm2 }
 0x209   : > { %v2778_v39 = vsel %vm2763_vm7, %v2740_v11, %v5249_v27  ;;  %v2779_v33 = vsel %vm2763_vm7, %v2741_v61, %v5250_v34  ;;  %v3045_v23 = vshrl.u32 %v2961_v1, 16  ;;  %v3048_v12 = vshll.u32 %v2961_v1, 16  ;;  %vm9934_vm12 = vmmov %vm9931_vm3 }
 0x20a   : > { %v2816_v14 = vsel %vm2801_vm14, %v2778_v39, %v5259_v6  ;;  %v2817_v48 = vsel %vm2801_vm14, %v2779_v33, %v5260_v15  ;;  %v5290_v18 = vunpack.i.h.bf16 %v5288_v16  ;;  %v5289_v26 = vunpack.i.l.bf16 %v5288_v16  ;;  %vm9937_vm5 = vmmov %vm9927_vm2 }
 0x20b   : > { %v2854_v8 = vsel %vm2839_vm15, %v2816_v14, %v5269_v29  ;;  %v2855_v5 = vsel %vm2839_vm15, %v2817_v48, %v5270_v24  ;;  %v3047_v17 = vrot.slane %v3045_v23, 2  ;;  %v3050_v32 = vrot.slane %v3048_v12, 3  ;;  %v9935_v23 = vld [vmem:[#allocation65_spill] sm:$0xff]  ;;  %v9936_v14 = vld [vmem:[#allocation64_spill] sm:$0xff]  ;;  %vm9938_vm1 = vmmov %vm9927_vm2 }
 0x20c   : > { %v2892_v57 = vsel %vm2877_vm0, %v2854_v8, %v5279_v21  ;;  %v2893_v19 = vsel %vm2877_vm0, %v2855_v5, %v5280_v53  ;;  %v5298_v49 = vpop.permute.xlu0 %5297  ;;  %v5305_v46 = vunpack.i.h.bf16 %v5303_v50  ;;  %v5304_v40 = vunpack.i.l.bf16 %v5303_v50  ;;  %v5333_v20 = vpop.permute.xlu1 %5332  ;;  %vm9941_vm4 = vmmov %vm9931_vm3 }
 0x20d   : > { %v2930_v44 = vsel %vm9927_vm2, %v2892_v57, %v5289_v26  ;;  %v2931_v37 = vsel %vm9928_vm8, %v2893_v19, %v5290_v18  ;;  %v5315_v54 = vunpack.i.h.bf16 %v5313_v43  ;;  %v5314_v30 = vunpack.i.l.bf16 %v5313_v43  ;;  %vm9942_vm9 = vmmov %vm9938_vm1 }
 0x20e   : > { %v2960_v22 = vpack.c.bf16 %v2931_v37, %v2930_v44  ;;  %v5325_v28 = vunpack.i.h.bf16 %v5323_v31  ;;  %v5324_v36 = vunpack.i.l.bf16 %v5323_v31  ;;  %v8661_v55 = vor.u32 %v3050_v32, %v3047_v17  ;;  %vm9943_vm6 = vmmov %vm9938_vm1 }
 0x20f   : > { %v5335_v52 = vunpack.i.h.bf16 %v5333_v20  ;;  %v5334_v58 = vunpack.i.l.bf16 %v5333_v20  ;;  %v2784_v45 = vsel %vm2763_vm7, %v9929_v9, %v5304_v40  ;;  %v2785_v38 = vsel %vm2763_vm7, %v9930_v35, %v5305_v46  ;;  %vm9944_vm2 = vmmov %vm9931_vm3 }
 0x210   : > { %v3036_v63 = vshrl.u32 %v2960_v22, 16  ;;  %v3039_v56 = vshll.u32 %v2960_v22, 16  ;;  %v5308_v25 = vpop.permute.xlu0 %5307  ;;  %v2822_v7 = vsel %vm2801_vm14, %v2784_v45, %v5314_v30  ;;  %v2823_v2 = vsel %vm2801_vm14, %v2785_v38, %v5315_v54  ;;  %v5343_v42 = vpop.permute.xlu1 %5342  ;;  %vm9947_vm8 = vmmov %vm9938_vm1 }
 0x211   : > { %v2860_v50 = vsel %vm2839_vm15, %v2822_v7, %v5324_v36  ;;  %v2861_v34 = vsel %vm2839_vm15, %v2823_v2, %v5325_v28  ;;  %v5345_v27 = vunpack.i.h.bf16 %v5343_v42  ;;  %v5344_v1 = vunpack.i.l.bf16 %v5343_v42  ;;  %v9939_v2 = vld [vmem:[#allocation87_spill] sm:$0xff]  ;;  %v9940_v42 = vld [vmem:[#allocation86_spill] sm:$0xff] }
 0x212   : > { %v3038_v59 = vrot.slane %v3036_v63, 2  ;;  %v3041_v62 = vrot.slane %v3039_v56, 3  ;;  %v2898_v13 = vsel %vm2877_vm0, %v2860_v50, %v5334_v58  ;;  %v2899_v15 = vsel %vm2877_vm0, %v2861_v34, %v5335_v52 }
 0x213   : > { %v2936_v6 = vsel %vm9932_vm13, %v2898_v13, %v5344_v1  ;;  %v2937_v41 = vsel %vm9933_vm11, %v2899_v15, %v5345_v27  ;;  %v5300_v24 = vunpack.i.h.bf16 %v5298_v49  ;;  %v5299_v29 = vunpack.i.l.bf16 %v5298_v49  ;;  %vm9951_vm13 = vmmov %vm9944_vm2 }
 0x214   : > { %v3042_v47 = vor.u32 %v3041_v62, %v3038_v59  ;;  %v5318_v10 = vpop.permute.xlu0 %5317  ;;  %v2963_v4 = vpack.c.bf16 %v2937_v41, %v2936_v6  ;;  %v5353_v0 = vpop.permute.xlu1 %5352  ;;  %v5309_v11 = vunpack.i.l.bf16 %v5308_v25  ;;  %vm9952_vm11 = vmmov %vm9938_vm1 }
 0x215   : > { %v5320_v53 = vunpack.i.h.bf16 %v5318_v10  ;;  %v5319_v21 = vunpack.i.l.bf16 %v5318_v10  ;;  %v2782_v12 = vsel %vm2763_vm7, %v9935_v23, %v5299_v29  ;;  %v2783_v48 = vsel %vm2763_vm7, %v9936_v14, %v5300_v24 }
 0x216   : > { %v3043_v3 = vsel %vm2972_vm10, %v8617_v60, %v3042_v47  ;;  %v3052_v51 = vsel %vm2972_vm10, %v3042_v47, %v8661_v55  ;;  %v5310_v60 = vunpack.i.h.bf16 %v5308_v25  ;;  %v3063_v16 = vshrl.u32 %v2963_v4, 16 }
 0x217   : > { %4590 = vmatprep.mubr.msk.bf16.mxu0 %vm9931_vm3, %v3043_v3  ;;  %v3066_v8 = vshll.u32 %v2963_v4, 16  ;;  %v2820_v5 = vsel %vm2801_vm14, %v2782_v12, %v5309_v11  ;;  %v5355_v54 = vunpack.i.h.bf16 %v5353_v0  ;;  %v5354_v30 = vunpack.i.l.bf16 %v5353_v0  ;;  %vm9948_vm3 = vmmov %vm9938_vm1 }
 0x218   : > { %4591 = vmatmul.mubr.msk.bf16.gmra.mxu0 %vm9934_vm12, %v3052_v51  ;;  %v5328_v61 = vpop.permute.xlu0 %5327  ;;  %v5363_v33 = vpop.permute.xlu1 %5362  ;;  %v2821_v18 = vsel %vm2801_vm14, %v2783_v48, %v5310_v60  ;;  %v2858_v57 = vsel %vm2839_vm15, %v2820_v5, %v5319_v21  ;;  %v3065_v22 = vrot.slane %v3063_v16, 2  ;;  %v9945_v16 = vld [vmem:[#allocation61_spill] sm:$0xff]  ;;  %v9946_v5 = vld [vmem:[#allocation60_spill] sm:$0xff]  ;;  %vm9953_vm12 = vmmov %vm9938_vm1 }
 0x219   : > { %v5330_v43 = vunpack.i.h.bf16 %v5328_v61  ;;  %v5329_v39 = vunpack.i.l.bf16 %v5328_v61  ;;  %v2859_v19 = vsel %vm2839_vm15, %v2821_v18, %v5320_v53  ;;  %v3068_v49 = vrot.slane %v3066_v8, 3 }
 0x21a   : > { %v5365_v36 = vunpack.i.h.bf16 %v5363_v33  ;;  %v5364_v59 = vunpack.i.l.bf16 %v5363_v33  ;;  %v2788_v47 = vsel %vm2763_vm7, %v9939_v2, %v5354_v30  ;;  %v2789_v50 = vsel %vm2763_vm7, %v9940_v42, %v5355_v54 }
 0x21b   : > { %v2896_v32 = vsel %vm2877_vm0, %v2858_v57, %v5329_v39  ;;  %v2897_v44 = vsel %vm2877_vm0, %v2859_v19, %v5330_v43  ;;  %v8693_v58 = vor.u32 %v3068_v49, %v3065_v22 }
 0x21c   : > { %v5338_v26 = vpop.permute.xlu0 %5337  ;;  %v5373_v37 = vpop.permute.xlu1 %5372  ;;  %v2826_v34 = vsel %vm2801_vm14, %v2788_v47, %v5364_v59  ;;  %v2827_v27 = vsel %vm2801_vm14, %v2789_v50, %v5365_v36 }
 0x21d   : > { %v5340_v31 = vunpack.i.h.bf16 %v5338_v26  ;;  %v5339_v17 = vunpack.i.l.bf16 %v5338_v26  ;;  %v5375_v25 = vunpack.i.h.bf16 %v5373_v37  ;;  %v5374_v52 = vunpack.i.l.bf16 %v5373_v37 }
 0x21f   : > { %v2934_v46 = vsel %vm9937_vm5, %v2896_v32, %v5339_v17  ;;  %v2935_v40 = vsel %vm9938_vm1, %v2897_v44, %v5340_v31  ;;  %v2864_v3 = vsel %vm2839_vm15, %v2826_v34, %v5374_v52  ;;  %v2865_v51 = vsel %vm2839_vm15, %v2827_v27, %v5375_v25  ;;  %v9949_v27 = vld [vmem:[#allocation75_spill] sm:$0xff]  ;;  %vm9954_vm5 = vmmov %vm9944_vm2 }
 0x220   : > { %v2962_v63 = vpack.c.bf16 %v2935_v40, %v2934_v46  ;;  %v5348_v56 = vpop.permute.xlu0 %5347  ;;  %v5383_v62 = vpop.permute.xlu1 %5382 }
 0x221   : > { %v5385_v38 = vunpack.i.h.bf16 %v5383_v62  ;;  %v5384_v7 = vunpack.i.l.bf16 %v5383_v62  ;;  %v5350_v53 = vunpack.i.h.bf16 %v5348_v56  ;;  %v5349_v21 = vunpack.i.l.bf16 %v5348_v56 }
 0x222   : > { %v3054_v20 = vshrl.u32 %v2962_v63, 16  ;;  %v3057_v28 = vshll.u32 %v2962_v63, 16 }
 0x223   : > { %v2902_v0 = vsel %vm2877_vm0, %v2864_v3, %v5384_v7  ;;  %v2903_v24 = vsel %vm2877_vm0, %v2865_v51, %v5385_v38  ;;  %v2786_v8 = vsel %vm2763_vm7, %v9945_v16, %v5349_v21  ;;  %v2787_v18 = vsel %vm2763_vm7, %v9946_v5, %v5350_v53 }
 0x224   : > { %v3056_v9 = vrot.slane %v3054_v20, 2  ;;  %v3059_v45 = vrot.slane %v3057_v28, 3  ;;  %v5358_v35 = vpop.permute.xlu0 %5357  ;;  %v5393_v10 = vpop.permute.xlu1 %5392 }
 0x225   : > { %v5395_v13 = vunpack.i.h.bf16 %v5393_v10  ;;  %v5394_v15 = vunpack.i.l.bf16 %v5393_v10  ;;  %v5359_v43 = vunpack.i.l.bf16 %v5358_v35  ;;  %v9950_v10 = vld [vmem:[#allocation39_spill] sm:$0xff] }
 0x226   : > { %v3060_v1 = vor.u32 %v3059_v45, %v3056_v9 }
 0x227   : > { %v2940_v29 = vsel %vm9942_vm9, %v2902_v0, %v5394_v15  ;;  %v2941_v60 = vsel %vm9943_vm6, %v2903_v24, %v5395_v13  ;;  %v2824_v19 = vsel %vm2801_vm14, %v2786_v8, %v5359_v43  ;;  %vm9960_vm9 = vmmov %vm9944_vm2 }
 0x228   : > { %v5368_v6 = vpop.permute.xlu0 %5367  ;;  %v3061_v41 = vsel %vm2972_vm10, %v8661_v55, %v3060_v1  ;;  %v3070_v4 = vsel %vm2972_vm10, %v3060_v1, %v8693_v58  ;;  %v2965_v11 = vpack.c.bf16 %v2941_v60, %v2940_v29  ;;  %v5403_v61 = vpop.permute.xlu1 %5402  ;;  %v5360_v55 = vunpack.i.h.bf16 %v5358_v35  ;;  %vm9961_vm6 = vmmov %vm9938_vm1 }
 0x229   : > { %4594 = vmatprep.mubr.msk.bf16.mxu0 %vm9941_vm4, %v3061_v41  ;;  %v5370_v33 = vunpack.i.h.bf16 %v5368_v6  ;;  %v5369_v23 = vunpack.i.l.bf16 %v5368_v6  ;;  %v5405_v36 = vunpack.i.h.bf16 %v5403_v61  ;;  %v5404_v59 = vunpack.i.l.bf16 %v5403_v61  ;;  %vm9957_vm4 = vmmov %vm9938_vm1 }
 0x22a   : > { %4595 = vmatmul.mubr.msk.bf16.gmra.mxu0 %vm9944_vm2, %v3070_v4  ;;  %v3081_v26 = vshrl.u32 %v2965_v11, 16  ;;  %v3084_v57 = vshll.u32 %v2965_v11, 16  ;;  %v2825_v31 = vsel %vm2801_vm14, %v2787_v18, %v5360_v55  ;;  %vm9962_vm2 = vmmov %vm9938_vm1 }
 0x22b   : > { %v2862_v32 = vsel %vm2839_vm15, %v2824_v19, %v5369_v23  ;;  %v2863_v44 = vsel %vm2839_vm15, %v2825_v31, %v5370_v33  ;;  %v2792_v1 = vsel %vm2763_vm7, %v9949_v27, %v5404_v59  ;;  %v2793_v3 = vsel %vm2763_vm7, %v9950_v10, %v5405_v36  ;;  %v9956_v19 = vld [vmem:[#allocation58_spill] sm:$0xff] }
 0x22c   : > { %v5378_v39 = vpop.permute.xlu0 %5377  ;;  %v5413_v48 = vpop.permute.xlu1 %5412  ;;  %v3083_v63 = vrot.slane %v3081_v26, 2  ;;  %v3086_v56 = vrot.slane %v3084_v57, 3  ;;  %v9955_v26 = vld [vmem:[#allocation70_spill] sm:$0xff] }
 0x22d   : > { %v5380_v12 = vunpack.i.h.bf16 %v5378_v39  ;;  %v5379_v14 = vunpack.i.l.bf16 %v5378_v39  ;;  %v5415_v62 = vunpack.i.h.bf16 %v5413_v48  ;;  %v5414_v25 = vunpack.i.l.bf16 %v5413_v48 }
 0x22e   : > { %v8725_v7 = vor.u32 %v3086_v56, %v3083_v63 }
 0x22f   : > { %v2900_v49 = vsel %vm2877_vm0, %v2862_v32, %v5379_v14  ;;  %v2901_v46 = vsel %vm2877_vm0, %v2863_v44, %v5380_v12  ;;  %v2830_v51 = vsel %vm2801_vm14, %v2792_v1, %v5414_v25  ;;  %v2831_v13 = vsel %vm2801_vm14, %v2793_v3, %v5415_v62 }
 0x230   : > { %v5388_v17 = vpop.permute.xlu0 %5387  ;;  %v5423_v40 = vpop.permute.xlu1 %5422 }
 0x231   : > { %v5390_v37 = vunpack.i.h.bf16 %v5388_v17  ;;  %v5389_v22 = vunpack.i.l.bf16 %v5388_v17  ;;  %v5425_v35 = vunpack.i.h.bf16 %v5423_v40  ;;  %v5424_v38 = vunpack.i.l.bf16 %v5423_v40 }
 0x233   : > { %v2938_v54 = vsel %vm9947_vm8, %v2900_v49, %v5389_v22  ;;  %v2939_v30 = vsel %vm9948_vm3, %v2901_v46, %v5390_v37  ;;  %v2868_v41 = vsel %vm2839_vm15, %v2830_v51, %v5424_v38  ;;  %v2869_v4 = vsel %vm2839_vm15, %v2831_v13, %v5425_v35  ;;  %v9958_v13 = vld [vmem:[#allocation91_spill] sm:$0xff]  ;;  %vm9963_vm8 = vmmov %vm9954_vm5 }
 0x234   : > { %v2964_v20 = vpack.c.bf16 %v2939_v30, %v2938_v54  ;;  %v5398_v28 = vpop.permute.xlu0 %5397  ;;  %v5433_v45 = vpop.permute.xlu1 %5432  ;;  %vm9966_vm3 = vmmov %vm9938_vm1 }
 0x235   : > { %v5435_v50 = vunpack.i.h.bf16 %v5433_v45  ;;  %v5434_v34 = vunpack.i.l.bf16 %v5433_v45  ;;  %v5400_v33 = vunpack.i.h.bf16 %v5398_v28  ;;  %v5399_v23 = vunpack.i.l.bf16 %v5398_v28 }
 0x236   : > { %v3072_v52 = vshrl.u32 %v2964_v20, 16  ;;  %v3075_v9 = vshll.u32 %v2964_v20, 16 }
 0x237   : > { %v2906_v61 = vsel %vm2877_vm0, %v2868_v41, %v5434_v34  ;;  %v2907_v53 = vsel %vm2877_vm0, %v2869_v4, %v5435_v50  ;;  %v2790_v57 = vsel %vm2763_vm7, %v9955_v26, %v5399_v23  ;;  %v2791_v31 = vsel %vm2763_vm7, %v9956_v19, %v5400_v33 }
 0x238   : > { %v5408_v2 = vpop.permute.xlu0 %5407  ;;  %v3074_v47 = vrot.slane %v3072_v52, 2  ;;  %v3077_v42 = vrot.slane %v3075_v9, 3  ;;  %v5443_v6 = vpop.permute.xlu1 %5442 }
 0x239   : > { %v5445_v0 = vunpack.i.h.bf16 %v5443_v6  ;;  %v5444_v24 = vunpack.i.l.bf16 %v5443_v6  ;;  %v5409_v12 = vunpack.i.l.bf16 %v5408_v2  ;;  %v9959_v6 = vld [vmem:[#allocation88_spill] sm:$0xff] }
 0x23a   : > { %v3078_v15 = vor.u32 %v3077_v42, %v3074_v47 }
 0x23b   : > { %v2944_v21 = vsel %vm9952_vm11, %v2906_v61, %v5444_v24  ;;  %v2945_v55 = vsel %vm9953_vm12, %v2907_v53, %v5445_v0  ;;  %v2828_v44 = vsel %vm2801_vm14, %v2790_v57, %v5409_v12  ;;  %vm9969_vm11 = vmmov %vm9954_vm5 }
 0x23c   : > { %v5418_v29 = vpop.permute.xlu0 %5417  ;;  %v3079_v60 = vsel %vm2972_vm10, %v8693_v58, %v3078_v15  ;;  %v3088_v11 = vsel %vm2972_vm10, %v3078_v15, %v8725_v7  ;;  %v2967_v43 = vpack.c.bf16 %v2945_v55, %v2944_v21  ;;  %v5453_v39 = vpop.permute.xlu1 %5452  ;;  %v5410_v58 = vunpack.i.h.bf16 %v5408_v2  ;;  %vm9970_vm12 = vmmov %vm9954_vm5 }
 0x23d   : > { %4598 = vmatprep.mubr.msk.bf16.mxu1 %vm9951_vm13, %v3079_v60  ;;  %v5420_v48 = vunpack.i.h.bf16 %v5418_v29  ;;  %v5419_v16 = vunpack.i.l.bf16 %v5418_v29  ;;  %v5455_v52 = vunpack.i.h.bf16 %v5453_v39  ;;  %v5454_v9 = vunpack.i.l.bf16 %v5453_v39  ;;  %vm9967_vm13 = vmmov %vm9938_vm1 }
 0x23e   : > { %4599 = vmatmul.mubr.msk.bf16.vlgmr.msra.gmra.mxu1 %vm9954_vm5, %v3088_v11  ;;  %v3099_v17 = vshrl.u32 %v2967_v43, 16  ;;  %v3102_v32 = vshll.u32 %v2967_v43, 16  ;;  %v2829_v37 = vsel %vm2801_vm14, %v2791_v31, %v5410_v58  ;;  %vm9971_vm5 = vmmov %vm9938_vm1 }
 0x23f   : > { %v2866_v49 = vsel %vm2839_vm15, %v2828_v44, %v5419_v16  ;;  %v2867_v46 = vsel %vm2839_vm15, %v2829_v37, %v5420_v48  ;;  %v2796_v15 = vsel %vm2763_vm7, %v9958_v13, %v5454_v9  ;;  %v2797_v41 = vsel %vm2763_vm7, %v9959_v6, %v5455_v52  ;;  %v9965_v44 = vld [vmem:[#allocation84_spill] sm:$0xff] }
 0x240   : > { %v5428_v14 = vpop.permute.xlu0 %5427  ;;  %v5463_v18 = vpop.permute.xlu1 %5462  ;;  %v3101_v20 = vrot.slane %v3099_v17, 2  ;;  %v3104_v28 = vrot.slane %v3102_v32, 3  ;;  %v9964_v17 = vld [vmem:[#allocation59_spill] sm:$0xff] }
 0x241   : > { %v5430_v8 = vunpack.i.h.bf16 %v5428_v14  ;;  %v5429_v5 = vunpack.i.l.bf16 %v5428_v14  ;;  %v5465_v38 = vunpack.i.h.bf16 %v5463_v18  ;;  %v5464_v2 = vunpack.i.l.bf16 %v5463_v18 }
 0x242   : > { %v8757_v34 = vor.u32 %v3104_v28, %v3101_v20 }
 0x243   : > { %v2904_v56 = vsel %vm2877_vm0, %v2866_v49, %v5429_v5  ;;  %v2905_v54 = vsel %vm2877_vm0, %v2867_v46, %v5430_v8  ;;  %v2834_v4 = vsel %vm2801_vm14, %v2796_v15, %v5464_v2  ;;  %v2835_v0 = vsel %vm2801_vm14, %v2797_v41, %v5465_v38 }
 0x244   : > { %v5438_v22 = vpop.permute.xlu0 %5437  ;;  %v5473_v30 = vpop.permute.xlu1 %5472 }
 0x245   : > { %v5440_v40 = vunpack.i.h.bf16 %v5438_v22  ;;  %v5439_v63 = vunpack.i.l.bf16 %v5438_v22  ;;  %v5475_v42 = vunpack.i.h.bf16 %v5473_v30  ;;  %v5474_v50 = vunpack.i.l.bf16 %v5473_v30 }
 0x247   : > { %v2942_v36 = vsel %vm9938_vm1, %v2904_v56, %v5439_v63  ;;  %v2943_v59 = vsel %vm9957_vm4, %v2905_v54, %v5440_v40  ;;  %v2872_v60 = vsel %vm2839_vm15, %v2834_v4, %v5474_v50  ;;  %v2873_v11 = vsel %vm2839_vm15, %v2835_v0, %v5475_v42 }
 0x248   : > { %v2966_v62 = vpack.c.bf16 %v2943_v59, %v2942_v36  ;;  %v5448_v25 = vpop.permute.xlu0 %5447 }
 0x249   : > { %v5483_v47 = vpop.permute.xlu1 %5482  ;;  %v5450_v48 = vunpack.i.h.bf16 %v5448_v25  ;;  %v5449_v16 = vunpack.i.l.bf16 %v5448_v25 }
 0x24a   : > { %v3090_v45 = vshrl.u32 %v2966_v62, 16  ;;  %v3093_v35 = vshll.u32 %v2966_v62, 16  ;;  %v5485_v3 = vunpack.i.h.bf16 %v5483_v47  ;;  %v5484_v51 = vunpack.i.l.bf16 %v5483_v47 }
 0x24b   : > { %v2794_v32 = vsel %vm2763_vm7, %v9964_v17, %v5449_v16  ;;  %v2795_v37 = vsel %vm2763_vm7, %v9965_v44, %v5450_v48 }
 0x24c   : > { %v3092_v27 = vrot.slane %v3090_v45, 2  ;;  %v3095_v1 = vrot.slane %v3093_v35, 3  ;;  %v5458_v10 = vpop.permute.xlu0 %5457  ;;  %v2910_v39 = vsel %vm2877_vm0, %v2872_v60, %v5484_v51  ;;  %v2911_v33 = vsel %vm2877_vm0, %v2873_v11, %v5485_v3  ;;  %v9968_v3 = vld [vmem:[#allocation45_spill] sm:$0xff] }
 0x24d   : > { %v5459_v8 = vunpack.i.l.bf16 %v5458_v10 }
 0x24e   : > { %v3096_v24 = vor.u32 %v3095_v1, %v3092_v27 }
 0x24f   : > { %v5493_v29 = vpop.permute.xlu1 %5492  ;;  %v2832_v22 = vsel %vm2801_vm14, %v2794_v32, %v5459_v8 }
 0x250   : > { %v5495_v61 = vunpack.i.h.bf16 %v5493_v29  ;;  %v5494_v53 = vunpack.i.l.bf16 %v5493_v29  ;;  %v5468_v21 = vpop.permute.xlu0 %5467  ;;  %v3097_v55 = vsel %vm2972_vm10, %v8725_v7, %v3096_v24  ;;  %v3106_v43 = vsel %vm2972_vm10, %v3096_v24, %v8757_v34 }
 0x251   : > { %4602 = vmatprep.mubr.msk.bf16.mxu1 %vm9960_vm9, %v3097_v55  ;;  %v5460_v7 = vunpack.i.h.bf16 %v5458_v10  ;;  %v5470_v18 = vunpack.i.h.bf16 %v5468_v21  ;;  %v5469_v26 = vunpack.i.l.bf16 %v5468_v21 }
 0x252   : > { %v2948_v23 = vsel %vm9961_vm6, %v2910_v39, %v5494_v53  ;;  %v2949_v58 = vsel %vm9962_vm2, %v2911_v33, %v5495_v61  ;;  %4603 = vmatmul.mubr.msk.bf16.gmra.mxu1 %vm9963_vm8, %v3106_v43  ;;  %vm9989_vm2 = vcmask 64512  }
 0x253   : > { %v2969_v12 = vpack.c.bf16 %v2949_v58, %v2948_v23  ;;  %v1938_v14 = vpop.permute.xlu1 %1937  ;;  %v2833_v49 = vsel %vm2801_vm14, %v2795_v37, %v5460_v7  ;;  %v2870_v56 = vsel %vm2839_vm15, %v2832_v22, %v5469_v26  ;;  %v9972_v23 = vld [vmem:[#allocation28_spill] sm:$0xff] }
 0x254   : > { %v2871_v54 = vsel %vm2839_vm15, %v2833_v49, %v5470_v18  ;;  %v2800_v51 = vsel %vm2763_vm7, %v9968_v3, %v1938_v14 }
 0x255   : > { %v3117_v46 = vshrl.u32 %v2969_v12, 16  ;;  %v3120_v40 = vshll.u32 %v2969_v12, 16  ;;  %v9973_v12 = vld [vmem:[#allocation74_spill] sm:$0xff] }
 0x256   : > { %v5478_v5 = vpop.permute.xlu0 %5477 }
 0x257   : > { %v5480_v57 = vunpack.i.h.bf16 %v5478_v5  ;;  %v5479_v19 = vunpack.i.l.bf16 %v5478_v5  ;;  %v2124_v31 = vpop.permute.xlu1 %2123  ;;  %v3119_v52 = vrot.slane %v3117_v46, 2  ;;  %v3122_v9 = vrot.slane %v3120_v40, 3 }
 0x258   : > { %v2838_v13 = vsel %vm2801_vm14, %v2800_v51, %v2124_v31 }
 0x259   : > { %v2908_v28 = vsel %vm2877_vm0, %v2870_v56, %v5479_v19  ;;  %v2909_v36 = vsel %vm2877_vm0, %v2871_v54, %v5480_v57  ;;  %v3123_v1 = vor.u32 %v3122_v9, %v3119_v52  ;;  %v9979_v52 = vld [vmem:[#allocation10_spill] sm:$0xff] }
 0x25a   : > { %v5488_v63 = vpop.permute.xlu0 %5487  ;;  %v3589_v9 = vcvt.s32.f32 %v9979_v52 }
 0x25b   : > { %v5490_v30 = vunpack.i.h.bf16 %v5488_v63  ;;  %v5489_v20 = vunpack.i.l.bf16 %v5488_v63  ;;  %v2241_v59 = vpop.permute.xlu1 %2240 }
 0x25c   : > { %v2876_v0 = vsel %vm2839_vm15, %v2838_v13, %v2241_v59 }
 0x25d   : > { %v2946_v62 = vsel %vm9966_vm3, %v2908_v28, %v5489_v20  ;;  %v2947_v25 = vsel %vm9967_vm13, %v2909_v36, %v5490_v30  ;;  %v9975_v20 = vld [vmem:[#allocation2_spill] sm:$0xff]  ;;  %vm9991_vm3 = vmmov %vm9989_vm2 }
 0x25e   : > { %v2968_v45 = vpack.c.bf16 %v2947_v25, %v2946_v62  ;;  %v5498_v35 = vpop.permute.xlu0 %5497  ;;  %v3586_v28 = vcvt.s32.f32 %v9975_v20  ;;  %v9977_v62 = vld [vmem:[#allocation7_spill] sm:$0xff]  ;;  %vm9992_vm13 = vmmov %vm9989_vm2 }
 0x25f   : > { %v2426_v47 = vpop.permute.xlu1 %2425  ;;  %v5500_v29 = vunpack.i.h.bf16 %v5498_v35  ;;  %v5499_v60 = vunpack.i.l.bf16 %v5498_v35  ;;  %v3588_v25 = vcvt.s32.f32 %v9977_v62  ;;  %v9980_v35 = vld [vmem:[#allocation6_spill] sm:$0xff] }
 0x260   : > { %v3108_v38 = vshrl.u32 %v2968_v45, 16  ;;  %v3111_v2 = vshll.u32 %v2968_v45, 16  ;;  %v2914_v24 = vsel %vm2877_vm0, %v2876_v0, %v2426_v47  ;;  %v3622_v45 = vadd.f32 0.5, %v3586_v28 }
 0x261   : > { %v2798_v58 = vsel %vm2763_vm7, %v9972_v23, %v5499_v60  ;;  %v2799_v14 = vsel %vm2763_vm7, %v9973_v12, %v5500_v29  ;;  %vm9974_vm7 = vmmov %vm9938_vm1  ;;  %v3625_v47 = vadd.f32 0.5, %v3589_v9  ;;  %v9982_v29 = vld [vmem:[#allocation3_spill] sm:$0xff] }
 0x262   : > { %v3110_v42 = vrot.slane %v3108_v38, 2  ;;  %v3113_v50 = vrot.slane %v3111_v2, 3  ;;  %v5503_v27 = vpop.permute.xlu0 %5502  ;;  %v3587_v38 = vcvt.s32.f32 %v9980_v35  ;;  %v3624_v2 = vadd.f32 0.5, %v3588_v25 }
 0x263   : > { %v2611_v4 = vpop.permute.xlu1 %2610  ;;  %v5505_v61 = vunpack.i.h.bf16 %v5503_v27  ;;  %v5504_v53 = vunpack.i.l.bf16 %v5503_v27  ;;  %v3590_v60 = vcvt.s32.f32 %v9982_v29 }
 0x264   : > { %v3114_v10 = vor.u32 %v3113_v50, %v3110_v42  ;;  %v2952_v11 = vsel %vm9971_vm5, %v2914_v24, %v2611_v4  ;;  %v3658_v42 = vmul.f32 0.055555556, %v3622_v45  ;;  %v3623_v50 = vadd.f32 0.5, %v3587_v38  ;;  %vm9995_vm5 = vmmov %vm9989_vm2 }
 0x265   : > { %v2971_v33 = vpack.c.bf16 %v2952_v11, %v2952_v11  ;;  %v2836_v48 = vsel %vm2801_vm14, %v2798_v58, %v5504_v53  ;;  %v2837_v16 = vsel %vm2801_vm14, %v2799_v14, %v5505_v61  ;;  %vm9976_vm14 = vmmov %vm9963_vm8  ;;  %v3660_v27 = vmul.f32 0.055555556, %v3624_v2 }
 0x266   : > { %v5508_v15 = vpop.permute.xlu0 %5507  ;;  %v3115_v6 = vsel %vm2972_vm10, %v8757_v34, %v3114_v10  ;;  %v3124_v41 = vsel %vm2972_vm10, %v3114_v10, %v3123_v1  ;;  %v3661_v10 = vmul.f32 0.055555556, %v3625_v47  ;;  %v3659_v3 = vmul.f32 0.055555556, %v3623_v50 }
 0x267   : > { %4606 = vmatprep.mubr.msk.bf16.mxu1 %vm9969_vm11, %v3115_v6  ;;  %v5510_v55 = vunpack.i.h.bf16 %v5508_v15  ;;  %v5509_v34 = vunpack.i.l.bf16 %v5508_v15  ;;  %v3135_v31 = vshrl.u32 %v2971_v33, 16  ;;  %v3138_v17 = vshll.u32 %v2971_v33, 16  ;;  %v9984_v33 = vld [vmem:[#allocation4_spill] sm:$0xff]  ;;  %vm9993_vm11 = vmmov %vm9989_vm2 }
 0x268   : > { %4607 = vmatmul.mubr.msk.bf16.gmra.mxu1 %vm9970_vm12, %v3124_v41  ;;  %v3696_v51 = vfloor.f32 %v3660_v27  ;;  %v3697_v13 = vfloor.f32 %v3661_v10  ;;  %v3695_v6 = vfloor.f32 %v3659_v3  ;;  %v9981_v41 = vld [vmem:[#allocation5_spill] sm:$0xff]  ;;  %v3591_v23 = vcvt.s32.f32 %v9984_v33  ;;  %vm9994_vm12 = vmmov %vm9989_vm2 }
 0x269   : > { %v2874_v8 = vsel %vm2839_vm15, %v2836_v48, %v5509_v34  ;;  %v2875_v5 = vsel %vm2839_vm15, %v2837_v16, %v5510_v55  ;;  %v3137_v22 = vrot.slane %v3135_v31, 2  ;;  %v3140_v49 = vrot.slane %v3138_v17, 3  ;;  %vm9978_vm15 = vmmov %vm9963_vm8 }
 0x26a   : > { %v5513_v21 = vpop.permute.xlu0 %5512  ;;  %v3592_v4 = vcvt.s32.f32 %v9981_v41  ;;  %v4716_v0 = vtrunc.f32 %v3696_v51  ;;  %v4718_v24 = vtrunc.f32 %v3697_v13  ;;  %v4714_v61 = vtrunc.f32 %v3695_v6  ;;  %vm9990_vm8 = vmmov %vm9989_vm2 }
 0x26b   : > { %v5515_v43 = vunpack.i.h.bf16 %v5513_v21  ;;  %v5514_v39 = vunpack.i.l.bf16 %v5513_v21  ;;  %v3141_v54 = vor.u32 %v3140_v49, %v3137_v22  ;;  %v9983_v21 = vld [vmem:[#allocation8_spill] sm:$0xff] }
 0x26c   : > { %v3628_v53 = vadd.f32 0.5, %v3592_v4  ;;  %v3593_v55 = vcvt.s32.f32 %v9983_v21  ;;  %v4717_v34 = vcvt.f32.s32 %v4716_v0  ;;  %v4715_v12 = vcvt.f32.s32 %v4714_v61 }
 0x26d   : > { %v2912_v57 = vsel %vm2877_vm0, %v2874_v8, %v5514_v39  ;;  %v2913_v19 = vsel %vm2877_vm0, %v2875_v5, %v5515_v43  ;;  %v4719_v43 = vcvt.f32.s32 %v4718_v24  ;;  %v3626_v39 = vadd.f32 0.5, %v3590_v60 }
 0x26e   : > { %v5518_v7 = vpop.permute.xlu0 %5517  ;;  %v3664_v14 = vmul.f32 0.055555556, %v3628_v53  ;;  %v3629_v48 = vadd.f32 0.5, %v3593_v55  ;;  %v3768_v16 = vmul.u32 18, %v4717_v34  ;;  %v3627_v5 = vadd.f32 0.5, %v3591_v23  ;;  %v9988_v55 = vld [vmem:[#allocation14_spill] sm:$0xff] }
 0x26f   : > { %v5520_v18 = vunpack.i.h.bf16 %v5518_v7  ;;  %v5519_v26 = vunpack.i.l.bf16 %v5518_v7  ;;  %v3769_v7 = vmul.u32 18, %v4719_v43  ;;  %v3662_v8 = vmul.f32 0.055555556, %v3626_v39 }
 0x270   : > { %v3804_v31 = vsub.s32 %v9977_v62, %v3768_v16  ;;  %vm3549_vm0 = vcmask 60416   ;;  %v9985_v62 = vld [vmem:[#allocation9_spill] sm:$0xff]  ;;  %v3595_v34 = vcvt.s32.f32 %v9988_v55 }
 0x271   : > { %v2950_v32 = vsel %vm9938_vm1, %v2912_v57, %v5519_v26  ;;  %v2951_v44 = vsel %vm9974_vm7, %v2913_v19, %v5520_v18  ;;  %v3767_v26 = vmul.u32 18, %v4715_v12  ;;  %v3700_v57 = vfloor.f32 %v3664_v14  ;;  %vm9996_vm1 = vmmov %vm9989_vm2 }
 0x272   : > { %v2970_v37 = vpack.c.bf16 %v2951_v44, %v2950_v32  ;;  %v3665_v19 = vmul.f32 0.055555556, %v3629_v48  ;;  %v3805_v17 = vsub.s32 %v9979_v52, %v3769_v7  ;;  %v3698_v32 = vfloor.f32 %v3662_v8 }
 0x273   : > { %v3663_v44 = vmul.f32 0.055555556, %v3627_v5  ;;  %v4724_v22 = vtrunc.f32 %v3700_v57  ;;  %vm3840_vm4 = vcmp.lt.s32.totalorder %v3804_v31, 16  ;;  %v3594_v25 = vcvt.s32.f32 %v9985_v62 }
 0x274   : > { %v3126_v46 = vshrl.u32 %v2970_v37, 16  ;;  %v3129_v40 = vshll.u32 %v2970_v37, 16  ;;  %v3803_v37 = vsub.s32 %v9980_v35, %v3767_v26  ;;  %v3701_v49 = vfloor.f32 %v3665_v19 }
 0x275   : > { %vm3841_vm9 = vcmp.lt.s32.totalorder %v3805_v17, 16  ;;  %v3630_v13 = vadd.f32 0.5, %v3594_v25  ;;  %v3631_v31 = vadd.f32 0.5, %v3595_v34 }
 0x276   : > { %v3128_v63 = vrot.slane %v3126_v46, 2  ;;  %v3131_v56 = vrot.slane %v3129_v40, 3  ;;  %v5549_v40 = vmov 0.0   ;;  %vm3839_vm6 = vcmp.lt.s32.totalorder %v3803_v37, 16 }
 0x277   : > { %v4375_v45 = vsel %vm3841_vm9, 1.0, %v5549_v40  ;;  %v4373_v38 = vsel %vm3839_vm6, 1.0, %v5549_v40  ;;  %v3666_v48 = vmul.f32 0.055555556, %v3630_v13  ;;  %vm10000_vm9 = vmmov %vm9996_vm1 }
 0x278   : > { %v3132_v30 = vor.u32 %v3131_v56, %v3128_v63  ;;  %v4720_v56 = vtrunc.f32 %v3698_v32  ;;  %vm10003_vm6 = vmmov %vm9996_vm1 }
 0x27a   : > { %v3133_v36 = vsel %vm2972_vm10, %v3123_v1, %v3132_v30  ;;  %v3142_v59 = vsel %vm2972_vm10, %v3132_v30, %v3141_v54  ;;  %v3694_v1 = vfloor.f32 %v3658_v42  ;;  %v3699_v54 = vfloor.f32 %v3663_v44  ;;  %v9986_v42 = vld [vmem:[#allocation11_spill] sm:$0xff] }
 0x27b   : > { %4610 = vmatprep.mubr.msk.bf16.mxu1 %vm9976_vm14, %v3133_v36  ;;  %v4725_v36 = vcvt.f32.s32 %v4724_v22  ;;  %v4721_v2 = vcvt.f32.s32 %v4720_v56  ;;  %v3596_v50 = vcvt.s32.f32 %v9986_v42 }
 0x27c   : > { %4611 = vmatmul.mubr.msk.bf16.gmra.mxu1 %vm9978_vm15, %v3142_v59  ;;  %v4712_v15 = vtrunc.f32 %v3694_v1  ;;  %v4726_v59 = vtrunc.f32 %v3701_v49  ;;  %v4722_v47 = vtrunc.f32 %v3699_v54 }
 0x27d   : > { %v3772_v3 = vmul.u32 18, %v4725_v36  ;;  %v3632_v53 = vadd.f32 0.5, %v3596_v50  ;;  %v3667_v36 = vmul.f32 0.055555556, %v3631_v31  ;;  %v9997_v50 = vld [vmem:[#allocation13_spill] sm:$0xff] }
 0x27e   : > { %v4713_v11 = vcvt.f32.s32 %v4712_v15  ;;  %v4727_v51 = vcvt.f32.s32 %v4726_v59  ;;  %v9987_v15 = vld [vmem:[#allocation12_spill] sm:$0xff]  ;;  %v4723_v61 = vcvt.f32.s32 %v4722_v47 }
 0x27f   : > { %v3597_v6 = vcvt.s32.f32 %v9987_v15  ;;  %v3668_v19 = vmul.f32 0.055555556, %v3632_v53  ;;  %v3808_v54 = vsub.s32 %v9981_v41, %v3772_v3 }
 0x280   : > { %v3766_v58 = vmul.u32 18, %v4713_v11  ;;  %v3770_v11 = vmul.u32 18, %v4721_v2 }
 0x281   : > { %v3773_v14 = vmul.u32 18, %v4727_v51  ;;  %v3633_v16 = vadd.f32 0.5, %v3597_v6  ;;  %v3771_v37 = vmul.u32 18, %v4723_v61  ;;  %vm3844_vm14 = vcmp.lt.s32.totalorder %v3808_v54, 16 }
 0x282   : > { %v3802_v18 = vsub.s32 %v9975_v20, %v3766_v58  ;;  %v4374_v20 = vsel %vm3840_vm4, 1.0, %v5549_v40  ;;  %v3806_v44 = vsub.s32 %v9982_v29, %v3770_v11  ;;  %v4378_v41 = vsel %vm3844_vm14, 1.0, %v5549_v40  ;;  %vm9999_vm4 = vmmov %vm9996_vm1 }
 0x283   : > { %v3807_v59 = vsub.s32 %v9984_v33, %v3771_v37  ;;  %v3598_v33 = vcvt.s32.f32 %v9997_v50 }
 0x284   : > { %vm3838_vm10 = vcmp.lt.s32.totalorder %v3802_v18, 16  ;;  %vm3842_vm7 = vcmp.lt.s32.totalorder %v3806_v44, 16 }
 0x285   : > { %v4372_v63 = vsel %vm3838_vm10, 1.0, %v5549_v40  ;;  %vm3843_vm10 = vcmp.lt.s32.totalorder %v3807_v59, 16 }
 0x286   : > { %v4377_v51 = vsel %vm3843_vm10, 1.0, %v5549_v40 }
 0x299   : > { %v4580_v46 = vpop.f32.mrf.mxu0 }
 0x29a   : > { %v4412_v30 = vpack.c.bf16 %v4580_v46, %v4580_v46  ;;  %v3948_v27 = vmul.f32 %v4580_v46, %v4374_v20  ;;  %v3809_v20 = vsub.s32 %v9983_v21, %v3773_v14 }
 0x29b   : > { %v3262_v28 = vpop.f32.mrf.mxu0 }
 0x29c   : > { %3552 = vst.msk [vmem:[%s8832_s13 + $0x8] sm:$0xf] %vm3549_vm0, %v4412_v30  ;;  %v4410_v52 = vpack.c.bf16 %v3262_v28, %v3262_v28  ;;  %v3946_v9 = vmul.f32 %v4372_v63, %v3262_v28  ;;  %v4063_v43 = vmul.f32 %v4580_v46, %v3948_v27  ;;  %v3985_v7 = vsel %vm9991_vm3, %v3948_v27, 0.0  ;;  %vm10006_vm3 = vmmov %vm9996_vm1 }
 0x29d   : > { %v4581_v35 = vpop.f32.mrf.mxu0  ;;  %v3702_v46 = vfloor.f32 %v3666_v48  ;;  %v3669_v63 = vmul.f32 0.055555556, %v3633_v16  ;;  %vm3845_vm15 = vcmp.lt.s32.totalorder %v3809_v20, 16 }
 0x29e   : > { %3550 = vst.msk [vmem:[%s8832_s13] sm:$0xf] %vm3549_vm0, %v4410_v52  ;;  %v4413_v10 = vpack.c.bf16 %v4581_v35, %v4581_v35  ;;  %v4061_v4 = vmul.f32 %v3946_v9, %v3262_v28  ;;  %v3949_v0 = vmul.f32 %v4581_v35, %v4375_v45  ;;  %v3982_v39 = vsel %vm9989_vm2, %v3946_v9, 0.0  ;;  %vm10004_vm2 = vmmov %vm9996_vm1 }
 0x29f   : > { %v3265_v1 = vpop.f32.mrf.mxu0  ;;  %v4100_v17 = vsel %vm9994_vm12, %v4063_v43, 0.0  ;;  %v3704_v28 = vfloor.f32 %v3668_v19  ;;  %v4728_v25 = vtrunc.f32 %v3702_v46  ;;  %v3705_v29 = vfloor.f32 %v3669_v63  ;;  %vm10009_vm14 = vmmov %vm10004_vm2 }
 0x2a0   : > { %3553 = vst.msk [vmem:[%s8832_s13 + $0xc] sm:$0xf] %vm3549_vm0, %v4413_v10  ;;  %v4411_v24 = vpack.c.bf16 %v3265_v1, %v3265_v1  ;;  %v3947_v60 = vmul.f32 %v4373_v38, %v3265_v1  ;;  %v4097_v8 = vsel %vm9992_vm13, %v4061_v4, 0.0  ;;  %v4064_v5 = vmul.f32 %v4581_v35, %v3949_v0  ;;  %v9998_v4 = vld [vmem:[#allocation15_spill] sm:$0xff]  ;;  %vm10007_vm13 = vmmov %vm9996_vm1 }
 0x2a1   : > { %v3987_v32 = vsel %vm9995_vm5, %v3949_v0, 0.0  ;;  %v4376_v9 = vsel %vm3842_vm7, 1.0, %v5549_v40  ;;  %v4732_v45 = vtrunc.f32 %v3704_v28  ;;  %v3703_v35 = vfloor.f32 %v3667_v36  ;;  %vm10011_vm10 = vmmov %vm10004_vm2 }
 0x2a2   : > { %3551 = vst.msk [vmem:[%s8832_s13 + $0x4] sm:$0xf] %vm3549_vm0, %v4411_v24  ;;  %v3983_v23 = vsel %vm9990_vm8, %v3947_v60, 0.0  ;;  %v4062_v58 = vmul.f32 %v3947_v60, %v3265_v1  ;;  %v4102_v56 = vsel %vm9996_vm1, %v4064_v5, 0.0  ;;  %v4729_v2 = vcvt.f32.s32 %v4728_v25  ;;  %vm10005_vm8 = vmmov %vm9996_vm1 }
 0x2a3   : > { %v3984_v12 = vadd.f32 %v3983_v23, %v3982_v39  ;;  %v4734_v47 = vtrunc.f32 %v3705_v29  ;;  %v4379_v1 = vsel %vm3845_vm15, 1.0, %v5549_v40  ;;  %v4733_v13 = vcvt.f32.s32 %v4732_v45  ;;  %vm10010_vm15 = vmmov %vm10004_vm2 }
 0x2a4   : > { %v4098_v18 = vsel %vm9993_vm11, %v4062_v58, 0.0  ;;  %v4730_v6 = vtrunc.f32 %v3703_v35  ;;  %v3600_v0 = vcvt.s32.f32 %v9998_v4  ;;  %v3774_v43 = vmul.u32 18, %v4729_v2  ;;  %vm10008_vm11 = vmmov %vm9996_vm1 }
 0x2a5   : > { %v3986_v26 = vadd.f32 %v3985_v7, %v3984_v12  ;;  %v4099_v57 = vadd.f32 %v4098_v18, %v4097_v8  ;;  %v4735_v39 = vcvt.f32.s32 %v4734_v47  ;;  %v3634_v23 = vadd.f32 0.5, %v3598_v33  ;;  %v10001_v8 = vld [vmem:[#allocation16_spill] sm:$0xff]  ;;  %v10002_v18 = vld [vmem:[#allocation18_spill] sm:$0xff] }
 0x2a6   : > { %v3776_v7 = vmul.u32 18, %v4733_v13  ;;  %v3601_v5 = vcvt.s32.f32 %v10001_v8  ;;  %v3810_v44 = vsub.s32 %v9985_v62, %v3774_v43 }
 0x2a7   : > { %v4101_v22 = vadd.f32 %v4100_v17, %v4099_v57  ;;  %v3988_v49 = vadd.f32 %v3987_v32, %v3986_v26  ;;  %v3599_v26 = vcvt.s32.f32 %v10002_v18  ;;  %v4731_v17 = vcvt.f32.s32 %v4730_v6 }
 0x2a8   : > { %v3777_v37 = vmul.u32 18, %v4735_v39  ;;  %v3637_v20 = vadd.f32 0.5, %v3601_v5  ;;  %v3812_v45 = vsub.s32 %v9986_v42, %v3776_v7  ;;  %vm3846_vm12 = vcmp.lt.s32.totalorder %v3810_v44, 16 }
 0x2a9   : > { %v4103_v30 = vadd.f32 %v4102_v56, %v4101_v22  ;;  %v3636_v22 = vadd.f32 0.5, %v3600_v0  ;;  %v3670_v56 = vmul.f32 0.055555556, %v3634_v23  ;;  %v3635_v28 = vadd.f32 0.5, %v3599_v26 }
 0x2aa   : > { %v3775_v25 = vmul.u32 18, %v4731_v17  ;;  %v3813_v35 = vsub.s32 %v9987_v15, %v3777_v37  ;;  %vm3848_vm5 = vcmp.lt.s32.totalorder %v3812_v45, 16 }
 0x2ab   : > { %v3672_v62 = vmul.f32 0.055555556, %v3636_v22  ;;  %v3671_v2 = vmul.f32 0.055555556, %v3635_v28  ;;  %v4382_v15 = vsel %vm3848_vm5, 1.0, %v5549_v40  ;;  %vm10016_vm5 = vmmov %vm10004_vm2 }
 0x2ac   : > { %v3811_v47 = vsub.s32 %v9988_v55, %v3775_v25  ;;  %vm3849_vm1 = vcmp.lt.s32.totalorder %v3813_v35, 16 }
 0x2ad   : > { %v3708_v33 = vfloor.f32 %v3672_v62 }
 0x2ae   : > { %vm3847_vm7 = vcmp.lt.s32.totalorder %v3811_v47, 16 }
 0x2af   : > { %v4584_v52 = vpop.f32.mrf.mxu0  ;;  %v4740_v6 = vtrunc.f32 %v3708_v33 }
 0x2b0   : > { %v4416_v38 = vpack.c.bf16 %v4584_v52, %v4584_v52  ;;  %v3952_v24 = vmul.f32 %v4584_v52, %v4378_v41  ;;  %v3706_v41 = vfloor.f32 %v3670_v56 }
 0x2b1   : > { %v3278_v21 = vpop.f32.mrf.mxu0 }
 0x2b2   : > { %3556 = vst.msk [vmem:[%s8832_s13 + $0x18] sm:$0xf] %vm3549_vm0, %v4416_v38  ;;  %v4414_v27 = vpack.c.bf16 %v3278_v21, %v3278_v21  ;;  %v3950_v10 = vmul.f32 %v4376_v9, %v3278_v21  ;;  %v4067_v57 = vmul.f32 %v4584_v52, %v3952_v24 }
 0x2b3   : > { %v4585_v3 = vpop.f32.mrf.mxu0 }
 0x2b4   : > { %3554 = vst.msk [vmem:[%s8832_s13 + $0x10] sm:$0xf] %vm3549_vm0, %v4414_v27  ;;  %v3989_v60 = vsel %vm9999_vm4, %v3950_v10, 0.0  ;;  %v4065_v11 = vmul.f32 %v3950_v10, %v3278_v21  ;;  %v4417_v61 = vpack.c.bf16 %v4585_v3, %v4585_v3  ;;  %v3953_v12 = vmul.f32 %v4585_v3, %v4379_v1  ;;  %vm10012_vm4 = vmmov %vm10004_vm2 }
 0x2b5   : > { %v3990_v53 = vadd.f32 %v3989_v60, %v3988_v49  ;;  %v3281_v34 = vpop.f32.mrf.mxu0  ;;  %v3993_v49 = vsel %vm10004_vm2, %v3952_v24, 0.0  ;;  %v4108_v36 = vsel %vm10006_vm3, %v4067_v57, 0.0  ;;  %v3673_v21 = vmul.f32 0.055555556, %v3637_v20 }
 0x2b6   : > { %v4104_v58 = vsel %vm10000_vm9, %v4065_v11, 0.0  ;;  %3557 = vst.msk [vmem:[%s8832_s13 + $0x1c] sm:$0xf] %vm3549_vm0, %v4417_v61  ;;  %v4415_v14 = vpack.c.bf16 %v3281_v34, %v3281_v34  ;;  %v3951_v48 = vmul.f32 %v4377_v51, %v3281_v34  ;;  %v4068_v46 = vmul.f32 %v4585_v3, %v3953_v12  ;;  %vm10013_vm9 = vmmov %vm10004_vm2 }
 0x2b7   : > { %v4105_v16 = vadd.f32 %v4104_v58, %v4103_v30  ;;  %v3995_v59 = vsel %vm10007_vm13, %v3953_v12, 0.0  ;;  %v4380_v27 = vsel %vm3846_vm12, 1.0, %v5549_v40  ;;  %v4736_v1 = vtrunc.f32 %v3706_v41 }
 0x2b8   : > { %3555 = vst.msk [vmem:[%s8832_s13 + $0x14] sm:$0xf] %vm3549_vm0, %v4415_v14  ;;  %v3991_v19 = vsel %vm10003_vm6, %v3951_v48, 0.0  ;;  %v4066_v31 = vmul.f32 %v3951_v48, %v3281_v34  ;;  %v4110_v9 = vsel %vm10008_vm11, %v4068_v46, 0.0  ;;  %v3709_v3 = vfloor.f32 %v3673_v21  ;;  %vm10014_vm6 = vmmov %vm10004_vm2 }
 0x2b9   : > { %v3992_v32 = vadd.f32 %v3991_v19, %v3990_v53  ;;  %v3707_v51 = vfloor.f32 %v3671_v2  ;;  %v4383_v24 = vsel %vm3849_vm1, 1.0, %v5549_v40  ;;  %v4381_v11 = vsel %vm3847_vm7, 1.0, %v5549_v40  ;;  %vm10017_vm1 = vmmov %vm10004_vm2 }
 0x2ba   : > { %v4106_v63 = vsel %vm10005_vm8, %v4066_v31, 0.0  ;;  %v4737_v61 = vcvt.f32.s32 %v4736_v1  ;;  %v4742_v53 = vtrunc.f32 %v3709_v3  ;;  %v4741_v48 = vcvt.f32.s32 %v4740_v6  ;;  %vm10015_vm8 = vmmov %vm10004_vm2 }
 0x2bb   : > { %v3994_v54 = vadd.f32 %v3993_v49, %v3992_v32  ;;  %v4107_v30 = vadd.f32 %v4106_v63, %v4105_v16  ;;  %v4738_v34 = vtrunc.f32 %v3707_v51  ;;  %vm10018_vm7 = vmmov %vm10017_vm1 }
 0x2bc   : > { %v3778_v19 = vmul.u32 18, %v4737_v61  ;;  %v4743_v31 = vcvt.f32.s32 %v4742_v53  ;;  %v3780_v56 = vmul.u32 18, %v4741_v48  ;;  %v10023_v48 = vld [vmem:[#allocation17_spill] sm:$0xff] }
 0x2bd   : > { %v4109_v29 = vadd.f32 %v4108_v36, %v4107_v30  ;;  %v3996_v52 = vadd.f32 %v3995_v59, %v3994_v54  ;;  %v4739_v37 = vcvt.f32.s32 %v4738_v34 }
 0x2be   : > { %v3814_v20 = vsub.s32 %v9997_v50, %v3778_v19  ;;  %v3781_v59 = vmul.u32 18, %v4743_v31  ;;  %v10026_v31 = vld [vmem:[#allocation19_spill] sm:$0xff] }
 0x2bf   : > { %v4111_v38 = vadd.f32 %v4110_v9, %v4109_v29  ;;  %v3779_v25 = vmul.u32 18, %v4739_v37  ;;  %v3816_v9 = vsub.s32 %v9998_v4, %v3780_v56  ;;  %v10027_v37 = vld [vmem:[#allocation20_spill] sm:$0xff] }
 0x2c0   : > { %vm3850_vm3 = vcmp.lt.s32.totalorder %v3814_v20, 16  ;;  %v3817_v35 = vsub.s32 %v10001_v8, %v3781_v59 }
 0x2c1   : > { %vm3852_vm13 = vcmp.lt.s32.totalorder %v3816_v9, 16  ;;  %v4384_v41 = vsel %vm3850_vm3, 1.0, %v5549_v40 }
 0x2c2   : > { %vm3853_vm11 = vcmp.lt.s32.totalorder %v3817_v35, 16  ;;  %v4386_v2 = vsel %vm3852_vm13, 1.0, %v5549_v40 }
 0x2c3   : > { %v4387_v8 = vsel %vm3853_vm11, 1.0, %v5549_v40 }
 0x2c6   : > { %v4588_v10 = vpop.f32.mrf.mxu0 }
 0x2c7   : > { %v4420_v42 = vpack.c.bf16 %v4588_v10, %v4588_v10  ;;  %v3956_v43 = vmul.f32 %v4588_v10, %v4382_v15 }
 0x2c8   : > { %v3294_v13 = vpop.f32.mrf.mxu0 }
 0x2c9   : > { %3560 = vst.msk [vmem:[%s8832_s13 + $0x28] sm:$0xf] %vm3549_vm0, %v4420_v42  ;;  %v4418_v0 = vpack.c.bf16 %v3294_v13, %v3294_v13  ;;  %v3954_v55 = vmul.f32 %v4380_v27, %v3294_v13  ;;  %v4071_v17 = vmul.f32 %v4588_v10, %v3956_v43  ;;  %v4001_v49 = vsel %vm10012_vm4, %v3956_v43, 0.0  ;;  %vm10022_vm4 = vmmov %vm10017_vm1 }
 0x2ca   : > { %v4589_v60 = vpop.f32.mrf.mxu0 }
 0x2cb   : > { %3558 = vst.msk [vmem:[%s8832_s13 + $0x20] sm:$0xf] %vm3549_vm0, %v4418_v0  ;;  %v3997_v39 = vsel %vm10009_vm14, %v3954_v55, 0.0  ;;  %v4069_v23 = vmul.f32 %v3954_v55, %v3294_v13  ;;  %v4421_v58 = vpack.c.bf16 %v4589_v60, %v4589_v60  ;;  %v3957_v7 = vmul.f32 %v4589_v60, %v4383_v24  ;;  %vm10019_vm14 = vmmov %vm10017_vm1 }
 0x2cc   : > { %v3998_v12 = vadd.f32 %v3997_v39, %v3996_v52  ;;  %v3297_v14 = vpop.f32.mrf.mxu0  ;;  %v4116_v28 = vsel %vm10014_vm6, %v4071_v17, 0.0  ;;  %v3604_v17 = vcvt.s32.f32 %v10026_v31 }
 0x2cd   : > { %v4112_v16 = vsel %vm10010_vm15, %v4069_v23, 0.0  ;;  %3561 = vst.msk [vmem:[%s8832_s13 + $0x2c] sm:$0xf] %vm3549_vm0, %v4421_v58  ;;  %v4419_v5 = vpack.c.bf16 %v3297_v14, %v3297_v14  ;;  %v3955_v26 = vmul.f32 %v4381_v11, %v3297_v14  ;;  %v4072_v46 = vmul.f32 %v4589_v60, %v3957_v7  ;;  %vm10020_vm15 = vmmov %vm10017_vm1 }
 0x2ce   : > { %v4113_v57 = vadd.f32 %v4112_v16, %v4111_v38  ;;  %v4003_v36 = vsel %vm10004_vm2, %v3957_v7, 0.0  ;;  %v3815_v38 = vsub.s32 %v10002_v18, %v3779_v25  ;;  %v3602_v16 = vcvt.s32.f32 %v10023_v48 }
 0x2cf   : > { %3559 = vst.msk [vmem:[%s8832_s13 + $0x24] sm:$0xf] %vm3549_vm0, %v4419_v5  ;;  %v3999_v32 = vsel %vm10011_vm10, %v3955_v26, 0.0  ;;  %v4070_v44 = vmul.f32 %v3955_v26, %v3297_v14  ;;  %v4118_v62 = vsel %vm10015_vm8, %v4072_v46, 0.0  ;;  %vm10021_vm10 = vmmov %vm10017_vm1  ;;  %v3640_v20 = vadd.f32 0.5, %v3604_v17 }
 0x2d0   : > { %v4000_v22 = vadd.f32 %v3999_v32, %v3998_v12  ;;  %vm3851_vm12 = vcmp.lt.s32.totalorder %v3815_v38, 16  ;;  %v10031_v38 = vld [vmem:[#allocation29_spill] sm:$0xff] }
 0x2d1   : > { %v4114_v63 = vsel %vm10013_vm9, %v4070_v44, 0.0  ;;  %v4385_v18 = vsel %vm3851_vm12, 1.0, %v5549_v40  ;;  %vm10024_vm9 = vmmov %vm10017_vm1  ;;  %v3638_v44 = vadd.f32 0.5, %v3602_v16 }
 0x2d2   : > { %v4002_v54 = vadd.f32 %v4001_v49, %v4000_v22  ;;  %v4115_v30 = vadd.f32 %v4114_v63, %v4113_v57  ;;  %v10025_v57 = vld [vmem:[#allocation24_spill] sm:$0xff]  ;;  %v3605_v22 = vcvt.s32.f32 %v10027_v37  ;;  %v10028_v49 = vld [vmem:[#allocation25_spill] sm:$0xff] }
 0x2d3   : > { %v3603_v19 = vcvt.s32.f32 %v10025_v57  ;;  %v3608_v46 = vcvt.s32.f32 %v10028_v49  ;;  %v10029_v63 = vld [vmem:[#allocation21_spill] sm:$0xff] }
 0x2d4   : > { %v4117_v29 = vadd.f32 %v4116_v28, %v4115_v30  ;;  %v4004_v52 = vadd.f32 %v4003_v36, %v4002_v54  ;;  %v3606_v56 = vcvt.s32.f32 %v10029_v63  ;;  %v3674_v36 = vmul.f32 0.055555556, %v3638_v44 }
 0x2d5   : > { %v3639_v54 = vadd.f32 0.5, %v3603_v19  ;;  %v3641_v59 = vadd.f32 0.5, %v3605_v22 }
 0x2d6   : > { %v4119_v45 = vadd.f32 %v4118_v62, %v4117_v29  ;;  %v3644_v29 = vadd.f32 0.5, %v3608_v46  ;;  %v10030_v62 = vld [vmem:[#allocation26_spill] sm:$0xff] }
 0x2d7   : > { %v3609_v9 = vcvt.s32.f32 %v10030_v62  ;;  %v3675_v35 = vmul.f32 0.055555556, %v3639_v54 }
 0x2d8   : > { %v4592_v50 = vpop.f32.mrf.mxu0 }
 0x2d9   : > { %v4424_v21 = vpack.c.bf16 %v4592_v50, %v4592_v50  ;;  %v3960_v10 = vmul.f32 %v4592_v50, %v4386_v2  ;;  %v3676_v2 = vmul.f32 0.055555556, %v3640_v20 }
 0x2da   : > { %v3310_v47 = vpop.f32.mrf.mxu0 }
 0x2db   : > { %3564 = vst.msk [vmem:[%s8832_s13 + $0x38] sm:$0xf] %vm3549_vm0, %v4424_v21  ;;  %v4422_v4 = vpack.c.bf16 %v3310_v47, %v3310_v47  ;;  %v3958_v33 = vmul.f32 %v4384_v41, %v3310_v47  ;;  %v4075_v60 = vmul.f32 %v4592_v50, %v3960_v10  ;;  %v4009_v34 = vsel %vm10019_vm14, %v3960_v10, 0.0  ;;  %v10032_v41 = vld [vmem:[#allocation31_spill] sm:$0xff]  ;;  %vm10048_vm14 = vmmov %vm10022_vm4 }
 0x2dc   : > { %v4593_v27 = vpop.f32.mrf.mxu0  ;;  %v3607_v50 = vcvt.s32.f32 %v10031_v38  ;;  %v3612_v21 = vcvt.s32.f32 %v10032_v41 }
 0x2dd   : > { %3562 = vst.msk [vmem:[%s8832_s13 + $0x30] sm:$0xf] %vm3549_vm0, %v4422_v4  ;;  %v4005_v1 = vsel %vm10016_vm5, %v3958_v33, 0.0  ;;  %v4073_v3 = vmul.f32 %v3958_v33, %v3310_v47  ;;  %v4425_v51 = vpack.c.bf16 %v4593_v27, %v4593_v27  ;;  %v3961_v13 = vmul.f32 %v4593_v27, %v4387_v8  ;;  %v10033_v4 = vld [vmem:[#allocation27_spill] sm:$0xff] }
 0x2de   : > { %v3313_v42 = vpop.f32.mrf.mxu0  ;;  %v4006_v55 = vadd.f32 %v4005_v1, %v4004_v52  ;;  %v4124_v12 = vsel %vm10021_vm10, %v4075_v60, 0.0  ;;  %v3642_v52 = vadd.f32 0.5, %v3606_v56  ;;  %v3610_v33 = vcvt.s32.f32 %v10033_v4  ;;  %vm10050_vm10 = vmmov %vm10022_vm4 }
 0x2df   : > { %v4120_v15 = vsel %vm10017_vm1, %v4073_v3, 0.0  ;;  %3565 = vst.msk [vmem:[%s8832_s13 + $0x3c] sm:$0xf] %vm3549_vm0, %v4425_v51  ;;  %v4423_v6 = vpack.c.bf16 %v3313_v42, %v3313_v42  ;;  %v3959_v0 = vmul.f32 %v4385_v18, %v3313_v42  ;;  %v4076_v43 = vmul.f32 %v4593_v27, %v3961_v13 }
 0x2e0   : > { %v4121_v24 = vadd.f32 %v4120_v15, %v4119_v45  ;;  %v4011_v14 = vsel %vm10022_vm4, %v3961_v13, 0.0  ;;  %v3710_v27 = vfloor.f32 %v3674_v36  ;;  %v3677_v18 = vmul.f32 0.055555556, %v3641_v59 }
 0x2e1   : > { %3563 = vst.msk [vmem:[%s8832_s13 + $0x34] sm:$0xf] %vm3549_vm0, %v4423_v6  ;;  %v4007_v11 = vsel %vm10018_vm7, %v3959_v0, 0.0  ;;  %v4074_v61 = vmul.f32 %v3959_v0, %v3313_v42  ;;  %v4126_v26 = vsel %vm10024_vm9, %v4076_v43, 0.0  ;;  %v3680_v1 = vmul.f32 0.055555556, %v3644_v29 }
 0x2e2   : > { %v4008_v53 = vadd.f32 %v4007_v11, %v4006_v55  ;;  %v3678_v3 = vmul.f32 0.055555556, %v3642_v52  ;;  %v3645_v51 = vadd.f32 0.5, %v3609_v9  ;;  %v3711_v15 = vfloor.f32 %v3675_v35 }
 0x2e3   : > { %v4122_v39 = vsel %vm10020_vm15, %v4074_v61, 0.0  ;;  %v3643_v13 = vadd.f32 0.5, %v3607_v50  ;;  %v3648_v6 = vadd.f32 0.5, %v3612_v21  ;;  %v3712_v0 = vfloor.f32 %v3676_v2  ;;  %vm10049_vm15 = vmmov %vm10022_vm4 }
 0x2e4   : > { %v4010_v23 = vadd.f32 %v4009_v34, %v4008_v53  ;;  %v4123_v58 = vadd.f32 %v4122_v39, %v4121_v24  ;;  %v3646_v55 = vadd.f32 0.5, %v3610_v33  ;;  %v4744_v24 = vtrunc.f32 %v3710_v27 }
 0x2e5   : > { %v3713_v60 = vfloor.f32 %v3677_v18  ;;  %v3716_v11 = vfloor.f32 %v3680_v1  ;;  %v3714_v61 = vfloor.f32 %v3678_v3  ;;  %v3681_v53 = vmul.f32 0.055555556, %v3645_v51 }
 0x2e6   : > { %v4125_v7 = vadd.f32 %v4124_v12, %v4123_v58  ;;  %v8934_v5 = vadd.f32 %v4011_v14, %v4010_v23  ;;  %v4746_v34 = vtrunc.f32 %v3711_v15  ;;  %v3679_v43 = vmul.f32 0.055555556, %v3643_v13  ;;  %v10034_v12 = vld [vmem:[#allocation34_spill] sm:$0xff] }
 0x2e7   : > { %v3684_v39 = vmul.f32 0.055555556, %v3648_v6  ;;  %v4748_v23 = vtrunc.f32 %v3712_v0  ;;  %v3682_v58 = vmul.f32 0.055555556, %v3646_v55  ;;  %v3611_v14 = vcvt.s32.f32 %v10034_v12  ;;  %v10036_v55 = vld [vmem:[#allocation33_spill] sm:$0xff] }
 0x2e8   : > { %v8939_v32 = vadd.f32 %v4126_v26, %v4125_v7  ;;  %v4745_v16 = vcvt.f32.s32 %v4744_v24  ;;  %v4750_v7 = vtrunc.f32 %v3713_v60  ;;  %v10035_v26 = vld [vmem:[#allocation32_spill] sm:$0xff]  ;;  %v4756_v17 = vtrunc.f32 %v3716_v11 }
 0x2e9   : > { %v3613_v19 = vcvt.s32.f32 %v10035_v26  ;;  %v4752_v44 = vtrunc.f32 %v3714_v61  ;;  %v3717_v22 = vfloor.f32 %v3681_v53  ;;  %v4747_v46 = vcvt.f32.s32 %v4746_v34 }
 0x2ea   : > { %v8944_v30 = vpop.f32.mrf.mxu0  ;;  %v3715_v56 = vfloor.f32 %v3679_v43  ;;  %v3720_v54 = vfloor.f32 %v3684_v39  ;;  %v4749_v20 = vcvt.f32.s32 %v4748_v23  ;;  %v3647_v36 = vadd.f32 0.5, %v3611_v14  ;;  %v10037_v23 = vld [vmem:[#allocation36_spill] sm:$0xff] }
 0x2eb   : > { %v4428_v28 = vpack.c.bf16 %v8944_v30, %v8944_v30  ;;  %v3782_v59 = vmul.u32 18, %v4745_v16  ;;  %v4751_v29 = vcvt.f32.s32 %v4750_v7  ;;  %v3649_v52 = vadd.f32 0.5, %v3613_v19 }
 0x2ec   : > { %v8948_v25 = vpop.f32.mrf.mxu0  ;;  %v4757_v9 = vcvt.f32.s32 %v4756_v17  ;;  %v4758_v35 = vtrunc.f32 %v3717_v22  ;;  %v3783_v50 = vmul.u32 18, %v4747_v46  ;;  %v4754_v21 = vtrunc.f32 %v3715_v56 }
 0x2ed   : > { %3568 = vst.msk [vmem:[%s8832_s13 + $0x48] sm:$0xf] %vm3549_vm0, %v4428_v28  ;;  %v4426_v45 = vpack.c.bf16 %v8948_v25, %v8948_v25  ;;  %v3718_v28 = vfloor.f32 %v3682_v58  ;;  %v4764_v2 = vtrunc.f32 %v3720_v54  ;;  %v3784_v33 = vmul.u32 18, %v4749_v20 }
 0x2ee   : > { %v8957_v47 = vpop.f32.mrf.mxu0  ;;  %v3683_v18 = vmul.f32 0.055555556, %v3647_v36  ;;  %v3818_v1 = vsub.s32 %v10023_v48, %v3782_v59  ;;  %v3785_v3 = vmul.u32 18, %v4751_v29  ;;  %v3788_v15 = vmul.u32 18, %v4757_v9  ;;  %v10042_v59 = vld [vmem:[#allocation40_spill] sm:$0xff] }
 0x2ef   : > { %3566 = vst.msk [vmem:[%s8832_s13 + $0x40] sm:$0xf] %vm3549_vm0, %v4426_v45  ;;  %v4429_v8 = vpack.c.bf16 %v8957_v47, %v8957_v47  ;;  %v4753_v45 = vcvt.f32.s32 %v4752_v44  ;;  %v4759_v0 = vcvt.f32.s32 %v4758_v35  ;;  %v3614_v24 = vcvt.s32.f32 %v10036_v55 }
 0x2f0   : > { %v8964_v10 = vpop.f32.mrf.mxu0  ;;  %v3819_v60 = vsub.s32 %v10025_v57, %v3783_v50  ;;  %v4755_v11 = vcvt.f32.s32 %v4754_v21  ;;  %v4765_v61 = vcvt.f32.s32 %v4764_v2  ;;  %v3820_v53 = vsub.s32 %v10026_v31, %v3784_v33 }
 0x2f1   : > { %3569 = vst.msk [vmem:[%s8832_s13 + $0x4c] sm:$0xf] %vm3549_vm0, %v4429_v8  ;;  %v4427_v42 = vpack.c.bf16 %v8964_v10, %v8964_v10  ;;  %v4760_v8 = vtrunc.f32 %v3718_v28  ;;  %v3786_v6 = vmul.u32 18, %v4753_v45  ;;  %v3719_v39 = vfloor.f32 %v3683_v18 }
 0x2f2   : > { %v3616_v58 = vcvt.s32.f32 %v10037_v23  ;;  %vm3854_vm6 = vcmp.lt.s32.totalorder %v3818_v1, 16  ;;  %v3821_v14 = vsub.s32 %v10027_v37, %v3785_v3  ;;  %v3824_v7 = vsub.s32 %v10028_v49, %v3788_v15  ;;  %v10047_v3 = vld [vmem:[#allocation37_spill] sm:$0xff] }
 0x2f3   : > { %3567 = vst.msk [vmem:[%s8832_s13 + $0x44] sm:$0xf] %vm3549_vm0, %v4427_v42  ;;  %v3685_v42 = vmul.f32 0.055555556, %v3649_v52  ;;  %v4761_v43 = vcvt.f32.s32 %v4760_v8  ;;  %v3822_v31 = vsub.s32 %v10029_v63, %v3786_v6  ;;  %v3789_v19 = vmul.u32 18, %v4759_v0 }
 0x2f4   : > { %v3650_v44 = vadd.f32 0.5, %v3614_v24  ;;  %vm3855_vm2 = vcmp.lt.s32.totalorder %v3819_v60, 16  ;;  %v3787_v22 = vmul.u32 18, %v4755_v11  ;;  %v3792_v46 = vmul.u32 18, %v4765_v61 }
 0x2f5   : > { %v3721_v16 = vfloor.f32 %v3685_v42  ;;  %v4388_v56 = vsel %vm3854_vm6, 1.0, %v5549_v40  ;;  %v3790_v54 = vmul.u32 18, %v4761_v43  ;;  %v4762_v20 = vtrunc.f32 %v3719_v39  ;;  %vm10054_vm6 = vmmov %vm10022_vm4 }
 0x2f6   : > { %v3652_v49 = vadd.f32 0.5, %v3616_v58  ;;  %vm9005_vm8 = vcmp.lt.s32.totalorder %v3820_v53, 16  ;;  %vm9009_vm3 = vcmp.lt.s32.totalorder %v3821_v14, 16  ;;  %v3615_v29 = vcvt.s32.f32 %v10042_v59 }
 0x2f7   : > { %v4766_v36 = vtrunc.f32 %v3721_v16  ;;  %v4389_v52 = vsel %vm3855_vm2, 1.0, %v5549_v40  ;;  %vm9017_vm13 = vcmp.lt.s32.totalorder %v3824_v7, 16  ;;  %vm9021_vm11 = vcmp.lt.s32.totalorder %v3822_v31, 16 }
 0x2f8   : > { %v3686_v35 = vmul.f32 0.055555556, %v3650_v44  ;;  %v3962_v50 = vmul.f32 %v4388_v56, %v8948_v25  ;;  %v3825_v21 = vsub.s32 %v10030_v62, %v3789_v19  ;;  %v3823_v2 = vsub.s32 %v10031_v38, %v3787_v22 }
 0x2f9   : > { %v3828_v33 = vsub.s32 %v10032_v41, %v3792_v46  ;;  %v3826_v8 = vsub.s32 %v10033_v4, %v3790_v54  ;;  %v4763_v18 = vcvt.f32.s32 %v4762_v20  ;;  %v3688_v1 = vmul.f32 0.055555556, %v3652_v49 }
 0x2fa   : > { %v4390_v42 = vsel %vm9005_vm8, 1.0, %v5549_v40  ;;  %v3963_v15 = vmul.f32 %v4389_v52, %v8964_v10  ;;  %v4767_v6 = vcvt.f32.s32 %v4766_v36  ;;  %v3651_v0 = vadd.f32 0.5, %v3615_v29  ;;  %v10051_v29 = vld [vmem:[#allocation38_spill] sm:$0xff]  ;;  %vm10058_vm8 = vmmov %vm10022_vm4 }
 0x2fb   : > { %v4391_v62 = vsel %vm9009_vm3, 1.0, %v5549_v40  ;;  %v9041_v38 = vsel %vm9017_vm13, 1.0, %v5549_v40  ;;  %v4392_v41 = vsel %vm9021_vm11, 1.0, %v5549_v40  ;;  %v3722_v4 = vfloor.f32 %v3686_v35  ;;  %vm10061_vm3 = vmmov %vm10022_vm4 }
 0x2fc   : > { %v4077_v24 = vmul.f32 %v3962_v50, %v8948_v25  ;;  %vm3861_vm12 = vcmp.lt.s32.totalorder %v3825_v21, 16  ;;  %vm3859_vm5 = vcmp.lt.s32.totalorder %v3823_v2, 16  ;;  %vm3864_vm1 = vcmp.lt.s32.totalorder %v3828_v33, 16  ;;  %vm10062_vm13 = vmmov %vm10061_vm3 }
 0x2fd   : > { %vm3862_vm7 = vcmp.lt.s32.totalorder %v3826_v8, 16  ;;  %v3791_v60 = vmul.u32 18, %v4763_v18  ;;  %v4013_v61 = vsel %vm10048_vm14, %v3962_v50, 0.0  ;;  %v4078_v53 = vmul.f32 %v3963_v15, %v8964_v10  ;;  %vm10063_vm11 = vmmov %vm10061_vm3 }
 0x2fe   : > { %v8974_v27 = vpop.f32.mrf.mxu1  ;;  %v3793_v43 = vmul.u32 18, %v4767_v6  ;;  %v3687_v39 = vmul.f32 0.055555556, %v3651_v0  ;;  %v9050_v58 = vsel %vm3861_vm12, 1.0, %v5549_v40  ;;  %v4393_v14 = vsel %vm3859_vm5, 1.0, %v5549_v40  ;;  %v10057_v6 = vld [vmem:[#allocation43_spill] sm:$0xff]  ;;  %vm10064_vm12 = vmmov %vm10061_vm3 }
 0x2ff   : > { %v4432_v51 = vpack.c.bf16 %v8974_v27, %v8974_v27  ;;  %v9054_v25 = vsel %vm3864_vm1, 1.0, %v5549_v40  ;;  %v3964_v16 = vmul.f32 %v8944_v30, %v4390_v42  ;;  %v4128_v7 = vsel %vm10049_vm15, %v4077_v24, 0.0  ;;  %vm10065_vm5 = vmmov %vm10061_vm3 }
 0x300   : > { %v8979_v13 = vpop.f32.mrf.mxu1  ;;  %v4015_v31 = vsel %vm10050_vm10, %v3963_v15, 0.0  ;;  %v9060_v19 = vsel %vm3862_vm7, 1.0, %v5549_v40  ;;  %v4014_v10 = vadd.f32 %v4013_v61, %v8934_v5  ;;  %v4130_v56 = vsel %vm10022_vm4, %v4078_v53, 0.0  ;;  %v10059_v61 = vld [vmem:[#allocation44_spill] sm:$0xff]  ;;  %vm10066_vm1 = vmmov %vm10061_vm3 }
 0x301   : > { %3572 = vst.msk [vmem:[%s8832_s13 + $0x58] sm:$0xf] %vm3549_vm0, %v4432_v51  ;;  %v4430_v48 = vpack.c.bf16 %v8979_v13, %v8979_v13  ;;  %v3617_v51 = vcvt.s32.f32 %v10047_v3  ;;  %v3829_v20 = vsub.s32 %v10035_v26, %v3793_v43  ;;  %v3723_v49 = vfloor.f32 %v3687_v39  ;;  %v10060_v43 = vld [vmem:[#allocation47_spill] sm:$0xff]  ;;  %vm10069_vm14 = vmmov %vm10066_vm1 }
 0x302   : > { %v8988_v34 = vpop.f32.mrf.mxu1  ;;  %v4129_v28 = vadd.f32 %v4128_v7, %v8939_v32  ;;  %v4016_v63 = vadd.f32 %v4015_v31, %v4014_v10  ;;  %v3618_v52 = vcvt.s32.f32 %v10051_v29  ;;  %v3965_v9 = vmul.f32 %v8957_v47, %v4391_v62  ;;  %vm10070_vm15 = vmmov %vm10066_vm1 }
 0x303   : > { %3570 = vst.msk [vmem:[%s8832_s13 + $0x50] sm:$0xf] %vm3549_vm0, %v4430_v48  ;;  %v4433_v57 = vpack.c.bf16 %v8988_v34, %v8988_v34  ;;  %v3724_v48 = vfloor.f32 %v3688_v1  ;;  %v3653_v11 = vadd.f32 0.5, %v3617_v51  ;;  %v3966_v45 = vmul.f32 %v4392_v41, %v8979_v13  ;;  %vm10071_vm10 = vmmov %vm10066_vm1 }
 0x304   : > { %v8998_v17 = vpop.f32.mrf.mxu1  ;;  %v4131_v35 = vadd.f32 %v4130_v56, %v4129_v28  ;;  %v4770_v18 = vtrunc.f32 %v3723_v49  ;;  %vm9093_vm2 = vcmp.lt.s32.totalorder %v3829_v20, 16  ;;  %v3620_v0 = vcvt.s32.f32 %v10057_v6  ;;  %vm10072_vm4 = vmmov %vm10066_vm1 }
 0x305   : > { %3573 = vst.msk [vmem:[%s8832_s13 + $0x5c] sm:$0xf] %vm3549_vm0, %v4433_v57  ;;  %v4431_v37 = vpack.c.bf16 %v8998_v17, %v8998_v17  ;;  %v4768_v57 = vtrunc.f32 %v3722_v4  ;;  %v4772_v22 = vtrunc.f32 %v3724_v48  ;;  %v3689_v46 = vmul.f32 0.055555556, %v3653_v11 }
 0x306   : > { %v3967_v33 = vmul.f32 %v4393_v14, %v8998_v17  ;;  %v3654_v62 = vadd.f32 0.5, %v3618_v52  ;;  %v4080_v4 = vmul.f32 %v8957_v47, %v3965_v9  ;;  %v4081_v24 = vmul.f32 %v3966_v45, %v8979_v13 }
 0x307   : > { %3571 = vst.msk [vmem:[%s8832_s13 + $0x54] sm:$0xf] %vm3549_vm0, %v4431_v37  ;;  %v3827_v37 = vsub.s32 %v10034_v12, %v3791_v60  ;;  %v4769_v36 = vcvt.f32.s32 %v4768_v57  ;;  %v4079_v12 = vmul.f32 %v8944_v30, %v3964_v16  ;;  %v4773_v21 = vcvt.f32.s32 %v4772_v22 }
 0x308   : > { %v3725_v2 = vfloor.f32 %v3689_v46  ;;  %v4017_v30 = vsel %vm10054_vm6, %v3964_v16, 0.0  ;;  %v3621_v53 = vcvt.s32.f32 %v10059_v61  ;;  %v3619_v39 = vcvt.s32.f32 %v10060_v43 }
 0x309   : > { %vm9083_vm9 = vcmp.lt.s32.totalorder %v3827_v37, 16  ;;  %v4018_v1 = vadd.f32 %v4017_v30, %v4016_v63  ;;  %v3794_v15 = vmul.u32 18, %v4769_v36  ;;  %v4132_v41 = vsel %vm10058_vm8, %v4079_v12, 0.0  ;;  %vm10077_vm8 = vmmov %vm10066_vm1 }
 0x30a   : > { %v4133_v48 = vadd.f32 %v4132_v41, %v4131_v35  ;;  %v4774_v11 = vtrunc.f32 %v3725_v2  ;;  %v4019_v14 = vsel %vm10061_vm3, %v3965_v9, 0.0  ;;  %v4021_v57 = vsel %vm10062_vm13, %v3966_v45, 0.0  ;;  %vm10078_vm3 = vmmov %vm10066_vm1 }
 0x30b   : > { %v4082_v16 = vmul.f32 %v3967_v33, %v8998_v17  ;;  %v4771_v47 = vcvt.f32.s32 %v4770_v18  ;;  %v4020_v13 = vadd.f32 %v4019_v14, %v4018_v1  ;;  %v3830_v7 = vsub.s32 %v10036_v55, %v3794_v15  ;;  %vm10079_vm13 = vmmov %vm10066_vm1 }
 0x30c   : > { %v3656_v31 = vadd.f32 0.5, %v3620_v0  ;;  %v3690_v10 = vmul.f32 0.055555556, %v3654_v62  ;;  %v4134_v37 = vsel %vm10063_vm11, %v4080_v4, 0.0  ;;  %v3968_v22 = vmul.f32 %v8974_v27, %v9041_v38 }
 0x30d   : > { %v4136_v46 = vsel %vm10064_vm12, %v4081_v24, 0.0  ;;  %v4023_v56 = vsel %vm10065_vm5, %v3967_v33, 0.0  ;;  %v4135_v20 = vadd.f32 %v4134_v37, %v4133_v48  ;;  %v3657_v17 = vadd.f32 0.5, %v3621_v53  ;;  %vm10080_vm12 = vmmov %vm10066_vm1 }
 0x30e   : > { %v3655_v49 = vadd.f32 0.5, %v3619_v39  ;;  %v4138_v28 = vsel %vm10066_vm1, %v4082_v16, 0.0  ;;  %v4397_v55 = vsel %vm9083_vm9, 1.0, %v5549_v40  ;;  %v9124_v63 = vmul.u32 18, %v4773_v21  ;;  %vm10073_vm9 = vmmov %vm10066_vm1 }
 0x30f   : > { %v3795_v36 = vmul.u32 18, %v4771_v47  ;;  %v4137_v52 = vadd.f32 %v4136_v46, %v4135_v20  ;;  %v3969_v38 = vmul.f32 %v8988_v34, %v9050_v58  ;;  %v3692_v9 = vmul.f32 0.055555556, %v3656_v31 }
 0x310   : > { %v4083_v45 = vmul.f32 %v8974_v27, %v3968_v22  ;;  %vm9131_vm7 = vcmp.lt.s32.totalorder %v3830_v7, 16  ;;  %v4775_v50 = vcvt.f32.s32 %v4774_v11  ;;  %v3726_v21 = vfloor.f32 %v3690_v10 }
 0x311   : > { %v4139_v2 = vadd.f32 %v4138_v28, %v4137_v52  ;;  %v3693_v30 = vmul.f32 0.055555556, %v3657_v17  ;;  %v3691_v33 = vmul.f32 0.055555556, %v3655_v49  ;;  %v4399_v58 = vsel %vm9093_vm2, 1.0, %v5549_v40  ;;  %vm10076_vm2 = vmmov %vm10066_vm1 }
 0x312   : > { %v9063_v44 = vpop.f32.mrf.mxu1  ;;  %v4084_v18 = vmul.f32 %v8988_v34, %v3969_v38  ;;  %v3831_v15 = vsub.s32 %v10042_v59, %v3795_v36  ;;  %v3728_v0 = vfloor.f32 %v3692_v9  ;;  %v4140_v62 = vsel %vm10070_vm15, %v4083_v45, 0.0  ;;  %vm10083_vm15 = vmmov %vm10066_vm1 }
 0x313   : > { %v4436_v54 = vpack.c.bf16 %v9063_v44, %v9063_v44  ;;  %v4400_v51 = vsel %vm9131_vm7, 1.0, %v5549_v40  ;;  %v3797_v4 = vmul.u32 18, %v4775_v50  ;;  %v4141_v24 = vadd.f32 %v4140_v62, %v4139_v2  ;;  %vm10081_vm7 = vmmov %vm10066_vm1 }
 0x314   : > { %v9071_v5 = vpop.f32.mrf.mxu1  ;;  %v3729_v48 = vfloor.f32 %v3693_v30  ;;  %v3727_v34 = vfloor.f32 %v3691_v33  ;;  %v4027_v11 = vsel %vm10071_vm10, %v3969_v38, 0.0  ;;  %v4142_v39 = vsel %vm10073_vm9, %v4084_v18, 0.0  ;;  %vm10084_vm10 = vmmov %vm10066_vm1 }
 0x315   : > { %3576 = vst.msk [vmem:[%s8832_s13 + $0x68] sm:$0xf] %vm3549_vm0, %v4436_v54  ;;  %v4434_v26 = vpack.c.bf16 %v9071_v5, %v9071_v5  ;;  %v4022_v54 = vadd.f32 %v4021_v57, %v4020_v13  ;;  %vm9157_vm6 = vcmp.lt.s32.totalorder %v3831_v15, 16  ;;  %v4780_v47 = vtrunc.f32 %v3728_v0 }
 0x316   : > { %v9081_v32 = vpop.f32.mrf.mxu1  ;;  %v3972_v13 = vmul.f32 %v9063_v44, %v9054_v25  ;;  %v4143_v37 = vadd.f32 %v4142_v39, %v4141_v24  ;;  %v3833_v20 = vsub.s32 %v10047_v3, %v3797_v4  ;;  %v4778_v17 = vtrunc.f32 %v3727_v34 }
 0x317   : > { %3574 = vst.msk [vmem:[%s8832_s13 + $0x60] sm:$0xf] %vm3549_vm0, %v4434_v26  ;;  %v4437_v8 = vpack.c.bf16 %v9081_v32, %v9081_v32  ;;  %v4024_v12 = vadd.f32 %v4023_v56, %v4022_v54  ;;  %v3970_v26 = vmul.f32 %v9060_v19, %v9071_v5  ;;  %v3832_v19 = vsub.s32 %v10037_v23, %v9124_v63 }
 0x318   : > { %v9097_v42 = vpop.f32.mrf.mxu1  ;;  %v4776_v23 = vtrunc.f32 %v3726_v21  ;;  %v4782_v56 = vtrunc.f32 %v3729_v48  ;;  %v4401_v63 = vsel %vm9157_vm6, 1.0, %v5549_v40  ;;  %v4781_v36 = vcvt.f32.s32 %v4780_v47 }
 0x319   : > { %3577 = vst.msk [vmem:[%s8832_s13 + $0x6c] sm:$0xf] %vm3549_vm0, %v4437_v8  ;;  %v4435_v60 = vpack.c.bf16 %v9097_v42, %v9097_v42  ;;  %v4025_v8 = vsel %vm10069_vm14, %v3968_v22, 0.0  ;;  %v3971_v27 = vmul.f32 %v4397_v55, %v9097_v42  ;;  %v4085_v41 = vmul.f32 %v3970_v26, %v9071_v5  ;;  %vm10082_vm14 = vmmov %vm10066_vm1 }
 0x31a   : > { %v4026_v1 = vadd.f32 %v4025_v8, %v4024_v12  ;;  %v4029_v59 = vsel %vm10072_vm4, %v3970_v26, 0.0  ;;  %v4777_v46 = vcvt.f32.s32 %v4776_v23  ;;  %v4087_v52 = vmul.f32 %v9063_v44, %v3972_v13  ;;  %vm10085_vm4 = vmmov %vm10066_vm1 }
 0x31b   : > { %3575 = vst.msk [vmem:[%s8832_s13 + $0x64] sm:$0xf] %vm3549_vm0, %v4435_v60  ;;  %v4086_v53 = vmul.f32 %v3971_v27, %v9097_v42  ;;  %v4144_v7 = vsel %vm10076_vm2, %v4085_v41, 0.0  ;;  %v4031_v42 = vsel %vm10077_vm8, %v3971_v27, 0.0  ;;  %v3973_v38 = vmul.f32 %v9081_v32, %v4399_v58  ;;  %vm10086_vm2 = vmmov %vm10066_vm1 }
 0x31c   : > { %v4028_v14 = vadd.f32 %v4027_v11, %v4026_v1  ;;  %v4145_v49 = vadd.f32 %v4144_v7, %v4143_v37  ;;  %v3798_v3 = vmul.u32 18, %v4777_v46  ;;  %v4783_v26 = vcvt.f32.s32 %v4782_v56 }
 0x31d   : > { %v4146_v54 = vsel %vm10078_vm3, %v4086_v53, 0.0  ;;  %v4033_v35 = vsel %vm10079_vm13, %v3972_v13, 0.0  ;;  %vm3868_vm11 = vcmp.lt.s32.totalorder %v3832_v19, 16  ;;  %v4779_v2 = vcvt.f32.s32 %v4778_v17  ;;  %vm10087_vm13 = vmmov %vm10066_vm1 }
 0x31e   : > { %v4030_v10 = vadd.f32 %v4029_v59, %v4028_v14  ;;  %v4147_v45 = vadd.f32 %v4146_v54, %v4145_v49  ;;  %v3800_v30 = vmul.u32 18, %v4781_v36  ;;  %v4148_v44 = vsel %vm10080_vm12, %v4087_v52, 0.0  ;;  %vm10089_vm12 = vmmov %vm10066_vm1 }
 0x31f   : > { %v4088_v33 = vmul.f32 %v9081_v32, %v3973_v38  ;;  %vm3869_vm5 = vcmp.lt.s32.totalorder %v3833_v20, 16  ;;  %v4402_v27 = vsel %vm3868_vm11, 1.0, %v5549_v40  ;;  %v3834_v18 = vsub.s32 %v10051_v29, %v3798_v3  ;;  %vm10088_vm11 = vmmov %vm10066_vm1 }
 0x320   : > { %v4032_v28 = vadd.f32 %v4031_v42, %v4030_v10  ;;  %v4149_v58 = vadd.f32 %v4148_v44, %v4147_v45  ;;  %v3801_v1 = vmul.u32 18, %v4783_v26  ;;  %v4035_v19 = vsel %vm10066_vm1, %v3973_v38, 0.0 }
 0x321   : > { %v3799_v62 = vmul.u32 18, %v4779_v2  ;;  %v3836_v4 = vsub.s32 %v10057_v6, %v3800_v30  ;;  %v4150_v32 = vsel %vm10082_vm14, %v4088_v33, 0.0  ;;  %vm3870_vm9 = vcmp.lt.s32.totalorder %v3834_v18, 16  ;;  %vm10092_vm14 = vmmov %vm10066_vm1 }
 0x322   : > { %v4034_v21 = vadd.f32 %v4033_v35, %v4032_v28  ;;  %v4151_v34 = vadd.f32 %v4150_v32, %v4149_v58  ;;  %v3837_v59 = vsub.s32 %v10059_v61, %v3801_v1  ;;  %v4404_v47 = vsel %vm3870_vm9, 1.0, %v5549_v40 }
 0x323   : > { %v3835_v53 = vsub.s32 %v10060_v43, %v3799_v62  ;;  %vm3872_vm6 = vcmp.lt.s32.totalorder %v3836_v4, 16  ;;  %vm4059_vm9 = vcmask 57344  }
 0x324   : > { %v4036_v41 = vadd.f32 %v4035_v19, %v4034_v21  ;;  %vm3873_vm8 = vcmp.lt.s32.totalorder %v3837_v59, 16  ;;  %v4406_v42 = vsel %vm3872_vm6, 1.0, %v5549_v40 }
 0x325   : > { %vm3871_vm3 = vcmp.lt.s32.totalorder %v3835_v53, 16 }
 0x326   : > { %v4405_v20 = vsel %vm3871_vm3, 1.0, %v5549_v40 }
 0x328   : > { %v9149_v60 = vpop.f32.mrf.mxu1 }
 0x329   : > { %v4440_v5 = vpack.c.bf16 %v9149_v60, %v9149_v60  ;;  %v3976_v24 = vmul.f32 %v9149_v60, %v4402_v27 }
 0x32a   : > { %v3374_v57 = vpop.f32.mrf.mxu1 }
 0x32b   : > { %3580 = vst.msk [vmem:[%s8832_s13 + $0x78] sm:$0xf] %vm3549_vm0, %v4440_v5  ;;  %v4438_v31 = vpack.c.bf16 %v3374_v57, %v3374_v57  ;;  %v3974_v12 = vmul.f32 %v4400_v51, %v3374_v57  ;;  %v4403_v51 = vsel %vm3869_vm5, 1.0, %v5549_v40  ;;  %v4091_v14 = vmul.f32 %v9149_v60, %v3976_v24  ;;  %vm10090_vm5 = vmmov %vm10066_vm1 }
 0x32c   : > { %v9167_v22 = vpop.f32.mrf.mxu1  ;;  %v4041_v13 = vsel %vm10086_vm2, %v3976_v24, 0.0 }
 0x32d   : > { %3578 = vst.msk [vmem:[%s8832_s13 + $0x70] sm:$0xf] %vm3549_vm0, %v4438_v31  ;;  %v4441_v25 = vpack.c.bf16 %v9167_v22, %v9167_v22  ;;  %v4089_v8 = vmul.f32 %v3974_v12, %v3374_v57  ;;  %v4037_v15 = vsel %vm10081_vm7, %v3974_v12, 0.0  ;;  %v3977_v6 = vmul.f32 %v9167_v22, %v4403_v51  ;;  %vm10091_vm7 = vmmov %vm10066_vm1 }
 0x32e   : > { %v3377_v55 = vpop.f32.mrf.mxu1  ;;  %v4038_v48 = vadd.f32 %v4037_v15, %v4036_v41  ;;  %v4156_v10 = vsel %vm10087_vm13, %v4091_v14, 0.0 }
 0x32f   : > { %3581 = vst.msk [vmem:[%s8832_s13 + $0x7c] sm:$0xf] %vm3549_vm0, %v4441_v25  ;;  %v4439_v9 = vpack.c.bf16 %v3377_v55, %v3377_v55  ;;  %v3975_v50 = vmul.f32 %v4401_v63, %v3377_v55  ;;  %v4152_v23 = vsel %vm10083_vm15, %v4089_v8, 0.0  ;;  %v4092_v61 = vmul.f32 %v9167_v22, %v3977_v6  ;;  %vm10093_vm15 = vmmov %vm10066_vm1 }
 0x330   : > { %v4153_v5 = vadd.f32 %v4152_v23, %v4151_v34  ;;  %v4043_v46 = vsel %vm10088_vm11, %v3977_v6, 0.0  ;;  %v4407_v25 = vsel %vm3873_vm8, 1.0, %v5549_v40 }
 0x331   : > { %3579 = vst.msk [vmem:[%s8832_s13 + $0x74] sm:$0xf] %vm3549_vm0, %v4439_v9  ;;  %v4090_v0 = vmul.f32 %v3975_v50, %v3377_v55  ;;  %v4039_v29 = vsel %vm10084_vm10, %v3975_v50, 0.0  ;;  %v4158_v55 = vsel %vm10090_vm5, %v4092_v61, 0.0  ;;  %vm10094_vm10 = vmmov %vm10066_vm1 }
 0x332   : > { %v4040_v39 = vadd.f32 %v4039_v29, %v4038_v48 }
 0x333   : > { %v4154_v11 = vsel %vm10085_vm4, %v4090_v0, 0.0  ;;  %vm10095_vm4 = vmmov %vm10066_vm1 }
 0x334   : > { %v4155_v57 = vadd.f32 %v4154_v11, %v4153_v5  ;;  %v4042_v43 = vadd.f32 %v4041_v13, %v4040_v39 }
 0x336   : > { %v4157_v56 = vadd.f32 %v4156_v10, %v4155_v57  ;;  %v4044_v63 = vadd.f32 %v4043_v46, %v4042_v43 }
 0x338   : > { %v4159_v45 = vadd.f32 %v4158_v55, %v4157_v56 }
 0x33c   : > { %v4612_v16 = vpop.f32.mrf.mxu1 }
 0x33d   : > { %v4444_v7 = vpack.c.bf16 %v4612_v16, %v4612_v16  ;;  %v3980_v22 = vmul.f32 %v4612_v16, %v4406_v42 }
 0x33e   : > { %v3390_v31 = vpop.f32.mrf.mxu1 }
 0x33f   : > { %3584 = vst.msk [vmem:[%s8832_s13 + $0x88] sm:$0xf] %vm3549_vm0, %v4444_v7  ;;  %v4442_v60 = vpack.c.bf16 %v3390_v31, %v3390_v31  ;;  %v3978_v37 = vmul.f32 %v4404_v47, %v3390_v31  ;;  %v4095_v3 = vmul.f32 %v4612_v16, %v3980_v22  ;;  %v4049_v21 = vsel %vm10092_vm14, %v3980_v22, 0.0 }
 0x340   : > { %v4613_v54 = vpop.f32.mrf.mxu1 }
 0x341   : > { %3582 = vst.msk [vmem:[%s8832_s13 + $0x80] sm:$0xf] %vm3549_vm0, %v4442_v60  ;;  %v4045_v17 = vsel %vm10089_vm12, %v3978_v37, 0.0  ;;  %v4093_v49 = vmul.f32 %v3978_v37, %v3390_v31  ;;  %v4445_v28 = vpack.c.bf16 %v4613_v54, %v4613_v54  ;;  %v3981_v38 = vmul.f32 %v4613_v54, %v4407_v25 }
 0x342   : > { %v3393_v36 = vpop.f32.mrf.mxu1  ;;  %v4046_v40 = vadd.f32 %v4045_v17, %v4044_v63  ;;  %v4164_v58 = vsel %vm10094_vm10, %v4095_v3, 0.0 }
 0x343   : > { %v4160_v52 = vsel %vm10066_vm1, %v4093_v49, 0.0  ;;  %3585 = vst.msk [vmem:[%s8832_s13 + $0x8c] sm:$0xf] %vm3549_vm0, %v4445_v28  ;;  %v4443_v12 = vpack.c.bf16 %v3393_v36, %v3393_v36  ;;  %v3979_v9 = vmul.f32 %v4405_v20, %v3393_v36  ;;  %v4096_v30 = vmul.f32 %v4613_v54, %v3981_v38 }
 0x344   : > { %v4161_v50 = vadd.f32 %v4160_v52, %v4159_v45  ;;  %v4051_v27 = vsel %vm10095_vm4, %v3981_v38, 0.0 }
 0x345   : > { %3583 = vst.msk [vmem:[%s8832_s13 + $0x84] sm:$0xf] %vm3549_vm0, %v4443_v12  ;;  %v4047_v26 = vsel %vm10091_vm7, %v3979_v9, 0.0  ;;  %v4094_v35 = vmul.f32 %v3979_v9, %v3393_v36  ;;  %vm10096_vm0 = vmmov %vm10066_vm1 }
 0x346   : > { %v4048_v2 = vadd.f32 %v4047_v26, %v4046_v40  ;;  %v4166_v19 = vsel %vm10096_vm0, %v4096_v30, 0.0 }
 0x347   : > { %v4162_v44 = vsel %vm10093_vm15, %v4094_v35, 0.0 }
 0x348   : > { %v4050_v33 = vadd.f32 %v4049_v21, %v4048_v2  ;;  %v4163_v8 = vadd.f32 %v4162_v44, %v4161_v50 }
 0x34a   : > { %v4052_v18 = vadd.f32 %v4051_v27, %v4050_v33  ;;  %v4165_v1 = vadd.f32 %v4164_v58, %v4163_v8 }
 0x34c   : > { %v4053_v15 = vrot.slane %v4052_v18, 4  ;;  %v4167_v0 = vadd.f32 %v4166_v19, %v4165_v1 }
 0x34e   : > { %v4054_v62 = vadd.f32 %v4053_v15, %v4052_v18  ;;  %v4168_v41 = vrot.slane %v4167_v0, 4 }
 0x350   : > { %v4055_v51 = vrot.slane %v4054_v62, 2  ;;  %v4169_v4 = vadd.f32 %v4168_v41, %v4167_v0 }
 0x352   : > { %v4056_v32 = vadd.f32 %v4055_v51, %v4054_v62  ;;  %v4170_v24 = vrot.slane %v4169_v4, 2 }
 0x354   : > { %v4057_v23 = vrot.slane %v4056_v32, 1  ;;  %v4171_v29 = vadd.f32 %v4170_v24, %v4169_v4 }
 0x356   : > { %v4058_v48 = vadd.f32 %v4057_v23, %v4056_v32  ;;  %v4172_v34 = vrot.slane %v4171_v29, 1 }
 0x358   : > { %4060 = vst.msk [vmem:[%s235_s17] sm:$0x1] %vm4059_vm9, %v4058_v48  ;;  %v4173_v11 = vadd.f32 %v4172_v34, %v4171_v29 }
 0x35a   : > { %4174 = vst.msk [vmem:[%s235_s17 + $0x1] sm:$0x1] %vm4059_vm9, %v4173_v11 }
 0x35b PF: > { %s16_s18 = sadd.s32 1, %s5539_s18  }
 0x35c   : > { %p13_p4 = scmp.ge.s32.totalorder %s16_s18, 4  }
 0x35e   :  { %15 = sbr.rel (!%p13_p4) target bundleno = 1 (0x1), region = 78 }

</bundles_post_ra>
